<compile_context>
chip_gen: v7x
topology: tpu7x:2x2x1
jax: 0.10.0
libtpu: 0.0.40
codegen_flags: <defaults>
</compile_context>

<pallas_src>
import jax
import jax.numpy as jnp
from jax.experimental import pallas as pl
from jax.experimental.pallas import tpu as pltpu

EPS = 1e-5  # torch BatchNorm default eps


def _round_up(x, m):
    return (x + m - 1) // m * m


# ----------------------------- fused kernel -----------------------------
def make_vicreg_kernel(B, H, W, Cin, Cout):
    Hp, Wp = H + 2, W + 2
    HWm = H * Wp                        # flattened conv-output rows per image (incl. junk cols)
    BHWm = B * HWm
    inv_n_bn = 1.0 / float(B * H * W)   # BatchNorm2d divisor (valid pixels only)
    inv_hw = 1.0 / float(H * W)         # AdaptiveAvgPool2d divisor

    def kernel(x_ref, w27_ref, g_ref, bt_ref,
               w1_ref, g1_ref, b1_ref, w2_ref, g2_ref, b2_ref,
               w3_ref, bias3_ref, o_ref):
        # ---- conv stem: ONE K=27 matmul over the whole batch ----
        # 3x3 / stride 1 / pad 1 conv: 9 static shifted slices of the flattened
        # padded slab concatenated along channels -> (B*HWm, 27) bf16 patch.
        per_image = []
        for b in range(B):
            taps = [x_ref[b, kh * Wp + kw: kh * Wp + kw + HWm, :]
                    for kh in range(3) for kw in range(3)]        # 9 x (HWm, Cin) bf16
            per_image.append(jnp.concatenate(taps, axis=1))       # (HWm, 9*Cin)
        patch = jnp.concatenate(per_image, axis=0)                # (B*HWm, 27)
        conv = jnp.dot(patch, w27_ref[...],
                       preferred_element_type=jnp.float32)        # (B*HWm, Cout) f32

        # ---- junk-column mask (flattened-padding artifact), generated in-kernel ----
        row = jax.lax.broadcasted_iota(jnp.int32, (BHWm, Cout), 0)
        valid = (row % Wp) < W

        # ---- BatchNorm2d (training batch stats, centered form) + ReLU ----
        convm = jnp.where(valid, conv, 0.0)
        mean = jnp.sum(convm, axis=0, keepdims=True) * inv_n_bn
        d = jnp.where(valid, conv - mean, 0.0)
        var = jnp.sum(d * d, axis=0, keepdims=True) * inv_n_bn    # biased batch variance
        y = jnp.maximum(d * jax.lax.rsqrt(var + EPS) * g_ref[...] + bt_ref[...], 0.0)
        y = jnp.where(valid, y, 0.0)                              # zero junk cols before pooling

        # ---- AdaptiveAvgPool2d(1) + flatten -> (B, Cout) ----
        feats = jnp.concatenate(
            [jnp.sum(y[b * HWm:(b + 1) * HWm, :], axis=0, keepdims=True) * inv_hw
             for b in range(B)], axis=0)

        # ---- VICRegProjectionHead: [Linear(no bias)+BN1d+ReLU] x2 -> Linear(bias) ----
        def lin_bn_relu(x, w, g, beta):
            h = jnp.dot(x, w, preferred_element_type=jnp.float32)  # bias=False
            m = jnp.mean(h, axis=0, keepdims=True)
            v = jnp.mean((h - m) * (h - m), axis=0, keepdims=True)
            return jnp.maximum((h - m) * jax.lax.rsqrt(v + EPS) * g + beta, 0.0)

        h = lin_bn_relu(feats, w1_ref[...], g1_ref[...], b1_ref[...])
        h = lin_bn_relu(h, w2_ref[...], g2_ref[...], b2_ref[...])
        o_ref[...] = jnp.dot(h, w3_ref[...],
                             preferred_element_type=jnp.float32) + bias3_ref[...]

    return kernel


# -------------------------------- wrapper --------------------------------
def _full_spec(shape):
    nd = len(shape)
    return pl.BlockSpec(shape, lambda i, nd=nd: (0,) * nd)


def vicreg_forward(x_nchw, params):
    B, Cin, H, W = x_nchw.shape
    Cout = params["conv_w"].shape[0]
    out_dim = params["w3"].shape[1]
    Hp, Wp = H + 2, W + 2

    # Host prep: pad + flatten + bf16 cast only (no 9x im2col expansion).
    x_nhwc = jnp.transpose(x_nchw, (0, 2, 3, 1))                    # (B, H, W, Cin)
    xpad = jnp.pad(x_nhwc, ((0, 0), (1, 1), (1, 1), (0, 0)))        # (B, Hp, Wp, Cin)
    slab_rows = _round_up(Hp * Wp + 2, 8)                           # +2 so the last shift stays in bounds
    x2d = xpad.reshape(B, Hp * Wp, Cin)
    x2d = jnp.pad(x2d, ((0, 0), (0, slab_rows - Hp * Wp), (0, 0))).astype(jnp.bfloat16)

    # conv weight: torch (Cout, Cin, 3, 3) -> (9*Cin, Cout), (kh, kw, cin) major; bf16 MXU operand.
    w27 = jnp.transpose(params["conv_w"], (2, 3, 1, 0)).reshape(9 * Cin, Cout)
    w27 = w27.astype(jnp.bfloat16)

    kernel = make_vicreg_kernel(B, H, W, Cin, Cout)

    inputs = [x2d, w27, params["bn_g"], params["bn_b"],
              params["w1"], params["g1"], params["b1"],
              params["w2"], params["g2"], params["b2"],
              params["w3"], params["bias3"]]

    return pl.pallas_call(
        kernel,
        out_shape=jax.ShapeDtypeStruct((B, out_dim), jnp.float32),
        grid=(1,),                                   # whole problem fits one VMEM-resident step
        in_specs=[_full_spec(a.shape) for a in inputs],
        out_specs=pl.BlockSpec((B, out_dim), lambda i: (0, 0)),
        compiler_params=pltpu.CompilerParams(
            dimension_semantics=("arbitrary",),
            vmem_limit_bytes=32 * 1024 * 1024),
    )(*inputs)


# --------------------------- pure-JAX reference ---------------------------
def _bn_train(y, gamma, beta):
    mean = jnp.mean(y, axis=0, keepdims=True)
    var = jnp.mean((y - mean) ** 2, axis=0, keepdims=True)
    return (y - mean) * jax.lax.rsqrt(var + EPS) * gamma + beta


def vicreg_reference(x_nchw, params):
    """Same math as the PyTorch module; the conv matmul uses the kernel's
    precision policy (bf16 operands, f32 accumulation), everything else f32."""
    B, Cin, H, W = x_nchw.shape
    Cout = params["conv_w"].shape[0]
    x_nhwc = jnp.transpose(x_nchw, (0, 2, 3, 1))
    xp = jnp.pad(x_nhwc, ((0, 0), (1, 1), (1, 1), (0, 0)))
    cols = [xp[:, i:i + H, j:j + W, :] for i in range(3) for j in range(3)]
    patches = jnp.stack(cols, axis=3).reshape(B * H * W, 9 * Cin)
    w_mat = jnp.transpose(params["conv_w"], (2, 3, 1, 0)).reshape(9 * Cin, Cout)
    conv = jnp.dot(patches.astype(jnp.bfloat16), w_mat.astype(jnp.bfloat16),
                   preferred_element_type=jnp.float32)
    y = jnp.maximum(_bn_train(conv, params["bn_g"], params["bn_b"]), 0.0)
    feats = jnp.mean(y.reshape(B, H * W, Cout), axis=1)
    h = jnp.maximum(_bn_train(feats @ params["w1"], params["g1"], params["b1"]), 0.0)
    h = jnp.maximum(_bn_train(h @ params["w2"], params["g2"], params["b2"]), 0.0)
    return h @ params["w3"] + params["bias3"]


def init_params(key, cin=3, cout=64, hidden=32, out_dim=32):
    ks = jax.random.split(key, 6)
    return {
        # backbone conv (torch layout Cout, Cin, KH, KW) + BatchNorm2d defaults
        "conv_w": jax.random.normal(ks[0], (cout, cin, 3, 3), jnp.float32) * 0.1,
        "bn_g": jnp.ones((1, cout), jnp.float32),
        "bn_b": jnp.zeros((1, cout), jnp.float32),
        # projection head: Linear(64,32,bias=False)+BN+ReLU,
        #                  Linear(32,32,bias=False)+BN+ReLU, Linear(32,32,bias=True)
        "w1": jax.random.normal(ks[1], (cout, hidden), jnp.float32) / jnp.sqrt(cout),
        "g1": jnp.ones((1, hidden), jnp.float32),
        "b1": jnp.zeros((1, hidden), jnp.float32),
        "w2": jax.random.normal(ks[2], (hidden, hidden), jnp.float32) / jnp.sqrt(hidden),
        "g2": jnp.ones((1, hidden), jnp.float32),
        "b2": jnp.zeros((1, hidden), jnp.float32),
        "w3": jax.random.normal(ks[3], (hidden, out_dim), jnp.float32) / jnp.sqrt(hidden),
        "bias3": jax.random.normal(ks[4], (1, out_dim), jnp.float32) * 0.01,
    }


if __name__ == "__main__":
    key = jax.random.PRNGKey(0)
    k_x, k_p = jax.random.split(key)
    # PyTorch-convention input: NCHW, 3 input channels (fixed by Conv2d(3, 64, ...))
    x = jax.random.normal(k_x, (2, 3, 16, 16), jnp.float32)
    params = init_params(k_p)

    z = jax.block_until_ready(vicreg_forward(x, params))
    z_ref = jax.block_until_ready(vicreg_reference(x, params))

    assert z.shape == (2, 32), z.shape
    assert bool(jnp.all(jnp.isfinite(z)))
    assert bool(jnp.allclose(z, z_ref, atol=1e-2, rtol=1e-2)), \
        float(jnp.max(jnp.abs(z - z_ref)))
    print("KERNEL_OK")
</pallas_src>

<mosaic_0001>
module attributes {stable_mosaic.version = 11 : i64} {
  func.func @kernel(%arg0: i32, %arg1: memref<2x328x3xbf16, #tpu.memory_space<vmem>>, %arg2: memref<27x64xbf16, #tpu.memory_space<vmem>>, %arg3: memref<1x64xf32, #tpu.memory_space<vmem>>, %arg4: memref<1x64xf32, #tpu.memory_space<vmem>>, %arg5: memref<64x32xf32, #tpu.memory_space<vmem>>, %arg6: memref<1x32xf32, #tpu.memory_space<vmem>>, %arg7: memref<1x32xf32, #tpu.memory_space<vmem>>, %arg8: memref<32x32xf32, #tpu.memory_space<vmem>>, %arg9: memref<1x32xf32, #tpu.memory_space<vmem>>, %arg10: memref<1x32xf32, #tpu.memory_space<vmem>>, %arg11: memref<32x32xf32, #tpu.memory_space<vmem>>, %arg12: memref<1x32xf32, #tpu.memory_space<vmem>>, %arg13: memref<2x32xf32, #tpu.memory_space<vmem>>) attributes {dimension_semantics = [#tpu.dimension_semantics<arbitrary>], iteration_bounds = array<i64: 1>, scalar_prefetch = 0 : i64, scratch_operands = 0 : i64, tpu.core_type = #tpu.core_type<tc>, window_params = [{pipeline_mode = #tpu.pipeline_mode<synchronous>, transform_indices = @transform_0, window_bounds = array<i64: 2, 328, 3>}, {pipeline_mode = #tpu.pipeline_mode<synchronous>, transform_indices = @transform_1, window_bounds = array<i64: 27, 64>}, {pipeline_mode = #tpu.pipeline_mode<synchronous>, transform_indices = @transform_2, window_bounds = array<i64: 1, 64>}, {pipeline_mode = #tpu.pipeline_mode<synchronous>, transform_indices = @transform_3, window_bounds = array<i64: 1, 64>}, {pipeline_mode = #tpu.pipeline_mode<synchronous>, transform_indices = @transform_4, window_bounds = array<i64: 64, 32>}, {pipeline_mode = #tpu.pipeline_mode<synchronous>, transform_indices = @transform_5, window_bounds = array<i64: 1, 32>}, {pipeline_mode = #tpu.pipeline_mode<synchronous>, transform_indices = @transform_6, window_bounds = array<i64: 1, 32>}, {pipeline_mode = #tpu.pipeline_mode<synchronous>, transform_indices = @transform_7, window_bounds = array<i64: 32, 32>}, {pipeline_mode = #tpu.pipeline_mode<synchronous>, transform_indices = @transform_8, window_bounds = array<i64: 1, 32>}, {pipeline_mode = #tpu.pipeline_mode<synchronous>, transform_indices = @transform_9, window_bounds = array<i64: 1, 32>}, {pipeline_mode = #tpu.pipeline_mode<synchronous>, transform_indices = @transform_10, window_bounds = array<i64: 32, 32>}, {pipeline_mode = #tpu.pipeline_mode<synchronous>, transform_indices = @transform_11, window_bounds = array<i64: 1, 32>}, {pipeline_mode = #tpu.pipeline_mode<synchronous>, transform_indices = @transform_12, window_bounds = array<i64: 2, 32>}]} {
    %c0 = arith.constant 0 : index
    %c0_0 = arith.constant 0 : index
    %c0_1 = arith.constant 0 : index
    %0 = vector.load %arg1[%c0, %c0_0, %c0_1] : memref<2x328x3xbf16, #tpu.memory_space<vmem>>, vector<1x288x3xbf16>
    %1 = vector.shape_cast %0 : vector<1x288x3xbf16> to vector<288x3xbf16>
    %c0_2 = arith.constant 0 : index
    %c1 = arith.constant 1 : index
    %c0_3 = arith.constant 0 : index
    %2 = vector.load %arg1[%c0_2, %c1, %c0_3] : memref<2x328x3xbf16, #tpu.memory_space<vmem>>, vector<1x288x3xbf16>
    %3 = vector.shape_cast %2 : vector<1x288x3xbf16> to vector<288x3xbf16>
    %c0_4 = arith.constant 0 : index
    %c2 = arith.constant 2 : index
    %c0_5 = arith.constant 0 : index
    %4 = vector.load %arg1[%c0_4, %c2, %c0_5] : memref<2x328x3xbf16, #tpu.memory_space<vmem>>, vector<1x288x3xbf16>
    %5 = vector.shape_cast %4 : vector<1x288x3xbf16> to vector<288x3xbf16>
    %c0_6 = arith.constant 0 : index
    %c18 = arith.constant 18 : index
    %c0_7 = arith.constant 0 : index
    %6 = vector.load %arg1[%c0_6, %c18, %c0_7] : memref<2x328x3xbf16, #tpu.memory_space<vmem>>, vector<1x288x3xbf16>
    %7 = vector.shape_cast %6 : vector<1x288x3xbf16> to vector<288x3xbf16>
    %c0_8 = arith.constant 0 : index
    %c19 = arith.constant 19 : index
    %c0_9 = arith.constant 0 : index
    %8 = vector.load %arg1[%c0_8, %c19, %c0_9] : memref<2x328x3xbf16, #tpu.memory_space<vmem>>, vector<1x288x3xbf16>
    %9 = vector.shape_cast %8 : vector<1x288x3xbf16> to vector<288x3xbf16>
    %c0_10 = arith.constant 0 : index
    %c20 = arith.constant 20 : index
    %c0_11 = arith.constant 0 : index
    %10 = vector.load %arg1[%c0_10, %c20, %c0_11] : memref<2x328x3xbf16, #tpu.memory_space<vmem>>, vector<1x288x3xbf16>
    %11 = vector.shape_cast %10 : vector<1x288x3xbf16> to vector<288x3xbf16>
    %c0_12 = arith.constant 0 : index
    %c36 = arith.constant 36 : index
    %c0_13 = arith.constant 0 : index
    %12 = vector.load %arg1[%c0_12, %c36, %c0_13] : memref<2x328x3xbf16, #tpu.memory_space<vmem>>, vector<1x288x3xbf16>
    %13 = vector.shape_cast %12 : vector<1x288x3xbf16> to vector<288x3xbf16>
    %c0_14 = arith.constant 0 : index
    %c37 = arith.constant 37 : index
    %c0_15 = arith.constant 0 : index
    %14 = vector.load %arg1[%c0_14, %c37, %c0_15] : memref<2x328x3xbf16, #tpu.memory_space<vmem>>, vector<1x288x3xbf16>
    %15 = vector.shape_cast %14 : vector<1x288x3xbf16> to vector<288x3xbf16>
    %c0_16 = arith.constant 0 : index
    %c38 = arith.constant 38 : index
    %c0_17 = arith.constant 0 : index
    %16 = vector.load %arg1[%c0_16, %c38, %c0_17] : memref<2x328x3xbf16, #tpu.memory_space<vmem>>, vector<1x288x3xbf16>
    %17 = vector.shape_cast %16 : vector<1x288x3xbf16> to vector<288x3xbf16>
    %18 = tpu.concatenate %1, %3, %5, %7, %9, %11, %13, %15, %17 in 1 : vector<288x3xbf16>, vector<288x3xbf16>, vector<288x3xbf16>, vector<288x3xbf16>, vector<288x3xbf16>, vector<288x3xbf16>, vector<288x3xbf16>, vector<288x3xbf16>, vector<288x3xbf16> -> vector<288x27xbf16>
    %c1_18 = arith.constant 1 : index
    %c0_19 = arith.constant 0 : index
    %c0_20 = arith.constant 0 : index
    %19 = vector.load %arg1[%c1_18, %c0_19, %c0_20] : memref<2x328x3xbf16, #tpu.memory_space<vmem>>, vector<1x288x3xbf16>
    %20 = vector.shape_cast %19 : vector<1x288x3xbf16> to vector<288x3xbf16>
    %c1_21 = arith.constant 1 : index
    %c1_22 = arith.constant 1 : index
    %c0_23 = arith.constant 0 : index
    %21 = vector.load %arg1[%c1_21, %c1_22, %c0_23] : memref<2x328x3xbf16, #tpu.memory_space<vmem>>, vector<1x288x3xbf16>
    %22 = vector.shape_cast %21 : vector<1x288x3xbf16> to vector<288x3xbf16>
    %c1_24 = arith.constant 1 : index
    %c2_25 = arith.constant 2 : index
    %c0_26 = arith.constant 0 : index
    %23 = vector.load %arg1[%c1_24, %c2_25, %c0_26] : memref<2x328x3xbf16, #tpu.memory_space<vmem>>, vector<1x288x3xbf16>
    %24 = vector.shape_cast %23 : vector<1x288x3xbf16> to vector<288x3xbf16>
    %c1_27 = arith.constant 1 : index
    %c18_28 = arith.constant 18 : index
    %c0_29 = arith.constant 0 : index
    %25 = vector.load %arg1[%c1_27, %c18_28, %c0_29] : memref<2x328x3xbf16, #tpu.memory_space<vmem>>, vector<1x288x3xbf16>
    %26 = vector.shape_cast %25 : vector<1x288x3xbf16> to vector<288x3xbf16>
    %c1_30 = arith.constant 1 : index
    %c19_31 = arith.constant 19 : index
    %c0_32 = arith.constant 0 : index
    %27 = vector.load %arg1[%c1_30, %c19_31, %c0_32] : memref<2x328x3xbf16, #tpu.memory_space<vmem>>, vector<1x288x3xbf16>
    %28 = vector.shape_cast %27 : vector<1x288x3xbf16> to vector<288x3xbf16>
    %c1_33 = arith.constant 1 : index
    %c20_34 = arith.constant 20 : index
    %c0_35 = arith.constant 0 : index
    %29 = vector.load %arg1[%c1_33, %c20_34, %c0_35] : memref<2x328x3xbf16, #tpu.memory_space<vmem>>, vector<1x288x3xbf16>
    %30 = vector.shape_cast %29 : vector<1x288x3xbf16> to vector<288x3xbf16>
    %c1_36 = arith.constant 1 : index
    %c36_37 = arith.constant 36 : index
    %c0_38 = arith.constant 0 : index
    %31 = vector.load %arg1[%c1_36, %c36_37, %c0_38] : memref<2x328x3xbf16, #tpu.memory_space<vmem>>, vector<1x288x3xbf16>
    %32 = vector.shape_cast %31 : vector<1x288x3xbf16> to vector<288x3xbf16>
    %c1_39 = arith.constant 1 : index
    %c37_40 = arith.constant 37 : index
    %c0_41 = arith.constant 0 : index
    %33 = vector.load %arg1[%c1_39, %c37_40, %c0_41] : memref<2x328x3xbf16, #tpu.memory_space<vmem>>, vector<1x288x3xbf16>
    %34 = vector.shape_cast %33 : vector<1x288x3xbf16> to vector<288x3xbf16>
    %c1_42 = arith.constant 1 : index
    %c38_43 = arith.constant 38 : index
    %c0_44 = arith.constant 0 : index
    %35 = vector.load %arg1[%c1_42, %c38_43, %c0_44] : memref<2x328x3xbf16, #tpu.memory_space<vmem>>, vector<1x288x3xbf16>
    %36 = vector.shape_cast %35 : vector<1x288x3xbf16> to vector<288x3xbf16>
    %37 = tpu.concatenate %20, %22, %24, %26, %28, %30, %32, %34, %36 in 1 : vector<288x3xbf16>, vector<288x3xbf16>, vector<288x3xbf16>, vector<288x3xbf16>, vector<288x3xbf16>, vector<288x3xbf16>, vector<288x3xbf16>, vector<288x3xbf16>, vector<288x3xbf16> -> vector<288x27xbf16>
    %38 = tpu.concatenate %18, %37 in 0 : vector<288x27xbf16>, vector<288x27xbf16> -> vector<576x27xbf16>
    %c0_45 = arith.constant 0 : index
    %c0_46 = arith.constant 0 : index
    %39 = vector.load %arg2[%c0_45, %c0_46] : memref<27x64xbf16, #tpu.memory_space<vmem>>, vector<27x64xbf16>
    %cst = arith.constant dense<0.000000e+00> : vector<576x64xf32>
    %40 = tpu.matmul %38, %39, %cst {dimension_numbers = #tpu.dot_dimension_numbers<[1], [0], [0], [1], [0, 0, 1, 1], [], []>} : vector<576x27xbf16>, vector<27x64xbf16>, vector<576x64xf32> -> vector<576x64xf32>
    %41 = tpu.iota {dimensions = array<i32: 0>} : vector<576x64xi32>
    %c18_i32 = arith.constant 18 : i32
    %c0_i32 = arith.constant 0 : i32
    %42 = arith.cmpi eq, %c18_i32, %c0_i32 : i32
    %c1_i32 = arith.constant 1 : i32
    %43 = arith.select %42, %c1_i32, %c18_i32 : i32
    %44 = vector.broadcast %43 : i32 to vector<576x64xi32>
    %45 = arith.remsi %41, %44 : vector<576x64xi32>
    %c0_i32_47 = arith.constant 0 : i32
    %46 = vector.broadcast %c0_i32_47 : i32 to vector<576x64xi32>
    %47 = arith.cmpi ne, %45, %46 : vector<576x64xi32>
    %c0_i32_48 = arith.constant 0 : i32
    %48 = vector.broadcast %c0_i32_48 : i32 to vector<576x64xi32>
    %49 = arith.cmpi slt, %45, %48 : vector<576x64xi32>
    %c0_i32_49 = arith.constant 0 : i32
    %50 = arith.cmpi slt, %43, %c0_i32_49 : i32
    %51 = vector.broadcast %50 : i1 to vector<576x64xi1>
    %52 = vector.broadcast %51 : vector<576x64xi1> to vector<576x64xi1>
    %53 = arith.xori %49, %52 : vector<576x64xi1>
    %54 = arith.andi %53, %47 : vector<576x64xi1>
    %55 = vector.broadcast %43 : i32 to vector<576x64xi32>
    %56 = arith.addi %45, %55 : vector<576x64xi32>
    %57 = arith.select %54, %56, %45 : vector<576x64xi1>, vector<576x64xi32>
    %c16_i32 = arith.constant 16 : i32
    %58 = vector.broadcast %c16_i32 : i32 to vector<576x64xi32>
    %59 = arith.cmpi slt, %57, %58 : vector<576x64xi32>
    %cst_50 = arith.constant 0.000000e+00 : f32
    %60 = vector.broadcast %cst_50 : f32 to vector<576x64xf32>
    %61 = arith.select %59, %40, %60 : vector<576x64xi1>, vector<576x64xf32>
    %cst_51 = arith.constant dense<0.000000e+00> : vector<64xf32>
    %62 = vector.multi_reduction <add>, %61, %cst_51 [0] : vector<576x64xf32> to vector<64xf32>
    %63 = vector.shape_cast %62 : vector<64xf32> to vector<1x64xf32>
    %cst_52 = arith.constant 0.001953125 : f32
    %64 = vector.broadcast %cst_52 : f32 to vector<1x64xf32>
    %65 = arith.mulf %63, %64 : vector<1x64xf32>
    %66 = vector.broadcast %65 : vector<1x64xf32> to vector<576x64xf32>
    %67 = arith.subf %40, %66 : vector<576x64xf32>
    %cst_53 = arith.constant 0.000000e+00 : f32
    %68 = vector.broadcast %cst_53 : f32 to vector<576x64xf32>
    %69 = arith.select %59, %67, %68 : vector<576x64xi1>, vector<576x64xf32>
    %70 = arith.mulf %69, %69 : vector<576x64xf32>
    %cst_54 = arith.constant dense<0.000000e+00> : vector<64xf32>
    %71 = vector.multi_reduction <add>, %70, %cst_54 [0] : vector<576x64xf32> to vector<64xf32>
    %72 = vector.shape_cast %71 : vector<64xf32> to vector<1x64xf32>
    %cst_55 = arith.constant 0.001953125 : f32
    %73 = vector.broadcast %cst_55 : f32 to vector<1x64xf32>
    %74 = arith.mulf %72, %73 : vector<1x64xf32>
    %cst_56 = arith.constant 9.99999974E-6 : f32
    %75 = vector.broadcast %cst_56 : f32 to vector<1x64xf32>
    %76 = arith.addf %74, %75 : vector<1x64xf32>
    %77 = math.rsqrt %76 : vector<1x64xf32>
    %78 = vector.broadcast %77 : vector<1x64xf32> to vector<576x64xf32>
    %79 = arith.mulf %69, %78 : vector<576x64xf32>
    %c0_57 = arith.constant 0 : index
    %c0_58 = arith.constant 0 : index
    %80 = vector.load %arg3[%c0_57, %c0_58] : memref<1x64xf32, #tpu.memory_space<vmem>>, vector<1x64xf32>
    %81 = vector.broadcast %80 : vector<1x64xf32> to vector<576x64xf32>
    %82 = arith.mulf %79, %81 : vector<576x64xf32>
    %c0_59 = arith.constant 0 : index
    %c0_60 = arith.constant 0 : index
    %83 = vector.load %arg4[%c0_59, %c0_60] : memref<1x64xf32, #tpu.memory_space<vmem>>, vector<1x64xf32>
    %84 = vector.broadcast %83 : vector<1x64xf32> to vector<576x64xf32>
    %85 = arith.addf %82, %84 : vector<576x64xf32>
    %cst_61 = arith.constant 0.000000e+00 : f32
    %86 = vector.broadcast %cst_61 : f32 to vector<576x64xf32>
    %87 = arith.maximumf %85, %86 : vector<576x64xf32>
    %cst_62 = arith.constant 0.000000e+00 : f32
    %88 = vector.broadcast %cst_62 : f32 to vector<576x64xf32>
    %89 = arith.select %59, %87, %88 : vector<576x64xi1>, vector<576x64xf32>
    %90 = vector.extract_strided_slice %89 {offsets = [0, 0], sizes = [288, 64], strides = [1, 1]} : vector<576x64xf32> to vector<288x64xf32>
    %cst_63 = arith.constant dense<0.000000e+00> : vector<64xf32>
    %91 = vector.multi_reduction <add>, %90, %cst_63 [0] : vector<288x64xf32> to vector<64xf32>
    %92 = vector.shape_cast %91 : vector<64xf32> to vector<1x64xf32>
    %cst_64 = arith.constant 3.906250e-03 : f32
    %93 = vector.broadcast %cst_64 : f32 to vector<1x64xf32>
    %94 = arith.mulf %92, %93 : vector<1x64xf32>
    %95 = vector.extract_strided_slice %89 {offsets = [288, 0], sizes = [288, 64], strides = [1, 1]} : vector<576x64xf32> to vector<288x64xf32>
    %cst_65 = arith.constant dense<0.000000e+00> : vector<64xf32>
    %96 = vector.multi_reduction <add>, %95, %cst_65 [0] : vector<288x64xf32> to vector<64xf32>
    %97 = vector.shape_cast %96 : vector<64xf32> to vector<1x64xf32>
    %cst_66 = arith.constant 3.906250e-03 : f32
    %98 = vector.broadcast %cst_66 : f32 to vector<1x64xf32>
    %99 = arith.mulf %97, %98 : vector<1x64xf32>
    %100 = tpu.concatenate %94, %99 in 0 : vector<1x64xf32>, vector<1x64xf32> -> vector<2x64xf32>
    %c0_67 = arith.constant 0 : index
    %c0_68 = arith.constant 0 : index
    %101 = vector.load %arg5[%c0_67, %c0_68] : memref<64x32xf32, #tpu.memory_space<vmem>>, vector<64x32xf32>
    %c0_69 = arith.constant 0 : index
    %c0_70 = arith.constant 0 : index
    %102 = vector.load %arg6[%c0_69, %c0_70] : memref<1x32xf32, #tpu.memory_space<vmem>>, vector<1x32xf32>
    %c0_71 = arith.constant 0 : index
    %c0_72 = arith.constant 0 : index
    %103 = vector.load %arg7[%c0_71, %c0_72] : memref<1x32xf32, #tpu.memory_space<vmem>>, vector<1x32xf32>
    %cst_73 = arith.constant dense<0.000000e+00> : vector<2x32xf32>
    %104 = tpu.matmul %100, %101, %cst_73 {dimension_numbers = #tpu.dot_dimension_numbers<[1], [0], [0], [1], [0, 0, 1, 1], [], []>} : vector<2x64xf32>, vector<64x32xf32>, vector<2x32xf32> -> vector<2x32xf32>
    %cst_74 = arith.constant dense<0.000000e+00> : vector<32xf32>
    %105 = vector.multi_reduction <add>, %104, %cst_74 [0] : vector<2x32xf32> to vector<32xf32>
    %106 = vector.shape_cast %105 : vector<32xf32> to vector<1x32xf32>
    %cst_75 = arith.constant 2.000000e+00 : f32
    %107 = vector.broadcast %cst_75 : f32 to vector<1x32xf32>
    %108 = arith.divf %106, %107 : vector<1x32xf32>
    %109 = vector.broadcast %108 : vector<1x32xf32> to vector<2x32xf32>
    %110 = arith.subf %104, %109 : vector<2x32xf32>
    %111 = vector.broadcast %108 : vector<1x32xf32> to vector<2x32xf32>
    %112 = arith.subf %104, %111 : vector<2x32xf32>
    %113 = arith.mulf %110, %112 : vector<2x32xf32>
    %cst_76 = arith.constant dense<0.000000e+00> : vector<32xf32>
    %114 = vector.multi_reduction <add>, %113, %cst_76 [0] : vector<2x32xf32> to vector<32xf32>
    %115 = vector.shape_cast %114 : vector<32xf32> to vector<1x32xf32>
    %cst_77 = arith.constant 2.000000e+00 : f32
    %116 = vector.broadcast %cst_77 : f32 to vector<1x32xf32>
    %117 = arith.divf %115, %116 : vector<1x32xf32>
    %118 = vector.broadcast %108 : vector<1x32xf32> to vector<2x32xf32>
    %119 = arith.subf %104, %118 : vector<2x32xf32>
    %cst_78 = arith.constant 9.99999974E-6 : f32
    %120 = vector.broadcast %cst_78 : f32 to vector<1x32xf32>
    %121 = arith.addf %117, %120 : vector<1x32xf32>
    %122 = math.rsqrt %121 : vector<1x32xf32>
    %123 = vector.broadcast %122 : vector<1x32xf32> to vector<2x32xf32>
    %124 = arith.mulf %119, %123 : vector<2x32xf32>
    %125 = vector.broadcast %102 : vector<1x32xf32> to vector<2x32xf32>
    %126 = arith.mulf %124, %125 : vector<2x32xf32>
    %127 = vector.broadcast %103 : vector<1x32xf32> to vector<2x32xf32>
    %128 = arith.addf %126, %127 : vector<2x32xf32>
    %cst_79 = arith.constant 0.000000e+00 : f32
    %129 = vector.broadcast %cst_79 : f32 to vector<2x32xf32>
    %130 = arith.maximumf %128, %129 : vector<2x32xf32>
    %c0_80 = arith.constant 0 : index
    %c0_81 = arith.constant 0 : index
    %131 = vector.load %arg8[%c0_80, %c0_81] : memref<32x32xf32, #tpu.memory_space<vmem>>, vector<32x32xf32>
    %c0_82 = arith.constant 0 : index
    %c0_83 = arith.constant 0 : index
    %132 = vector.load %arg9[%c0_82, %c0_83] : memref<1x32xf32, #tpu.memory_space<vmem>>, vector<1x32xf32>
    %c0_84 = arith.constant 0 : index
    %c0_85 = arith.constant 0 : index
    %133 = vector.load %arg10[%c0_84, %c0_85] : memref<1x32xf32, #tpu.memory_space<vmem>>, vector<1x32xf32>
    %cst_86 = arith.constant dense<0.000000e+00> : vector<2x32xf32>
    %134 = tpu.matmul %130, %131, %cst_86 {dimension_numbers = #tpu.dot_dimension_numbers<[1], [0], [0], [1], [0, 0, 1, 1], [], []>} : vector<2x32xf32>, vector<32x32xf32>, vector<2x32xf32> -> vector<2x32xf32>
    %cst_87 = arith.constant dense<0.000000e+00> : vector<32xf32>
    %135 = vector.multi_reduction <add>, %134, %cst_87 [0] : vector<2x32xf32> to vector<32xf32>
    %136 = vector.shape_cast %135 : vector<32xf32> to vector<1x32xf32>
    %cst_88 = arith.constant 2.000000e+00 : f32
    %137 = vector.broadcast %cst_88 : f32 to vector<1x32xf32>
    %138 = arith.divf %136, %137 : vector<1x32xf32>
    %139 = vector.broadcast %138 : vector<1x32xf32> to vector<2x32xf32>
    %140 = arith.subf %134, %139 : vector<2x32xf32>
    %141 = vector.broadcast %138 : vector<1x32xf32> to vector<2x32xf32>
    %142 = arith.subf %134, %141 : vector<2x32xf32>
    %143 = arith.mulf %140, %142 : vector<2x32xf32>
    %cst_89 = arith.constant dense<0.000000e+00> : vector<32xf32>
    %144 = vector.multi_reduction <add>, %143, %cst_89 [0] : vector<2x32xf32> to vector<32xf32>
    %145 = vector.shape_cast %144 : vector<32xf32> to vector<1x32xf32>
    %cst_90 = arith.constant 2.000000e+00 : f32
    %146 = vector.broadcast %cst_90 : f32 to vector<1x32xf32>
    %147 = arith.divf %145, %146 : vector<1x32xf32>
    %148 = vector.broadcast %138 : vector<1x32xf32> to vector<2x32xf32>
    %149 = arith.subf %134, %148 : vector<2x32xf32>
    %cst_91 = arith.constant 9.99999974E-6 : f32
    %150 = vector.broadcast %cst_91 : f32 to vector<1x32xf32>
    %151 = arith.addf %147, %150 : vector<1x32xf32>
    %152 = math.rsqrt %151 : vector<1x32xf32>
    %153 = vector.broadcast %152 : vector<1x32xf32> to vector<2x32xf32>
    %154 = arith.mulf %149, %153 : vector<2x32xf32>
    %155 = vector.broadcast %132 : vector<1x32xf32> to vector<2x32xf32>
    %156 = arith.mulf %154, %155 : vector<2x32xf32>
    %157 = vector.broadcast %133 : vector<1x32xf32> to vector<2x32xf32>
    %158 = arith.addf %156, %157 : vector<2x32xf32>
    %cst_92 = arith.constant 0.000000e+00 : f32
    %159 = vector.broadcast %cst_92 : f32 to vector<2x32xf32>
    %160 = arith.maximumf %158, %159 : vector<2x32xf32>
    %c0_93 = arith.constant 0 : index
    %c0_94 = arith.constant 0 : index
    %161 = vector.load %arg11[%c0_93, %c0_94] : memref<32x32xf32, #tpu.memory_space<vmem>>, vector<32x32xf32>
    %cst_95 = arith.constant dense<0.000000e+00> : vector<2x32xf32>
    %162 = tpu.matmul %160, %161, %cst_95 {dimension_numbers = #tpu.dot_dimension_numbers<[1], [0], [0], [1], [0, 0, 1, 1], [], []>} : vector<2x32xf32>, vector<32x32xf32>, vector<2x32xf32> -> vector<2x32xf32>
    %c0_96 = arith.constant 0 : index
    %c0_97 = arith.constant 0 : index
    %163 = vector.load %arg12[%c0_96, %c0_97] : memref<1x32xf32, #tpu.memory_space<vmem>>, vector<1x32xf32>
    %164 = vector.broadcast %163 : vector<1x32xf32> to vector<2x32xf32>
    %165 = arith.addf %162, %164 : vector<2x32xf32>
    %c0_98 = arith.constant 0 : index
    %c0_99 = arith.constant 0 : index
    %166 = vector.load %arg13[%c0_98, %c0_99] : memref<2x32xf32, #tpu.memory_space<vmem>>, vector<2x32xf32>
    tpu.vector_store %arg13[%c0_98, %c0_99], %165 {strides = array<i32>} : memref<2x32xf32, #tpu.memory_space<vmem>>, vector<2x32xf32>,
    return
  }
  func.func @transform_0(%arg0: i32) -> (i32, i32, i32) {
    %c0_i32 = arith.constant 0 : i32
    %c0_i32_0 = arith.constant 0 : i32
    %c0_i32_1 = arith.constant 0 : i32
    %c0_i32_2 = arith.constant 0 : i32
    return %c0_i32, %c0_i32_0, %c0_i32_1 : i32, i32, i32
  }
  func.func @transform_1(%arg0: i32) -> (i32, i32) {
    %c0_i32 = arith.constant 0 : i32
    %c0_i32_0 = arith.constant 0 : i32
    %c0_i32_1 = arith.constant 0 : i32
    return %c0_i32, %c0_i32_0 : i32, i32
  }
  func.func @transform_2(%arg0: i32) -> (i32, i32) {
    %c0_i32 = arith.constant 0 : i32
    %c0_i32_0 = arith.constant 0 : i32
    %c0_i32_1 = arith.constant 0 : i32
    return %c0_i32, %c0_i32_0 : i32, i32
  }
  func.func @transform_3(%arg0: i32) -> (i32, i32) {
    %c0_i32 = arith.constant 0 : i32
    %c0_i32_0 = arith.constant 0 : i32
    %c0_i32_1 = arith.constant 0 : i32
    return %c0_i32, %c0_i32_0 : i32, i32
  }
  func.func @transform_4(%arg0: i32) -> (i32, i32) {
    %c0_i32 = arith.constant 0 : i32
    %c0_i32_0 = arith.constant 0 : i32
    %c0_i32_1 = arith.constant 0 : i32
    return %c0_i32, %c0_i32_0 : i32, i32
  }
  func.func @transform_5(%arg0: i32) -> (i32, i32) {
    %c0_i32 = arith.constant 0 : i32
    %c0_i32_0 = arith.constant 0 : i32
    %c0_i32_1 = arith.constant 0 : i32
    return %c0_i32, %c0_i32_0 : i32, i32
  }
  func.func @transform_6(%arg0: i32) -> (i32, i32) {
    %c0_i32 = arith.constant 0 : i32
    %c0_i32_0 = arith.constant 0 : i32
    %c0_i32_1 = arith.constant 0 : i32
    return %c0_i32, %c0_i32_0 : i32, i32
  }
  func.func @transform_7(%arg0: i32) -> (i32, i32) {
    %c0_i32 = arith.constant 0 : i32
    %c0_i32_0 = arith.constant 0 : i32
    %c0_i32_1 = arith.constant 0 : i32
    return %c0_i32, %c0_i32_0 : i32, i32
  }
  func.func @transform_8(%arg0: i32) -> (i32, i32) {
    %c0_i32 = arith.constant 0 : i32
    %c0_i32_0 = arith.constant 0 : i32
    %c0_i32_1 = arith.constant 0 : i32
    return %c0_i32, %c0_i32_0 : i32, i32
  }
  func.func @transform_9(%arg0: i32) -> (i32, i32) {
    %c0_i32 = arith.constant 0 : i32
    %c0_i32_0 = arith.constant 0 : i32
    %c0_i32_1 = arith.constant 0 : i32
    return %c0_i32, %c0_i32_0 : i32, i32
  }
  func.func @transform_10(%arg0: i32) -> (i32, i32) {
    %c0_i32 = arith.constant 0 : i32
    %c0_i32_0 = arith.constant 0 : i32
    %c0_i32_1 = arith.constant 0 : i32
    return %c0_i32, %c0_i32_0 : i32, i32
  }
  func.func @transform_11(%arg0: i32) -> (i32, i32) {
    %c0_i32 = arith.constant 0 : i32
    %c0_i32_0 = arith.constant 0 : i32
    %c0_i32_1 = arith.constant 0 : i32
    return %c0_i32, %c0_i32_0 : i32, i32
  }
  func.func @transform_12(%arg0: i32) -> (i32, i32) {
    %c0_i32 = arith.constant 0 : i32
    %c0_i32_0 = arith.constant 0 : i32
    %c0_i32_1 = arith.constant 0 : i32
    return %c0_i32, %c0_i32_0 : i32, i32
  }
}

</mosaic_0001>

<bundles_post_ra>
// kernel: tpu_custom_call.1
= control target key start
LH: loop header
LB: loop body
LE: loop exit
PB: predicated region body
PF: predicated region fallthrough
CT: control target
= control target key end

     0   :  { %vm12222_vm0 = vcmask 1046528   ;;  %vm12197_vm1 = vsmask.f32 7424  ;;  %s6278_s21 = smov 9   ;;  %s6279_s22 = smov 6   ;;  %vm12212_vm3 = vcmask 1045504   ;;  %s12183_s0 = inlined_call_operand.vmem [shape: bf16[2,328,3], index: 0, kind: input, shape index: {}]   ;;  %s12184_s1 = inlined_call_operand.vmem [shape: bf16[27,64], index: 1, kind: input, shape index: {}]   ;;  %s12185_s2 = inlined_call_operand.vmem [shape: f32[1,64], index: 2, kind: input, shape index: {}]   ;;  %s12186_s3 = inlined_call_operand.vmem [shape: f32[1,64], index: 3, kind: input, shape index: {}]   ;;  %s12187_s4 = inlined_call_operand.vmem [shape: f32[64,32], index: 4, kind: input, shape index: {}]   ;;  %s12188_s5 = inlined_call_operand.vmem [shape: f32[1,32], index: 5, kind: input, shape index: {}]   ;;  %s12189_s6 = inlined_call_operand.vmem [shape: f32[1,32], index: 6, kind: input, shape index: {}]   ;;  %s12190_s7 = inlined_call_operand.vmem [shape: f32[32,32], index: 7, kind: input, shape index: {}]   ;;  %s12191_s8 = inlined_call_operand.vmem [shape: f32[1,32], index: 8, kind: input, shape index: {}]   ;;  %s12192_s9 = inlined_call_operand.vmem [shape: f32[1,32], index: 9, kind: input, shape index: {}]   ;;  %s12193_s10 = inlined_call_operand.vmem [shape: f32[32,32], index: 10, kind: input, shape index: {}]   ;;  %s12194_s11 = inlined_call_operand.vmem [shape: f32[1,32], index: 11, kind: input, shape index: {}]   ;;  %s12195_s12 = inlined_call_operand.hbm [shape: f32[2,32], index: 12, kind: output, shape index: {}]  }
   0x1   :  { %v6359_v0 = vld [vmem:[%s12183_s0 + $0xc] sm:$0xf]  ;;  %v47_v1 = vld [vmem:[%s12183_s0 + $0x10] sm:$0xf]  ;;  %v6367_v2 = vld [vmem:[%s12183_s0 + $0x14] sm:$0xf] }
   0x2   :  { %v81_v3 = vld [vmem:[%s12183_s0 + $0x8] sm:$0xe]  ;;  %v6373_v4 = vcombine.low %v47_v1, %v6367_v2  ;;  %v44_v5 = vld [vmem:[%s12183_s0 + $0x4] sm:$0xf]  ;;  %v80_v8 = vld [vmem:[%s12183_s0] sm:$0xe] }
   0x3   :  { %v5664_v6 = vcombine.low %v81_v3, %v6359_v0  ;;  %v45_v7 = vld [vmem:[%s12183_s0 + $0x8] sm:$0xf]  ;;  %v5663_v11 = vcombine.low %v80_v8, %v44_v5  ;;  %v43_v12 = vld [vmem:[%s12183_s0] sm:$0xf]  ;;  %v6395_v13 = vld [vmem:[%s12183_s0 + $0x18] sm:$0xff]   ;;  %s6280_s27 = smov 3  }
   0x4   :  { %v378_v9 = vrot.slane %v6373_v4, 1  ;;  %v6387_v10 = vcombine.low %v45_v7, %v6359_v0  ;;  %v6397_v15 = vcombine.low %v43_v12, %v44_v5  ;;  %v203_v19 = vshll.u32 %v6373_v4, 16  ;;  %v86_v39 = vld [vmem:[%s12183_s0 + $0x8] sm:$0xc]  ;;  %v87_v42 = vld [vmem:[%s12183_s0 + $0x10] sm:$0xc] }
   0x5   :  { %v459_v14 = vrot.slane %v5664_v6, 1  ;;  %v375_v16 = vrot.slane %v5663_v11, 1  ;;  %v380_v26 = vrot.slane %v6395_v13, 1  ;;  %v207_v29 = vshrl.u32 %v6373_v4, 16  ;;  %v6443_v49 = vld [vmem:[%s12183_s0 + $0x20] sm:$0xff]   ;;  %s6281_s14 = smov 12  }
   0x6   :  { %v376_v17 = vrot.slane %v6387_v10, 1  ;;  %v195_v18 = vshll.u32 %v6387_v10, 16  ;;  %v188_v21 = vshrl.u32 %v6397_v15, 16  ;;  %v190_v22 = vshll.u32 %v6397_v15, 16  ;;  %v6178_v63 = vld [vmem:[%s12184_s1] sm:$0xff]   ;;  %s6282_s17 = smov 15  }
   0x7   :  { %v460_v20 = vsel %vm12222_vm0, %v459_v14, %v378_v9  ;;  %v199_v23 = vshrl.u32 %v6387_v10, 16  ;;  %v6413_v30 = vshll.u32 %v6395_v13, 16  ;;  %v6415_v32 = vrot.slane %v203_v19, 1  ;;  %5859 = vmatprep.subr.bf16.mxu0 %v6178_v63  ;;  %6000 = vmatprep.subr.bf16.mxu1 %v6178_v63  ;;  %v92_v14 = vld [vmem:[%s12183_s0 + $0x10] sm:$0x8]  ;;  %s6283_s18 = smov 18  }
   0x8   :  { %465 = vrot.lane.b32.xlu0 %v460_v20, %s6278_s21  ;;  %v377_v24 = vsel %vm12222_vm0, %v375_v16, %v376_v17  ;;  %v197_v25 = vrot.slane %v195_v18, 1  ;;  %v379_v27 = vsel %vm12222_vm0, %v376_v17, %v378_v9  ;;  %v192_v28 = vrot.slane %v190_v22, 1  ;;  %5860 = vmatpush3.bf16.msra.mxu0 %v6178_v63  ;;  %s6284_s19 = smov 21   ;;  %s6285_s24 = smov 24  }
   0x9   :  { %412 = vrot.lane.b32.xlu1 %v377_v24, %s6279_s22  ;;  %v6418_v33 = vshrl.u32 %v6395_v13, 16  ;;  %v514_v34 = vrot.slane %v203_v19, 2  ;;  %v513_v36 = vrot.slane %v207_v29, 1  ;;  %v518_v37 = vrot.slane %v6413_v30, 2  ;;  %6002 = vmatpush3.bf16.msra.mxu1 %v6178_v63 }
   0xa   :  { %v201_v31 = vor.u32 %v199_v23, %v197_v25  ;;  %v193_v35 = vor.u32 %v192_v28, %v188_v21  ;;  %v506_v38 = vshrl.u32 %v5664_v6, 16  ;;  %v509_v41 = vshll.u32 %v5664_v6, 16 }
   0xb   :  { %v517_v40 = vrot.slane %v6418_v33, 1  ;;  %v6436_v45 = vsel %vm12222_vm0, %v378_v9, %v380_v26  ;;  %v515_v46 = vor.u32 %v514_v34, %v513_v36  ;;  %vm12221_vm2 = vsmask.f32 6400 }
   0xc   :  { %v198_v43 = vsel %vm12197_vm1, %v193_v35, %v197_v25  ;;  %v508_v44 = vrot.slane %v506_v38, 1  ;;  %v511_v48 = vrot.slane %v509_v41, 2  ;;  %v206_v50 = vsel %vm12197_vm1, %v201_v31, %v6415_v32 }
   0xd   :  { %414 = vrot.lane.b32.xlu1 %v379_v27, %s6279_s22  ;;  %335 = vrot.lane.b32.xlu0 %v198_v43, %s6280_s27  ;;  %v6438_v47 = vor.u32 %v518_v37, %v517_v40  ;;  %v5668_v51 = vcombine.low %v86_v39, %v6359_v0  ;;  %v5669_v52 = vcombine.low %v87_v42, %v6367_v2  ;;  %v636_v54 = vrot.slane %v6373_v4, 2 }
   0xe   :  { %v512_v53 = vor.u32 %v511_v48, %v508_v44  ;;  %v638_v56 = vrot.slane %v6395_v13, 2  ;;  %v6457_v57 = vshll.u32 %v6443_v49, 16  ;;  %v6460_v58 = vshrl.u32 %v6443_v49, 16 }
   0xf   :  { %v520_v55 = vsel %vm12221_vm2, %v515_v46, %v6438_v47  ;;  %v635_v60 = vrot.slane %v5668_v51, 2  ;;  %v766_v61 = vshrl.u32 %v5669_v52, 16  ;;  %v769_v62 = vshll.u32 %v5669_v52, 16 }
  0x10   :  { %v516_v59 = vsel %vm12221_vm2, %v512_v53, %v515_v46  ;;  %v640_v0 = vrot.slane %v6443_v49, 2  ;;  %v719_v1 = vrot.slane %v5669_v52, 2  ;;  %v773_v3 = vrot.slane %v6418_v33, 2 }
  0x11   :  { %467 = vrot.lane.b32.xlu1 %v6436_v45, %s6278_s21  ;;  %337 = vrot.lane.b32.xlu0 %v206_v50, %s6280_s27  ;;  %v774_v5 = vrot.slane %v6413_v30, 3  ;;  %v639_v6 = vsel %vm12212_vm3, %v636_v54, %v638_v56  ;;  %v777_v7 = vrot.slane %v6460_v58, 2  ;;  %v778_v8 = vrot.slane %v6457_v57, 3 }
  0x12   :  { %v637_v9 = vsel %vm12212_vm3, %v635_v60, %v636_v54  ;;  %v768_v11 = vrot.slane %v766_v61, 2  ;;  %v771_v12 = vrot.slane %v769_v62, 3  ;;  %v6483_v16 = vsel %vm12212_vm3, %v638_v56, %v640_v0 }
  0x13   :  { %v775_v17 = vor.u32 %v774_v5, %v773_v3  ;;  %v6485_v18 = vor.u32 %v778_v8, %v777_v7  ;;  %v720_v19 = vsel %vm12212_vm3, %v719_v1, %v638_v56  ;;  %vm12196_vm4 = vsmask.f32 5376 }
  0x14   :  { %v772_v20 = vor.u32 %v771_v12, %v768_v11  ;;  %v5673_v21 = vcombine.low %v92_v14, %v6367_v2  ;;  %v209_v23 = vor.u32 %v207_v29, %v6415_v32  ;;  %v213_v24 = vrot.slane %v6413_v30, 1  ;;  %v6508_v29 = vld [vmem:[%s12183_s0 + $0x28] sm:$0xff]  }
  0x15   :  { %597 = vrot.lane.b32.xlu1 %v520_v55, %s6281_s14  ;;  %595 = vrot.lane.b32.xlu0 %v516_v59, %s6281_s14  ;;  %v780_v22 = vsel %vm12196_vm4, %v775_v17, %v6485_v18  ;;  %v896_v2 = vrot.slane %v6395_v13, 3  ;;  %vm12199_vm5 = vcmask 1044480   ;;  %v221_v34 = vrot.slane %v6457_v57, 1  ;;  %v6542_v13 = vld [vmem:[%s12183_s0 + $0x30] sm:$0xff]  }
  0x16   :  { %v776_v25 = vsel %vm12196_vm4, %v772_v20, %v775_v17  ;;  %v895_v27 = vrot.slane %v5673_v21, 3  ;;  %v214_v28 = vsel %vm12197_vm1, %v209_v23, %v213_v24  ;;  %v217_v31 = vor.u32 %v6418_v33, %v213_v24 }
  0x17   :  { %v898_v32 = vrot.slane %v6443_v49, 3  ;;  %v382_v35 = vrot.slane %v6443_v49, 1  ;;  %v227_v36 = vshll.u32 %v6508_v29, 16  ;;  %v231_v37 = vshrl.u32 %v6508_v29, 16 }
  0x18   :  { %v897_v30 = vsel %vm12199_vm5, %v895_v27, %v896_v2  ;;  %v222_v33 = vsel %vm12197_vm1, %v217_v31, %v221_v34  ;;  %v384_v39 = vrot.slane %v6508_v29, 1  ;;  %v521_v40 = vrot.slane %v6460_v58, 1 }
  0x19   :  { %674 = vrot.lane.b32.xlu1 %v639_v6, %s6282_s17  ;;  %672 = vrot.lane.b32.xlu0 %v637_v9, %s6282_s17  ;;  %v899_v38 = vsel %vm12199_vm5, %v896_v2, %v898_v32  ;;  %v522_v41 = vrot.slane %v6457_v57, 2  ;;  %v383_v42 = vsel %vm12222_vm0, %v380_v26, %v382_v35  ;;  %v525_v43 = vrot.slane %v231_v37, 1 }
  0x1a   :  { %v526_v44 = vrot.slane %v227_v36, 2  ;;  %v6535_v46 = vsel %vm12222_vm0, %v382_v35, %v384_v39  ;;  %v642_v26 = vrot.slane %v6508_v29, 2  ;;  %v6551_v51 = vshll.u32 %v6542_v13, 16 }
  0x1b   :  { %v523_v48 = vor.u32 %v522_v41, %v521_v40  ;;  %v6554_v52 = vshrl.u32 %v6542_v13, 16  ;;  %v644_v54 = vrot.slane %v6542_v13, 2  ;;  %v781_v55 = vrot.slane %v231_v37, 2 }
  0x1c   :  { %v6537_v50 = vor.u32 %v526_v44, %v525_v43  ;;  %v782_v56 = vrot.slane %v227_v36, 3  ;;  %v643_v57 = vsel %vm12212_vm3, %v640_v0, %v642_v26  ;;  %v786_v60 = vrot.slane %v6551_v51, 3 }
  0x1d   :  { %727 = vrot.lane.b32.xlu1 %v6483_v16, %s6283_s18  ;;  %725 = vrot.lane.b32.xlu0 %v720_v19, %s6283_s18  ;;  %v524_v53 = vsel %vm12221_vm2, %v6438_v47, %v523_v48  ;;  %v785_v59 = vrot.slane %v6554_v52, 2  ;;  %v6179_v47 = vld [vmem:[%s12184_s1 + $0x8] sm:$0x3f]   ;;  %v6575_v61 = vsel %vm12212_vm3, %v642_v26, %v644_v54  ;;  %v6286_v0 = vmov 65535  }
  0x1e   :  { %v783_v62 = vor.u32 %v782_v56, %v781_v55  ;;  %v2562_v1 = vsel %vm12199_vm5, 4294967295, %v6286_v0  ;;  %v225_v7 = vor.u32 %v6460_v58, %v221_v34  ;;  %v229_v8 = vrot.slane %v227_v36, 1 }
  0x1f   :  { %v6577_v63 = vor.u32 %v786_v60, %v785_v59  ;;  %v2563_v3 = vsel %vm12212_vm3, %v2562_v1, 0  ;;  %v900_v11 = vrot.slane %v6508_v29, 3 }
  0x20   :  { %v2565_v5 = vand.u32 %v6179_v47, %v2563_v3  ;;  %v784_v9 = vsel %vm12196_vm4, %v6485_v18, %v783_v62 }
  0x21   :  { %857 = vrot.lane.b32.xlu1 %v780_v22, %s6284_s19  ;;  %855 = vrot.lane.b32.xlu0 %v776_v25, %s6284_s19  ;;  %v788_v6 = vsel %vm12196_vm4, %v783_v62, %v6577_v63 }
  0x22   :  { %5861 = vmatprep.subr.bf16.mxu0 %v2565_v5  ;;  %6001 = vmatprep.subr.bf16.mxu1 %v2565_v5 }
  0x23   :  { %5862 = vmatpush3.bf16.msra.mxu0 %v2565_v5  ;;  %6003 = vmatpush3.bf16.msra.mxu1 %v2565_v5 }
  0x25   :  { %339 = vrot.lane.b32.xlu1 %v214_v28, %s6280_s27  ;;  %932 = vrot.lane.b32.xlu0 %v897_v30, %s6285_s24 }
  0x29   :  { %341 = vrot.lane.b32.xlu1 %v222_v33, %s6280_s27  ;;  %934 = vrot.lane.b32.xlu0 %v899_v38, %s6285_s24 }
  0x2d   :  { %418 = vrot.lane.b32.xlu1 %v383_v42, %s6279_s22  ;;  %416 = vrot.lane.b32.xlu0 %v6436_v45, %s6279_s22  ;;  %v528_v45 = vsel %vm12221_vm2, %v523_v48, %v6537_v50 }
  0x31   :  { %471 = vrot.lane.b32.xlu1 %v6535_v46, %s6278_s21  ;;  %469 = vrot.lane.b32.xlu0 %v383_v42, %s6278_s21 }
  0x35   :  { %601 = vrot.lane.b32.xlu1 %v528_v45, %s6281_s14  ;;  %599 = vrot.lane.b32.xlu0 %v524_v53, %s6281_s14 }
  0x39   :  { %678 = vrot.lane.b32.xlu1 %v643_v57, %s6282_s17  ;;  %676 = vrot.lane.b32.xlu0 %v6483_v16, %s6282_s17 }
  0x3d   :  { %731 = vrot.lane.b32.xlu1 %v6575_v61, %s6283_s18  ;;  %729 = vrot.lane.b32.xlu0 %v643_v57, %s6283_s18 }
  0x3e   :  { %17 = vsyncpa [#allocation3], 0  ;;  %v230_v12 = vsel %vm12197_vm1, %v225_v7, %v229_v8  ;;  %v233_v14 = vor.u32 %v231_v37, %v229_v8  ;;  %v237_v58 = vrot.slane %v6551_v51, 1  ;;  %v6597_v16 = vld [vmem:[%s12183_s0 + $0x38] sm:$0xff]   ;;  %v901_v17 = vsel %vm12199_vm5, %v898_v32, %v900_v11  ;;  %v6627_v32 = vld [vmem:[%s12183_s0 + $0x40] sm:$0xff]  }
  0x3f   :  { %v902_v18 = vrot.slane %v6542_v13, 3  ;;  %v386_v19 = vrot.slane %v6542_v13, 1  ;;  %v243_v21 = vshll.u32 %v6597_v16, 16  ;;  %v247_v22 = vshrl.u32 %v6597_v16, 16  ;;  %v6671_v59 = vld [vmem:[%s12183_s0 + $0x48] sm:$0xff]  }
  0x40   :  { %v238_v20 = vsel %vm12197_vm1, %v233_v14, %v237_v58  ;;  %v388_v24 = vrot.slane %v6597_v16, 1  ;;  %v529_v25 = vrot.slane %v6554_v52, 1  ;;  %v530_v27 = vrot.slane %v6551_v51, 2  ;;  %v6700_v14 = vld [vmem:[%s12183_s0 + $0x50] sm:$0xff]  }
  0x41   :  { %861 = vrot.lane.b32.xlu1 %v788_v6, %s6284_s19  ;;  %859 = vrot.lane.b32.xlu0 %v784_v9, %s6284_s19  ;;  %v903_v23 = vsel %vm12199_vm5, %v900_v11, %v902_v18  ;;  %v387_v49 = vsel %vm12222_vm0, %v384_v39, %v386_v19  ;;  %v533_v2 = vrot.slane %v247_v22, 1  ;;  %v534_v28 = vrot.slane %v243_v21, 2 }
  0x42   :  { %v389_v31 = vsel %vm12222_vm0, %v386_v19, %v388_v24  ;;  %v531_v34 = vor.u32 %v530_v27, %v529_v25  ;;  %v646_v35 = vrot.slane %v6597_v16, 2  ;;  %v6635_v36 = vshll.u32 %v6627_v32, 16 }
  0x43   :  { %v6622_v30 = vor.u32 %v534_v28, %v533_v2  ;;  %v6638_v37 = vshrl.u32 %v6627_v32, 16  ;;  %v648_v40 = vrot.slane %v6627_v32, 2  ;;  %v789_v41 = vrot.slane %v247_v22, 2 }
  0x44   :  { %v532_v38 = vsel %vm12221_vm2, %v6537_v50, %v531_v34  ;;  %v647_v39 = vsel %vm12212_vm3, %v644_v54, %v646_v35  ;;  %v790_v42 = vrot.slane %v243_v21, 3  ;;  %v794_v44 = vrot.slane %v6635_v36, 3 }
  0x45   :  { %343 = vrot.lane.b32.xlu1 %v230_v12, %s6280_s27  ;;  %936 = vrot.lane.b32.xlu0 %v901_v17, %s6285_s24  ;;  %v536_v33 = vsel %vm12221_vm2, %v531_v34, %v6622_v30  ;;  %v793_v43 = vrot.slane %v6638_v37, 2  ;;  %v241_v45 = vor.u32 %v6554_v52, %v237_v58  ;;  %v245_v51 = vrot.slane %v243_v21, 1 }
  0x46   :  { %v791_v48 = vor.u32 %v790_v42, %v789_v41  ;;  %v904_v54 = vrot.slane %v6597_v16, 3  ;;  %v253_v57 = vrot.slane %v6635_v36, 1  ;;  %v906_v60 = vrot.slane %v6627_v32, 3 }
  0x47   :  { %v6654_v50 = vor.u32 %v794_v44, %v793_v43  ;;  %v246_v55 = vsel %vm12197_vm1, %v241_v45, %v245_v51  ;;  %v249_v56 = vor.u32 %v247_v22, %v245_v51  ;;  %v390_v47 = vrot.slane %v6627_v32, 1 }
  0x48   :  { %v792_v53 = vsel %vm12196_vm4, %v6577_v63, %v791_v48  ;;  %v905_v52 = vsel %vm12199_vm5, %v902_v18, %v904_v54  ;;  %v259_v62 = vshll.u32 %v6671_v59, 16  ;;  %v263_v63 = vshrl.u32 %v6671_v59, 16 }
  0x49   :  { %345 = vrot.lane.b32.xlu1 %v238_v20, %s6280_s27  ;;  %938 = vrot.lane.b32.xlu0 %v903_v23, %s6285_s24  ;;  %v796_v26 = vsel %vm12196_vm4, %v791_v48, %v6654_v50  ;;  %v907_v0 = vsel %vm12199_vm5, %v904_v54, %v906_v60  ;;  %v391_v1 = vsel %vm12222_vm0, %v388_v24, %v390_v47  ;;  %v392_v3 = vrot.slane %v6671_v59, 1 }
  0x4a   :  { %v537_v5 = vrot.slane %v6638_v37, 1  ;;  %v538_v6 = vrot.slane %v6635_v36, 2  ;;  %v541_v7 = vrot.slane %v263_v63, 1  ;;  %v542_v8 = vrot.slane %v259_v62, 2 }
  0x4b   :  { %v6693_v9 = vsel %vm12222_vm0, %v390_v47, %v392_v3  ;;  %v650_v58 = vrot.slane %v6671_v59, 2  ;;  %v6709_v18 = vshll.u32 %v6700_v14, 16  ;;  %v6712_v19 = vshrl.u32 %v6700_v14, 16 }
  0x4c   :  { %v539_v11 = vor.u32 %v538_v6, %v537_v5  ;;  %v6695_v12 = vor.u32 %v542_v8, %v541_v7  ;;  %v652_v22 = vrot.slane %v6700_v14, 2  ;;  %v797_v23 = vrot.slane %v263_v63, 2  ;;  %v6793_v7 = vld [vmem:[%s12183_s0 + $0x60] sm:$0xff]  }
  0x4d   :  { %422 = vrot.lane.b32.xlu1 %v387_v49, %s6279_s22  ;;  %420 = vrot.lane.b32.xlu0 %v6535_v46, %s6279_s22  ;;  %v649_v46 = vsel %vm12212_vm3, %v646_v35, %v648_v40  ;;  %v651_v21 = vsel %vm12212_vm3, %v648_v40, %v650_v58  ;;  %v801_v24 = vrot.slane %v6712_v19, 2  ;;  %v802_v25 = vrot.slane %v6709_v18, 3 }
  0x4e   :  { %v544_v17 = vsel %vm12221_vm2, %v539_v11, %v6695_v12  ;;  %v540_v20 = vsel %vm12221_vm2, %v6622_v30, %v539_v11  ;;  %v6729_v2 = vsel %vm12212_vm3, %v650_v58, %v652_v22  ;;  %v257_v35 = vor.u32 %v6638_v37, %v253_v57  ;;  %v6749_v37 = vld [vmem:[%s12183_s0 + $0x58] sm:$0xff]  }
  0x4f   :  { %v269_v43 = vrot.slane %v6709_v18, 1  ;;  %v910_v48 = vrot.slane %v6700_v14, 3  ;;  %v6760_v51 = vshll.u32 %v6749_v37, 16  ;;  %v546_v47 = vrot.slane %v6709_v18, 2 }
  0x50   :  { %vm12211_vm6 = vcmask 23552   ;;  %vm12210_vm7 = vcmask 48128   ;;  %vm12209_vm8 = vcmask 72704   ;;  %vm12204_vm9 = vcmask 97280  }
  0x51   :  { %475 = vrot.lane.b32.xlu1 %v389_v31, %s6278_s21  ;;  %473 = vrot.lane.b32.xlu0 %v387_v49, %s6278_s21  ;;  %v798_v49 = vrot.slane %v259_v62, 3  ;;  %vm12203_vm10 = vcmask 121856   ;;  %vm12202_vm11 = vcmask 146432   ;;  %vm12201_vm12 = vcmask 171008  }
  0x52   :  { %vm12200_vm13 = vcmask 195584   ;;  %vm12198_vm14 = vcmask 220160  }
  0x53   :  { %v799_v28 = vor.u32 %v798_v49, %v797_v23 }
  0x55   :  { %605 = vrot.lane.b32.xlu1 %v536_v33, %s6281_s14  ;;  %603 = vrot.lane.b32.xlu0 %v532_v38, %s6281_s14  ;;  %v261_v33 = vrot.slane %v259_v62, 1  ;;  %v800_v38 = vsel %vm12196_vm4, %v6654_v50, %v799_v28  ;;  %v550_v62 = vrot.slane %v6760_v51, 2 }
  0x57   :  { %v262_v41 = vsel %vm12197_vm1, %v257_v35, %v261_v33  ;;  %v265_v42 = vor.u32 %v263_v63, %v261_v33 }
  0x59   :  { %682 = vrot.lane.b32.xlu1 %v647_v39, %s6282_s17  ;;  %680 = vrot.lane.b32.xlu0 %v6575_v61, %s6282_s17  ;;  %v254_v61 = vsel %vm12197_vm1, %v249_v56, %v253_v57  ;;  %v270_v45 = vsel %vm12197_vm1, %v265_v42, %v269_v43 }
  0x5d   :  { %735 = vrot.lane.b32.xlu1 %v649_v46, %s6283_s18  ;;  %733 = vrot.lane.b32.xlu0 %v647_v39, %s6283_s18  ;;  %v908_v39 = vrot.slane %v6671_v59, 3 }
  0x61   :  { %865 = vrot.lane.b32.xlu1 %v796_v26, %s6284_s19  ;;  %863 = vrot.lane.b32.xlu0 %v792_v53, %s6284_s19  ;;  %v394_v26 = vrot.slane %v6700_v14, 1  ;;  %v6763_v53 = vshrl.u32 %v6749_v37, 16 }
  0x63   :  { %v395_v57 = vsel %vm12222_vm0, %v392_v3, %v394_v26  ;;  %v805_v35 = vrot.slane %v6763_v53, 2 }
  0x65   :  { %347 = vrot.lane.b32.xlu1 %v246_v55, %s6280_s27  ;;  %940 = vrot.lane.b32.xlu0 %v905_v52, %s6285_s24  ;;  %v911_v55 = vsel %vm12199_vm5, %v908_v39, %v910_v48  ;;  %v396_v52 = vrot.slane %v6749_v37, 1 }
  0x67   :  { %v6786_v3 = vsel %vm12222_vm0, %v394_v26, %v396_v52 }
  0x69   :  { %349 = vrot.lane.b32.xlu1 %v254_v61, %s6280_s27  ;;  %942 = vrot.lane.b32.xlu0 %v907_v0, %s6285_s24  ;;  %v549_v61 = vrot.slane %v6763_v53, 1 }
  0x6b   :  { %v6788_v6 = vor.u32 %v550_v62, %v549_v61  ;;  %v277_v61 = vrot.slane %v6760_v51, 1 }
  0x6d   :  { %426 = vrot.lane.b32.xlu1 %v391_v1, %s6279_s22  ;;  %424 = vrot.lane.b32.xlu0 %v389_v31, %s6279_s22  ;;  %v6731_v31 = vor.u32 %v802_v25, %v801_v24  ;;  %v281_v18 = vor.u32 %v6763_v53, %v277_v61 }
  0x6f   :  { %v804_v30 = vsel %vm12196_vm4, %v799_v28, %v6731_v31 }
  0x71   :  { %479 = vrot.lane.b32.xlu1 %v6693_v9, %s6278_s21  ;;  %477 = vrot.lane.b32.xlu0 %v391_v1, %s6278_s21 }
  0x75   :  { %609 = vrot.lane.b32.xlu1 %v544_v17, %s6281_s14  ;;  %607 = vrot.lane.b32.xlu0 %v540_v20, %s6281_s14  ;;  %v6805_v20 = vshll.u32 %v6793_v7, 16 }
  0x79   :  { %686 = vrot.lane.b32.xlu1 %v651_v21, %s6282_s17  ;;  %684 = vrot.lane.b32.xlu0 %v649_v46, %s6282_s17  ;;  %v909_v46 = vsel %vm12199_vm5, %v906_v60, %v908_v39  ;;  %v545_v60 = vrot.slane %v6712_v19, 1 }
  0x7a   :  { %v6724_v27 = vpop.permute.xlu0 %465 }
  0x7b   :  { %v413_v34 = vpop.permute.xlu1 %412  ;;  %v547_v5 = vor.u32 %v546_v47, %v545_v60  ;;  %v273_v47 = vor.u32 %v6712_v19, %v269_v43  ;;  %v285_v19 = vrot.slane %v6805_v20, 1  ;;  %v6874_v43 = vld [vmem:[%s12183_s0 + $0x68] sm:$0xff]  }
  0x7c   :  { %v6890_v14 = vshrl.u32 %v6874_v43, 16 }
  0x7d   :  { %739 = vrot.lane.b32.xlu1 %v6729_v2, %s6283_s18  ;;  %737 = vrot.lane.b32.xlu0 %v651_v21, %s6283_s18  ;;  %v552_v17 = vsel %vm12221_vm2, %v547_v5, %v6788_v6  ;;  %v548_v49 = vsel %vm12221_vm2, %v6695_v12, %v547_v5  ;;  %v806_v12 = vrot.slane %v6760_v51, 3  ;;  %v278_v5 = vsel %vm12197_vm1, %v273_v47, %v277_v61 }
  0x7e   :  { %v286_v53 = vsel %vm12197_vm1, %v281_v18, %v285_v19 }
  0x7f   :  { %v415_v36 = vpop.permute.xlu1 %414  ;;  %v336_v40 = vpop.permute.xlu0 %335  ;;  %v807_v26 = vor.u32 %v806_v12, %v805_v35 }
  0x80   :  { %v970_v1 = vsel %vm12211_vm6, %v6397_v15, %v336_v40 }
  0x81   :  { %869 = vrot.lane.b32.xlu1 %v804_v30, %s6284_s19  ;;  %867 = vrot.lane.b32.xlu0 %v800_v38, %s6284_s19  ;;  %v1007_v58 = vsel %vm12210_vm7, %v970_v1, %v413_v34  ;;  %v656_v30 = vrot.slane %v6793_v7, 2 }
  0x82   :  { %v1044_v24 = vsel %vm12209_vm8, %v1007_v58, %v6724_v27 }
  0x83   :  { %v468_v44 = vpop.permute.xlu1 %467  ;;  %v338_v50 = vpop.permute.xlu0 %337 }
  0x84   :  { %v972_v15 = vsel %vm12211_vm6, %v6387_v10, %v338_v50  ;;  %v6808_v10 = vshrl.u32 %v6793_v7, 16 }
  0x85   :  { %351 = vrot.lane.b32.xlu1 %v262_v41, %s6280_s27  ;;  %944 = vrot.lane.b32.xlu0 %v909_v46, %s6285_s24  ;;  %v1009_v21 = vsel %vm12210_vm7, %v972_v15, %v415_v36 }
  0x86   :  { %v1046_v33 = vsel %vm12209_vm8, %v1009_v21, %v468_v44  ;;  %v809_v36 = vrot.slane %v6808_v10, 2 }
  0x87   :  { %v598_v54 = vpop.permute.xlu1 %597  ;;  %v596_v56 = vpop.permute.xlu0 %595 }
  0x88   :  { %v1081_v34 = vsel %vm12204_vm9, %v1044_v24, %v596_v56  ;;  %v1083_v42 = vsel %vm12204_vm9, %v1046_v33, %v598_v54  ;;  %v554_v24 = vrot.slane %v6805_v20, 2  ;;  %v6918_v33 = vld [vmem:[%s12183_s0 + $0x70] sm:$0xff]  }
  0x89   :  { %353 = vrot.lane.b32.xlu1 %v270_v45, %s6280_s27  ;;  %946 = vrot.lane.b32.xlu0 %v911_v55, %s6285_s24 }
  0x8b   :  { %v675_v63 = vpop.permute.xlu1 %674  ;;  %v673_v0 = vpop.permute.xlu0 %672 }
  0x8c   :  { %v1118_v27 = vsel %vm12203_vm10, %v1081_v34, %v673_v0  ;;  %v1120_v50 = vsel %vm12203_vm10, %v1083_v42, %v675_v63  ;;  %v808_v63 = vsel %vm12196_vm4, %v6731_v31, %v807_v26  ;;  %v912_v0 = vrot.slane %v6749_v37, 3 }
  0x8d   :  { %430 = vrot.lane.b32.xlu1 %v395_v57, %s6279_s22  ;;  %428 = vrot.lane.b32.xlu0 %v6693_v9, %s6279_s22  ;;  %v654_v9 = vrot.slane %v6749_v37, 2 }
  0x8e   :  { %v913_v31 = vsel %vm12199_vm5, %v910_v48, %v912_v0 }
  0x8f   :  { %v728_v8 = vpop.permute.xlu1 %727  ;;  %v726_v11 = vpop.permute.xlu0 %725  ;;  %v655_v28 = vsel %vm12212_vm3, %v652_v22, %v654_v9  ;;  %v810_v22 = vrot.slane %v6805_v20, 3  ;;  %v6838_v46 = vsel %vm12212_vm3, %v654_v9, %v656_v30  ;;  %v6887_v9 = vshll.u32 %v6874_v43, 16 }
  0x90   :  { %v1155_v38 = vsel %vm12202_vm11, %v1118_v27, %v726_v11  ;;  %v1157_v54 = vsel %vm12202_vm11, %v1120_v50, %v728_v8  ;;  %v914_v8 = vrot.slane %v6793_v7, 3  ;;  %v398_v11 = vrot.slane %v6793_v7, 1 }
  0x91   :  { %483 = vrot.lane.b32.xlu1 %v6786_v3, %s6278_s21  ;;  %481 = vrot.lane.b32.xlu0 %v395_v57, %s6278_s21  ;;  %v6844_v45 = vor.u32 %v810_v22, %v809_v36 }
  0x92   :  { %v915_v58 = vsel %vm12199_vm5, %v912_v0, %v914_v8  ;;  %v399_v21 = vsel %vm12222_vm0, %v396_v52, %v398_v11 }
  0x93   :  { %v858_v23 = vpop.permute.xlu1 %857  ;;  %v856_v25 = vpop.permute.xlu0 %855 }
  0x94   :  { %v1192_v40 = vsel %vm12201_vm12, %v1155_v38, %v856_v25  ;;  %v1194_v56 = vsel %vm12201_vm12, %v1157_v54, %v858_v23  ;;  %v400_v23 = vrot.slane %v6874_v43, 1  ;;  %v557_v25 = vrot.slane %v6890_v14, 1 }
  0x95   :  { %613 = vrot.lane.b32.xlu1 %v552_v17, %s6281_s14  ;;  %611 = vrot.lane.b32.xlu0 %v548_v49, %s6281_s14  ;;  %v553_v49 = vrot.slane %v6808_v10, 1 }
  0x96   :  { %v6911_v37 = vsel %vm12222_vm0, %v398_v11, %v400_v23 }
  0x97   :  { %v6829_v39 = vpop.permute.xlu1 %339  ;;  %v933_v41 = vpop.permute.xlu0 %932  ;;  %v555_v52 = vor.u32 %v554_v24, %v553_v49  ;;  %v289_v24 = vor.u32 %v6808_v10, %v285_v19  ;;  %v7005_v19 = vld [vmem:[%s12183_s0 + $0x78] sm:$0xff]  }
  0x98   :  { %v1229_v44 = vsel %vm12200_vm13, %v1192_v40, %v933_v41  ;;  %v974_v22 = vsel %vm12211_vm6, %v6373_v4, %v6829_v39  ;;  %v6930_v40 = vshll.u32 %v6918_v33, 16  ;;  %v6933_v41 = vshrl.u32 %v6918_v33, 16 }
  0x99   :  { %690 = vrot.lane.b32.xlu1 %v655_v28, %s6282_s17  ;;  %688 = vrot.lane.b32.xlu0 %v6729_v2, %s6282_s17  ;;  %v812_v2 = vsel %vm12196_vm4, %v807_v26, %v6844_v45  ;;  %v556_v50 = vsel %vm12221_vm2, %v6788_v6, %v555_v52  ;;  %v660_v39 = vrot.slane %v6918_v33, 2  ;;  %v6229_v6 = vld [vmem:[%s12183_s0 + $0x18] sm:$0xff]   ;;  %v7021_v7 = vshrl.u32 %v7005_v19, 16 }
  0x9a   :  { %5863 = vmatprep.mubr.msk.bf16.mxu0 %vm12198_vm14, %v1229_v44  ;;  %v817_v61 = vrot.slane %v6933_v41, 2  ;;  %v301_v10 = vrot.slane %v6930_v40, 1 }
  0x9b   :  { %v6847_v55 = vpop.permute.xlu1 %341  ;;  %v935_v57 = vpop.permute.xlu0 %934 }
  0x9c   :  { %v1231_v60 = vsel %vm12200_vm13, %v1194_v56, %v935_v57  ;;  %v813_v57 = vrot.slane %v6890_v14, 2 }
  0x9d   :  { %743 = vrot.lane.b32.xlu1 %v6838_v46, %s6283_s18  ;;  %741 = vrot.lane.b32.xlu0 %v655_v28, %s6283_s18  ;;  %v558_v28 = vrot.slane %v6887_v9, 2 }
  0x9e   :  { %5864 = vmatmul.mubr.msk.bf16.vlgmr.msra.gmra.mrb[0].mxu0 %vm12198_vm14, %v1231_v60  ;;  %v814_v60 = vrot.slane %v6887_v9, 3 }
  0x9f   :  { %v6861_v62 = vpop.permute.xlu1 %418  ;;  %v417_v1 = vpop.permute.xlu0 %416  ;;  %v6913_v12 = vor.u32 %v558_v28, %v557_v25  ;;  %v293_v25 = vrot.slane %v6887_v9, 1 }
  0xa0   :  { %v1011_v42 = vsel %vm12210_vm7, %v974_v22, %v417_v1  ;;  %v402_v22 = vrot.slane %v6918_v33, 1 }
  0xa1   :  { %873 = vrot.lane.b32.xlu1 %v812_v2, %s6284_s19  ;;  %871 = vrot.lane.b32.xlu0 %v808_v63, %s6284_s19  ;;  %v560_v38 = vsel %vm12221_vm2, %v555_v52, %v6913_v12  ;;  %v976_v2 = vsel %vm12211_vm6, %v6229_v6, %v6847_v55  ;;  %v818_v63 = vrot.slane %v6930_v40, 3  ;;  %v297_v20 = vor.u32 %v6890_v14, %v293_v25 }
  0xa3   :  { %v472_v51 = vpop.permute.xlu1 %471  ;;  %v470_v15 = vpop.permute.xlu0 %469  ;;  %v302_v14 = vsel %vm12197_vm1, %v297_v20, %v301_v10 }
  0xa4   :  { %v1048_v26 = vsel %vm12209_vm8, %v1011_v42, %v470_v15 }
  0xa5   :  { %355 = vrot.lane.b32.xlu1 %v278_v5, %s6280_s27  ;;  %948 = vrot.lane.b32.xlu0 %v913_v31, %s6285_s24 }
  0xa7   :  { %v602_v48 = vpop.permute.xlu1 %601  ;;  %v600_v17 = vpop.permute.xlu0 %599 }
  0xa8   :  { %v1085_v54 = vsel %vm12204_vm9, %v1048_v26, %v600_v17  ;;  %v404_v26 = vrot.slane %v7005_v19, 1 }
  0xa9   :  { %357 = vrot.lane.b32.xlu1 %v286_v53, %s6280_s27  ;;  %950 = vrot.lane.b32.xlu0 %v915_v58, %s6285_s24  ;;  %v6975_v53 = vor.u32 %v818_v63, %v817_v61 }
  0xab   :  { %v679_v34 = vpop.permute.xlu1 %678  ;;  %v677_v35 = vpop.permute.xlu0 %676 }
  0xac   :  { %v1122_v47 = vsel %vm12203_vm10, %v1085_v54, %v677_v35  ;;  %v916_v35 = vrot.slane %v6874_v43, 3  ;;  %v562_v54 = vrot.slane %v6930_v40, 2 }
  0xad   :  { %434 = vrot.lane.b32.xlu1 %v399_v21, %s6279_s22  ;;  %432 = vrot.lane.b32.xlu0 %v6786_v3, %s6279_s22  ;;  %v658_v3 = vrot.slane %v6874_v43, 2  ;;  %v7042_v43 = vsel %vm12222_vm0, %v402_v22, %v404_v26 }
  0xaf   :  { %v732_v27 = vpop.permute.xlu1 %731  ;;  %v730_v36 = vpop.permute.xlu0 %729  ;;  %v659_v56 = vsel %vm12212_vm3, %v656_v30, %v658_v3  ;;  %v1013_v30 = vsel %vm12210_vm7, %v976_v2, %v6861_v62  ;;  %v6969_v11 = vsel %vm12212_vm3, %v658_v3, %v660_v39 }
  0xb0   :  { %v1159_v0 = vsel %vm12202_vm11, %v1122_v47, %v730_v36  ;;  %v1050_v5 = vsel %vm12209_vm8, %v1013_v30, %v472_v51  ;;  %v815_v51 = vor.u32 %v814_v60, %v813_v57  ;;  %v918_v36 = vrot.slane %v6918_v33, 3  ;;  %v7049_v47 = vld [vmem:[%s12183_s0 + $0x80] sm:$0xff]  }
  0xb1   :  { %487 = vrot.lane.b32.xlu1 %v6911_v37, %s6278_s21  ;;  %485 = vrot.lane.b32.xlu0 %v399_v21, %s6278_s21  ;;  %v1087_v31 = vsel %vm12204_vm9, %v1050_v5, %v602_v48  ;;  %v662_v30 = vrot.slane %v7005_v19, 2 }
  0xb2   :  { %v1124_v62 = vsel %vm12203_vm10, %v1087_v31, %v679_v34  ;;  %v816_v34 = vsel %vm12196_vm4, %v6844_v45, %v815_v51  ;;  %v917_v45 = vsel %vm12199_vm5, %v914_v8, %v916_v35  ;;  %v919_v42 = vsel %vm12199_vm5, %v916_v35, %v918_v36 }
  0xb3   :  { %v862_v44 = vpop.permute.xlu1 %861  ;;  %v860_v4 = vpop.permute.xlu0 %859  ;;  %v1161_v48 = vsel %vm12202_vm11, %v1124_v62, %v732_v27  ;;  %v294_v27 = vsel %vm12197_vm1, %v289_v24, %v293_v25 }
  0xb4   :  { %v1196_v18 = vsel %vm12201_vm12, %v1159_v0, %v860_v4  ;;  %v1198_v17 = vsel %vm12201_vm12, %v1161_v48, %v862_v44  ;;  %v561_v4 = vrot.slane %v6933_v41, 1  ;;  %v663_v48 = vsel %vm12212_vm3, %v660_v39, %v662_v30 }
  0xb5   :  { %617 = vrot.lane.b32.xlu1 %v560_v38, %s6281_s14  ;;  %615 = vrot.lane.b32.xlu0 %v556_v50, %s6281_s14  ;;  %v7018_v38 = vshll.u32 %v7005_v19, 16  ;;  %v403_v50 = vsel %vm12222_vm0, %v400_v23, %v402_v22 }
  0xb6   :  { %v563_v23 = vor.u32 %v562_v54, %v561_v4  ;;  %v305_v4 = vor.u32 %v6933_v41, %v301_v10  ;;  %v7136_v10 = vld [vmem:[%s12183_s0 + $0x88] sm:$0xff]  }
  0xb7   :  { %v6959_v1 = vpop.permute.xlu1 %343  ;;  %v937_v55 = vpop.permute.xlu0 %936  ;;  %v566_v57 = vrot.slane %v7018_v38, 2  ;;  %v309_v54 = vrot.slane %v7018_v38, 1  ;;  %v7152_v33 = vshrl.u32 %v7136_v10, 16 }
  0xb8   :  { %v1233_v15 = vsel %vm12200_vm13, %v1196_v18, %v937_v55  ;;  %v7063_v18 = vshll.u32 %v7049_v47, 16  ;;  %v7066_v55 = vshrl.u32 %v7049_v47, 16  ;;  %v564_v62 = vsel %vm12221_vm2, %v6913_v12, %v563_v23 }
  0xb9   :  { %694 = vrot.lane.b32.xlu1 %v659_v56, %s6282_s17  ;;  %692 = vrot.lane.b32.xlu0 %v6838_v46, %s6282_s17  ;;  %v820_v46 = vsel %vm12196_vm4, %v815_v51, %v6975_v53  ;;  %v313_v40 = vor.u32 %v7021_v7, %v309_v54 }
  0xba   :  { %5867 = vmatprep.mubr.msk.bf16.mxu0 %vm12198_vm14, %v1233_v15  ;;  %v825_v39 = vrot.slane %v7066_v55, 2  ;;  %v826_v25 = vrot.slane %v7063_v18, 3  ;;  %v317_v41 = vrot.slane %v7063_v18, 1 }
  0xbb   :  { %v6978_v58 = vpop.permute.xlu1 %345  ;;  %v939_v21 = vpop.permute.xlu0 %938 }
  0xbc   :  { %v1235_v49 = vsel %vm12200_vm13, %v1198_v17, %v939_v21  ;;  %v664_v21 = vrot.slane %v7049_v47, 2  ;;  %v980_v12 = vsel %vm12211_vm6, %v6508_v29, %v6978_v58  ;;  %v7106_v22 = vor.u32 %v826_v25, %v825_v39 }
  0xbd   :  { %747 = vrot.lane.b32.xlu1 %v6969_v11, %s6283_s18  ;;  %745 = vrot.lane.b32.xlu0 %v659_v56, %s6283_s18  ;;  %v565_v56 = vrot.slane %v7021_v7, 1  ;;  %v666_v25 = vrot.slane %v7136_v10, 2 }
  0xbe   :  { %5868 = vmatmul.mubr.msk.bf16.gmra.mrb[4].mxu0 %vm12198_vm14, %v1235_v49  ;;  %v821_v49 = vrot.slane %v7021_v7, 2  ;;  %v318_v7 = vsel %vm12197_vm1, %v313_v40, %v317_v41 }
  0xbf   :  { %v6992_v28 = vpop.permute.xlu1 %422  ;;  %v421_v52 = vpop.permute.xlu0 %420  ;;  %v7044_v2 = vor.u32 %v566_v57, %v565_v56 }
  0xc1   :  { %877 = vrot.lane.b32.xlu1 %v820_v46, %s6284_s19  ;;  %875 = vrot.lane.b32.xlu0 %v816_v34, %s6284_s19  ;;  %v568_v5 = vsel %vm12221_vm2, %v563_v23, %v7044_v2  ;;  %v822_v46 = vrot.slane %v7018_v38, 3  ;;  %v1017_v34 = vsel %vm12210_vm7, %v980_v12, %v6992_v28  ;;  %v310_v23 = vsel %vm12197_vm1, %v305_v4, %v309_v54  ;;  %v7181_v12 = vld [vmem:[%s12183_s0 + $0x90] sm:$0xff]  }
  0xc3   :  { %v476_v9 = vpop.permute.xlu1 %475  ;;  %v474_v3 = vpop.permute.xlu0 %473 }
  0xc5   :  { %359 = vrot.lane.b32.xlu1 %v294_v27, %s6280_s27  ;;  %952 = vrot.lane.b32.xlu0 %v917_v45, %s6285_s24  ;;  %v1054_v27 = vsel %vm12209_vm8, %v1017_v34, %v476_v9  ;;  %v823_v9 = vor.u32 %v822_v46, %v821_v49 }
  0xc7   :  { %v606_v8 = vpop.permute.xlu1 %605  ;;  %v604_v44 = vpop.permute.xlu0 %603  ;;  %v824_v57 = vsel %vm12196_vm4, %v6975_v53, %v823_v9 }
  0xc8   :  { %v1091_v58 = vsel %vm12204_vm9, %v1054_v27, %v606_v8  ;;  %v581_v27 = vshll.u32 %v7181_v12, 16 }
  0xc9   :  { %361 = vrot.lane.b32.xlu1 %v302_v14, %s6280_s27  ;;  %954 = vrot.lane.b32.xlu0 %v919_v42, %s6285_s24 }
  0xcb   :  { %v683_v60 = vpop.permute.xlu1 %682  ;;  %v681_v6 = vpop.permute.xlu0 %680 }
  0xcc   :  { %v1128_v28 = vsel %vm12203_vm10, %v1091_v58, %v683_v60  ;;  %v920_v60 = vrot.slane %v7005_v19, 3 }
  0xcd   :  { %438 = vrot.lane.b32.xlu1 %v403_v50, %s6279_s22  ;;  %436 = vrot.lane.b32.xlu0 %v6911_v37, %s6279_s22  ;;  %v6230_v37 = vld [vmem:[%s12183_s0 + $0x20] sm:$0xff]  }
  0xce   :  { %v978_v0 = vsel %vm12211_vm6, %v6230_v37, %v6959_v1  ;;  %v921_v53 = vsel %vm12199_vm5, %v918_v36, %v920_v60  ;;  %v7149_v37 = vshll.u32 %v7136_v10, 16 }
  0xcf   :  { %v736_v61 = vpop.permute.xlu1 %735  ;;  %v734_v63 = vpop.permute.xlu0 %733  ;;  %v1015_v31 = vsel %vm12210_vm7, %v978_v0, %v421_v52 }
  0xd0   :  { %v1052_v51 = vsel %vm12209_vm8, %v1015_v31, %v474_v3  ;;  %v7100_v3 = vsel %vm12212_vm3, %v662_v30, %v664_v21  ;;  %v1165_v14 = vsel %vm12202_vm11, %v1128_v28, %v736_v61  ;;  %v922_v61 = vrot.slane %v7049_v47, 3 }
  0xd1   :  { %491 = vrot.lane.b32.xlu1 %v7042_v43, %s6278_s21  ;;  %489 = vrot.lane.b32.xlu0 %v403_v50, %s6278_s21  ;;  %v1089_v17 = vsel %vm12204_vm9, %v1052_v51, %v604_v44  ;;  %v406_v30 = vrot.slane %v7049_v47, 1  ;;  %v570_v51 = vrot.slane %v7063_v18, 2 }
  0xd2   :  { %v1126_v24 = vsel %vm12203_vm10, %v1089_v17, %v681_v6  ;;  %v923_v0 = vsel %vm12199_vm5, %v920_v60, %v922_v61 }
  0xd3   :  { %v866_v15 = vpop.permute.xlu1 %865  ;;  %v864_v1 = vpop.permute.xlu0 %863  ;;  %v1163_v35 = vsel %vm12202_vm11, %v1126_v24, %v734_v63  ;;  %v407_v31 = vsel %vm12222_vm0, %v404_v26, %v406_v30 }
  0xd4   :  { %v1200_v20 = vsel %vm12201_vm12, %v1163_v35, %v864_v1  ;;  %v1202_v42 = vsel %vm12201_vm12, %v1165_v14, %v866_v15  ;;  %v7162_v15 = vrot.slane %v7136_v10, 1  ;;  %v573_v1 = vrot.slane %v7152_v33, 1 }
  0xd5   :  { %621 = vrot.lane.b32.xlu1 %v568_v5, %s6281_s14  ;;  %619 = vrot.lane.b32.xlu0 %v564_v62, %s6281_s14  ;;  %v569_v62 = vrot.slane %v7066_v55, 1  ;;  %v578_v35 = vshrl.u32 %v7181_v12, 16  ;;  %v829_v14 = vrot.slane %v7152_v33, 2 }
  0xd6   :  { %v7174_v19 = vsel %vm12222_vm0, %v406_v30, %v7162_v15 }
  0xd7   :  { %v7090_v52 = vpop.permute.xlu1 %347  ;;  %v941_v29 = vpop.permute.xlu0 %940  ;;  %v571_v26 = vor.u32 %v570_v51, %v569_v62 }
  0xd8   :  { %v1237_v45 = vsel %vm12200_vm13, %v1200_v20, %v941_v29 }
  0xd9   :  { %698 = vrot.lane.b32.xlu1 %v663_v48, %s6282_s17  ;;  %696 = vrot.lane.b32.xlu0 %v6969_v11, %s6282_s17  ;;  %v828_v11 = vsel %vm12196_vm4, %v823_v9, %v7106_v22  ;;  %v572_v58 = vsel %vm12221_vm2, %v7044_v2, %v571_v26  ;;  %v7204_v9 = vrot.slane %v7181_v12, 2 }
  0xda   :  { %5871 = vmatprep.mubr.msk.bf16.mxu0 %vm12198_vm14, %v1237_v45 }
  0xdb   :  { %v7109_v8 = vpop.permute.xlu1 %349  ;;  %v943_v44 = vpop.permute.xlu0 %942 }
  0xdc   :  { %v1239_v50 = vsel %vm12200_vm13, %v1202_v42, %v943_v44  ;;  %v830_v42 = vrot.slane %v7149_v37, 3  ;;  %v984_v2 = vsel %vm12211_vm6, %v6597_v16, %v7109_v8 }
  0xdd   :  { %751 = vrot.lane.b32.xlu1 %v7100_v3, %s6283_s18  ;;  %749 = vrot.lane.b32.xlu0 %v663_v48, %s6283_s18  ;;  %v574_v48 = vrot.slane %v7149_v37, 2 }
  0xde   :  { %5872 = vmatmul.mubr.msk.bf16.gmra.mrb[8].mxu0 %vm12198_vm14, %v1239_v50  ;;  %v834_v50 = vrot.slane %v581_v27, 3  ;;  %v831_v40 = vor.u32 %v830_v42, %v829_v14 }
  0xdf   :  { %v7123_v56 = vpop.permute.xlu1 %426  ;;  %v425_v6 = vpop.permute.xlu0 %424  ;;  %v7176_v46 = vor.u32 %v574_v48, %v573_v1  ;;  %v924_v48 = vrot.slane %v7136_v10, 3  ;;  %v926_v10 = vrot.slane %v7181_v12, 3 }
  0xe0   :  { %v832_v1 = vsel %vm12196_vm4, %v7106_v22, %v831_v40 }
  0xe1   :  { %881 = vrot.lane.b32.xlu1 %v828_v11, %s6284_s19  ;;  %879 = vrot.lane.b32.xlu0 %v824_v57, %s6284_s19  ;;  %v576_v34 = vsel %vm12221_vm2, %v571_v26, %v7176_v46  ;;  %v1021_v11 = vsel %vm12210_vm7, %v984_v2, %v7123_v56  ;;  %v925_v22 = vsel %vm12199_vm5, %v922_v61, %v924_v48  ;;  %v7296_v2 = vld [vmem:[%s12183_s0 + $0x98] sm:$0xff]  }
  0xe2   :  { %v927_v47 = vsel %vm12199_vm5, %v924_v48, %v926_v10 }
  0xe3   :  { %v480_v38 = vpop.permute.xlu1 %479  ;;  %v478_v63 = vpop.permute.xlu0 %477 }
  0xe4   :  { %v1058_v57 = vsel %vm12209_vm8, %v1021_v11, %v480_v38 }
  0xe5   :  { %363 = vrot.lane.b32.xlu1 %v310_v23, %s6280_s27  ;;  %956 = vrot.lane.b32.xlu0 %v921_v53, %s6285_s24  ;;  %v7229_v23 = vsel %vm12212_vm3, %v666_v25, %v7204_v9  ;;  %v6187_v53 = vld [vmem:[%s12183_s0 + $0x90] ss:$0 sps:$4 sm:$0x11]  }
  0xe6   :  { %v331_v62 = vshll.u32 %v6187_v53, 16 }
  0xe7   :  { %v610_v36 = vpop.permute.xlu1 %609  ;;  %v608_v5 = vpop.permute.xlu0 %607 }
  0xe8   :  { %v1095_v60 = vsel %vm12204_vm9, %v1058_v57, %v610_v36 }
  0xe9   :  { %365 = vrot.lane.b32.xlu1 %v318_v7, %s6280_s27  ;;  %958 = vrot.lane.b32.xlu0 %v923_v0, %s6285_s24 }
  0xeb   :  { %v687_v17 = vpop.permute.xlu1 %686  ;;  %v685_v49 = vpop.permute.xlu0 %684 }
  0xec   :  { %v1132_v56 = vsel %vm12203_vm10, %v1095_v60, %v687_v17 }
  0xed   :  { %442 = vrot.lane.b32.xlu1 %v407_v31, %s6279_s22  ;;  %440 = vrot.lane.b32.xlu0 %v7042_v43, %s6279_s22  ;;  %v982_v43 = vsel %vm12211_vm6, %v6542_v13, %v7090_v52  ;;  %v667_v13 = vsel %vm12212_vm3, %v664_v21, %v666_v25  ;;  %v833_v21 = vrot.slane %v578_v35, 2 }
  0xee   :  { %v1019_v20 = vsel %vm12210_vm7, %v982_v43, %v425_v6 }
  0xef   :  { %v740_v24 = vpop.permute.xlu1 %739  ;;  %v738_v39 = vpop.permute.xlu0 %737  ;;  %v1056_v45 = vsel %vm12209_vm8, %v1019_v20, %v478_v63  ;;  %v7235_v38 = vor.u32 %v834_v50, %v833_v21 }
  0xf0   :  { %v1093_v52 = vsel %vm12204_vm9, %v1056_v45, %v608_v5  ;;  %v1169_v63 = vsel %vm12202_vm11, %v1132_v56, %v740_v24  ;;  %v321_v5 = vor.u32 %v7066_v55, %v317_v41  ;;  %v333_v55 = vrot.slane %v331_v62, 1  ;;  %v6189_v41 = vld [vmem:[%s12183_s0 + $0x98] ss:$0 sps:$4 sm:$0x33]  }
  0xf1   :  { %495 = vrot.lane.b32.xlu1 %v7174_v19, %s6278_s21  ;;  %493 = vrot.lane.b32.xlu0 %v407_v31, %s6278_s21  ;;  %v1130_v44 = vsel %vm12203_vm10, %v1093_v52, %v685_v49  ;;  %v325_v31 = vrot.slane %v7149_v37, 1  ;;  %v410_v24 = vrot.slane %v6187_v53, 1  ;;  %v587_v25 = vshrl.u32 %v6189_v41, 16  ;;  %v6191_v56 = vld [vmem:[%s12183_s0 + $0xa0] ss:$0 sps:$4 sm:$0x33]  }
  0xf2   :  { %v1167_v4 = vsel %vm12202_vm11, %v1130_v44, %v738_v39  ;;  %v590_v43 = vshll.u32 %v6189_v41, 16  ;;  %v580_v45 = vrot.slane %v578_v35, 1  ;;  %v7302_v44 = vld [vmem:[%s12183_s0 + $0xa0] ss:$0 sps:$4 sm:$0x77]   ;;  %v670_v57 = vrot.slane %v6189_v41, 2 }
  0xf3   :  { %v870_v29 = vpop.permute.xlu1 %869  ;;  %v868_v28 = vpop.permute.xlu0 %867  ;;  %v326_v49 = vsel %vm12197_vm1, %v321_v5, %v325_v31  ;;  %v329_v18 = vor.u32 %v7152_v33, %v325_v31  ;;  %v6188_v33 = vld [vmem:[%s12183_s0 + $0x98] ss:$0 sps:$4 sm:$0x11]   ;;  %v411_v20 = vsel %vm12222_vm0, %v7162_v15, %v410_v24  ;;  %v847_v60 = vshrl.u32 %v7302_v44, 16  ;;  %v7343_v31 = vld [vmem:[%s12183_s0 + $0xa8] sm:$0xf] }
  0xf4   :  { %v1204_v16 = vsel %vm12201_vm12, %v1167_v4, %v868_v28  ;;  %v1206_v7 = vsel %vm12201_vm12, %v1169_v63, %v870_v29  ;;  %v461_v29 = vrot.slane %v7181_v12, 1  ;;  %v583_v28 = vrot.slane %v581_v27, 2 }
  0xf5   :  { %625 = vrot.lane.b32.xlu1 %v576_v34, %s6281_s14  ;;  %623 = vrot.lane.b32.xlu0 %v572_v58, %s6281_s14  ;;  %v334_v39 = vsel %vm12197_vm1, %v329_v18, %v333_v55  ;;  %v463_v58 = vrot.slane %v6188_v33, 1  ;;  %v592_v52 = vrot.slane %v590_v43, 2  ;;  %v849_v48 = vrot.slane %v847_v60, 2  ;;  %v5678_v33 = vld [vmem:[%s12183_s0 + $0xb4] sm:$0xf] }
  0xf6   :  { %v584_v27 = vor.u32 %v583_v28, %v580_v45  ;;  %v462_v11 = vsel %vm12222_vm0, %v7162_v15, %v461_v29  ;;  %v723_v55 = vrot.slane %v6191_v56, 2  ;;  %v5711_v60 = vld [vmem:[%s12183_s0 + $0xa4] sm:$0xe] }
  0xf7   :  { %v7220_v54 = vpop.permute.xlu1 %351  ;;  %v945_v8 = vpop.permute.xlu0 %944  ;;  %v464_v35 = vsel %vm12222_vm0, %v461_v29, %v463_v58 }
  0xf8   :  { %v1241_v6 = vsel %vm12200_vm13, %v1204_v16, %v945_v8  ;;  %v838_v16 = vshrl.u32 %v7296_v2, 16  ;;  %v841_v8 = vshll.u32 %v7296_v2, 16  ;;  %v585_v63 = vsel %vm12221_vm2, %v7176_v46, %v584_v27  ;;  %v5674_v46 = vld [vmem:[%s12183_s0 + $0xa4] sm:$0xf] }
  0xf9   :  { %702 = vrot.lane.b32.xlu1 %v667_v13, %s6282_s17  ;;  %700 = vrot.lane.b32.xlu0 %v7100_v3, %s6282_s17  ;;  %v836_v3 = vsel %vm12196_vm4, %v831_v40, %v7235_v38 }
  0xfa   :  { %5875 = vmatprep.mubr.msk.bf16.mxu0 %vm12198_vm14, %v1241_v6  ;;  %v986_v6 = vsel %vm12211_vm6, %v6627_v32, %v7220_v54  ;;  %v7331_v32 = vld [vmem:[%s12183_s0 + $0xb0] sm:$0xf]  ;;  %v840_v5 = vrot.slane %v838_v16, 2 }
  0xfb   :  { %v7241_v30 = vpop.permute.xlu1 %353  ;;  %v947_v36 = vpop.permute.xlu0 %946 }
  0xfc   :  { %v1243_v0 = vsel %vm12200_vm13, %v1206_v7, %v947_v36  ;;  %v5676_v7 = vld [vmem:[%s12183_s0 + $0xac] sm:$0xf] }
  0xfd   :  { %755 = vrot.lane.b32.xlu1 %v7229_v23, %s6283_s18  ;;  %753 = vrot.lane.b32.xlu0 %v667_v13, %s6283_s18  ;;  %v589_v13 = vrot.slane %v587_v25, 1  ;;  %v7353_v41 = vcombine.low %v5676_v7, %v7331_v32 }
  0xfe   :  { %5876 = vmatmul.mubr.msk.bf16.gmra.mrb[12].mxu0 %vm12198_vm14, %v1243_v0  ;;  %v671_v0 = vsel %vm12212_vm3, %v7204_v9, %v670_v57 }
  0xff   :  { %v7255_v51 = vpop.permute.xlu1 %430  ;;  %v429_v17 = vpop.permute.xlu0 %428  ;;  %v593_v21 = vor.u32 %v592_v52, %v589_v13 }
 0x100   :  { %v1023_v40 = vsel %vm12210_vm7, %v986_v6, %v429_v17 }
 0x101   :  { %885 = vrot.lane.b32.xlu1 %v836_v3, %s6284_s19  ;;  %883 = vrot.lane.b32.xlu0 %v832_v1, %s6284_s19  ;;  %v594_v15 = vsel %vm12221_vm2, %v584_v27, %v593_v21  ;;  %v721_v3 = vrot.slane %v7296_v2, 2  ;;  %v843_v1 = vrot.slane %v841_v8, 3  ;;  %v928_v27 = vrot.slane %v7296_v2, 3 }
 0x102   :  { %v930_v21 = vrot.slane %v7302_v44, 3 }
 0x103   :  { %v7267_v37 = vpop.permute.xlu1 %483  ;;  %v482_v26 = vpop.permute.xlu0 %481  ;;  %v722_v13 = vsel %vm12212_vm3, %v7204_v9, %v721_v3 }
 0x104   :  { %v1060_v54 = vsel %vm12209_vm8, %v1023_v40, %v482_v26  ;;  %v929_v40 = vsel %vm12199_vm5, %v926_v10, %v928_v27 }
 0x105   :  { %367 = vrot.lane.b32.xlu1 %v326_v49, %s6280_s27  ;;  %960 = vrot.lane.b32.xlu0 %v925_v22, %s6285_s24  ;;  %v988_v49 = vsel %vm12211_vm6, %v6671_v59, %v7241_v30  ;;  %v7366_v59 = vld [vmem:[%s12183_s0 + $0xb8] sm:$0xf]  ;;  %v7369_v30 = vcombine.low %v5674_v46, %v7343_v31 }
 0x106   :  { %v1025_v22 = vsel %vm12210_vm7, %v988_v49, %v7255_v51  ;;  %v7384_v58 = vcombine.low %v5678_v33, %v7366_v59 }
 0x107   :  { %v7279_v34 = vpop.permute.xlu1 %613  ;;  %v612_v61 = vpop.permute.xlu0 %611  ;;  %v1411_v52 = vshll.u32 %v7369_v30, 16  ;;  %v1409_v16 = vshrl.u32 %v7369_v30, 16 }
 0x108   :  { %v1097_v62 = vsel %vm12204_vm9, %v1060_v54, %v612_v61  ;;  %v844_v61 = vor.u32 %v843_v1, %v840_v5  ;;  %v1428_v12 = vshrl.u32 %v7384_v58, 16 }
 0x109   :  { %369 = vrot.lane.b32.xlu1 %v334_v39, %s6280_s27  ;;  %962 = vrot.lane.b32.xlu0 %v927_v47, %s6285_s24  ;;  %v1062_v39 = vsel %vm12209_vm8, %v1025_v22, %v7267_v37  ;;  %v724_v37 = vsel %vm12212_vm3, %v721_v3, %v723_v55  ;;  %v1413_v8 = vrot.slane %v1411_v52, 1  ;;  %v5717_v55 = vld [vmem:[%s12183_s0 + $0xac] sm:$0xc] }
 0x10a   :  { %v1099_v43 = vsel %vm12204_vm9, %v1062_v39, %v7279_v34  ;;  %v1416_v34 = vshll.u32 %v7353_v41, 16  ;;  %v845_v57 = vsel %vm12196_vm4, %v7235_v38, %v844_v61  ;;  %v1732_v22 = vrot.slane %v1428_v12, 1 }
 0x10b   :  { %v691_v14 = vpop.permute.xlu1 %690  ;;  %v689_v42 = vpop.permute.xlu0 %688 }
 0x10c   :  { %v1134_v18 = vsel %vm12203_vm10, %v1097_v62, %v689_v42  ;;  %v1136_v29 = vsel %vm12203_vm10, %v1099_v43, %v691_v14  ;;  %v1418_v9 = vrot.slane %v1416_v34, 1 }
 0x10d   :  { %446 = vrot.lane.b32.xlu1 %v411_v20, %s6279_s22  ;;  %444 = vrot.lane.b32.xlu0 %v7174_v19, %s6279_s22  ;;  %v850_v19 = vshll.u32 %v7302_v44, 16  ;;  %v5712_v44 = vld [vmem:[%s12183_s0 + $0xac] sm:$0xe] }
 0x10e   :  { %v5744_v7 = vcombine.low %v5712_v44, %v7331_v32 }
 0x10f   :  { %v744_v50 = vpop.permute.xlu1 %743  ;;  %v742_v4 = vpop.permute.xlu0 %741  ;;  %v852_v17 = vrot.slane %v850_v19, 3  ;;  %v931_v19 = vsel %vm12199_vm5, %v928_v27, %v930_v21  ;;  %v1854_v27 = vrot.slane %v7384_v58, 2 }
 0x110   :  { %v1171_v26 = vsel %vm12202_vm11, %v1134_v18, %v742_v4  ;;  %v1173_v45 = vsel %vm12202_vm11, %v1136_v29, %v744_v50  ;;  %v1420_v50 = vshrl.u32 %v7353_v41, 16  ;;  %v1725_v1 = vshrl.u32 %v5744_v7, 16 }
 0x111   :  { %499 = vrot.lane.b32.xlu1 %v464_v35, %s6278_s21  ;;  %497 = vrot.lane.b32.xlu0 %v462_v11, %s6278_s21  ;;  %v853_v20 = vor.u32 %v852_v17, %v849_v48  ;;  %v1424_v11 = vshll.u32 %v7384_v58, 16  ;;  %v1728_v48 = vshll.u32 %v5744_v7, 16  ;;  %v1679_v43 = vrot.slane %v5744_v7, 1 }
 0x112   :  { %v1422_v38 = vor.u32 %v1420_v50, %v1418_v9  ;;  %v5748_v29 = vcombine.low %v5717_v55, %v7331_v32  ;;  %v7479_v32 = vld [vmem:[%s12183_s0 + $0xc4] sm:$0xff]   ;;  %v6231_v50 = vld [vmem:[%s12183_s0 + $0x50] sm:$0xff]  }
 0x113   :  { %v874_v53 = vpop.permute.xlu1 %873  ;;  %v872_v36 = vpop.permute.xlu0 %871  ;;  %v854_v35 = vsel %vm12196_vm4, %v844_v61, %v853_v20  ;;  %v7419_v6 = vrot.slane %v1424_v11, 1  ;;  %v1730_v61 = vrot.slane %v1728_v48, 2 }
 0x114   :  { %v1208_v51 = vsel %vm12201_vm12, %v1171_v26, %v872_v36  ;;  %v1596_v36 = vrot.slane %v7353_v41, 1  ;;  %v1733_v26 = vrot.slane %v1424_v11, 2 }
 0x115   :  { %629 = vrot.lane.b32.xlu1 %v594_v15, %s6281_s14  ;;  %627 = vrot.lane.b32.xlu0 %v585_v63, %s6281_s14  ;;  %v7424_v15 = vld [vmem:[%s12183_s0 + $0xbc] sm:$0xff]   ;;  %v5743_v63 = vcombine.low %v5711_v60, %v7343_v31  ;;  %v1427_v3 = vsel %vm12197_vm1, %v1422_v38, %v7419_v6 }
 0x116   :  { %v7441_v10 = vshll.u32 %v7424_v15, 16  ;;  %v7444_v5 = vshrl.u32 %v7424_v15, 16  ;;  %v1600_v18 = vrot.slane %v7424_v15, 1  ;;  %v1856_v21 = vrot.slane %v7424_v15, 2 }
 0x117   :  { %v7358_v24 = vpop.permute.xlu1 %355  ;;  %v949_v25 = vpop.permute.xlu0 %948  ;;  %v1595_v62 = vrot.slane %v5743_v63, 1 }
 0x118   :  { %v1245_v47 = vsel %vm12200_vm13, %v1208_v51, %v949_v25  ;;  %v1736_v33 = vrot.slane %v7444_v5, 1  ;;  %v1737_v39 = vrot.slane %v7441_v10, 2  ;;  %v990_v11 = vsel %vm12211_vm6, %v6231_v50, %v7358_v24 }
 0x119   :  { %706 = vrot.lane.b32.xlu1 %v671_v0, %s6282_s17  ;;  %704 = vrot.lane.b32.xlu0 %v7229_v23, %s6282_s17  ;;  %v1210_v23 = vsel %vm12201_vm12, %v1173_v45, %v874_v53  ;;  %v1414_v53 = vor.u32 %v1413_v8, %v1409_v16  ;;  %v1598_v0 = vrot.slane %v7384_v58, 1  ;;  %v1597_v25 = vsel %vm12222_vm0, %v1595_v62, %v1596_v36 }
 0x11a   :  { %5879 = vmatprep.mubr.msk.bf16.mxu0 %vm12198_vm14, %v1245_v47  ;;  %v1727_v47 = vrot.slane %v1725_v1, 1  ;;  %v1734_v45 = vor.u32 %v1733_v26, %v1732_v22  ;;  %v7496_v16 = vshll.u32 %v7479_v32, 16  ;;  %v7499_v8 = vshrl.u32 %v7479_v32, 16 }
 0x11b   :  { %v7388_v28 = vpop.permute.xlu1 %357  ;;  %v951_v14 = vpop.permute.xlu0 %950  ;;  %v1419_v31 = vsel %vm12197_vm1, %v1414_v53, %v1418_v9  ;;  %v1599_v49 = vsel %vm12222_vm0, %v1596_v36, %v1598_v0  ;;  %v7472_v34 = vsel %vm12222_vm0, %v1598_v0, %v1600_v18  ;;  %v1853_v9 = vrot.slane %v5748_v29, 2 }
 0x11c   :  { %v1247_v42 = vsel %vm12200_vm13, %v1210_v23, %v951_v14  ;;  %v1680_v23 = vsel %vm12222_vm0, %v1679_v43, %v1598_v0  ;;  %v1731_v14 = vor.u32 %v1730_v61, %v1727_v47  ;;  %v1857_v63 = vsel %vm12212_vm3, %v1854_v27, %v1856_v21  ;;  %v5723_v43 = vld [vmem:[%s12183_s0 + $0xb4] sm:$0x8] }
 0x11d   :  { %759 = vrot.lane.b32.xlu1 %v724_v37, %s6283_s18  ;;  %757 = vrot.lane.b32.xlu0 %v722_v13, %s6283_s18  ;;  %v5718_v37 = vld [vmem:[%s12183_s0 + $0xb4] sm:$0xc]  ;;  %v7474_v13 = vor.u32 %v1737_v39, %v1736_v33  ;;  %v1855_v7 = vsel %vm12212_vm3, %v1853_v9, %v1854_v27  ;;  %v1858_v36 = vrot.slane %v7479_v32, 2  ;;  %v1994_v48 = vrot.slane %v7499_v8, 2 }
 0x11e   :  { %5880 = vmatmul.mubr.msk.bf16.gmra.mrb[16].mxu0 %vm12198_vm14, %v1247_v42  ;;  %v5749_v42 = vcombine.low %v5718_v37, %v7366_v59  ;;  %v1430_v27 = vor.u32 %v1428_v12, %v7419_v6 }
 0x11f   :  { %v7403_v4 = vpop.permute.xlu1 %434  ;;  %v7408_v2 = vpop.permute.xlu0 %432  ;;  %v7539_v61 = vsel %vm12212_vm3, %v1856_v21, %v1858_v36 }
 0x120   :  { %v1027_v60 = vsel %vm12210_vm7, %v990_v11, %v7408_v2  ;;  %v1983_v38 = vshrl.u32 %v5749_v42, 16  ;;  %v1990_v2 = vrot.slane %v7444_v5, 2  ;;  %v2112_v11 = vrot.slane %v7424_v15, 3 }
 0x121   :  { %889 = vrot.lane.b32.xlu1 %v854_v35, %s6284_s19  ;;  %887 = vrot.lane.b32.xlu0 %v845_v57, %s6284_s19  ;;  %v1739_v57 = vsel %vm12221_vm2, %v1734_v45, %v7474_v13 }
 0x122   :  { %v1985_v26 = vrot.slane %v1983_v38, 2  ;;  %v2114_v38 = vrot.slane %v7479_v32, 3 }
 0x123   :  { %v7426_v56 = vpop.permute.xlu1 %487  ;;  %v486_v54 = vpop.permute.xlu0 %485 }
 0x124   :  { %v1064_v24 = vsel %vm12209_vm8, %v1027_v60, %v486_v54  ;;  %v6232_v54 = vld [vmem:[%s12183_s0 + $0x58] sm:$0xff]   ;;  %v7572_v60 = vld [vmem:[%s12183_s0 + $0xcc] sm:$0xff]  }
 0x125   :  { %966 = vrot.lane.b32.xlu1 %v931_v19, %s6285_s24  ;;  %964 = vrot.lane.b32.xlu0 %v929_v40, %s6285_s24  ;;  %v1735_v19 = vsel %vm12221_vm2, %v1731_v14, %v1734_v45  ;;  %v1986_v40 = vshll.u32 %v5749_v42, 16  ;;  %v992_v62 = vsel %vm12211_vm6, %v6232_v54, %v7388_v28  ;;  %v5753_v14 = vcombine.low %v5723_v43, %v7366_v59 }
 0x126   :  { %v1434_v59 = vrot.slane %v7441_v10, 1  ;;  %v1741_v54 = vrot.slane %v7496_v16, 2 }
 0x127   :  { %v7446_v46 = vpop.permute.xlu1 %617  ;;  %v616_v17 = vpop.permute.xlu0 %615  ;;  %v1988_v33 = vrot.slane %v1986_v40, 3  ;;  %v2111_v50 = vrot.slane %v5753_v14, 3 }
 0x128   :  { %v1101_v0 = vsel %vm12204_vm9, %v1064_v24, %v616_v17  ;;  %v1995_v17 = vrot.slane %v7496_v16, 3  ;;  %v1435_v6 = vsel %vm12197_vm1, %v1430_v27, %v1434_v59  ;;  %v1438_v12 = vor.u32 %v7444_v5, %v1434_v59 }
 0x129   :  { %1558 = vrot.lane.b32.xlu1 %v1427_v3, %s6280_s27  ;;  %1556 = vrot.lane.b32.xlu0 %v1419_v31, %s6280_s27  ;;  %v1937_v3 = vrot.slane %v5749_v42, 2  ;;  %v1991_v31 = vrot.slane %v7441_v10, 3  ;;  %v1442_v10 = vrot.slane %v7496_v16, 1  ;;  %v7584_v24 = vshll.u32 %v7572_v60, 16 }
 0x12a   :  { %v7545_v29 = vor.u32 %v1995_v17, %v1994_v48 }
 0x12b   :  { %v7460_v51 = vpop.permute.xlu1 %694  ;;  %v693_v20 = vpop.permute.xlu0 %692  ;;  %v1938_v45 = vsel %vm12212_vm3, %v1937_v3, %v1856_v21  ;;  %v1443_v5 = vsel %vm12197_vm1, %v1438_v12, %v1442_v10  ;;  %v2115_v3 = vsel %vm12199_vm5, %v2112_v11, %v2114_v38 }
 0x12c   :  { %v1138_v1 = vsel %vm12203_vm10, %v1101_v0, %v693_v20  ;;  %v1992_v20 = vor.u32 %v1991_v31, %v1990_v2  ;;  %v1740_v31 = vrot.slane %v7499_v8, 1 }
 0x12d   :  { %1634 = vrot.lane.b32.xlu1 %v1599_v49, %s6279_s22  ;;  %1632 = vrot.lane.b32.xlu0 %v1597_v25, %s6279_s22  ;;  %v1029_v49 = vsel %vm12210_vm7, %v992_v62, %v7403_v4 }
 0x12e   :  { %v1066_v28 = vsel %vm12209_vm8, %v1029_v49, %v7426_v56  ;;  %v1604_v49 = vrot.slane %v7572_v60, 1 }
 0x12f   :  { %v748_v52 = vpop.permute.xlu1 %747  ;;  %v746_v35 = vpop.permute.xlu0 %745  ;;  %v1103_v47 = vsel %vm12204_vm9, %v1066_v28, %v7446_v46 }
 0x130   :  { %v1175_v55 = vsel %vm12202_vm11, %v1138_v1, %v746_v35  ;;  %v1140_v56 = vsel %vm12203_vm10, %v1103_v47, %v7460_v51  ;;  %v1745_v1 = vrot.slane %v7584_v24, 2 }
 0x131   :  { %1687 = vrot.lane.b32.xlu1 %v7472_v34, %s6278_s21  ;;  %1685 = vrot.lane.b32.xlu0 %v1680_v23, %s6278_s21  ;;  %v1177_v46 = vsel %vm12202_vm11, %v1140_v56, %v748_v52  ;;  %v1989_v23 = vor.u32 %v1988_v33, %v1985_v26  ;;  %v1997_v52 = vsel %vm12196_vm4, %v1992_v20, %v7545_v29 }
 0x132   :  { %v1742_v33 = vor.u32 %v1741_v54, %v1740_v31 }
 0x133   :  { %v878_v44 = vpop.permute.xlu1 %877  ;;  %v876_v53 = vpop.permute.xlu0 %875  ;;  %v1993_v9 = vsel %vm12196_vm4, %v1989_v23, %v1992_v20  ;;  %v6233_v23 = vld [vmem:[%s12183_s0 + $0x60] sm:$0xff]  }
 0x134   :  { %v1212_v39 = vsel %vm12201_vm12, %v1175_v55, %v876_v53  ;;  %v1214_v42 = vsel %vm12201_vm12, %v1177_v46, %v878_v44  ;;  %v7587_v53 = vshrl.u32 %v7572_v60, 16  ;;  %v1743_v59 = vsel %vm12221_vm2, %v7474_v13, %v1742_v33 }
 0x135   :  { %1816 = vrot.lane.b32.xlu1 %v1739_v57, %s6281_s14  ;;  %1814 = vrot.lane.b32.xlu0 %v1735_v19, %s6281_s14  ;;  %v2113_v19 = vsel %vm12199_vm5, %v2111_v50, %v2112_v11 }
 0x136   :  { %v1744_v62 = vrot.slane %v7587_v53, 1 }
 0x137   :  { %v7524_v22 = vpop.permute.xlu1 %359  ;;  %v953_v25 = vpop.permute.xlu0 %952 }
 0x138   :  { %v1249_v4 = vsel %vm12200_vm13, %v1212_v39, %v953_v25  ;;  %v7612_v28 = vor.u32 %v1745_v1, %v1744_v62  ;;  %v7617_v39 = vld [vmem:[%s12183_s0 + $0xd4] sm:$0xff]   ;;  %v994_v14 = vsel %vm12211_vm6, %v6233_v23, %v7524_v22 }
 0x139   :  { %1892 = vrot.lane.b32.xlu1 %v1857_v63, %s6282_s17  ;;  %1890 = vrot.lane.b32.xlu0 %v1855_v7, %s6282_s17  ;;  %v2888_v63 = vlaneseq  ;;  %v1602_v7 = vrot.slane %v7479_v32, 1  ;;  %v7641_v20 = vshll.u32 %v7617_v39, 16  ;;  %v1862_v13 = vrot.slane %v7617_v39, 2 }
 0x13a   :  { %5883 = vmatprep.mubr.msk.bf16.mxu0 %vm12198_vm14, %v1249_v4  ;;  %v1860_v4 = vrot.slane %v7572_v60, 2  ;;  %v12207_v16 = vrot.slane %v7617_v39, 3  ;;  %v1606_v32 = vrot.slane %v7617_v39, 1 }
 0x13b   :  { %v7548_v37 = vpop.permute.xlu1 %361  ;;  %v955_v35 = vpop.permute.xlu0 %954  ;;  %v7604_v48 = vshrl.u32 %v2888_v63, 7  ;;  %v1603_v17 = vsel %vm12222_vm0, %v1600_v18, %v1602_v7  ;;  %v7627_v15 = vsel %vm12222_vm0, %v1602_v7, %v1604_v49  ;;  %v1998_v63 = vrot.slane %v7587_v53, 2 }
 0x13c   :  { %v1251_v51 = vsel %vm12200_vm13, %v1214_v42, %v955_v35  ;;  %v7654_v42 = vshrl.u32 %v7617_v39, 16 }
 0x13d   :  { %1945 = vrot.lane.b32.xlu1 %v7539_v61, %s6283_s18  ;;  %1943 = vrot.lane.b32.xlu0 %v1938_v45, %s6283_s18  ;;  %v7620_v25 = vadd.s32 16, %v7604_v48  ;;  %v7630_v43 = vadd.s32 24, %v7604_v48  ;;  %v7634_v56 = vadd.s32 8, %v7604_v48 }
 0x13e   :  { %5884 = vmatmul.mubr.msk.bf16.gmra.mrb[20].mxu0 %vm12198_vm14, %v1251_v51  ;;  %v7657_v35 = vmul.u32.u64.low 3817748708, %v7604_v48  ;;  %v7658_v51 = vmul.u32.u64.high 3817748708, %v7604_v48, %v7657_v35 }
 0x13f   :  { %v7564_v21 = vpop.permute.xlu1 %438  ;;  %v437_v57 = vpop.permute.xlu0 %436  ;;  %v7644_v46 = vmul.u32.u64.low 3817748708, %v7620_v25  ;;  %v7645_v45 = vmul.u32.u64.high 3817748708, %v7620_v25, %v7644_v46 }
 0x140   :  { %v2967_v46 = vshrl.u32 %v7658_v51, 4  ;;  %v1446_v51 = vor.u32 %v7499_v8, %v1442_v10 }
 0x141   :  { %2074 = vrot.lane.b32.xlu1 %v1997_v52, %s6284_s19  ;;  %2072 = vrot.lane.b32.xlu0 %v1993_v9, %s6284_s19  ;;  %v1031_v52 = vsel %vm12210_vm7, %v994_v14, %v437_v57  ;;  %v7664_v9 = vmul.u32.u64.low 3817748708, %v7630_v43  ;;  %v7665_v50 = vmul.u32.u64.high 3817748708, %v7630_v43, %v7664_v9 }
 0x143   :  { %v7578_v44 = vpop.permute.xlu1 %491  ;;  %v490_v40 = vpop.permute.xlu0 %489 }
 0x144   :  { %v1068_v22 = vsel %vm12209_vm8, %v1031_v52, %v490_v40  ;;  %v6234_v40 = vld [vmem:[%s12183_s0 + $0x68] sm:$0xff]  }
 0x145   :  { %1560 = vrot.lane.b32.xlu1 %v1435_v6, %s6280_s27  ;;  %2148 = vrot.lane.b32.xlu0 %v2113_v19, %s6285_s24  ;;  %v1861_v6 = vsel %vm12212_vm3, %v1858_v36, %v1860_v4  ;;  %v7672_v12 = vmul.u32.u64.low 3817748708, %v7634_v56  ;;  %v7673_v19 = vmul.u32.u64.high 3817748708, %v7634_v56, %v7672_v12  ;;  %v996_v36 = vsel %vm12211_vm6, %v6234_v40, %v7548_v37 }
 0x146   :  { %v1033_v31 = vsel %vm12210_vm7, %v996_v36, %v7564_v21  ;;  %v7704_v21 = vsel %vm12212_vm3, %v1860_v4, %v1862_v13  ;;  %v3000_v4 = vshrl.u32 %v7665_v50, 4 }
 0x147   :  { %v7594_v0 = vpop.permute.xlu1 %621  ;;  %v620_v2 = vpop.permute.xlu0 %619  ;;  %v1070_v1 = vsel %vm12209_vm8, %v1033_v31, %v7578_v44  ;;  %v7790_v31 = vadd.s32 48, %v7604_v48 }
 0x148   :  { %v1105_v57 = vsel %vm12204_vm9, %v1068_v22, %v620_v2  ;;  %v2003_v2 = vrot.slane %v7641_v20, 3  ;;  %v2116_v22 = vrot.slane %v7572_v60, 3  ;;  %v7834_v60 = vld [vmem:[%s12183_s0 + $0xe4] sm:$0xff]  }
 0x149   :  { %1562 = vrot.lane.b32.xlu1 %v1443_v5, %s6280_s27  ;;  %2150 = vrot.lane.b32.xlu0 %v2115_v3, %s6285_s24  ;;  %v1999_v5 = vrot.slane %v7584_v24, 3  ;;  %v2002_v3 = vrot.slane %v7654_v42, 2 }
 0x14a   :  { %v2119_v36 = vsel %vm12199_vm5, %v2116_v22, %v12207_v16 }
 0x14b   :  { %v699_v55 = vpop.permute.xlu1 %698  ;;  %v697_v26 = vpop.permute.xlu0 %696  ;;  %v2000_v44 = vor.u32 %v1999_v5, %v1998_v63  ;;  %v2117_v63 = vsel %vm12199_vm5, %v2114_v38, %v2116_v22 }
 0x14c   :  { %v1142_v7 = vsel %vm12203_vm10, %v1105_v57, %v697_v26  ;;  %v1107_v26 = vsel %vm12204_vm9, %v1070_v1, %v7594_v0  ;;  %v7711_v0 = vor.u32 %v2003_v2, %v2002_v3 }
 0x14d   :  { %1638 = vrot.lane.b32.xlu1 %v1603_v17, %s6279_s22  ;;  %1636 = vrot.lane.b32.xlu0 %v7472_v34, %s6279_s22  ;;  %v1747_v34 = vsel %vm12221_vm2, %v1742_v33, %v7612_v28  ;;  %v2001_v50 = vsel %vm12196_vm4, %v7545_v29, %v2000_v44 }
 0x14f   :  { %v752_v18 = vpop.permute.xlu1 %751  ;;  %v750_v47 = vpop.permute.xlu0 %749 }
 0x150   :  { %v1179_v54 = vsel %vm12202_vm11, %v1142_v7, %v750_v47  ;;  %v2989_v47 = vshrl.u32 %v7645_v45, 4 }
 0x151   :  { %1691 = vrot.lane.b32.xlu1 %v7627_v15, %s6278_s21  ;;  %1689 = vrot.lane.b32.xlu0 %v1603_v17, %s6278_s21 }
 0x152   :  { %v2990_v52 = vmul.u32 18, %v2989_v47  ;;  %v1748_v47 = vrot.slane %v7654_v42, 1 }
 0x153   :  { %v882_v27 = vpop.permute.xlu1 %881  ;;  %v880_v11 = vpop.permute.xlu0 %879 }
 0x154   :  { %v1216_v37 = vsel %vm12201_vm12, %v1179_v54, %v880_v11  ;;  %v3001_v11 = vmul.u32 18, %v3000_v4  ;;  %v7743_v10 = vsub.s32 %v7620_v25, %v2990_v52 }
 0x155   :  { %1820 = vrot.lane.b32.xlu1 %v1747_v34, %s6281_s14  ;;  %1818 = vrot.lane.b32.xlu0 %v1743_v59, %s6281_s14  ;;  %v1144_v34 = vsel %vm12203_vm10, %v1107_v26, %v699_v55  ;;  %v2978_v55 = vshrl.u32 %v7673_v19, 4  ;;  %v2968_v59 = vmul.u32 18, %v2967_v46  ;;  %v1458_v19 = vrot.slane %v7641_v20, 1 }
 0x156   :  { %v1181_v23 = vsel %vm12202_vm11, %v1144_v34, %v752_v18  ;;  %v2005_v18 = vsel %vm12196_vm4, %v2000_v44, %v7711_v0  ;;  %v7759_v25 = vsub.s32 %v7630_v43, %v3001_v11  ;;  %vm3755_vm15 = vcmp.ne.s32.totalorder %v7743_v10, 0 }
 0x157   :  { %v7692_v62 = vpop.permute.xlu1 %363  ;;  %v957_v17 = vpop.permute.xlu0 %956  ;;  %v1218_v45 = vsel %vm12201_vm12, %v1181_v23, %v882_v27  ;;  %v1450_v27 = vrot.slane %v7584_v24, 1  ;;  %v2979_v8 = vmul.u32 18, %v2978_v55  ;;  %v7750_v24 = vld [vmem:[%s12183_s0 + $0xdc] sm:$0xff]   ;;  %vm3827_vm4 = vcmp.lt.s32.totalorder %v7743_v10, 0 }
 0x158   :  { %v1253_v33 = vsel %vm12200_vm13, %v1216_v37, %v957_v17  ;;  %v3971_v38 = vadd.s32 18, %v7743_v10  ;;  %v7779_v43 = vshll.u32 %v7750_v24, 16  ;;  %v12206_v2 = vrot.slane %v7750_v24, 1  ;;  %vm7794_vm12 = vmand %vm3827_vm4, %vm3755_vm15 }
 0x159   :  { %1896 = vrot.lane.b32.xlu1 %v1861_v6, %s6282_s17  ;;  %1894 = vrot.lane.b32.xlu0 %v7539_v61, %s6282_s17  ;;  %v1454_v12 = vor.u32 %v7587_v53, %v1450_v27  ;;  %v1451_v29 = vsel %vm12197_vm1, %v1446_v51, %v1450_v27  ;;  %v2969_v53 = vsub.s32 %v7604_v48, %v2968_v59  ;;  %vm3756_vm5 = vcmp.ne.s32.totalorder %v7759_v25, 0 }
 0x15a   :  { %5887 = vmatprep.mubr.msk.bf16.mxu0 %vm12198_vm14, %v1253_v33  ;;  %v7770_v7 = vsub.s32 %v7634_v56, %v2979_v8  ;;  %v7782_v56 = vshrl.u32 %v7750_v24, 16  ;;  %v7801_v17 = vadd.s32 32, %v7604_v48  ;;  %v3972_v33 = vadd.s32 18, %v7759_v25 }
 0x15b   :  { %v7715_v14 = vpop.permute.xlu1 %365  ;;  %v959_v35 = vpop.permute.xlu0 %958  ;;  %v1459_v40 = vsel %vm12197_vm1, %v1454_v12, %v1458_v19  ;;  %vm3753_vm1 = vcmp.ne.s32.totalorder %v2969_v53, 0  ;;  %v3969_v37 = vadd.s32 18, %v2969_v53  ;;  %v1749_v34 = vrot.slane %v7641_v20, 2 }
 0x15c   :  { %v1255_v61 = vsel %vm12200_vm13, %v1218_v45, %v959_v35  ;;  %vm3828_vm13 = vcmp.lt.s32.totalorder %v7759_v25, 0  ;;  %vm3754_vm11 = vcmp.ne.s32.totalorder %v7770_v7, 0  ;;  %vm3826_vm10 = vcmp.lt.s32.totalorder %v7770_v7, 0 }
 0x15d   :  { %1949 = vrot.lane.b32.xlu1 %v7704_v21, %s6283_s18  ;;  %1947 = vrot.lane.b32.xlu0 %v1861_v6, %s6283_s18  ;;  %v7814_v44 = vadd.s32 56, %v7604_v48  ;;  %v1607_v46 = vsel %vm12222_vm0, %v1604_v49, %v1606_v32  ;;  %v3970_v4 = vadd.s32 18, %v7770_v7  ;;  %v1752_v45 = vrot.slane %v7782_v56, 1  ;;  %vm7850_vm4 = vmand %vm3826_vm10, %vm3754_vm11 }
 0x15e   :  { %5888 = vmatmul.mubr.msk.bf16.gmra.mrb[24].mxu0 %vm12198_vm14, %v1255_v61  ;;  %vm3825_vm14 = vcmp.lt.s32.totalorder %v2969_v53, 0  ;;  %v1753_v35 = vrot.slane %v7779_v43, 2  ;;  %v4043_v55 = vsel %vm7794_vm12, %v3971_v38, %v7743_v10  ;;  %v7844_v61 = vsel %vm12222_vm0, %v1606_v32, %v12206_v2 }
 0x15f   :  { %v7731_v9 = vpop.permute.xlu1 %442  ;;  %v7736_v6 = vpop.permute.xlu0 %440  ;;  %vm7806_vm9 = vmand %vm3825_vm14, %vm3753_vm1  ;;  %v7865_v11 = vadd.s32 40, %v7604_v48  ;;  %v1750_v8 = vor.u32 %v1749_v34, %v1748_v47  ;;  %v12631_v38 = vmov 0  ;;  %v2007_v26 = vrot.slane %v7779_v43, 3 }
 0x160   :  { %vm7824_vm1 = vmand %vm3828_vm13, %vm3756_vm5  ;;  %v4041_v59 = vsel %vm7806_vm9, %v3969_v37, %v2969_v53  ;;  %v4042_v53 = vsel %vm7850_vm4, %v3970_v4, %v7770_v7  ;;  %vm7886_vm5 = vcmp.lt.s32.totalorder %v4043_v55, 16  ;;  %v7898_v7 = vshrl.u32 %v7834_v60, 16 }
 0x161   :  { %2078 = vrot.lane.b32.xlu1 %v2005_v18, %s6284_s19  ;;  %2076 = vrot.lane.b32.xlu0 %v2001_v50, %s6284_s19  ;;  %v7855_v18 = vmul.u32.u64.low 3817748708, %v7790_v31  ;;  %v7856_v51 = vmul.u32.u64.high 3817748708, %v7790_v31, %v7855_v18  ;;  %v7861_v50 = vmul.u32.u64.low 3817748708, %v7801_v17  ;;  %v7862_v22 = vmul.u32.u64.high 3817748708, %v7801_v17, %v7861_v50 }
 0x162   :  { %v4044_v12 = vsel %vm7824_vm1, %v3972_v33, %v7759_v25  ;;  %v12628_v25 = vmov 0  ;;  %vm7890_vm9 = vcmp.lt.s32.totalorder %v4041_v59, 16  ;;  %v2006_v37 = vrot.slane %v7782_v56, 2 }
 0x163   :  { %v7753_v57 = vpop.permute.xlu1 %495  ;;  %v7761_v5 = vpop.permute.xlu0 %493  ;;  %v12629_v25 = vsel %vm7886_vm5, 4294967295, %v12628_v25  ;;  %v12632_v38 = vsel %vm7890_vm9, 4294967295, %v12631_v38  ;;  %v7903_v33 = vmul.u32.u64.low 3817748708, %v7865_v11  ;;  %v7904_v47 = vmul.u32.u64.high 3817748708, %v7865_v11, %v7903_v33 }
 0x164   :  { %12630 = vst [vmem:[#allocation5_spill] sm:$0xff] %v12629_v25  ;;  %12633 = vst [vmem:[#allocation6_spill] sm:$0xff] %v12632_v38  ;;  %vm12208_vm10 = vcmask 523264   ;;  %vm7910_vm11 = vcmp.lt.s32.totalorder %v4044_v12, 16  ;;  %v12634_v23 = vmov 0  ;;  %vm7914_vm12 = vcmp.lt.s32.totalorder %v4042_v53, 16 }
 0x165   :  { %1564 = vrot.lane.b32.xlu1 %v1451_v29, %s6280_s27  ;;  %2152 = vrot.lane.b32.xlu0 %v2117_v63, %s6285_s24  ;;  %v7872_v10 = vmul.u32.u64.low 3817748708, %v7814_v44  ;;  %v7873_v29 = vmul.u32.u64.high 3817748708, %v7814_v44, %v7872_v10  ;;  %v7880_v63 = vor.u32 %v1753_v35, %v1752_v45  ;;  %v12635_v23 = vsel %vm7910_vm11, 4294967295, %v12634_v23  ;;  %v6235_v35 = vld [vmem:[%s12183_s0 + $0x70] sm:$0xff]  }
 0x166   :  { %12636 = vst [vmem:[#allocation7_spill] sm:$0xff] %v12635_v23  ;;  %v12637_v4 = vmov 0  ;;  %v1751_v45 = vsel %vm12221_vm2, %v7612_v28, %v1750_v8  ;;  %v998_v55 = vsel %vm12211_vm6, %v6235_v35, %v7692_v62  ;;  %v2008_v33 = vor.u32 %v2007_v26, %v2006_v37 }
 0x167   :  { %v7784_v3 = vpop.permute.xlu1 %625  ;;  %v7792_v54 = vpop.permute.xlu0 %623  ;;  %v12638_v4 = vsel %vm7914_vm12, 4294967295, %v12637_v4  ;;  %v1755_v18 = vsel %vm12221_vm2, %v1750_v8, %v7880_v63  ;;  %v1035_v50 = vsel %vm12210_vm7, %v998_v55, %v7736_v6  ;;  %v2010_v8 = vrot.slane %v7898_v7, 2 }
 0x168   :  { %12639 = vst [vmem:[#allocation8_spill] sm:$0xff] %v12638_v4  ;;  %v3033_v6 = vshrl.u32 %v7856_v51, 4  ;;  %v3011_v35 = vshrl.u32 %v7862_v22, 4  ;;  %vm12641_vm13 = vcmask 97280   ;;  %v6236_v51 = vld [vmem:[%s12183_s0 + $0x78] sm:$0xff]   ;;  %vm12642_vm14 = vcmask 121856  }
 0x169   :  { %1566 = vrot.lane.b32.xlu1 %v1459_v40, %s6280_s27  ;;  %2154 = vrot.lane.b32.xlu0 %v2119_v36, %s6285_s24  ;;  %v1864_v40 = vrot.slane %v7750_v24, 2  ;;  %v12205_v36 = vrot.slane %v7834_v60, 2  ;;  %v1000_v22 = vsel %vm12211_vm6, %v6236_v51, %v7715_v14  ;;  %vm12643_vm15 = vcmask 146432   ;;  %vm12645_vm4 = vmmov %vm12641_vm13 }
 0x16a   :  { %vm12644_vm1 = vcmask 171008   ;;  %v3034_v51 = vmul.u32 18, %v3033_v6 }
 0x16b   :  { %v7836_v49 = vpop.permute.xlu1 %702  ;;  %v701_v27 = vpop.permute.xlu0 %700  ;;  %v1865_v59 = vsel %vm12212_vm3, %v1862_v13, %v1864_v40  ;;  %v7936_v28 = vsel %vm12212_vm3, %v1864_v40, %v12205_v36  ;;  %v1072_v13 = vsel %vm12209_vm8, %v1035_v50, %v7761_v5  ;;  %v3044_v5 = vshrl.u32 %v7873_v29, 4 }
 0x16c   :  { %v1109_v55 = vsel %vm12641_vm13, %v1072_v13, %v7792_v54  ;;  %vm12646_vm13 = vcmask 195584  }
 0x16d   :  { %1642 = vrot.lane.b32.xlu1 %v1607_v46, %s6279_s22  ;;  %1640 = vrot.lane.b32.xlu0 %v7627_v15, %s6279_s22  ;;  %v7895_v15 = vshll.u32 %v7834_v60, 16  ;;  %v1146_v54 = vsel %vm12642_vm14, %v1109_v55, %v701_v27  ;;  %v3045_v6 = vmul.u32 18, %v3044_v5 }
 0x16f   :  { %v7884_v32 = vpop.permute.xlu1 %755  ;;  %v754_v1 = vpop.permute.xlu0 %753  ;;  %v2011_v10 = vrot.slane %v7895_v15, 3 }
 0x170   :  { %v1183_v29 = vsel %vm12643_vm15, %v1146_v54, %v754_v1  ;;  %vm12647_vm15 = vcmask 220160  }
 0x171   :  { %v7906_v34 = vpop.f32.mrb[0].mxu0  ;;  %1695 = vrot.lane.b32.xlu1 %v7844_v61, %s6278_s21  ;;  %1693 = vrot.lane.b32.xlu0 %v1607_v46, %s6278_s21 }
 0x172   :  { %v7925_v52 = vpop.f32.mrb[1].mxu0  ;;  %v4187_v36 = vsel %vm7886_vm5, %v7906_v34, 0.0 }
 0x173   :  { %v4185_v62 = vsel %vm7890_vm9, %v7925_v52, 0.0  ;;  %v7943_v46 = vpop.f32.mrb[2].mxu0  ;;  %v886_v12 = vpop.permute.xlu1 %885  ;;  %v4261_v27 = vsel %vm12208_vm10, %v4187_v36, 0.0  ;;  %v7995_v36 = vor.u32 %v2011_v10, %v2010_v8 }
 0x174   :  { %12640 = vst [vmem:[#allocation9_spill] sm:$0xff] %v7943_v46  ;;  %v7949_v53 = vpop.f32.mrb[3].mxu0  ;;  %v884_v40 = vpop.permute.xlu0 %883  ;;  %v4258_v37 = vsel %vm12208_vm10, %v4185_v62, 0.0  ;;  %v4188_v50 = vsel %vm7910_vm11, %v7943_v46, 0.0  ;;  %v3022_v62 = vshrl.u32 %v7904_v47, 4  ;;  %v3012_v47 = vmul.u32 18, %v3011_v35 }
 0x175   :  { %v4186_v2 = vsel %vm7914_vm12, %v7949_v53, 0.0  ;;  %1824 = vrot.lane.b32.xlu1 %v1755_v18, %s6281_s14  ;;  %1822 = vrot.lane.b32.xlu0 %v1751_v45, %s6281_s14  ;;  %v1037_v18 = vsel %vm12210_vm7, %v1000_v22, %v7731_v9  ;;  %v8013_v35 = vsub.s32 %v7790_v31, %v3034_v51  ;;  %v8029_v31 = vld [vmem:[%s12183_s0 + $0xec] sm:$0xff]  }
 0x176   :  { %v4259_v26 = vsel %vm12208_vm10, %v4186_v2, 0.0  ;;  %v1074_v14 = vsel %vm12209_vm8, %v1037_v18, %v7753_v57  ;;  %v1220_v2 = vsel %vm12644_vm1, %v1183_v29, %v884_v40  ;;  %v4263_v57 = vsel %vm12208_vm10, %v4188_v50, 0.0 }
 0x177   :  { %v4260_v13 = vadd.f32 %v4259_v26, %v4258_v37  ;;  %v7978_v16 = vpop.permute.xlu1 %367  ;;  %v1111_v9 = vsel %vm12645_vm4, %v1074_v14, %v7784_v3  ;;  %vm12648_vm1 = vcmask 146432   ;;  %vm12649_vm4 = vcmask 171008  }
 0x178   :  { %v961_v45 = vpop.permute.xlu0 %960  ;;  %v1148_v22 = vsel %vm12642_vm14, %v1111_v9, %v7836_v49  ;;  %v1466_v26 = vrot.slane %v7779_v43, 1  ;;  %v3023_v8 = vmul.u32 18, %v3022_v62  ;;  %vm12650_vm14 = vmmov %vm12647_vm15  ;;  %v1756_v62 = vrot.slane %v7898_v7, 1 }
 0x179   :  { %v4262_v1 = vadd.f32 %v4261_v27, %v4260_v13  ;;  %v1257_v55 = vsel %vm12646_vm13, %v1220_v2, %v961_v45  ;;  %1900 = vrot.lane.b32.xlu1 %v1865_v59, %s6282_s17  ;;  %1898 = vrot.lane.b32.xlu0 %v7704_v21, %s6282_s17  ;;  %v1185_v3 = vsel %vm12648_vm1, %v1148_v22, %v7884_v32  ;;  %v2120_v32 = vrot.slane %v7750_v24, 3 }
 0x17a   :  { %5891 = vmatprep.mubr.msk.bf16.mxu0 %vm12647_vm15, %v1257_v55  ;;  %v1222_v49 = vsel %vm12649_vm4, %v1185_v3, %v886_v12  ;;  %v1462_v21 = vor.u32 %v7654_v42, %v1458_v19  ;;  %vm12651_vm15 = vsmask.f32 5376  ;;  %v8020_v42 = vsub.s32 %v7801_v17, %v3012_v47 }
 0x17b   :  { %v7999_v40 = vpop.permute.xlu1 %369  ;;  %v8001_v54 = vadd.f32 %v4263_v57, %v4262_v1  ;;  %v2013_v20 = vsel %vm12651_vm15, %v2008_v33, %v7995_v36  ;;  %vm12652_vm1 = vmmov %vm12651_vm15  ;;  %vm12653_vm4 = vsmask.f32 7424  ;;  %v3024_v18 = vsub.s32 %v7865_v11, %v3023_v8 }
 0x17c   :  { %v963_v37 = vpop.permute.xlu0 %962  ;;  %v2009_v43 = vsel %vm12652_vm1, %v7711_v0, %v2008_v33  ;;  %v1467_v5 = vsel %vm12653_vm4, %v1462_v21, %v1466_v26  ;;  %v12654_v17 = vrot.slane %v7617_v39, 3  ;;  %v1470_v0 = vor.u32 %v7782_v56, %v1466_v26 }
 0x17d   :  { %v1259_v10 = vsel %vm12646_vm13, %v1222_v49, %v963_v37  ;;  %1953 = vrot.lane.b32.xlu1 %v7936_v28, %s6283_s18  ;;  %1951 = vrot.lane.b32.xlu0 %v1865_v59, %s6283_s18  ;;  %v3046_v59 = vsub.s32 %v7814_v44, %v3045_v6  ;;  %vm12655_vm13 = vcmask 1044480   ;;  %vm3831_vm15 = vcmp.lt.s32.totalorder %v8013_v35, 0 }
 0x17e   :  { %5892 = vmatmul.mubr.msk.bf16.gmra.mrb[28].mxu0 %vm12650_vm14, %v1259_v10  ;;  %v2121_v29 = vsel %vm12655_vm13, %v12654_v17, %v2120_v32  ;;  %vm3759_vm14 = vcmp.ne.s32.totalorder %v8013_v35, 0  ;;  %v12215_v44 = vrot.slane %v7895_v15, 1  ;;  %v12214_v33 = vrot.slane %v7834_v60, 3 }
 0x17f   :  { %v8022_v19 = vpop.permute.xlu1 %446  ;;  %vm3757_vm1 = vcmp.ne.s32.totalorder %v8020_v42, 0  ;;  %vm3829_vm4 = vcmp.lt.s32.totalorder %v8020_v42, 0  ;;  %vm3760_vm10 = vcmp.ne.s32.totalorder %v3046_v59, 0  ;;  %vm3832_vm13 = vcmp.lt.s32.totalorder %v3046_v59, 0  ;;  %vm8059_vm8 = vmand %vm3831_vm15, %vm3759_vm14 }
 0x180   :  { %v8032_v12 = vpop.permute.xlu0 %444  ;;  %v8051_v39 = vshll.u32 %v8029_v31, 16  ;;  %v8054_v56 = vshrl.u32 %v8029_v31, 16  ;;  %v1610_v13 = vrot.slane %v7834_v60, 1  ;;  %vm3758_vm7 = vcmp.ne.s32.totalorder %v3024_v18, 0  ;;  %vm8065_vm3 = vmand %vm3829_vm4, %vm3757_vm1 }
 0x181   :  { %2082 = vrot.lane.b32.xlu1 %v2013_v20, %s6284_s19  ;;  %2080 = vrot.lane.b32.xlu0 %v2009_v43, %s6284_s19  ;;  %vm3830_vm6 = vcmp.lt.s32.totalorder %v3024_v18, 0  ;;  %v3975_v27 = vadd.s32 18, %v8013_v35  ;;  %v3973_v45 = vadd.s32 18, %v8020_v42  ;;  %v1757_v9 = vrot.slane %v7895_v15, 2  ;;  %vm8078_vm15 = vmand %vm3832_vm13, %vm3760_vm10 }
 0x182   :  { %vm12660_vm14 = vsmask.f32 7424  ;;  %v3976_v51 = vadd.s32 18, %v3046_v59  ;;  %v3974_v22 = vadd.s32 18, %v3024_v18  ;;  %vm12663_vm1 = vcmask 1044480   ;;  %vm8088_vm4 = vmand %vm3830_vm6, %vm3758_vm7 }
 0x183   :  { %v8048_v11 = vpop.permute.xlu1 %499  ;;  %v1475_v1 = vsel %vm12660_vm14, %v1470_v0, %v12215_v44  ;;  %v2123_v47 = vsel %vm12663_vm1, %v2120_v32, %v12214_v33  ;;  %v1760_v6 = vrot.slane %v8054_v56, 1  ;;  %v1761_v49 = vrot.slane %v8051_v39, 2 }
 0x184   :  { %v8056_v50 = vpop.permute.xlu0 %497  ;;  %v12213_v21 = vrot.slane %v8029_v31, 1  ;;  %v12666_v26 = vrot.slane %v7750_v24, 1  ;;  %v4047_v10 = vsel %vm8059_vm8, %v3975_v27, %v8013_v35  ;;  %v4045_v32 = vsel %vm8065_vm3, %v3973_v45, %v8020_v42  ;;  %v8119_v42 = vld [vmem:[%s12183_s0 + $0xf4] sm:$0xff]  }
 0x185   :  { %1568 = vrot.lane.b32.xlu1 %v1467_v5, %s6280_s27  ;;  %2156 = vrot.lane.b32.xlu0 %v2121_v29, %s6285_s24  ;;  %v1758_v20 = vor.u32 %v1757_v9, %v1756_v62  ;;  %v4048_v43 = vsel %vm8078_vm15, %v3976_v51, %v3046_v59  ;;  %v4046_v5 = vsel %vm8088_vm4, %v3974_v22, %v3024_v18  ;;  %v12216_v24 = vrot.slane %v8029_v31, 2 }
 0x186   :  { %v1611_v8 = vsel %vm12222_vm0, %v12666_v26, %v1610_v13  ;;  %v8112_v17 = vadd.s32 80, %v7604_v48  ;;  %v8114_v35 = vor.u32 %v1761_v49, %v1760_v6  ;;  %vm8121_vm3 = vcmp.lt.s32.totalorder %v4047_v10, 16 }
 0x187   :  { %v8082_v57 = vpop.permute.xlu1 %629  ;;  %v12667_v14 = vmov 0  ;;  %v8128_v59 = vsel %vm12222_vm0, %v1610_v13, %v12213_v21  ;;  %vm8130_vm6 = vcmp.lt.s32.totalorder %v4045_v32, 16  ;;  %v12670_v18 = vmov 0 }
 0x188   :  { %v628_v37 = vpop.permute.xlu0 %627  ;;  %v12668_v14 = vsel %vm8121_vm3, 4294967295, %v12667_v14  ;;  %v12671_v18 = vsel %vm8130_vm6, 4294967295, %v12670_v18  ;;  %v8135_v27 = vadd.s32 64, %v7604_v48  ;;  %vm8138_vm7 = vcmp.lt.s32.totalorder %v4048_v43, 16 }
 0x189   :  { %1570 = vrot.lane.b32.xlu1 %v1475_v1, %s6280_s27  ;;  %2158 = vrot.lane.b32.xlu0 %v2123_v47, %s6285_s24  ;;  %12669 = vst [vmem:[#allocation10_spill] sm:$0xff] %v12668_v14  ;;  %12672 = vst [vmem:[#allocation11_spill] sm:$0xff] %v12671_v18  ;;  %v12673_v2 = vmov 0  ;;  %vm8142_vm8 = vcmp.lt.s32.totalorder %v4046_v5, 16  ;;  %v12676_v45 = vmov 0  ;;  %v1759_v13 = vsel %vm12221_vm2, %v7880_v63, %v1758_v20 }
 0x18a   :  { %v12674_v2 = vsel %vm8138_vm7, 4294967295, %v12673_v2  ;;  %v12677_v45 = vsel %vm8142_vm8, 4294967295, %v12676_v45  ;;  %v8149_v62 = vadd.s32 88, %v7604_v48  ;;  %v12679_v9 = vrot.slane %v7834_v60, 2 }
 0x18b   :  { %v707_v29 = vpop.permute.xlu1 %706  ;;  %12675 = vst [vmem:[#allocation12_spill] sm:$0xff] %v12674_v2  ;;  %12678 = vst [vmem:[#allocation13_spill] sm:$0xff] %v12677_v45  ;;  %vm12680_vm10 = vcmask 1045504   ;;  %v8161_v55 = vmul.u32.u64.low 3817748708, %v8112_v17  ;;  %v8162_v51 = vmul.u32.u64.high 3817748708, %v8112_v17, %v8161_v55  ;;  %v8165_v22 = vadd.s32 72, %v7604_v48 }
 0x18c   :  { %v705_v0 = vpop.permute.xlu0 %704  ;;  %v8158_v1 = vsel %vm12680_vm10, %v12679_v9, %v12216_v24  ;;  %v1763_v47 = vsel %vm12221_vm2, %v1758_v20, %v8114_v35  ;;  %v8171_v3 = vshll.u32 %v8119_v42, 16  ;;  %v8174_v6 = vshrl.u32 %v8119_v42, 16  ;;  %v6237_v20 = vld [vmem:[%s12183_s0 + $0x80] sm:$0xff]   ;;  %v6238_v9 = vld [vmem:[%s12183_s0 + $0x88] sm:$0xff]  }
 0x18d   :  { %1646 = vrot.lane.b32.xlu1 %v1611_v8, %s6279_s22  ;;  %1644 = vrot.lane.b32.xlu0 %v7844_v61, %s6279_s22  ;;  %v2014_v26 = vrot.slane %v8054_v56, 2  ;;  %v2015_v10 = vrot.slane %v8051_v39, 3  ;;  %v8179_v32 = vmul.u32.u64.low 3817748708, %v8135_v27  ;;  %v8180_v43 = vmul.u32.u64.high 3817748708, %v8135_v27, %v8179_v32 }
 0x18e   :  { %vm12681_vm13 = vcmask 23552   ;;  %v8197_v32 = vmul.u32.u64.low 3817748708, %v8149_v62  ;;  %v8198_v33 = vmul.u32.u64.high 3817748708, %v8149_v62, %v8197_v32  ;;  %vm12684_vm15 = vcmask 48128  }
 0x18f   :  { %v760_v63 = vpop.permute.xlu1 %759  ;;  %v1002_v5 = vsel %vm12681_vm13, %v6237_v20, %v7978_v16  ;;  %vm12682_vm14 = vmmov %vm12681_vm13  ;;  %vm12687_vm4 = vcmask 72704   ;;  %vm12690_vm13 = vcmask 97280  }
 0x190   :  { %v758_v49 = vpop.permute.xlu0 %757  ;;  %v1004_v55 = vsel %vm12682_vm14, %v6238_v9, %v7999_v40  ;;  %vm12685_vm1 = vmmov %vm12684_vm15  ;;  %v8208_v40 = vmul.u32.u64.low 3817748708, %v8165_v22  ;;  %v8209_v9 = vmul.u32.u64.high 3817748708, %v8165_v22, %v8208_v40 }
 0x191   :  { %v8192_v21 = vpop.f32.mrb[4].mxu0  ;;  %1699 = vrot.lane.b32.xlu1 %v8128_v59, %s6278_s21  ;;  %v1041_v44 = vsel %vm12684_vm15, %v1004_v55, %v8022_v19  ;;  %v1039_v16 = vsel %vm12685_vm1, %v1002_v5, %v8032_v12  ;;  %1697 = vrot.lane.b32.xlu0 %v1611_v8, %s6278_s21  ;;  %vm12688_vm10 = vmmov %vm12687_vm4  ;;  %v2018_v5 = vrot.slane %v8174_v6, 2  ;;  %vm12692_vm15 = vcmask 523264  }
 0x192   :  { %12683 = vst [vmem:[#allocation14_spill] sm:$0xff] %v8192_v21  ;;  %v8204_v20 = vpop.f32.mrb[5].mxu0  ;;  %v1078_v24 = vsel %vm12687_vm4, %v1041_v44, %v8048_v11  ;;  %v1076_v32 = vsel %vm12688_vm10, %v1039_v16, %v8056_v50  ;;  %vm12691_vm14 = vmmov %vm12690_vm13  ;;  %v2019_v50 = vrot.slane %v8171_v3, 3  ;;  %vm12694_vm1 = vcmask 121856  }
 0x193   :  { %12686 = vst [vmem:[#allocation15_spill] sm:$0xff] %v8204_v20  ;;  %v4189_v19 = vsel %vm8130_vm6, %v8204_v20, 0.0  ;;  %v8218_v55 = vpop.f32.mrb[6].mxu0  ;;  %v890_v12 = vpop.permute.xlu1 %889  ;;  %v1115_v8 = vsel %vm12690_vm13, %v1078_v24, %v8082_v57  ;;  %v1113_v40 = vsel %vm12691_vm14, %v1076_v32, %v628_v37  ;;  %v4191_v18 = vsel %vm8121_vm3, %v8192_v21, 0.0  ;;  %vm12695_vm4 = vmmov %vm12694_vm1 }
 0x194   :  { %12689 = vst [vmem:[#allocation16_spill] sm:$0xff] %v8218_v55  ;;  %v4265_v61 = vsel %vm12692_vm15, %v4189_v19, 0.0  ;;  %v8225_v44 = vpop.f32.mrb[7].mxu0  ;;  %v888_v11 = vpop.permute.xlu0 %887  ;;  %v1152_v16 = vsel %vm12694_vm1, %v1115_v8, %v707_v29  ;;  %v1150_v37 = vsel %vm12695_vm4, %v1113_v40, %v705_v0  ;;  %vm12696_vm10 = vcmask 146432   ;;  %vm12697_vm13 = vmmov %vm12692_vm15 }
 0x195   :  { %12693 = vst [vmem:[#allocation17_spill] sm:$0xff] %v8225_v44  ;;  %v4266_v23 = vadd.f32 %v4265_v61, %v8001_v54  ;;  %v4190_v57 = vsel %vm8142_vm8, %v8225_v44, 0.0  ;;  %1828 = vrot.lane.b32.xlu1 %v1763_v47, %s6281_s14  ;;  %v1189_v24 = vsel %vm12696_vm10, %v1152_v16, %v760_v63  ;;  %1826 = vrot.lane.b32.xlu0 %v1759_v13, %s6281_s14  ;;  %v3077_v29 = vshrl.u32 %v8162_v51, 4  ;;  %vm12698_vm14 = vmmov %vm12696_vm10 }
 0x196   :  { %v4267_v32 = vsel %vm12697_vm13, %v4190_v57, 0.0  ;;  %v1187_v19 = vsel %vm12698_vm14, %v1150_v37, %v758_v49  ;;  %v4192_v54 = vsel %vm8138_vm7, %v8218_v55, 0.0  ;;  %vm12699_vm15 = vcmask 171008   ;;  %vm12700_vm1 = vmmov %vm12697_vm13 }
 0x197   :  { %v1226_v61 = vsel %vm12699_vm15, %v1189_v24, %v890_v12  ;;  %v4268_v8 = vadd.f32 %v4267_v32, %v4266_v23  ;;  %v967_v47 = vpop.permute.xlu1 %966  ;;  %v4269_v0 = vsel %vm12700_vm1, %v4191_v18, 0.0  ;;  %vm12701_vm4 = vmmov %vm12699_vm15  ;;  %vm12702_vm10 = vcmask 195584  }
 0x198   :  { %v1224_v63 = vsel %vm12701_vm4, %v1187_v19, %v888_v11  ;;  %v1263_v40 = vsel %vm12702_vm10, %v1226_v61, %v967_v47  ;;  %v965_v16 = vpop.permute.xlu0 %964  ;;  %v3055_v13 = vshrl.u32 %v8180_v43, 4  ;;  %vm12703_vm13 = vmmov %vm12702_vm10  ;;  %v12704_v57 = vrot.slane %v8119_v42, 2 }
 0x199   :  { %v4270_v51 = vadd.f32 %v4269_v0, %v4268_v8  ;;  %v1261_v49 = vsel %vm12703_vm13, %v1224_v63, %v965_v16  ;;  %1904 = vrot.lane.b32.xlu1 %v8158_v1, %s6282_s17  ;;  %v12705_v23 = vrot.slane %v8029_v31, 2  ;;  %vm12706_vm14 = vcmask 1045504   ;;  %vm12707_vm15 = vmmov %vm12700_vm1  ;;  %1902 = vrot.lane.b32.xlu0 %v7936_v28, %s6282_s17 }
 0x19a   :  { %v3088_v18 = vshrl.u32 %v8198_v33, 4  ;;  %v4271_v11 = vsel %vm12707_vm15, %v4192_v54, 0.0  ;;  %vm12708_vm1 = vcmask 220160   ;;  %v2016_v43 = vor.u32 %v2015_v10, %v2014_v26 }
 0x19b   :  { %v8259_v12 = vsel %vm12706_vm14, %v12705_v23, %v12704_v57  ;;  %5895 = vmatprep.mubr.msk.bf16.mxu0 %vm12708_vm1, %v1261_v49  ;;  %v8266_v37 = vor.u32 %v2019_v50, %v2018_v5  ;;  %v3078_v24 = vmul.u32 18, %v3077_v29  ;;  %vm12709_vm4 = vmmov %vm12708_vm1  ;;  %v8269_v32 = vpop.permute.xlu1 %1558  ;;  %v8271_v19 = vadd.f32 %v4271_v11, %v4270_v51 }
 0x19c   :  { %5896 = vmatmul.mubr.msk.bf16.gmra.mrb[32].mxu0 %vm12709_vm4, %v1263_v40  ;;  %v3066_v61 = vshrl.u32 %v8209_v9, 4  ;;  %v8274_v33 = vpop.permute.xlu0 %1556  ;;  %v3056_v54 = vmul.u32 18, %v3055_v13  ;;  %v3089_v28 = vmul.u32 18, %v3088_v18  ;;  %vm12710_vm10 = vsmask.f32 5376 }
 0x19d   :  { %1957 = vrot.lane.b32.xlu1 %v8259_v12, %s6283_s18  ;;  %1955 = vrot.lane.b32.xlu0 %v8158_v1, %s6283_s18  ;;  %v2021_v26 = vsel %vm12710_vm10, %v2016_v43, %v8266_v37  ;;  %v12711_v10 = vrot.slane %v7895_v15, 1  ;;  %v1482_v50 = vrot.slane %v8051_v39, 1  ;;  %v3079_v9 = vsub.s32 %v8112_v17, %v3078_v24  ;;  %vm12712_vm13 = vmmov %vm12710_vm10 }
 0x19e   :  { %v2017_v8 = vsel %vm12712_vm13, %v7995_v36, %v2016_v43  ;;  %v2124_v47 = vrot.slane %v8029_v31, 3  ;;  %v3067_v0 = vmul.u32 18, %v3066_v61  ;;  %v8295_v63 = vsub.s32 %v8135_v27, %v3056_v54  ;;  %v8309_v27 = vld [vmem:[%s12183_s0 + $0xfc] sm:$0xff]  }
 0x19f   :  { %v1478_v5 = vor.u32 %v7898_v7, %v12711_v10  ;;  %v8287_v29 = vpop.permute.xlu1 %1634  ;;  %v1486_v15 = vor.u32 %v8054_v56, %v1482_v50  ;;  %v12226_v7 = vrot.slane %v8171_v3, 1  ;;  %v12225_v39 = vrot.slane %v8119_v42, 3 }
 0x1a0   :  { %v8292_v1 = vpop.permute.xlu0 %1632  ;;  %v8302_v17 = vsub.s32 %v8149_v62, %v3089_v28  ;;  %vm12713_vm14 = vsmask.f32 7424  ;;  %vm3763_vm15 = vcmp.ne.s32.totalorder %v3079_v9, 0  ;;  %vm3835_vm1 = vcmp.lt.s32.totalorder %v3079_v9, 0 }
 0x1a1   :  { %2086 = vrot.lane.b32.xlu1 %v2021_v26, %s6284_s19  ;;  %2084 = vrot.lane.b32.xlu0 %v2017_v8, %s6284_s19  ;;  %v1483_v36 = vsel %vm12713_vm14, %v1478_v5, %v1482_v50  ;;  %v12714_v56 = vrot.slane %v7834_v60, 3  ;;  %vm12715_vm4 = vcmask 1044480   ;;  %v3068_v62 = vsub.s32 %v8165_v22, %v3067_v0  ;;  %v8364_v5 = vld [vmem:[%s12183_s0 + $0x104] sm:$0xff]  }
 0x1a2   :  { %v3979_v51 = vadd.s32 18, %v3079_v9  ;;  %vm3761_vm10 = vcmp.ne.s32.totalorder %v8295_v63, 0  ;;  %vm3833_vm13 = vcmp.lt.s32.totalorder %v8295_v63, 0  ;;  %v1491_v49 = vsel %vm12713_vm14, %v1486_v15, %v12226_v7  ;;  %vm12716_vm2 = vmmov %vm12715_vm4 }
 0x1a3   :  { %v8311_v40 = vpop.permute.xlu1 %1687  ;;  %v2125_v16 = vsel %vm12715_vm4, %v12714_v56, %v2124_v47  ;;  %v2127_v60 = vsel %vm12716_vm2, %v2124_v47, %v12225_v39  ;;  %vm8328_vm4 = vmand %vm3835_vm1, %vm3763_vm15  ;;  %vm3764_vm0 = vcmp.ne.s32.totalorder %v8302_v17, 0  ;;  %vm3836_vm7 = vcmp.lt.s32.totalorder %v8302_v17, 0 }
 0x1a4   :  { %v8317_v13 = vpop.permute.xlu0 %1685  ;;  %v1614_v22 = vrot.slane %v8119_v42, 1  ;;  %v12231_v23 = vrot.slane %v8309_v27, 1  ;;  %v8338_v18 = vshll.u32 %v8309_v27, 16  ;;  %v8341_v11 = vshrl.u32 %v8309_v27, 16  ;;  %vm8345_vm2 = vmand %vm3833_vm13, %vm3761_vm10 }
 0x1a5   :  { %1572 = vrot.lane.b32.xlu1 %v1483_v36, %s6280_s27  ;;  %2160 = vrot.lane.b32.xlu0 %v2125_v16, %s6285_s24  ;;  %v3977_v61 = vadd.s32 18, %v8295_v63  ;;  %v3980_v54 = vadd.s32 18, %v8302_v17  ;;  %vm3762_vm15 = vcmp.ne.s32.totalorder %v3068_v62, 0  ;;  %vm3834_vm1 = vcmp.lt.s32.totalorder %v3068_v62, 0  ;;  %vm8357_vm14 = vmand %vm3836_vm7, %vm3764_vm0 }
 0x1a6   :  { %v4051_v26 = vsel %vm8328_vm4, %v3979_v51, %v3079_v9  ;;  %v8367_v50 = vadd.s32 112, %v7604_v48  ;;  %v3978_v8 = vadd.s32 18, %v3068_v62  ;;  %v1764_v47 = vrot.slane %v8174_v6, 1  ;;  %vm8376_vm7 = vmand %vm3834_vm1, %vm3762_vm15 }
 0x1a7   :  { %v8343_v43 = vpop.permute.xlu1 %1816  ;;  %v1765_v9 = vrot.slane %v8171_v3, 2  ;;  %v12723_v0 = vrot.slane %v8029_v31, 1  ;;  %vm12724_vm0 = vcmask 1046528   ;;  %v1768_v56 = vrot.slane %v8341_v11, 1 }
 0x1a8   :  { %v8351_v28 = vpop.permute.xlu0 %1814  ;;  %v1769_v16 = vrot.slane %v8338_v18, 2  ;;  %v8383_v51 = vadd.s32 96, %v7604_v48  ;;  %vm8387_vm10 = vcmp.lt.s32.totalorder %v4051_v26, 16  ;;  %v12727_v57 = vmov 0  ;;  %vm12730_vm13 = vmmov %vm12724_vm0 }
 0x1a9   :  { %1574 = vrot.lane.b32.xlu1 %v1491_v49, %s6280_s27  ;;  %2162 = vrot.lane.b32.xlu0 %v2127_v60, %s6285_s24  ;;  %v1615_v15 = vsel %vm12724_vm0, %v12723_v0, %v1614_v22  ;;  %v12728_v57 = vsel %vm8387_vm10, 4294967295, %v12727_v57  ;;  %v8394_v31 = vsel %vm12730_vm13, %v1614_v22, %v12231_v23  ;;  %v4049_v60 = vsel %vm8345_vm2, %v3977_v61, %v8295_v63 }
 0x1aa   :  { %12729 = vst [vmem:[#allocation18_spill] sm:$0xff] %v12728_v57  ;;  %v4052_v0 = vsel %vm8357_vm14, %v3980_v54, %v8302_v17  ;;  %v8403_v7 = vshll.u32 %v8364_v5, 16  ;;  %v8406_v26 = vshrl.u32 %v8364_v5, 16  ;;  %v4050_v63 = vsel %vm8376_vm7, %v3978_v8, %v3068_v62 }
 0x1ab   :  { %v8385_v49 = vpop.permute.xlu1 %1892  ;;  %v8409_v2 = vmul.u32.u64.low 3817748708, %v8367_v50  ;;  %v8410_v14 = vmul.u32.u64.high 3817748708, %v8367_v50, %v8409_v2  ;;  %v1766_v22 = vor.u32 %v1765_v9, %v1764_v47  ;;  %v1872_v24 = vrot.slane %v8309_v27, 2 }
 0x1ac   :  { %v1891_v39 = vpop.permute.xlu0 %1890  ;;  %v8417_v17 = vadd.s32 120, %v7604_v48  ;;  %v8421_v61 = vor.u32 %v1769_v16, %v1768_v56  ;;  %v8424_v54 = vmul.u32.u64.low 3817748708, %v8383_v51  ;;  %v8425_v10 = vmul.u32.u64.high 3817748708, %v8383_v51, %v8424_v54 }
 0x1ad   :  { %1650 = vrot.lane.b32.xlu1 %v1615_v15, %s6279_s22  ;;  %1648 = vrot.lane.b32.xlu0 %v8128_v59, %s6279_s22  ;;  %v8428_v2 = vadd.s32 104, %v7604_v48  ;;  %vm8432_vm4 = vcmp.lt.s32.totalorder %v4049_v60, 16  ;;  %v12731_v62 = vmov 0  ;;  %v2022_v47 = vrot.slane %v8341_v11, 2 }
 0x1ae   :  { %v12732_v62 = vsel %vm8432_vm4, 4294967295, %v12731_v62  ;;  %v2023_v59 = vrot.slane %v8338_v18, 3  ;;  %vm8439_vm2 = vcmp.lt.s32.totalorder %v4052_v0, 16  ;;  %v12734_v56 = vmov 0 }
 0x1af   :  { %v8430_v36 = vpop.permute.xlu1 %1945  ;;  %12733 = vst [vmem:[#allocation19_spill] sm:$0xff] %v12732_v62  ;;  %v12735_v56 = vsel %vm8439_vm2, 4294967295, %v12734_v56  ;;  %vm8443_vm15 = vcmp.lt.s32.totalorder %v4050_v63, 16  ;;  %v12737_v16 = vmov 0  ;;  %v2026_v60 = vrot.slane %v8406_v26, 2 }
 0x1b0   :  { %v1944_v9 = vpop.permute.xlu0 %1943  ;;  %12736 = vst [vmem:[#allocation20_spill] sm:$0xff] %v12735_v56  ;;  %v12738_v16 = vsel %vm8443_vm15, 4294967295, %v12737_v16  ;;  %v2027_v54 = vrot.slane %v8403_v7, 3  ;;  %vm12740_vm1 = vsmask.f32 6400  ;;  %v12741_v0 = vrot.slane %v8119_v42, 2 }
 0x1b1   :  { %12739 = vst [vmem:[#allocation21_spill] sm:$0xff] %v12738_v16  ;;  %v8449_v23 = vpop.f32.mrb[8].mxu0  ;;  %1703 = vrot.lane.b32.xlu1 %v8394_v31, %s6278_s21  ;;  %v1767_v8 = vsel %vm12740_vm1, %v8114_v35, %v1766_v22  ;;  %vm12742_vm14 = vcmask 1045504   ;;  %v8461_v63 = vmul.u32.u64.low 3817748708, %v8417_v17  ;;  %v8462_v25 = vmul.u32.u64.high 3817748708, %v8417_v17, %v8461_v63  ;;  %1701 = vrot.lane.b32.xlu0 %v1615_v15, %s6278_s21  ;;  %vm12745_vm7 = vmmov %vm12740_vm1 }
 0x1b2   :  { %v8458_v45 = vsel %vm12742_vm14, %v12741_v0, %v1872_v24  ;;  %vm12743_vm0 = vcmask 23552   ;;  %v8467_v38 = vpop.f32.mrb[9].mxu0  ;;  %v1771_v35 = vsel %vm12745_vm7, %v1766_v22, %v8421_v61  ;;  %vm12746_vm13 = vcmask 48128   ;;  %vm12749_vm1 = vmmov %vm12742_vm14 }
 0x1b3   :  { %v2185_v4 = vsel %vm12743_vm0, %v7369_v30, %v8274_v33  ;;  %12744 = vst [vmem:[#allocation22_spill] sm:$0xff] %v8467_v38  ;;  %v8473_v55 = vmul.u32.u64.low 3817748708, %v8428_v2  ;;  %v8474_v21 = vmul.u32.u64.high 3817748708, %v8428_v2, %v8473_v55  ;;  %v4193_v63 = vsel %vm8432_vm4, %v8467_v38, 0.0  ;;  %v8481_v44 = vpop.f32.mrb[10].mxu0  ;;  %v2075_v30 = vpop.permute.xlu1 %2074 }
 0x1b4   :  { %v2221_v0 = vsel %vm12746_vm13, %v2185_v4, %v8292_v1  ;;  %12747 = vst [vmem:[#allocation23_spill] sm:$0xff] %v8481_v44  ;;  %v12748_v33 = vrot.slane %v8364_v5, 2  ;;  %v2024_v22 = vor.u32 %v2023_v59, %v2022_v47  ;;  %vm12750_vm14 = vcmask 72704   ;;  %v8491_v46 = vpop.f32.mrb[11].mxu0  ;;  %v2073_v4 = vpop.permute.xlu0 %2072 }
 0x1b5   :  { %v2257_v20 = vsel %vm12750_vm14, %v2221_v0, %v8317_v13  ;;  %vm12751_vm0 = vcmask 523264   ;;  %v8493_v1 = vor.u32 %v2027_v54, %v2026_v60  ;;  %v3121_v62 = vshrl.u32 %v8410_v14, 4  ;;  %1832 = vrot.lane.b32.xlu1 %v1771_v35, %s6281_s14  ;;  %1830 = vrot.lane.b32.xlu0 %v1767_v8, %s6281_s14 }
 0x1b6   :  { %v8486_v15 = vsel %vm12749_vm1, %v1872_v24, %v12748_v33  ;;  %v4273_v55 = vsel %vm12751_vm0, %v4193_v63, 0.0  ;;  %vm12752_vm7 = vcmask 97280   ;;  %v4195_v24 = vsel %vm8387_vm10, %v8449_v23, 0.0  ;;  %vm12755_vm14 = vmmov %vm12751_vm0 }
 0x1b7   :  { %v2293_v38 = vsel %vm12752_vm7, %v2257_v20, %v8351_v28  ;;  %v4274_v47 = vadd.f32 %v4273_v55, %v8271_v19  ;;  %v4194_v13 = vsel %vm8443_vm15, %v8491_v46, 0.0  ;;  %vm12753_vm13 = vcmask 23552   ;;  %v8519_v0 = vpop.permute.xlu1 %1560 }
 0x1b8   :  { %v2187_v59 = vsel %vm12753_vm13, %v7353_v41, %v8269_v32  ;;  %vm12754_vm1 = vcmask 121856   ;;  %v4275_v20 = vsel %vm12755_vm14, %v4194_v13, 0.0  ;;  %v3099_v28 = vshrl.u32 %v8425_v10, 4 }
 0x1b9   :  { %v2329_v14 = vsel %vm12754_vm1, %v2293_v38, %v1891_v39  ;;  %vm12756_vm0 = vcmask 48128   ;;  %vm12757_vm7 = vcmask 146432   ;;  %v4196_v54 = vsel %vm8439_vm2, %v8481_v44, 0.0  ;;  %vm12759_vm1 = vmmov %vm12755_vm14  ;;  %v2149_v39 = vpop.permute.xlu0 %2148  ;;  %1908 = vrot.lane.b32.xlu1 %v8458_v45, %s6282_s17  ;;  %1906 = vrot.lane.b32.xlu0 %v8259_v12, %s6282_s17 }
 0x1ba   :  { %v2223_v19 = vsel %vm12756_vm0, %v2187_v59, %v8287_v29  ;;  %v2365_v60 = vsel %vm12757_vm7, %v2329_v14, %v1944_v9  ;;  %v4276_v35 = vadd.f32 %v4275_v20, %v4274_v47  ;;  %vm12758_vm13 = vcmask 72704  }
 0x1bb   :  { %v2259_v41 = vsel %vm12758_vm13, %v2223_v19, %v8311_v40  ;;  %v4277_v38 = vsel %vm12759_vm1, %v4195_v24, 0.0  ;;  %vm12760_vm14 = vcmask 171008   ;;  %v3122_v10 = vmul.u32 18, %v3121_v62  ;;  %vm12764_vm13 = vmmov %vm12759_vm1 }
 0x1bc   :  { %v2401_v32 = vsel %vm12760_vm14, %v2365_v60, %v2073_v4  ;;  %vm12761_vm0 = vcmask 97280   ;;  %v4278_v8 = vadd.f32 %v4277_v38, %v4276_v35  ;;  %vm12762_vm7 = vcmask 195584   ;;  %v8540_v4 = vpop.permute.xlu1 %1562 }
 0x1bd   :  { %v2295_v29 = vsel %vm12761_vm0, %v2259_v41, %v8343_v43  ;;  %v2437_v9 = vsel %vm12762_vm7, %v2401_v32, %v2149_v39  ;;  %v3132_v63 = vshrl.u32 %v8462_v25, 4  ;;  %vm12763_vm2 = vcmask 121856   ;;  %1961 = vrot.lane.b32.xlu1 %v8486_v15, %s6283_s18  ;;  %1959 = vrot.lane.b32.xlu0 %v8458_v45, %s6283_s18 }
 0x1be   :  { %v2331_v40 = vsel %vm12763_vm2, %v2295_v29, %v8385_v49  ;;  %v4279_v33 = vsel %vm12764_vm13, %v4196_v54, 0.0  ;;  %vm12765_vm1 = vcmask 220160   ;;  %v3100_v62 = vmul.u32 18, %v3099_v28  ;;  %v2151_v49 = vpop.permute.xlu0 %2150  ;;  %vm12769_vm2 = vmmov %vm12762_vm7 }
 0x1bf   :  { %5899 = vmatprep.mubr.msk.bf16.mxu0 %vm12765_vm1, %v2437_v9  ;;  %v3110_v43 = vshrl.u32 %v8474_v21, 4  ;;  %vm12766_vm14 = vcmask 146432   ;;  %v8542_v24 = vadd.f32 %v4279_v33, %v4278_v8  ;;  %vm12767_vm0 = vcmask 171008   ;;  %vm12770_vm7 = vmmov %vm12765_vm1 }
 0x1c0   :  { %v2367_v55 = vsel %vm12766_vm14, %v2331_v40, %v8430_v36  ;;  %v12768_v47 = vrot.slane %v8171_v3, 1  ;;  %v1498_v12 = vrot.slane %v8338_v18, 1  ;;  %v3123_v21 = vsub.s32 %v8367_v50, %v3122_v10  ;;  %v8559_v18 = vpop.permute.xlu1 %1638 }
 0x1c1   :  { %v2403_v25 = vsel %vm12767_vm0, %v2367_v55, %v2075_v30  ;;  %v3133_v36 = vmul.u32 18, %v3132_v63  ;;  %vm12771_vm13 = vsmask.f32 5376  ;;  %v3111_v30 = vmul.u32 18, %v3110_v43 }
 0x1c2   :  { %v1494_v13 = vor.u32 %v8174_v6, %v12768_v47  ;;  %v2439_v59 = vsel %vm12769_vm2, %v2403_v25, %v2151_v49  ;;  %v2029_v3 = vsel %vm12771_vm13, %v2024_v22, %v8493_v1  ;;  %v3101_v6 = vsub.s32 %v8383_v51, %v3100_v62  ;;  %vm12772_vm1 = vmmov %vm12771_vm13  ;;  %v8564_v50 = vpop.permute.xlu0 %1636  ;;  %v8572_v51 = vld [vmem:[%s12183_s0 + $0x10c] sm:$0xff]  }
 0x1c3   :  { %5900 = vmatmul.mubr.msk.bf16.gmra.mrb[36].mxu0 %vm12770_vm7, %v2439_v59  ;;  %v2025_v14 = vsel %vm12772_vm1, %v8266_v37, %v2024_v22  ;;  %v2128_v20 = vrot.slane %v8309_v27, 3  ;;  %vm12773_vm14 = vsmask.f32 7424  ;;  %2090 = vrot.lane.b32.xlu1 %v2029_v3, %s6284_s19  ;;  %v1502_v45 = vor.u32 %v8341_v11, %v1498_v12  ;;  %v8639_v3 = vld [vmem:[%s12183_s0 + $0x114] sm:$0xff]  }
 0x1c4   :  { %v1499_v28 = vsel %vm12773_vm14, %v1494_v13, %v1498_v12  ;;  %vm3767_vm0 = vcmp.ne.s32.totalorder %v3123_v21, 0  ;;  %vm3839_vm2 = vcmp.lt.s32.totalorder %v3123_v21, 0  ;;  %v3134_v19 = vsub.s32 %v8417_v17, %v3133_v36  ;;  %2088 = vrot.lane.b32.xlu0 %v2025_v14, %s6284_s19  ;;  %v8578_v60 = vpop.permute.xlu1 %1691 }
 0x1c5   :  { %v12264_v37 = vrot.slane %v8403_v7, 1  ;;  %vm3765_vm7 = vcmp.ne.s32.totalorder %v3101_v6, 0  ;;  %vm3837_vm13 = vcmp.lt.s32.totalorder %v3101_v6, 0  ;;  %v3112_v22 = vsub.s32 %v8428_v2, %v3111_v30  ;;  %vm8586_vm14 = vmand %vm3839_vm2, %vm3767_vm0 }
 0x1c6   :  { %v12774_v11 = vrot.slane %v8119_v42, 3  ;;  %vm12775_vm1 = vcmask 1044480   ;;  %v12263_v35 = vrot.slane %v8364_v5, 3  ;;  %v8584_v41 = vpop.permute.xlu0 %1689  ;;  %v3983_v38 = vadd.s32 18, %v3123_v21  ;;  %vm8591_vm10 = vmand %vm3837_vm13, %vm3765_vm7 }
 0x1c7   :  { %v3981_v32 = vadd.s32 18, %v3101_v6  ;;  %1576 = vrot.lane.b32.xlu1 %v1499_v28, %s6280_s27  ;;  %vm3768_vm15 = vcmp.ne.s32.totalorder %v3134_v19, 0  ;;  %vm3840_vm4 = vcmp.lt.s32.totalorder %v3134_v19, 0  ;;  %v8596_v42 = vshll.u32 %v8572_v51, 16  ;;  %vm12781_vm13 = vmmov %vm12775_vm1 }
 0x1c8   :  { %v2129_v54 = vsel %vm12775_vm1, %v12774_v11, %v2128_v20  ;;  %v8599_v39 = vshrl.u32 %v8572_v51, 16  ;;  %vm12780_vm0 = vsmask.f32 7424  ;;  %v1618_v29 = vrot.slane %v8364_v5, 1  ;;  %v8606_v8 = vpop.permute.xlu1 %1820  ;;  %vm8619_vm1 = vmand %vm3840_vm4, %vm3768_vm15 }
 0x1c9   :  { %2164 = vrot.lane.b32.xlu0 %v2129_v54, %s6285_s24  ;;  %v1507_v10 = vsel %vm12780_vm0, %v1502_v45, %v12264_v37  ;;  %vm3766_vm2 = vcmp.ne.s32.totalorder %v3112_v22, 0  ;;  %vm3838_vm7 = vcmp.lt.s32.totalorder %v3112_v22, 0  ;;  %v2131_v9 = vsel %vm12781_vm13, %v2128_v20, %v12263_v35 }
 0x1ca   :  { %v12262_v63 = vrot.slane %v8572_v51, 1  ;;  %v8612_v40 = vpop.permute.xlu0 %1818  ;;  %v4055_v33 = vsel %vm8586_vm14, %v3983_v38, %v3123_v21  ;;  %v4053_v62 = vsel %vm8591_vm10, %v3981_v32, %v3101_v6  ;;  %v3984_v55 = vadd.s32 18, %v3134_v19  ;;  %vm8624_vm0 = vmand %vm3838_vm7, %vm3766_vm2 }
 0x1cb   :  { %v3982_v25 = vadd.s32 18, %v3112_v22  ;;  %1578 = vrot.lane.b32.xlu1 %v1507_v10, %s6280_s27  ;;  %v1772_v47 = vrot.slane %v8406_v26, 1  ;;  %v1773_v13 = vrot.slane %v8403_v7, 2  ;;  %v1776_v12 = vrot.slane %v8599_v39, 1 }
 0x1cc   :  { %v1777_v59 = vrot.slane %v8596_v42, 2  ;;  %v12786_v21 = vrot.slane %v8309_v27, 1  ;;  %vm12787_vm10 = vcmask 1046528   ;;  %v8642_v6 = vadd.s32 144, %v7604_v48  ;;  %v8644_v30 = vpop.permute.xlu1 %1896 }
 0x1cd   :  { %2166 = vrot.lane.b32.xlu0 %v2131_v9, %s6285_s24  ;;  %vm8646_vm4 = vcmp.lt.s32.totalorder %v4055_v33, 16  ;;  %v12788_v14 = vmov 0  ;;  %vm12791_vm15 = vmmov %vm12787_vm10  ;;  %vm8655_vm14 = vcmp.lt.s32.totalorder %v4053_v62, 16  ;;  %v12792_v28 = vmov 0 }
 0x1ce   :  { %v1619_v36 = vsel %vm12787_vm10, %v12786_v21, %v1618_v29  ;;  %v12789_v14 = vsel %vm8646_vm4, 4294967295, %v12788_v14  ;;  %v8653_v27 = vsel %vm12791_vm15, %v1618_v29, %v12262_v63  ;;  %v1895_v20 = vpop.permute.xlu0 %1894  ;;  %v12793_v28 = vsel %vm8655_vm14, 4294967295, %v12792_v28 }
 0x1cf   :  { %12790 = vst [vmem:[#allocation24_spill] sm:$0xff] %v12789_v14  ;;  %12794 = vst [vmem:[#allocation25_spill] sm:$0xff] %v12793_v28  ;;  %v4056_v45 = vsel %vm8619_vm1, %v3984_v55, %v3134_v19  ;;  %v4054_v11 = vsel %vm8624_vm0, %v3982_v25, %v3112_v22  ;;  %v8664_v54 = vadd.s32 128, %v7604_v48  ;;  %1654 = vrot.lane.b32.xlu1 %v1619_v36, %s6279_s22  ;;  %v1876_v32 = vrot.slane %v8572_v51, 2 }
 0x1d0   :  { %v1774_v17 = vor.u32 %v1773_v13, %v1772_v47  ;;  %v8667_v38 = vor.u32 %v1777_v59, %v1776_v12  ;;  %v8671_v2 = vadd.s32 152, %v7604_v48  ;;  %v12265_v19 = vrot.slane %v8639_v3, 2  ;;  %v8683_v9 = vpop.permute.xlu1 %1949 }
 0x1d1   :  { %1652 = vrot.lane.b32.xlu0 %v8394_v31, %s6279_s22  ;;  %v8677_v22 = vshrl.u32 %v8639_v3, 16  ;;  %v8680_v10 = vmul.u32.u64.low 3817748708, %v8642_v6  ;;  %v8681_v29 = vmul.u32.u64.high 3817748708, %v8642_v6, %v8680_v10  ;;  %vm8685_vm2 = vcmp.lt.s32.totalorder %v4056_v45, 16  ;;  %v8705_v12 = vpop.f32.mrb[12].mxu0 }
 0x1d2   :  { %v12795_v33 = vmov 0  ;;  %vm8689_vm7 = vcmp.lt.s32.totalorder %v4054_v11, 16  ;;  %v12798_v62 = vmov 0  ;;  %v8694_v31 = vshll.u32 %v8639_v3, 16  ;;  %v1948_v55 = vpop.permute.xlu0 %1947  ;;  %12801 = vst [vmem:[#allocation28_spill] sm:$0xff] %v8705_v12  ;;  %v8723_v63 = vpop.f32.mrb[13].mxu0 }
 0x1d3   :  { %v12796_v33 = vsel %vm8685_vm2, 4294967295, %v12795_v33  ;;  %v12799_v62 = vsel %vm8689_vm7, 4294967295, %v12798_v62  ;;  %v8697_v43 = vadd.s32 136, %v7604_v48  ;;  %v2030_v25 = vrot.slane %v8599_v39, 2  ;;  %1707 = vrot.lane.b32.xlu1 %v8653_v27, %s6278_s21  ;;  %12806 = vst [vmem:[#allocation29_spill] sm:$0xff] %v8723_v63 }
 0x1d4   :  { %12797 = vst [vmem:[#allocation26_spill] sm:$0xff] %v12796_v33  ;;  %12800 = vst [vmem:[#allocation27_spill] sm:$0xff] %v12799_v62  ;;  %v2031_v49 = vrot.slane %v8596_v42, 3  ;;  %v8702_v47 = vmul.u32.u64.low 3817748708, %v8664_v54  ;;  %v8703_v13 = vmul.u32.u64.high 3817748708, %v8664_v54, %v8702_v47  ;;  %v12803_v21 = vrot.slane %v8364_v5, 2 }
 0x1d5   :  { %vm12802_vm13 = vsmask.f32 6400  ;;  %vm12804_vm1 = vcmask 1045504   ;;  %v8717_v11 = vmul.u32.u64.low 3817748708, %v8671_v2  ;;  %v8718_v10 = vmul.u32.u64.high 3817748708, %v8671_v2, %v8717_v11  ;;  %1705 = vrot.lane.b32.xlu0 %v1619_v36, %s6278_s21  ;;  %v2079_v36 = vpop.permute.xlu1 %2078 }
 0x1d6   :  { %v1775_v59 = vsel %vm12802_vm13, %v8421_v61, %v1774_v17  ;;  %v8714_v45 = vsel %vm12804_vm1, %v12803_v21, %v1876_v32  ;;  %vm12805_vm0 = vcmask 23552   ;;  %vm12807_vm10 = vmmov %vm12802_vm13  ;;  %v2034_v35 = vrot.slane %v8677_v22, 2  ;;  %v2077_v57 = vpop.permute.xlu0 %2076 }
 0x1d7   :  { %v2189_v47 = vsel %vm12805_vm0, %v7384_v58, %v8519_v0  ;;  %v1779_v61 = vsel %vm12807_vm10, %v1774_v17, %v8667_v38  ;;  %vm12808_vm15 = vmmov %vm12804_vm1  ;;  %vm12809_vm13 = vcmask 48128   ;;  %v4197_v58 = vsel %vm8655_vm14, %v8723_v63, 0.0  ;;  %v8739_v0 = vpop.f32.mrb[14].mxu0 }
 0x1d8   :  { %v8731_v21 = vsel %vm12808_vm15, %v1876_v32, %v12265_v19  ;;  %v2225_v11 = vsel %vm12809_vm13, %v2189_v47, %v8564_v50  ;;  %12810 = vst [vmem:[#allocation30_spill] sm:$0xff] %v8739_v0  ;;  %v8742_v37 = vmul.u32.u64.low 3817748708, %v8697_v43  ;;  %v8743_v17 = vmul.u32.u64.high 3817748708, %v8697_v43, %v8742_v37  ;;  %v8748_v56 = vpop.f32.mrb[15].mxu0  ;;  %1836 = vrot.lane.b32.xlu1 %v1779_v61, %s6281_s14 }
 0x1d9   :  { %vm12811_vm1 = vcmask 72704   ;;  %vm12812_vm0 = vcmask 523264   ;;  %12813 = vst [vmem:[#allocation31_spill] sm:$0xff] %v8748_v56  ;;  %v2032_v50 = vor.u32 %v2031_v49, %v2030_v25  ;;  %v2035_v47 = vrot.slane %v8694_v31, 3  ;;  %v6239_v25 = vld [vmem:[%s12183_s0 + $0xbc] sm:$0xff]   ;;  %1834 = vrot.lane.b32.xlu0 %v1775_v59, %s6281_s14  ;;  %v8776_v14 = vpop.permute.xlu1 %1564 }
 0x1da   :  { %v2261_v32 = vsel %vm12811_vm1, %v2225_v11, %v8584_v41  ;;  %v4281_v19 = vsel %vm12812_vm0, %v4197_v58, 0.0  ;;  %vm12814_vm10 = vcmask 97280   ;;  %v4199_v16 = vsel %vm8646_vm4, %v8705_v12, 0.0  ;;  %vm12817_vm1 = vmmov %vm12812_vm0 }
 0x1db   :  { %v2297_v28 = vsel %vm12814_vm10, %v2261_v32, %v8612_v40  ;;  %v4282_v37 = vadd.f32 %v4281_v19, %v8542_v24  ;;  %v4198_v41 = vsel %vm8689_vm7, %v8748_v56, 0.0  ;;  %vm12815_vm15 = vcmask 23552  }
 0x1dc   :  { %v2191_v49 = vsel %vm12815_vm15, %v6239_v25, %v8540_v4  ;;  %vm12816_vm13 = vcmask 121856   ;;  %v4283_v11 = vsel %vm12817_vm1, %v4198_v41, 0.0  ;;  %v3165_v24 = vshrl.u32 %v8681_v29, 4  ;;  %v2153_v29 = vpop.permute.xlu0 %2152  ;;  %1912 = vrot.lane.b32.xlu1 %v8714_v45, %s6282_s17 }
 0x1dd   :  { %v2333_v40 = vsel %vm12816_vm13, %v2297_v28, %v1895_v20  ;;  %vm12818_vm0 = vcmask 48128   ;;  %vm12819_vm10 = vcmask 146432   ;;  %v4200_v58 = vsel %vm8685_vm2, %v8739_v0, 0.0  ;;  %vm12821_vm13 = vmmov %vm12817_vm1  ;;  %1910 = vrot.lane.b32.xlu0 %v8486_v15, %s6282_s17  ;;  %v8799_v25 = vpop.permute.xlu1 %1566 }
 0x1de   :  { %v2227_v19 = vsel %vm12818_vm0, %v2191_v49, %v8559_v18  ;;  %v2369_v61 = vsel %vm12819_vm10, %v2333_v40, %v1948_v55  ;;  %v4284_v32 = vadd.f32 %v4283_v11, %v4282_v37  ;;  %vm12820_vm15 = vcmask 72704  }
 0x1df   :  { %v2263_v4 = vsel %vm12820_vm15, %v2227_v19, %v8578_v60  ;;  %v4285_v20 = vsel %vm12821_vm13, %v4199_v16, 0.0  ;;  %vm12822_vm1 = vcmask 171008   ;;  %v3143_v59 = vshrl.u32 %v8703_v13, 4 }
 0x1e0   :  { %v2405_v28 = vsel %vm12822_vm1, %v2369_v61, %v2077_v57  ;;  %vm12823_vm0 = vcmask 97280   ;;  %v4286_v55 = vadd.f32 %v4285_v20, %v4284_v32  ;;  %vm12824_vm10 = vcmask 195584   ;;  %v2155_v40 = vpop.permute.xlu0 %2154  ;;  %1965 = vrot.lane.b32.xlu1 %v8731_v21, %s6283_s18 }
 0x1e1   :  { %v2299_v18 = vsel %vm12823_vm0, %v2263_v4, %v8606_v8  ;;  %v2441_v41 = vsel %vm12824_vm10, %v2405_v28, %v2153_v29  ;;  %v3176_v37 = vshrl.u32 %v8718_v10, 4  ;;  %vm12825_vm15 = vcmask 121856   ;;  %1963 = vrot.lane.b32.xlu0 %v8714_v45, %s6283_s18  ;;  %v8818_v19 = vpop.permute.xlu1 %1642 }
 0x1e2   :  { %v2335_v60 = vsel %vm12825_vm15, %v2299_v18, %v8644_v30  ;;  %v4287_v16 = vsel %vm12821_vm13, %v4200_v58, 0.0  ;;  %vm12826_vm1 = vcmask 220160   ;;  %v8795_v57 = vor.u32 %v2035_v47, %v2034_v35 }
 0x1e3   :  { %5903 = vmatprep.mubr.msk.bf16.mxu0 %vm12826_vm1, %v2441_v41  ;;  %v3166_v8 = vmul.u32 18, %v3165_v24  ;;  %vm12827_vm0 = vcmask 146432   ;;  %v8801_v49 = vadd.f32 %v4287_v16, %v4286_v55  ;;  %v3154_v10 = vshrl.u32 %v8743_v17, 4  ;;  %vm12830_vm13 = vmmov %vm12826_vm1 }
 0x1e4   :  { %v2371_v13 = vsel %vm12827_vm0, %v2335_v60, %v8683_v9  ;;  %vm12828_vm10 = vcmask 171008   ;;  %v3144_v11 = vmul.u32 18, %v3143_v59  ;;  %vm12829_vm15 = vcmask 195584   ;;  %v8823_v32 = vpop.permute.xlu0 %1640 }
 0x1e5   :  { %v2407_v30 = vsel %vm12828_vm10, %v2371_v13, %v2079_v36  ;;  %v3177_v35 = vmul.u32 18, %v3176_v37  ;;  %vm12831_vm1 = vsmask.f32 5376  ;;  %v12832_v17 = vrot.slane %v8403_v7, 1 }
 0x1e6   :  { %v2443_v15 = vsel %vm12829_vm15, %v2407_v30, %v2155_v40  ;;  %v2037_v9 = vsel %vm12831_vm1, %v2032_v50, %v8795_v57  ;;  %v1514_v47 = vrot.slane %v8596_v42, 1  ;;  %v3167_v24 = vsub.s32 %v8642_v6, %v3166_v8  ;;  %vm12833_vm0 = vmmov %vm12831_vm1 }
 0x1e7   :  { %5904 = vmatmul.mubr.msk.bf16.gmra.mrb[40].mxu0 %vm12830_vm13, %v2443_v15  ;;  %v1510_v36 = vor.u32 %v8406_v26, %v12832_v17  ;;  %v2033_v61 = vsel %vm12833_vm0, %v8493_v1, %v2032_v50  ;;  %v2132_v45 = vrot.slane %v8572_v51, 3  ;;  %v3155_v58 = vmul.u32 18, %v3154_v10  ;;  %2094 = vrot.lane.b32.xlu1 %v2037_v9, %s6284_s19  ;;  %v8842_v50 = vpop.permute.xlu1 %1695 }
 0x1e8   :  { %v8826_v4 = vsub.s32 %v8664_v54, %v3144_v11  ;;  %v1518_v7 = vor.u32 %v8599_v39, %v1514_v47  ;;  %v12286_v26 = vrot.slane %v8694_v31, 1  ;;  %v12285_v42 = vrot.slane %v8639_v3, 3  ;;  %2092 = vrot.lane.b32.xlu0 %v2033_v61, %s6284_s19  ;;  %v8840_v54 = vld [vmem:[%s12183_s0 + $0x11c] sm:$0xff]   ;;  %v8848_v28 = vpop.permute.xlu0 %1693  ;;  %v8895_v11 = vld [vmem:[%s12183_s0 + $0x124] sm:$0xff]  }
 0x1e9   :  { %v8833_v6 = vsub.s32 %v8671_v2, %v3177_v35  ;;  %vm12834_vm10 = vsmask.f32 7424  ;;  %vm3771_vm15 = vcmp.ne.s32.totalorder %v3167_v24, 0  ;;  %vm3843_vm13 = vcmp.lt.s32.totalorder %v3167_v24, 0 }
 0x1ea   :  { %v1515_v1 = vsel %vm12834_vm10, %v1510_v36, %v1514_v47  ;;  %v12835_v39 = vrot.slane %v8364_v5, 3  ;;  %vm12836_vm1 = vcmask 1044480   ;;  %v3156_v2 = vsub.s32 %v8697_v43, %v3155_v58 }
 0x1eb   :  { %v3987_v29 = vadd.s32 18, %v3167_v24  ;;  %vm3769_vm0 = vcmp.ne.s32.totalorder %v8826_v4, 0  ;;  %vm3841_vm10 = vcmp.lt.s32.totalorder %v8826_v4, 0  ;;  %1580 = vrot.lane.b32.xlu1 %v1515_v1, %s6280_s27  ;;  %vm12837_vm2 = vsmask.f32 7424  ;;  %vm12838_vm4 = vmmov %vm12836_vm1  ;;  %v8874_v60 = vpop.permute.xlu1 %1824 }
 0x1ec   :  { %v2133_v20 = vsel %vm12836_vm1, %v12835_v39, %v2132_v45  ;;  %v1523_v59 = vsel %vm12837_vm2, %v1518_v7, %v12286_v26  ;;  %v2135_v5 = vsel %vm12838_vm4, %v2132_v45, %v12285_v42  ;;  %vm8859_vm1 = vmand %vm3843_vm13, %vm3771_vm15  ;;  %vm3772_vm7 = vcmp.ne.s32.totalorder %v8833_v6, 0  ;;  %v8882_v10 = vpop.permute.xlu0 %1822 }
 0x1ed   :  { %vm3844_vm14 = vcmp.lt.s32.totalorder %v8833_v6, 0  ;;  %2168 = vrot.lane.b32.xlu0 %v2133_v20, %s6285_s24  ;;  %v1622_v43 = vrot.slane %v8639_v3, 1  ;;  %v12284_v55 = vrot.slane %v8840_v54, 1  ;;  %v8869_v41 = vshll.u32 %v8840_v54, 16  ;;  %vm8876_vm4 = vmand %vm3841_vm10, %vm3769_vm0 }
 0x1ee   :  { %v8872_v37 = vshrl.u32 %v8840_v54, 16  ;;  %v3985_v8 = vadd.s32 18, %v8826_v4  ;;  %v3988_v13 = vadd.s32 18, %v8833_v6  ;;  %vm3770_vm2 = vcmp.ne.s32.totalorder %v3156_v2, 0  ;;  %vm8888_vm13 = vmand %vm3844_vm14, %vm3772_vm7 }
 0x1ef   :  { %vm3842_vm15 = vcmp.lt.s32.totalorder %v3156_v2, 0  ;;  %v4059_v30 = vsel %vm8859_vm1, %v3987_v29, %v3167_v24  ;;  %v8898_v15 = vadd.s32 176, %v7604_v48  ;;  %1582 = vrot.lane.b32.xlu1 %v1523_v59, %s6280_s27  ;;  %v3986_v35 = vadd.s32 18, %v3156_v2  ;;  %v8916_v7 = vpop.permute.xlu1 %1900 }
 0x1f0   :  { %v1780_v9 = vrot.slane %v8677_v22, 1  ;;  %v1781_v17 = vrot.slane %v8694_v31, 2  ;;  %v12845_v36 = vrot.slane %v8572_v51, 1  ;;  %vm12846_vm14 = vcmask 1046528   ;;  %vm8907_vm7 = vmand %vm3842_vm15, %vm3770_vm2  ;;  %v1899_v29 = vpop.permute.xlu0 %1898 }
 0x1f1   :  { %2170 = vrot.lane.b32.xlu0 %v2135_v5, %s6285_s24  ;;  %v1784_v61 = vrot.slane %v8872_v37, 1  ;;  %v1785_v45 = vrot.slane %v8869_v41, 2  ;;  %v8914_v58 = vadd.s32 160, %v7604_v48  ;;  %vm8918_vm0 = vcmp.lt.s32.totalorder %v4059_v30, 16  ;;  %vm12852_vm10 = vmmov %vm12846_vm14 }
 0x1f2   :  { %v1623_v47 = vsel %vm12846_vm14, %v12845_v36, %v1622_v43  ;;  %v12849_v1 = vmov 0  ;;  %v8925_v51 = vsel %vm12852_vm10, %v1622_v43, %v12284_v55  ;;  %v4057_v39 = vsel %vm8876_vm4, %v3985_v8, %v8826_v4 }
 0x1f3   :  { %v12850_v1 = vsel %vm8918_vm0, 4294967295, %v12849_v1  ;;  %v4060_v20 = vsel %vm8888_vm13, %v3988_v13, %v8833_v6  ;;  %v8934_v59 = vshll.u32 %v8895_v11, 16  ;;  %v8937_v5 = vshrl.u32 %v8895_v11, 16  ;;  %1658 = vrot.lane.b32.xlu1 %v1623_v47, %s6279_s22  ;;  %v8961_v24 = vpop.permute.xlu1 %1953 }
 0x1f4   :  { %12851 = vst [vmem:[#allocation32_spill] sm:$0xff] %v12850_v1  ;;  %v8940_v18 = vmul.u32.u64.low 3817748708, %v8898_v15  ;;  %v8941_v30 = vmul.u32.u64.high 3817748708, %v8898_v15, %v8940_v18  ;;  %v4058_v4 = vsel %vm8907_vm7, %v3986_v35, %v3156_v2  ;;  %v1782_v43 = vor.u32 %v1781_v17, %v1780_v9  ;;  %v1952_v17 = vpop.permute.xlu0 %1951  ;;  %v6240_v35 = vld [vmem:[%s12183_s0 + $0xc4] sm:$0xff]  }
 0x1f5   :  { %v1880_v16 = vrot.slane %v8840_v54, 2  ;;  %v8948_v6 = vadd.s32 184, %v7604_v48  ;;  %1656 = vrot.lane.b32.xlu0 %v8653_v27, %s6279_s22  ;;  %v8952_v8 = vor.u32 %v1785_v45, %v1784_v61  ;;  %v8959_v36 = vadd.s32 168, %v7604_v48 }
 0x1f6   :  { %v8955_v13 = vmul.u32.u64.low 3817748708, %v8914_v58  ;;  %v8956_v40 = vmul.u32.u64.high 3817748708, %v8914_v58, %v8955_v13  ;;  %vm8963_vm1 = vcmp.lt.s32.totalorder %v4057_v39, 16  ;;  %v12853_v2 = vmov 0 }
 0x1f7   :  { %v12854_v2 = vsel %vm8963_vm1, 4294967295, %v12853_v2  ;;  %v2038_v9 = vrot.slane %v8872_v37, 2  ;;  %v2039_v27 = vrot.slane %v8869_v41, 3  ;;  %vm8970_vm4 = vcmp.lt.s32.totalorder %v4060_v20, 16  ;;  %v8980_v13 = vpop.f32.mrb[16].mxu0  ;;  %1711 = vrot.lane.b32.xlu1 %v8925_v51, %s6278_s21 }
 0x1f8   :  { %12855 = vst [vmem:[#allocation33_spill] sm:$0xff] %v12854_v2  ;;  %v12856_v61 = vmov 0  ;;  %vm8974_vm2 = vcmp.lt.s32.totalorder %v4058_v4, 16  ;;  %v12859_v45 = vmov 0  ;;  %v2042_v39 = vrot.slane %v8937_v5, 2  ;;  %12862 = vst [vmem:[#allocation36_spill] sm:$0xff] %v8980_v13 }
 0x1f9   :  { %v12857_v61 = vsel %vm8970_vm4, 4294967295, %v12856_v61  ;;  %v12860_v45 = vsel %vm8974_vm2, 4294967295, %v12859_v45  ;;  %v2043_v18 = vrot.slane %v8934_v59, 3  ;;  %vm12863_vm15 = vsmask.f32 6400  ;;  %v9000_v62 = vpop.f32.mrb[17].mxu0  ;;  %1709 = vrot.lane.b32.xlu0 %v1623_v47, %s6278_s21 }
 0x1fa   :  { %12858 = vst [vmem:[#allocation34_spill] sm:$0xff] %v12857_v61  ;;  %12861 = vst [vmem:[#allocation35_spill] sm:$0xff] %v12860_v45  ;;  %v1783_v55 = vsel %vm12863_vm15, %v8667_v38, %v1782_v43  ;;  %v12864_v20 = vrot.slane %v8639_v3, 2  ;;  %vm12865_vm13 = vcmask 1045504   ;;  %vm12866_vm14 = vcmask 23552   ;;  %v9014_v56 = vpop.f32.mrb[18].mxu0 }
 0x1fb   :  { %v8992_v4 = vmul.u32.u64.low 3817748708, %v8948_v6  ;;  %v8993_v26 = vmul.u32.u64.high 3817748708, %v8948_v6, %v8992_v4  ;;  %v2193_v33 = vsel %vm12866_vm14, %v6240_v35, %v8776_v14  ;;  %12867 = vst [vmem:[#allocation37_spill] sm:$0xff] %v9000_v62  ;;  %vm12868_vm7 = vmmov %vm12863_vm15  ;;  %vm12869_vm10 = vcmask 48128   ;;  %v2083_v14 = vpop.permute.xlu1 %2082  ;;  %v9024_v44 = vpop.f32.mrb[19].mxu0 }
 0x1fc   :  { %v8989_v42 = vsel %vm12865_vm13, %v12864_v20, %v1880_v16  ;;  %v1787_v38 = vsel %vm12868_vm7, %v1782_v43, %v8952_v8  ;;  %v9006_v20 = vmul.u32.u64.low 3817748708, %v8959_v36  ;;  %v9007_v0 = vmul.u32.u64.high 3817748708, %v8959_v36, %v9006_v20  ;;  %12870 = vst [vmem:[#allocation38_spill] sm:$0xff] %v9014_v56  ;;  %vm12872_vm15 = vmmov %vm12865_vm13 }
 0x1fd   :  { %v2229_v4 = vsel %vm12869_vm10, %v2193_v33, %v8823_v32  ;;  %v4201_v12 = vsel %vm8963_vm1, %v9000_v62, 0.0  ;;  %v12871_v35 = vrot.slane %v8895_v11, 2  ;;  %v2040_v43 = vor.u32 %v2039_v27, %v2038_v9  ;;  %v2081_v33 = vpop.permute.xlu0 %2080  ;;  %1840 = vrot.lane.b32.xlu1 %v1787_v38, %s6281_s14  ;;  %1838 = vrot.lane.b32.xlu0 %v1783_v55, %s6281_s14 }
 0x1fe   :  { %vm12873_vm13 = vcmask 72704   ;;  %vm12874_vm14 = vcmask 523264   ;;  %v9026_v32 = vor.u32 %v2043_v18, %v2042_v39  ;;  %v3209_v2 = vshrl.u32 %v8941_v30, 4 }
 0x1ff   :  { %v9019_v47 = vsel %vm12872_vm15, %v1880_v16, %v12871_v35  ;;  %v2265_v63 = vsel %vm12873_vm13, %v2229_v4, %v8848_v28  ;;  %v4289_v20 = vsel %vm12874_vm14, %v4201_v12, 0.0  ;;  %vm12875_vm7 = vcmask 97280   ;;  %v6241_v28 = vld [vmem:[%s12183_s0 + $0xcc] sm:$0xff]   ;;  %vm12878_vm13 = vmmov %vm12874_vm14  ;;  %v9054_v4 = vpop.permute.xlu1 %1568 }
 0x200   :  { %v2301_v62 = vsel %vm12875_vm7, %v2265_v63, %v8882_v10  ;;  %v4203_v16 = vsel %vm8918_vm0, %v8980_v13, 0.0  ;;  %v4290_v9 = vadd.f32 %v4289_v20, %v8801_v49  ;;  %v4202_v12 = vsel %vm8974_vm2, %v9024_v44, 0.0 }
 0x201   :  { %vm12876_vm10 = vcmask 23552   ;;  %vm12877_vm15 = vcmask 121856   ;;  %v4291_v10 = vsel %vm12878_vm13, %v4202_v12, 0.0  ;;  %v3187_v49 = vshrl.u32 %v8956_v40, 4  ;;  %1916 = vrot.lane.b32.xlu1 %v8989_v42, %s6282_s17  ;;  %1914 = vrot.lane.b32.xlu0 %v8731_v21, %s6282_s17 }
 0x202   :  { %v2195_v30 = vsel %vm12876_vm10, %v6241_v28, %v8799_v25  ;;  %v2337_v63 = vsel %vm12877_vm15, %v2301_v62, %v1899_v29  ;;  %vm12879_vm14 = vcmask 48128   ;;  %vm12880_vm7 = vcmask 146432   ;;  %vm12882_vm15 = vmmov %vm12878_vm13  ;;  %v2157_v29 = vpop.permute.xlu0 %2156 }
 0x203   :  { %v2231_v27 = vsel %vm12879_vm14, %v2195_v30, %v8818_v19  ;;  %v2373_v39 = vsel %vm12880_vm7, %v2337_v63, %v1952_v17  ;;  %v4204_v18 = vsel %vm8970_vm4, %v9014_v56, 0.0  ;;  %v4292_v38 = vadd.f32 %v4291_v10, %v4290_v9  ;;  %v9075_v9 = vpop.permute.xlu1 %1570 }
 0x204   :  { %vm12881_vm10 = vcmask 72704   ;;  %v4293_v25 = vsel %vm12882_vm15, %v4203_v16, 0.0  ;;  %vm12883_vm13 = vcmask 171008   ;;  %v3210_v40 = vmul.u32 18, %v3209_v2 }
 0x205   :  { %v2267_v62 = vsel %vm12881_vm10, %v2231_v27, %v8842_v50  ;;  %v2409_v55 = vsel %vm12883_vm13, %v2373_v39, %v2081_v33  ;;  %vm12884_vm14 = vcmask 97280   ;;  %v4294_v17 = vadd.f32 %v4293_v25, %v4292_v38  ;;  %vm12887_vm10 = vmmov %vm12882_vm15  ;;  %1969 = vrot.lane.b32.xlu1 %v9019_v47, %s6283_s18  ;;  %1967 = vrot.lane.b32.xlu0 %v8989_v42, %s6283_s18 }
 0x206   :  { %v2303_v19 = vsel %vm12884_vm14, %v2267_v62, %v8874_v60  ;;  %vm12885_vm7 = vcmask 195584   ;;  %v3220_v20 = vshrl.u32 %v8993_v26, 4  ;;  %vm12886_vm4 = vcmask 121856  }
 0x207   :  { %v2445_v35 = vsel %vm12885_vm7, %v2409_v55, %v2157_v29  ;;  %v2339_v50 = vsel %vm12886_vm4, %v2303_v19, %v8916_v7  ;;  %v4295_v16 = vsel %vm12887_vm10, %v4204_v18, 0.0  ;;  %vm12888_vm15 = vcmask 220160   ;;  %v2159_v7 = vpop.permute.xlu0 %2158  ;;  %vm12892_vm4 = vmmov %vm12885_vm7 }
 0x208   :  { %5907 = vmatprep.mubr.msk.bf16.mxu1 %vm12888_vm15, %v2445_v35  ;;  %v3188_v2 = vmul.u32 18, %v3187_v49  ;;  %v3198_v60 = vshrl.u32 %v9007_v0, 4  ;;  %vm12889_vm13 = vcmask 146432   ;;  %v9077_v12 = vadd.f32 %v4295_v16, %v4294_v17  ;;  %vm12893_vm7 = vmmov %vm12888_vm15 }
 0x209   :  { %v2375_v33 = vsel %vm12889_vm13, %v2339_v50, %v8961_v24  ;;  %vm12890_vm14 = vcmask 171008   ;;  %v12891_v28 = vrot.slane %v8694_v31, 1  ;;  %v1530_v21 = vrot.slane %v8869_v41, 1  ;;  %v9094_v41 = vpop.permute.xlu1 %1646 }
 0x20a   :  { %v2411_v26 = vsel %vm12890_vm14, %v2375_v33, %v2083_v14  ;;  %v3211_v0 = vsub.s32 %v8898_v15, %v3210_v40  ;;  %v3221_v24 = vmul.u32 18, %v3220_v20  ;;  %vm12894_vm10 = vsmask.f32 5376 }
 0x20b   :  { %v1526_v30 = vor.u32 %v8677_v22, %v12891_v28  ;;  %v2447_v63 = vsel %vm12892_vm4, %v2411_v26, %v2159_v7  ;;  %v2045_v31 = vsel %vm12894_vm10, %v2040_v43, %v9026_v32  ;;  %v3189_v22 = vsub.s32 %v8914_v58, %v3188_v2  ;;  %vm12895_vm15 = vmmov %vm12894_vm10  ;;  %v9099_v15 = vpop.permute.xlu0 %1644  ;;  %v9107_v58 = vld [vmem:[%s12183_s0 + $0x12c] sm:$0xff]  }
 0x20c   :  { %5908 = vmatmul.mubr.msk.bf16.vlgmr.msra.gmra.mrb[0].mxu1 %vm12893_vm7, %v2447_v63  ;;  %v3199_v14 = vmul.u32 18, %v3198_v60  ;;  %v2041_v10 = vsel %vm12895_vm15, %v8795_v57, %v2040_v43  ;;  %v2136_v49 = vrot.slane %v8840_v54, 3  ;;  %vm12896_vm13 = vsmask.f32 7424  ;;  %2098 = vrot.lane.b32.xlu1 %v2045_v31, %s6284_s19 }
 0x20d   :  { %v1531_v27 = vsel %vm12896_vm13, %v1526_v30, %v1530_v21  ;;  %v1534_v42 = vor.u32 %v8872_v37, %v1530_v21  ;;  %vm3775_vm14 = vcmp.ne.s32.totalorder %v3211_v0, 0  ;;  %vm3847_vm4 = vcmp.lt.s32.totalorder %v3211_v0, 0  ;;  %2096 = vrot.lane.b32.xlu0 %v2041_v10, %s6284_s19  ;;  %v9113_v18 = vpop.permute.xlu1 %1699 }
 0x20e   :  { %v3222_v39 = vsub.s32 %v8948_v6, %v3221_v24  ;;  %v12314_v57 = vrot.slane %v8934_v59, 1  ;;  %vm3773_vm7 = vcmp.ne.s32.totalorder %v3189_v22, 0  ;;  %vm3845_vm10 = vcmp.lt.s32.totalorder %v3189_v22, 0  ;;  %vm9121_vm13 = vmand %vm3847_vm4, %vm3775_vm14 }
 0x20f   :  { %v3200_v43 = vsub.s32 %v8959_v36, %v3199_v14  ;;  %v12897_v37 = vrot.slane %v8639_v3, 3  ;;  %vm12898_vm15 = vcmask 1044480   ;;  %v12313_v62 = vrot.slane %v8895_v11, 3  ;;  %v9119_v25 = vpop.permute.xlu0 %1697  ;;  %vm9126_vm0 = vmand %vm3845_vm10, %vm3773_vm7 }
 0x210   :  { %v3991_v55 = vadd.s32 18, %v3211_v0  ;;  %v3989_v29 = vadd.s32 18, %v3189_v22  ;;  %1584 = vrot.lane.b32.xlu1 %v1531_v27, %s6280_s27  ;;  %vm3776_vm2 = vcmp.ne.s32.totalorder %v3222_v39, 0  ;;  %vm3848_vm1 = vcmp.lt.s32.totalorder %v3222_v39, 0  ;;  %vm12904_vm10 = vmmov %vm12898_vm15 }
 0x211   :  { %v2137_v38 = vsel %vm12898_vm15, %v12897_v37, %v2136_v49  ;;  %v9131_v3 = vshll.u32 %v9107_v58, 16  ;;  %v9134_v40 = vshrl.u32 %v9107_v58, 16  ;;  %vm12903_vm14 = vsmask.f32 7424  ;;  %v9141_v35 = vpop.permute.xlu1 %1828  ;;  %vm9156_vm15 = vmand %vm3848_vm1, %vm3776_vm2 }
 0x212   :  { %2172 = vrot.lane.b32.xlu0 %v2137_v38, %s6285_s24  ;;  %v1539_v19 = vsel %vm12903_vm14, %v1534_v42, %v12314_v57  ;;  %v1626_v17 = vrot.slane %v8895_v11, 1  ;;  %vm3774_vm4 = vcmp.ne.s32.totalorder %v3200_v43, 0  ;;  %vm3846_vm7 = vcmp.lt.s32.totalorder %v3200_v43, 0 }
 0x213   :  { %v2139_v20 = vsel %vm12904_vm10, %v2136_v49, %v12313_v62  ;;  %v9147_v50 = vrot.slane %v9107_v58, 1  ;;  %v9149_v16 = vpop.permute.xlu0 %1826  ;;  %v4063_v2 = vsel %vm9121_vm13, %v3991_v55, %v3211_v0  ;;  %v4061_v60 = vsel %vm9126_vm0, %v3989_v29, %v3189_v22  ;;  %vm9161_vm14 = vmand %vm3846_vm7, %vm3774_vm4  ;;  %v9176_v22 = vld [vmem:[%s12183_s0 + $0x134] sm:$0xff]  }
 0x214   :  { %v3992_v26 = vadd.s32 18, %v3222_v39  ;;  %v3990_v7 = vadd.s32 18, %v3200_v43  ;;  %1586 = vrot.lane.b32.xlu1 %v1539_v19, %s6280_s27  ;;  %v1788_v30 = vrot.slane %v8937_v5, 1  ;;  %v1789_v21 = vrot.slane %v8934_v59, 2 }
 0x215   :  { %v1792_v63 = vrot.slane %v9134_v40, 1  ;;  %v1793_v0 = vrot.slane %v9131_v3, 2  ;;  %v12909_v24 = vrot.slane %v8840_v54, 1  ;;  %vm12910_vm0 = vcmask 1046528   ;;  %v9181_v10 = vpop.permute.xlu1 %1904 }
 0x216   :  { %2174 = vrot.lane.b32.xlu0 %v2139_v20, %s6285_s24  ;;  %v9179_v14 = vadd.s32 208, %v7604_v48  ;;  %vm9183_vm1 = vcmp.lt.s32.totalorder %v4063_v2, 16  ;;  %v12911_v49 = vmov 0  ;;  %vm12914_vm2 = vmmov %vm12910_vm0  ;;  %vm9191_vm13 = vcmp.lt.s32.totalorder %v4061_v60, 16 }
 0x217   :  { %v1627_v31 = vsel %vm12910_vm0, %v12909_v24, %v1626_v17  ;;  %v12912_v49 = vsel %vm9183_vm1, 4294967295, %v12911_v49  ;;  %v9189_v27 = vsel %vm12914_vm2, %v1626_v17, %v9147_v50  ;;  %v1903_v54 = vpop.permute.xlu0 %1902  ;;  %v12915_v42 = vmov 0 }
 0x218   :  { %12913 = vst [vmem:[#allocation39_spill] sm:$0xff] %v12912_v49  ;;  %v12916_v42 = vsel %vm9191_vm13, 4294967295, %v12915_v42  ;;  %v4064_v37 = vsel %vm9156_vm15, %v3992_v26, %v3222_v39  ;;  %v4062_v38 = vsel %vm9161_vm14, %v3990_v7, %v3200_v43  ;;  %v9200_v6 = vadd.s32 192, %v7604_v48  ;;  %1662 = vrot.lane.b32.xlu1 %v1627_v31, %s6279_s22 }
 0x219   :  { %12917 = vst [vmem:[#allocation40_spill] sm:$0xff] %v12916_v42  ;;  %v1790_v55 = vor.u32 %v1789_v21, %v1788_v30  ;;  %v9203_v29 = vor.u32 %v1793_v0, %v1792_v63  ;;  %v1884_v36 = vrot.slane %v9107_v58, 2  ;;  %v9207_v19 = vadd.s32 216, %v7604_v48  ;;  %v9219_v2 = vpop.permute.xlu1 %1957  ;;  %v9239_v0 = vpop.f32.mrb[20].mxu0 }
 0x21a   :  { %1660 = vrot.lane.b32.xlu0 %v8925_v51, %s6279_s22  ;;  %v9212_v39 = vrot.slane %v9176_v22, 2  ;;  %v12321_v43 = vshrl.u32 %v9176_v22, 16  ;;  %v9216_v17 = vmul.u32.u64.low 3817748708, %v9179_v14  ;;  %v9217_v20 = vmul.u32.u64.high 3817748708, %v9179_v14, %v9216_v17  ;;  %v9259_v51 = vpop.f32.mrb[21].mxu0 }
 0x21b   :  { %vm9221_vm4 = vcmp.lt.s32.totalorder %v4064_v37, 16  ;;  %v12918_v60 = vmov 0  ;;  %vm9225_vm7 = vcmp.lt.s32.totalorder %v4062_v38, 16  ;;  %v12921_v33 = vmov 0  ;;  %v1956_v7 = vpop.permute.xlu0 %1955  ;;  %12928 = vst [vmem:[#allocation43_spill] sm:$0xff] %v9259_v51 }
 0x21c   :  { %v12919_v60 = vsel %vm9221_vm4, 4294967295, %v12918_v60  ;;  %v12922_v33 = vsel %vm9225_vm7, 4294967295, %v12921_v33  ;;  %v9231_v26 = vadd.s32 200, %v7604_v48  ;;  %v2046_v28 = vrot.slane %v9134_v40, 2  ;;  %1715 = vrot.lane.b32.xlu1 %v9189_v27, %s6278_s21 }
 0x21d   :  { %12920 = vst [vmem:[#allocation41_spill] sm:$0xff] %v12919_v60  ;;  %12923 = vst [vmem:[#allocation42_spill] sm:$0xff] %v12922_v33  ;;  %v2047_v30 = vrot.slane %v9131_v3, 3  ;;  %v9236_v21 = vmul.u32.u64.low 3817748708, %v9200_v6  ;;  %v9237_v63 = vmul.u32.u64.high 3817748708, %v9200_v6, %v9236_v21  ;;  %v12925_v37 = vrot.slane %v8895_v11, 2 }
 0x21e   :  { %vm12924_vm10 = vsmask.f32 6400  ;;  %vm12926_vm15 = vcmask 1045504   ;;  %v9251_v17 = vmul.u32.u64.low 3817748708, %v9207_v19  ;;  %v9252_v62 = vmul.u32.u64.high 3817748708, %v9207_v19, %v9251_v17  ;;  %v6242_v21 = vld [vmem:[%s12183_s0 + $0xd4] sm:$0xff]   ;;  %1713 = vrot.lane.b32.xlu0 %v1627_v31, %s6278_s21  ;;  %v2087_v31 = vpop.permute.xlu1 %2086 }
 0x21f   :  { %v1791_v24 = vsel %vm12924_vm10, %v8952_v8, %v1790_v55  ;;  %v9248_v38 = vsel %vm12926_vm15, %v12925_v37, %v1884_v36  ;;  %vm12927_vm14 = vcmask 23552   ;;  %vm12929_vm0 = vmmov %vm12924_vm10  ;;  %v2050_v17 = vrot.slane %v12321_v43, 2  ;;  %v2085_v56 = vpop.permute.xlu0 %2084 }
 0x220   :  { %v2197_v57 = vsel %vm12927_vm14, %v6242_v21, %v9054_v4  ;;  %v1795_v8 = vsel %vm12929_vm0, %v1790_v55, %v9203_v29  ;;  %vm12930_vm2 = vmmov %vm12926_vm15  ;;  %vm12931_vm10 = vcmask 48128   ;;  %v4205_v4 = vsel %vm9191_vm13, %v9259_v51, 0.0  ;;  %v9275_v21 = vpop.f32.mrb[22].mxu0 }
 0x221   :  { %v9266_v37 = vsel %vm12930_vm2, %v1884_v36, %v9212_v39  ;;  %v2233_v61 = vsel %vm12931_vm10, %v2197_v57, %v9099_v15  ;;  %v9278_v1 = vmul.u32.u64.low 3817748708, %v9231_v26  ;;  %v9279_v55 = vmul.u32.u64.high 3817748708, %v9231_v26, %v9278_v1  ;;  %v9284_v43 = vpop.f32.mrb[23].mxu0  ;;  %1844 = vrot.lane.b32.xlu1 %v1795_v8, %s6281_s14 }
 0x222   :  { %vm12932_vm15 = vcmask 72704   ;;  %vm12933_vm14 = vcmask 523264   ;;  %v2048_v15 = vor.u32 %v2047_v30, %v2046_v28  ;;  %v12934_v57 = vshll.u32 %v9176_v22, 16  ;;  %1842 = vrot.lane.b32.xlu0 %v1791_v24, %s6281_s14 }
 0x223   :  { %v2269_v36 = vsel %vm12932_vm15, %v2233_v61, %v9119_v25  ;;  %v4297_v45 = vsel %vm12933_vm14, %v4205_v4, 0.0  ;;  %vm12935_vm0 = vcmask 97280   ;;  %v4207_v13 = vsel %vm9183_vm1, %v9239_v0, 0.0  ;;  %v6243_v25 = vld [vmem:[%s12183_s0 + $0xdc] sm:$0xff]   ;;  %vm12938_vm15 = vmmov %vm12933_vm14 }
 0x224   :  { %v2051_v42 = vrot.slane %v12934_v57, 3  ;;  %v2305_v51 = vsel %vm12935_vm0, %v2269_v36, %v9149_v16  ;;  %v4298_v1 = vadd.f32 %v4297_v45, %v9077_v12  ;;  %v4206_v61 = vsel %vm9225_vm7, %v9284_v43, 0.0  ;;  %v9313_v57 = vpop.permute.xlu1 %1572 }
 0x225   :  { %vm12936_vm2 = vcmask 23552   ;;  %vm12937_vm10 = vcmask 121856   ;;  %v4299_v30 = vsel %vm12938_vm15, %v4206_v61, 0.0  ;;  %v3253_v45 = vshrl.u32 %v9217_v20, 4  ;;  %v2161_v20 = vpop.permute.xlu0 %2160  ;;  %1920 = vrot.lane.b32.xlu1 %v9248_v38, %s6282_s17 }
 0x226   :  { %v2199_v28 = vsel %vm12936_vm2, %v6243_v25, %v9075_v9  ;;  %v2341_v16 = vsel %vm12937_vm10, %v2305_v51, %v1903_v54  ;;  %vm12939_vm14 = vcmask 48128   ;;  %vm12940_vm0 = vcmask 146432   ;;  %vm12942_vm10 = vmmov %vm12938_vm15  ;;  %1918 = vrot.lane.b32.xlu0 %v9019_v47, %s6282_s17 }
 0x227   :  { %v2235_v12 = vsel %vm12939_vm14, %v2199_v28, %v9094_v41  ;;  %v2377_v8 = vsel %vm12940_vm0, %v2341_v16, %v1956_v7  ;;  %v4208_v4 = vsel %vm9221_vm4, %v9275_v21, 0.0  ;;  %v4300_v36 = vadd.f32 %v4299_v30, %v4298_v1 }
 0x228   :  { %vm12941_vm2 = vcmask 72704   ;;  %v4301_v54 = vsel %vm12942_vm10, %v4207_v13, 0.0  ;;  %vm12943_vm15 = vcmask 171008   ;;  %v3231_v24 = vshrl.u32 %v9237_v63, 4  ;;  %v9341_v28 = vpop.permute.xlu1 %1574 }
 0x229   :  { %v2271_v9 = vsel %vm12941_vm2, %v2235_v12, %v9113_v18  ;;  %v2413_v51 = vsel %vm12943_vm15, %v2377_v8, %v2085_v56  ;;  %vm12944_vm14 = vcmask 97280   ;;  %v4302_v7 = vadd.f32 %v4301_v54, %v4300_v36  ;;  %v9328_v18 = vld [vmem:[%s12183_s0 + $0x134] ss:$0 sps:$4 sm:$0x11]   ;;  %v2163_v30 = vpop.permute.xlu0 %2162  ;;  %1973 = vrot.lane.b32.xlu1 %v9266_v37, %s6283_s18 }
 0x22a   :  { %v2307_v41 = vsel %vm12944_vm14, %v2271_v9, %v9141_v35  ;;  %vm12945_vm0 = vcmask 195584   ;;  %v3264_v13 = vshrl.u32 %v9252_v62, 4  ;;  %vm12946_vm2 = vcmask 121856   ;;  %1971 = vrot.lane.b32.xlu0 %v9248_v38, %s6283_s18 }
 0x22b   :  { %v2449_v61 = vsel %vm12945_vm0, %v2413_v51, %v2161_v20  ;;  %v2343_v56 = vsel %vm12946_vm2, %v2307_v41, %v9181_v10  ;;  %v4303_v63 = vsel %vm12942_vm10, %v4208_v4, 0.0  ;;  %vm12947_vm15 = vcmask 220160  }
 0x22c   :  { %5911 = vmatprep.mubr.msk.bf16.mxu1 %vm12947_vm15, %v2449_v61  ;;  %v9337_v35 = vor.u32 %v2051_v42, %v2050_v17  ;;  %v3254_v1 = vmul.u32 18, %v3253_v45  ;;  %vm12948_vm14 = vcmask 146432   ;;  %v9343_v16 = vadd.f32 %v4303_v63, %v4302_v7  ;;  %vm12951_vm10 = vmmov %vm12947_vm15  ;;  %v9361_v4 = vpop.permute.xlu1 %1650 }
 0x22d   :  { %v2379_v25 = vsel %vm12948_vm14, %v2343_v56, %v9219_v2  ;;  %v3242_v62 = vshrl.u32 %v9279_v55, 4  ;;  %vm12949_vm0 = vcmask 171008   ;;  %v3232_v12 = vmul.u32 18, %v3231_v24  ;;  %v9366_v54 = vpop.permute.xlu0 %1648 }
 0x22e   :  { %v2415_v10 = vsel %vm12949_vm0, %v2379_v25, %v2087_v31  ;;  %vm12950_vm2 = vcmask 195584   ;;  %v1552_v42 = vshll.u32 %v9328_v18, 16  ;;  %v3265_v17 = vmul.u32 18, %v3264_v13 }
 0x22f   :  { %v2451_v47 = vsel %vm12950_vm2, %v2415_v10, %v2163_v30  ;;  %vm12952_vm15 = vsmask.f32 5376  ;;  %v12953_v31 = vrot.slane %v8934_v59, 1  ;;  %v1546_v45 = vrot.slane %v9131_v3, 1 }
 0x230   :  { %5912 = vmatmul.mubr.msk.bf16.gmra.mrb[4].mxu1 %vm12951_vm10, %v2451_v47  ;;  %v2053_v2 = vsel %vm12952_vm15, %v2048_v15, %v9337_v35  ;;  %v3255_v8 = vsub.s32 %v9179_v14, %v3254_v1  ;;  %vm12954_vm14 = vmmov %vm12952_vm15  ;;  %v2140_v38 = vrot.slane %v9107_v58, 3  ;;  %v3243_v9 = vmul.u32 18, %v3242_v62  ;;  %v9374_v59 = vld [vmem:[%s12183_s0 + $0x13c] ss:$0 sps:$4 sm:$0x33]  }
 0x231   :  { %v1542_v55 = vor.u32 %v8937_v5, %v12953_v31  ;;  %v2049_v36 = vsel %vm12954_vm14, %v9026_v32, %v2048_v15  ;;  %v9369_v51 = vsub.s32 %v9200_v6, %v3232_v12  ;;  %2102 = vrot.lane.b32.xlu1 %v2053_v2, %s6284_s19  ;;  %v1550_v5 = vor.u32 %v9134_v40, %v1546_v45  ;;  %v9384_v6 = vpop.permute.xlu1 %1703  ;;  %v6218_v40 = vld [vmem:[%s12183_s0 + $0x13c] ss:$0 sps:$4 sm:$0x11]   ;;  %v9395_v41 = vpop.permute.xlu0 %1701 }
 0x232   :  { %v1554_v3 = vrot.slane %v1552_v42, 1  ;;  %v12336_v32 = vrot.slane %v9176_v22, 3  ;;  %v9380_v58 = vsub.s32 %v9207_v19, %v3265_v17  ;;  %2100 = vrot.lane.b32.xlu0 %v2049_v36, %s6284_s19  ;;  %vm12955_vm0 = vsmask.f32 7424  ;;  %v9449_v36 = vld [vmem:[%s12183_s0 + $0x13c] sm:$0xff]  }
 0x233   :  { %v1547_v14 = vsel %vm12955_vm0, %v1542_v55, %v1546_v45  ;;  %vm3851_vm10 = vcmp.lt.s32.totalorder %v3255_v8, 0  ;;  %v12956_v15 = vrot.slane %v8895_v11, 3  ;;  %vm12957_vm15 = vcmask 1044480  }
 0x234   :  { %v3995_v24 = vadd.s32 18, %v3255_v8  ;;  %v9393_v19 = vsub.s32 %v9231_v26, %v3243_v9  ;;  %v1806_v7 = vshrl.u32 %v9374_v59, 16  ;;  %v1809_v11 = vshll.u32 %v9374_v59, 16 }
 0x235   :  { %v2141_v20 = vsel %vm12957_vm15, %v12956_v15, %v2140_v38  ;;  %1588 = vrot.lane.b32.xlu1 %v1547_v14, %s6280_s27  ;;  %vm12958_vm15 = vmmov %vm12955_vm0  ;;  %vm12959_vm2 = vcmask 1044480   ;;  %vm12960_vm4 = vcmp.ne.s32.totalorder %v3255_v8, 0  ;;  %vm3780_vm14 = vcmp.ne.s32.totalorder %v9380_v58, 0  ;;  %v9420_v30 = vpop.permute.xlu1 %1832  ;;  %v9434_v42 = vpop.permute.xlu0 %1830  ;;  %v9466_v14 = vld [vmem:[%s12183_s0 + $0x144] ss:$0 sps:$4 sm:$0x77]  }
 0x236   :  { %v1555_v61 = vsel %vm12958_vm15, %v1550_v5, %v1554_v3  ;;  %v2143_v13 = vsel %vm12959_vm2, %v2140_v38, %v12336_v32  ;;  %vm9407_vm1 = vmand %vm3851_vm10, %vm12960_vm4  ;;  %2176 = vrot.lane.b32.xlu0 %v2141_v20, %s6285_s24  ;;  %v1630_v56 = vrot.slane %v9328_v18, 1  ;;  %v3993_v63 = vadd.s32 18, %v9369_v51  ;;  %v6244_v5 = vld [vmem:[%s12183_s0 + $0xe4] sm:$0xff]  }
 0x237   :  { %v12963_v1 = vshrl.u32 %v9176_v22, 16  ;;  %v12964_v62 = vshll.u32 %v9176_v22, 16  ;;  %v1681_v12 = vrot.slane %v9176_v22, 1  ;;  %vm12965_vm4 = vcmp.ne.s32.totalorder %v9369_v51, 0 }
 0x238   :  { %vm12966_vm2 = vcmp.lt.s32.totalorder %v9369_v51, 0  ;;  %v3996_v18 = vadd.s32 18, %v9380_v58  ;;  %vm3778_vm15 = vcmp.ne.s32.totalorder %v9393_v19, 0  ;;  %vm3850_vm0 = vcmp.lt.s32.totalorder %v9393_v19, 0 }
 0x239   :  { %v1799_v25 = vrot.slane %v12963_v1, 1  ;;  %v1802_v10 = vrot.slane %v12964_v62, 2  ;;  %vm9427_vm10 = vmand %vm12966_vm2, %vm12965_vm4  ;;  %v4067_v17 = vsel %vm9407_vm1, %v3995_v24, %v3255_v8  ;;  %v1683_v2 = vrot.slane %v6218_v40, 1  ;;  %1590 = vrot.lane.b32.xlu1 %v1555_v61, %s6280_s27  ;;  %v9468_v15 = vpop.permute.xlu1 %1908  ;;  %v9481_v40 = vld [vmem:[%s12183_s0 + $0x144] ss:$0 sps:$4 sm:$0x33]  }
 0x23a   :  { %vm12969_vm7 = vcmp.lt.s32.totalorder %v9380_v58, 0  ;;  %v1808_v55 = vrot.slane %v1806_v7, 1  ;;  %v1811_v45 = vrot.slane %v1809_v11, 2  ;;  %v3994_v8 = vadd.s32 18, %v9393_v19  ;;  %2178 = vrot.lane.b32.xlu0 %v2143_v13, %s6285_s24  ;;  %v1907_v7 = vpop.permute.xlu0 %1906  ;;  %s6290_s27 = smov [#allocation2]  }
 0x23b   :  { %vm9442_vm4 = vmand %vm12969_vm7, %vm3780_vm14  ;;  %vm12972_vm1 = vcmask 1046528   ;;  %v4065_v9 = vsel %vm9427_vm10, %v3993_v63, %v9369_v51  ;;  %v1803_v3 = vor.u32 %v1802_v10, %v1799_v25  ;;  %vm9470_vm14 = vcmp.lt.s32.totalorder %v4067_v17, 16 }
 0x23c   :  { %v1631_v38 = vsel %vm12972_vm1, %v9147_v50, %v1630_v56  ;;  %vm9459_vm7 = vmand %vm3850_vm0, %vm3778_vm15  ;;  %v12975_v20 = vmov 0  ;;  %v4068_v51 = vsel %vm9442_vm4, %v3996_v18, %v9380_v58  ;;  %v1888_v24 = vrot.slane %v9374_v59, 2 }
 0x23d   :  { %v12976_v20 = vsel %vm9470_vm14, 4294967295, %v12975_v20  ;;  %vm12978_vm0 = vmmov %vm12972_vm1  ;;  %v1812_v13 = vor.u32 %v1811_v45, %v1808_v55  ;;  %v2055_v26 = vshrl.u32 %v9449_v36, 16  ;;  %1666 = vrot.lane.b32.xlu1 %v1631_v38, %s6279_s22  ;;  %vm9488_vm10 = vcmp.lt.s32.totalorder %v4065_v9, 16  ;;  %v9528_v55 = vpop.f32.mrb[24].mxu0 }
 0x23e   :  { %12977 = vst [vmem:[#allocation44_spill] sm:$0xff] %v12976_v20  ;;  %v1684_v11 = vsel %vm12978_vm0, %v1681_v12, %v1683_v2  ;;  %vm12979_vm2 = vmmov %vm12978_vm0  ;;  %v12980_v58 = vmov 0  ;;  %v4066_v59 = vsel %vm9459_vm7, %v3994_v8, %v9393_v19  ;;  %v2058_v56 = vshll.u32 %v9449_v36, 16  ;;  %1664 = vrot.lane.b32.xlu0 %v9189_v27, %s6279_s22  ;;  %v9511_v19 = vpop.permute.xlu1 %1961  ;;  %v1960_v18 = vpop.permute.xlu0 %1959 }
 0x23f   :  { %v1682_v61 = vsel %vm12979_vm2, %v9147_v50, %v1681_v12  ;;  %v12981_v58 = vsel %vm9488_vm10, 4294967295, %v12980_v58  ;;  %v9497_v63 = vadd.s32 240, %v7604_v48  ;;  %vm9501_vm15 = vcmp.lt.s32.totalorder %v4068_v51, 16  ;;  %v9541_v51 = vpop.f32.mrb[25].mxu0 }
 0x240   :  { %12982 = vst [vmem:[#allocation45_spill] sm:$0xff] %v12981_v58  ;;  %v12983_v50 = vmov 0  ;;  %vm12986_vm4 = vsmask.f32 6400  ;;  %v2064_v25 = vshrl.u32 %v9466_v14, 16  ;;  %v9509_v62 = vadd.s32 224, %v7604_v48 }
 0x241   :  { %v12984_v50 = vsel %vm9501_vm15, 4294967295, %v12983_v50  ;;  %v1804_v1 = vsel %vm12986_vm4, %v9203_v29, %v1803_v3  ;;  %vm12987_vm1 = vcmask 1045504   ;;  %v1941_v27 = vrot.slane %v9481_v40, 2  ;;  %vm12991_vm0 = vmmov %vm12986_vm4  ;;  %1719 = vrot.lane.b32.xlu1 %v1684_v11, %s6278_s21 }
 0x242   :  { %12985 = vst [vmem:[#allocation46_spill] sm:$0xff] %v12984_v50  ;;  %v1889_v10 = vsel %vm12987_vm1, %v9212_v39, %v1888_v24  ;;  %v9518_v47 = vadd.s32 248, %v7604_v48  ;;  %vm9520_vm7 = vcmp.lt.s32.totalorder %v4066_v59, 16  ;;  %v12988_v29 = vmov 0  ;;  %1717 = vrot.lane.b32.xlu0 %v1682_v61, %s6278_s21  ;;  %v9553_v59 = vpop.f32.mrb[26].mxu0 }
 0x243   :  { %v12989_v29 = vsel %vm9520_vm7, 4294967295, %v12988_v29  ;;  %v1813_v17 = vsel %vm12991_vm0, %v1803_v3, %v1812_v13  ;;  %v2057_v2 = vrot.slane %v2055_v26, 2  ;;  %v9526_v31 = vadd.s32 232, %v7604_v48 }
 0x244   :  { %12990 = vst [vmem:[#allocation47_spill] sm:$0xff] %v12989_v29  ;;  %v2060_v45 = vrot.slane %v2058_v56, 3  ;;  %v2067_v8 = vshll.u32 %v9466_v14, 16  ;;  %v9533_v38 = vmul.u32.u64.low 3817748708, %v9497_v63  ;;  %v9534_v9 = vmul.u32.u64.high 3817748708, %v9497_v63, %v9533_v38  ;;  %v2091_v56 = vpop.permute.xlu1 %2090 }
 0x245   :  { %vm12992_vm2 = vcmask 23552   ;;  %v2066_v24 = vrot.slane %v2064_v25, 2  ;;  %v9545_v40 = vmul.u32.u64.low 3817748708, %v9509_v62  ;;  %v9546_v11 = vmul.u32.u64.high 3817748708, %v9509_v62, %v9545_v40  ;;  %1848 = vrot.lane.b32.xlu1 %v1813_v17, %s6281_s14 }
 0x246   :  { %v2201_v3 = vsel %vm12992_vm2, %v6244_v5, %v9313_v57  ;;  %vm12993_vm4 = vcmask 48128   ;;  %v4209_v26 = vsel %vm9488_vm10, %v9541_v51, 0.0  ;;  %vm12994_vm1 = vcmask 72704   ;;  %v9562_v5 = vpop.f32.mrb[27].mxu0  ;;  %v2089_v40 = vpop.permute.xlu0 %2088  ;;  %1846 = vrot.lane.b32.xlu0 %v1804_v1, %s6281_s14 }
 0x247   :  { %v2237_v13 = vsel %vm12993_vm4, %v2201_v3, %v9366_v54  ;;  %v9556_v57 = vmul.u32.u64.low 3817748708, %v9518_v47  ;;  %v9557_v38 = vmul.u32.u64.high 3817748708, %v9518_v47, %v9556_v57  ;;  %vm12995_vm0 = vcmask 523264  }
 0x248   :  { %v2273_v61 = vsel %vm12994_vm1, %v2237_v13, %v9395_v41  ;;  %v4305_v25 = vsel %vm12995_vm0, %v4209_v26, 0.0  ;;  %v9565_v54 = vmul.u32.u64.low 3817748708, %v9526_v31  ;;  %v9566_v3 = vmul.u32.u64.high 3817748708, %v9526_v31, %v9565_v54  ;;  %v6245_v13 = vld [vmem:[%s12183_s0 + $0xec] sm:$0xff]   ;;  %v9592_v29 = vpop.permute.xlu1 %1576 }
 0x249   :  { %vm12996_vm2 = vcmask 97280   ;;  %v4211_v12 = vsel %vm9470_vm14, %v9528_v55, 0.0  ;;  %v4306_v57 = vadd.f32 %v4305_v25, %v9343_v16  ;;  %v4210_v41 = vsel %vm9520_vm7, %v9562_v5, 0.0  ;;  %1924 = vrot.lane.b32.xlu1 %v1889_v10, %s6282_s17 }
 0x24a   :  { %v2309_v32 = vsel %vm12996_vm2, %v2273_v61, %v9434_v42  ;;  %vm12997_vm4 = vcmask 23552   ;;  %vm12998_vm1 = vcmask 121856   ;;  %v4307_v61 = vsel %vm12995_vm0, %v4210_v41, 0.0  ;;  %v2165_v1 = vpop.permute.xlu0 %2164  ;;  %1922 = vrot.lane.b32.xlu0 %v9266_v37, %s6282_s17 }
 0x24b   :  { %v2203_v26 = vsel %vm12997_vm4, %v6245_v13, %v9341_v28  ;;  %v2345_v42 = vsel %vm12998_vm1, %v2309_v32, %v1907_v7  ;;  %v2069_v16 = vrot.slane %v2067_v8, 3  ;;  %vm12999_vm2 = vcmask 48128   ;;  %vm13002_vm1 = vmmov %vm12995_vm0 }
 0x24c   :  { %v2239_v25 = vsel %vm12999_vm2, %v2203_v26, %v9361_v4  ;;  %vm13000_vm14 = vcmask 146432   ;;  %v4212_v17 = vsel %vm9501_vm15, %v9553_v59, 0.0  ;;  %v4308_v20 = vadd.f32 %v4307_v61, %v4306_v57  ;;  %v9613_v10 = vpop.permute.xlu1 %1578 }
 0x24d   :  { %v2381_v54 = vsel %vm13000_vm14, %v2345_v42, %v1960_v18  ;;  %vm13001_vm4 = vcmask 72704   ;;  %v4309_v32 = vsel %vm13002_vm1, %v4211_v12, 0.0  ;;  %vm13003_vm0 = vcmask 171008  }
 0x24e   :  { %v2275_v28 = vsel %vm13001_vm4, %v2239_v25, %v9384_v6  ;;  %v2417_v7 = vsel %vm13003_vm0, %v2381_v54, %v2089_v40  ;;  %vm13004_vm7 = vcmask 97280   ;;  %v4310_v8 = vadd.f32 %v4309_v32, %v4308_v20  ;;  %vm13009_vm4 = vmmov %vm13002_vm1  ;;  %v2167_v42 = vpop.permute.xlu0 %2166 }
 0x24f   :  { %v2311_v4 = vsel %vm13004_vm7, %v2275_v28, %v9420_v30  ;;  %vm13005_vm14 = vcmask 195584   ;;  %v13006_v57 = vrot.slane %v9449_v36, 2  ;;  %vm13007_vm2 = vcmask 1045504  }
 0x250   :  { %v2453_v18 = vsel %vm13005_vm14, %v2417_v7, %v2165_v1  ;;  %vm13008_vm15 = vcmask 121856   ;;  %v4311_v12 = vsel %vm13009_vm4, %v4212_v17, 0.0  ;;  %vm13010_vm1 = vcmask 220160   ;;  %vm13013_vm0 = vmmov %vm13007_vm2 }
 0x251   :  { %v1942_v41 = vsel %vm13007_vm2, %v13006_v57, %v1941_v27  ;;  %v2347_v6 = vsel %vm13008_vm15, %v2311_v4, %v9468_v15  ;;  %5915 = vmatprep.mubr.msk.bf16.mxu1 %vm13010_vm1, %v2453_v18  ;;  %v2061_v30 = vor.u32 %v2060_v45, %v2057_v2  ;;  %v2070_v20 = vor.u32 %v2069_v16, %v2066_v24  ;;  %vm13015_vm2 = vmmov %vm13010_vm1 }
 0x252   :  { %vm13011_vm7 = vcmask 146432   ;;  %v13012_v13 = vmov %v13006_v57  ;;  %v3275_v15 = vshrl.u32 %v9546_v11, 4  ;;  %v9620_v26 = vadd.f32 %v4311_v12, %v4310_v8  ;;  %1977 = vrot.lane.b32.xlu1 %v1942_v41, %s6283_s18  ;;  %v1653_v25 = vpop.permute.xlu0 %1652 }
 0x253   :  { %v2383_v40 = vsel %vm13011_vm7, %v2347_v6, %v9511_v19  ;;  %v1940_v27 = vsel %vm13013_vm0, %v9212_v39, %v13012_v13  ;;  %vm13014_vm15 = vcmask 171008   ;;  %v3297_v2 = vshrl.u32 %v9534_v9, 4 }
 0x254   :  { %v2419_v37 = vsel %vm13014_vm15, %v2383_v40, %v2091_v56  ;;  %v3286_v19 = vshrl.u32 %v9566_v3, 4  ;;  %1975 = vrot.lane.b32.xlu0 %v1940_v27, %s6283_s18  ;;  %vm13016_vm4 = vsmask.f32 5376  ;;  %v2144_v24 = vrot.slane %v9449_v36, 3  ;;  %v9632_v56 = vpop.permute.xlu1 %1654  ;;  %v6247_v27 = vld [vmem:[%s12183_s0 + $0xfc] sm:$0xff]  }
 0x255   :  { %v2455_v45 = vsel %vm13005_vm14, %v2419_v37, %v2167_v42  ;;  %v2071_v39 = vsel %vm13016_vm4, %v2061_v30, %v2070_v20  ;;  %v2146_v11 = vrot.slane %v9466_v14, 3  ;;  %vm13017_vm1 = vmmov %vm13016_vm4  ;;  %v3276_v61 = vmul.u32 18, %v3275_v15 }
 0x256   :  { %5916 = vmatmul.mubr.msk.bf16.gmra.mrb[8].mxu1 %vm13015_vm2, %v2455_v45  ;;  %v2062_v9 = vsel %vm13017_vm1, %v9337_v35, %v2061_v30  ;;  %v3308_v16 = vshrl.u32 %v9557_v38, 4  ;;  %v3298_v3 = vmul.u32 18, %v3297_v2  ;;  %2106 = vrot.lane.b32.xlu1 %v2071_v39, %s6284_s19  ;;  %v3287_v54 = vmul.u32 18, %v3286_v19  ;;  %v1706_v7 = vpop.permute.xlu0 %1705 }
 0x257   :  { %vm13018_vm7 = vcmask 1044480   ;;  %v13019_v14 = vrot.slane %v9176_v22, 3  ;;  %v3277_v35 = vsub.s32 %v9509_v62, %v3276_v61  ;;  %v9668_v12 = vadd.s32 256, %v7604_v48 }
 0x258   :  { %2104 = vrot.lane.b32.xlu0 %v2062_v9, %s6284_s19  ;;  %v2147_v17 = vsel %vm13018_vm7, %v2144_v24, %v2146_v11  ;;  %v9640_v36 = vpop.permute.xlu1 %1707  ;;  %vm13020_vm0 = vmmov %vm13018_vm7  ;;  %v3309_v32 = vmul.u32 18, %v3308_v16  ;;  %v3299_v38 = vsub.s32 %v9497_v63, %v3298_v3  ;;  %v3288_v1 = vsub.s32 %v9526_v31, %v3287_v54  ;;  %v9697_v11 = vpop.f32.mrb[28].mxu0  ;;  %v6246_v54 = vld [vmem:[%s12183_s0 + $0xf4] sm:$0xff]  }
 0x259   :  { %v2145_v28 = vsel %vm13020_vm0, %v13019_v14, %v2144_v24  ;;  %vm3781_vm15 = vcmp.ne.s32.totalorder %v3277_v35, 0  ;;  %vm3853_vm14 = vcmp.lt.s32.totalorder %v3277_v35, 0  ;;  %v3997_v62 = vadd.s32 18, %v3277_v35  ;;  %v9714_v14 = vpop.f32.mrb[29].mxu0 }
 0x25a   :  { %2182 = vrot.lane.b32.xlu1 %v2147_v17, %s6285_s24  ;;  %v3310_v22 = vsub.s32 %v9518_v47, %v3309_v32  ;;  %v1835_v8 = vpop.permute.xlu0 %1834  ;;  %vm3783_vm2 = vcmp.ne.s32.totalorder %v3299_v38, 0  ;;  %vm3855_vm4 = vcmp.lt.s32.totalorder %v3299_v38, 0  ;;  %vm3782_vm1 = vcmp.ne.s32.totalorder %v3288_v1, 0  ;;  %vm9653_vm0 = vmand %vm3853_vm14, %vm3781_vm15 }
 0x25b   :  { %vm3854_vm7 = vcmp.lt.s32.totalorder %v3288_v1, 0  ;;  %v3999_v18 = vadd.s32 18, %v3299_v38  ;;  %vm9659_vm10 = vmand %vm3855_vm4, %vm3783_vm2  ;;  %v3998_v47 = vadd.s32 18, %v3288_v1  ;;  %v4069_v30 = vsel %vm9653_vm0, %v3997_v62, %v3277_v35 }
 0x25c   :  { %2180 = vrot.lane.b32.xlu0 %v2145_v28, %s6285_s24  ;;  %v9650_v4 = vpop.permute.xlu1 %1836  ;;  %vm3784_vm13 = vcmp.ne.s32.totalorder %v3310_v22, 0  ;;  %vm3856_vm3 = vcmp.lt.s32.totalorder %v3310_v22, 0  ;;  %vm9663_vm8 = vmand %vm3854_vm7, %vm3782_vm1  ;;  %v4000_v20 = vadd.s32 18, %v3310_v22  ;;  %v9673_v40 = vadd.s32 272, %v7604_v48 }
 0x25d   :  { %v4071_v13 = vsel %vm9659_vm10, %v3999_v18, %v3299_v38  ;;  %vm9677_vm15 = vmand %vm3856_vm3, %vm3784_vm13  ;;  %v9682_v15 = vadd.s32 264, %v7604_v48  ;;  %v4070_v42 = vsel %vm9663_vm8, %v3998_v47, %v3288_v1  ;;  %v9687_v2 = vadd.s32 280, %v7604_v48 }
 0x25e   :  { %v1911_v41 = vpop.permute.xlu0 %1910  ;;  %vm9689_vm14 = vcmp.lt.s32.totalorder %v4069_v30, 16  ;;  %v13029_v19 = vmov 0  ;;  %v9694_v39 = vmul.u32.u64.low 3817748708, %v9668_v12  ;;  %v9695_v24 = vmul.u32.u64.high 3817748708, %v9668_v12, %v9694_v39 }
 0x25f   :  { %v13030_v19 = vsel %vm9689_vm14, 4294967295, %v13029_v19  ;;  %vm9699_vm3 = vcmp.lt.s32.totalorder %v4071_v13, 16  ;;  %v13032_v9 = vmov 0  ;;  %v4072_v61 = vsel %vm9677_vm15, %v4000_v20, %v3310_v22  ;;  %v9728_v22 = vpop.f32.mrb[30].mxu0 }
 0x260   :  { %v9657_v31 = vpop.permute.xlu1 %1912  ;;  %13031 = vst [vmem:[#allocation48_spill] sm:$0xff] %v13030_v19  ;;  %v13033_v9 = vsel %vm9699_vm3, 4294967295, %v13032_v9  ;;  %v9706_v16 = vmul.u32.u64.low 3817748708, %v9673_v40  ;;  %v9707_v3 = vmul.u32.u64.high 3817748708, %v9673_v40, %v9706_v16  ;;  %vm13035_vm8 = vcmask 23552  }
 0x261   :  { %13034 = vst [vmem:[#allocation49_spill] sm:$0xff] %v13033_v9  ;;  %v2205_v17 = vsel %vm13035_vm8, %v6246_v54, %v9592_v29  ;;  %vm9716_vm13 = vcmp.lt.s32.totalorder %v4070_v42, 16  ;;  %v13036_v28 = vmov 0  ;;  %vm13039_vm10 = vcmask 48128   ;;  %vm13046_vm0 = vmmov %vm13035_vm8 }
 0x262   :  { %v1964_v45 = vpop.permute.xlu0 %1963  ;;  %v13037_v28 = vsel %vm9716_vm13, 4294967295, %v13036_v28  ;;  %v9721_v35 = vmul.u32.u64.low 3817748708, %v9682_v15  ;;  %v9722_v32 = vmul.u32.u64.high 3817748708, %v9682_v15, %v9721_v35  ;;  %v2241_v38 = vsel %vm13039_vm10, %v2205_v17, %v1653_v25  ;;  %v9740_v25 = vpop.f32.mrb[31].mxu0 }
 0x263   :  { %13038 = vst [vmem:[#allocation50_spill] sm:$0xff] %v13037_v28  ;;  %v4213_v1 = vsel %vm9689_vm14, %v9714_v14, 0.0  ;;  %v9731_v29 = vmul.u32.u64.low 3817748708, %v9687_v2  ;;  %v9732_v18 = vmul.u32.u64.high 3817748708, %v9687_v2, %v9731_v29  ;;  %vm13040_vm2 = vcmask 72704  }
 0x264   :  { %v1966_v37 = vpop.permute.xlu1 %1965  ;;  %v2277_v63 = vsel %vm13040_vm2, %v2241_v38, %v1706_v7  ;;  %vm13041_vm4 = vcmask 523264   ;;  %vm9736_vm1 = vcmp.lt.s32.totalorder %v4072_v61, 16  ;;  %v13042_v47 = vmov 0 }
 0x265   :  { %v4313_v57 = vsel %vm13041_vm4, %v4213_v1, 0.0  ;;  %v13043_v47 = vsel %vm9736_vm1, 4294967295, %v13042_v47  ;;  %vm13045_vm7 = vcmask 97280   ;;  %v4215_v20 = vsel %vm9699_vm3, %v9697_v11, 0.0  ;;  %vm13048_vm8 = vmmov %vm13041_vm4 }
 0x266   :  { %13044 = vst [vmem:[#allocation51_spill] sm:$0xff] %v13043_v47  ;;  %v2093_v6 = vpop.permute.xlu0 %2092  ;;  %v2313_v30 = vsel %vm13045_vm7, %v2277_v63, %v1835_v8  ;;  %v4314_v13 = vadd.f32 %v4313_v57, %v9620_v26  ;;  %v4214_v7 = vsel %vm9716_vm13, %v9740_v25, 0.0  ;;  %v2207_v42 = vsel %vm13046_vm0, %v6247_v27, %v9613_v10  ;;  %vm13051_vm7 = vmmov %vm13048_vm8 }
 0x267   :  { %vm13047_vm15 = vcmask 121856   ;;  %v4315_v8 = vsel %vm13048_vm8, %v4214_v7, 0.0  ;;  %v2243_v61 = vsel %vm13039_vm10, %v2207_v42, %v9632_v56  ;;  %vm13049_vm2 = vcmask 146432  }
 0x268   :  { %v2095_v62 = vpop.permute.xlu1 %2094  ;;  %v2349_v39 = vsel %vm13047_vm15, %v2313_v30, %v1911_v41  ;;  %v4216_v16 = vsel %vm9736_vm1, %v9728_v22, 0.0  ;;  %v4316_v54 = vadd.f32 %v4315_v8, %v4314_v13  ;;  %vm13050_vm4 = vcmask 72704  }
 0x269   :  { %v2385_v26 = vsel %vm13049_vm2, %v2349_v39, %v1964_v45  ;;  %v2279_v35 = vsel %vm13050_vm4, %v2243_v61, %v9640_v36  ;;  %v4317_v10 = vsel %vm13051_vm7, %v4215_v20, 0.0  ;;  %vm13052_vm0 = vcmask 171008   ;;  %vm13056_vm2 = vmmov %vm13051_vm7 }
 0x26a   :  { %v2421_v41 = vsel %vm13052_vm0, %v2385_v26, %v2093_v6  ;;  %v2169_v38 = vpop.permute.xlu0 %2168  ;;  %v3319_v1 = vshrl.u32 %v9695_v24, 4  ;;  %vm13053_vm15 = vcmask 97280   ;;  %v4318_v45 = vadd.f32 %v4317_v10, %v4316_v54 }
 0x26b   :  { %v2315_v56 = vsel %vm13053_vm15, %v2279_v35, %v9650_v4  ;;  %vm13054_vm8 = vcmask 195584   ;;  %v3341_v63 = vshrl.u32 %v9707_v3, 4  ;;  %vm13055_vm10 = vcmask 121856  }
 0x26c   :  { %v9763_v17 = vpop.permute.xlu1 %1580  ;;  %v2457_v29 = vsel %vm13054_vm8, %v2421_v41, %v2169_v38  ;;  %v2351_v57 = vsel %vm13055_vm10, %v2315_v56, %v9657_v31  ;;  %v4319_v36 = vsel %vm13056_vm2, %v4216_v16, 0.0  ;;  %vm13057_vm4 = vcmask 220160   ;;  %vm13059_vm15 = vmmov %vm13054_vm8 }
 0x26d   :  { %5919 = vmatprep.mubr.msk.bf16.mxu1 %vm13057_vm4, %v2457_v29  ;;  %v3330_v6 = vshrl.u32 %v9722_v32, 4  ;;  %vm13058_vm7 = vcmask 146432   ;;  %v9782_v20 = vadd.f32 %v4319_v36, %v4318_v45  ;;  %v3352_v4 = vshrl.u32 %v9732_v18, 4  ;;  %vm13060_vm8 = vmmov %vm13057_vm4 }
 0x26e   :  { %v2387_v30 = vsel %vm13058_vm7, %v2351_v57, %v1966_v37  ;;  %v2171_v3 = vpop.permute.xlu0 %2170  ;;  %v3320_v7 = vmul.u32 18, %v3319_v1  ;;  %v3342_v27 = vmul.u32 18, %v3341_v63  ;;  %v9815_v57 = vadd.s32 304, %v7604_v48 }
 0x26f   :  { %v2423_v13 = vsel %vm13052_vm0, %v2387_v30, %v2095_v62  ;;  %v3331_v42 = vmul.u32 18, %v3330_v6  ;;  %v3353_v32 = vmul.u32 18, %v3352_v4  ;;  %v13067_v36 = vmov 0  ;;  %v9826_v4 = vpop.f32.mrb[32].mxu0 }
 0x270   :  { %v9780_v24 = vpop.permute.xlu1 %1582  ;;  %v2459_v31 = vsel %vm13059_vm15, %v2423_v13, %v2171_v3  ;;  %v3321_v8 = vsub.s32 %v9668_v12, %v3320_v7  ;;  %v3343_v61 = vsub.s32 %v9673_v40, %v3342_v27  ;;  %v9824_v30 = vadd.s32 288, %v7604_v48  ;;  %v9832_v3 = vpop.f32.mrb[33].mxu0 }
 0x271   :  { %5920 = vmatmul.mubr.msk.bf16.gmra.mrb[12].mxu1 %vm13060_vm8, %v2459_v31  ;;  %v3332_v18 = vsub.s32 %v9682_v15, %v3331_v42  ;;  %v3354_v62 = vsub.s32 %v9687_v2, %v3353_v32  ;;  %v13070_v13 = vmov 0  ;;  %v13073_v31 = vmov 0  ;;  %v9844_v32 = vpop.f32.mrb[34].mxu0 }
 0x272   :  { %v1657_v37 = vpop.permute.xlu0 %1656  ;;  %vm3785_vm10 = vcmp.ne.s32.totalorder %v3321_v8, 0  ;;  %vm3857_vm2 = vcmp.lt.s32.totalorder %v3321_v8, 0  ;;  %vm3787_vm4 = vcmp.ne.s32.totalorder %v3343_v61, 0  ;;  %vm3859_vm7 = vcmp.lt.s32.totalorder %v3343_v61, 0  ;;  %v9855_v12 = vpop.f32.mrb[35].mxu0 }
 0x273   :  { %v4001_v54 = vadd.s32 18, %v3321_v8  ;;  %vm3786_vm0 = vcmp.ne.s32.totalorder %v3332_v18, 0  ;;  %vm3858_vm15 = vcmp.lt.s32.totalorder %v3332_v18, 0  ;;  %vm9798_vm8 = vmand %vm3857_vm2, %vm3785_vm10  ;;  %vm3788_vm1 = vcmp.ne.s32.totalorder %v3354_v62, 0 }
 0x274   :  { %v9788_v39 = vpop.permute.xlu1 %1658  ;;  %vm3860_vm3 = vcmp.lt.s32.totalorder %v3354_v62, 0  ;;  %vm9802_vm13 = vmand %vm3859_vm7, %vm3787_vm4  ;;  %v4003_v2 = vadd.s32 18, %v3343_v61  ;;  %v4002_v10 = vadd.s32 18, %v3332_v18  ;;  %v4004_v41 = vadd.s32 18, %v3354_v62 }
 0x275   :  { %vm3930_vm14 = vmand %vm3858_vm15, %vm3786_vm0  ;;  %v4073_v38 = vsel %vm9798_vm8, %v4001_v54, %v3321_v8  ;;  %v9839_v27 = vadd.s32 312, %v7604_v48  ;;  %v13076_v8 = vmov 0  ;;  %vm13081_vm2 = vcmask 48128  }
 0x276   :  { %v1710_v16 = vpop.permute.xlu0 %1709  ;;  %vm9808_vm6 = vmand %vm3860_vm3, %vm3788_vm1  ;;  %v4075_v29 = vsel %vm9802_vm13, %v4003_v2, %v3343_v61  ;;  %v4074_v63 = vsel %vm3930_vm14, %v4002_v10, %v3332_v18  ;;  %vm9817_vm10 = vcmp.lt.s32.totalorder %v4073_v38, 16  ;;  %vm13079_vm13 = vcmask 523264  }
 0x277   :  { %v13068_v36 = vsel %vm9817_vm10, 4294967295, %v13067_v36  ;;  %v4076_v6 = vsel %vm9808_vm6, %v4004_v41, %v3354_v62  ;;  %vm9828_vm3 = vcmp.lt.s32.totalorder %v4075_v29, 16  ;;  %vm9834_vm14 = vcmp.lt.s32.totalorder %v4074_v63, 16  ;;  %v6248_v41 = vld [vmem:[%s12183_s0 + $0x104] sm:$0xff]   ;;  %vm13082_vm4 = vmmov %vm13079_vm13 }
 0x278   :  { %v9793_v26 = vpop.permute.xlu1 %1711  ;;  %13069 = vst [vmem:[#allocation52_spill] sm:$0xff] %v13068_v36  ;;  %v13071_v13 = vsel %vm9828_vm3, 4294967295, %v13070_v13  ;;  %v13074_v31 = vsel %vm9834_vm14, 4294967295, %v13073_v31  ;;  %v4217_v42 = vsel %vm9817_vm10, %v9832_v3, 0.0  ;;  %vm9846_vm6 = vcmp.lt.s32.totalorder %v4076_v6, 16  ;;  %vm13085_vm15 = vmmov %vm13082_vm4 }
 0x279   :  { %13072 = vst [vmem:[#allocation53_spill] sm:$0xff] %v13071_v13  ;;  %13075 = vst [vmem:[#allocation54_spill] sm:$0xff] %v13074_v31  ;;  %v13077_v8 = vsel %vm9846_vm6, 4294967295, %v13076_v8  ;;  %v9851_v18 = vmul.u32.u64.low 3817748708, %v9815_v57  ;;  %v9852_v62 = vmul.u32.u64.high 3817748708, %v9815_v57, %v9851_v18  ;;  %v4321_v54 = vsel %vm13079_vm13, %v4217_v42, 0.0 }
 0x27a   :  { %v1839_v40 = vpop.permute.xlu0 %1838  ;;  %13078 = vst [vmem:[#allocation55_spill] sm:$0xff] %v13077_v8  ;;  %v9858_v15 = vmul.u32.u64.low 3817748708, %v9824_v30  ;;  %v9859_v2 = vmul.u32.u64.high 3817748708, %v9824_v30, %v9858_v15  ;;  %v2926_v10 = vadd.s32 296, %v7604_v48  ;;  %vm13080_vm1 = vcmask 23552  }
 0x27b   :  { %v2209_v38 = vsel %vm13080_vm1, %v6248_v41, %v9763_v17  ;;  %v4219_v1 = vsel %vm9828_vm3, %v9826_v4, 0.0  ;;  %v4322_v29 = vadd.f32 %v4321_v54, %v9782_v20  ;;  %v4218_v63 = vsel %vm9834_vm14, %v9855_v12, 0.0  ;;  %vm13086_vm8 = vmmov %vm13080_vm1 }
 0x27c   :  { %v9796_v35 = vpop.permute.xlu1 %1840  ;;  %v2245_v6 = vsel %vm13081_vm2, %v2209_v38, %v1657_v37  ;;  %v4323_v42 = vsel %vm13082_vm4, %v4218_v63, 0.0  ;;  %v9877_v15 = vmul.u32.u64.low 3817748708, %v9839_v27  ;;  %v9878_v36 = vmul.u32.u64.high 3817748708, %v9839_v27, %v9877_v15  ;;  %v6249_v63 = vld [vmem:[%s12183_s0 + $0x10c] sm:$0xff]   ;;  %vm13088_vm1 = vmmov %vm13081_vm2 }
 0x27d   :  { %vm13083_vm7 = vcmask 72704   ;;  %v4220_v41 = vsel %vm9846_vm6, %v9844_v32, 0.0  ;;  %v4324_v20 = vadd.f32 %v4323_v42, %v4322_v29  ;;  %vm13084_vm0 = vcmask 97280   ;;  %vm13089_vm2 = vmmov %vm13082_vm4 }
 0x27e   :  { %v1915_v45 = vpop.permute.xlu0 %1914  ;;  %v2281_v17 = vsel %vm13083_vm7, %v2245_v6, %v1710_v16  ;;  %v4325_v31 = vsel %vm13085_vm15, %v4219_v1, 0.0  ;;  %v9886_v37 = vmul.u32.u64.low 3817748708, %v2926_v10  ;;  %v9887_v38 = vmul.u32.u64.high 3817748708, %v2926_v10, %v9886_v37 }
 0x27f   :  { %v2317_v13 = vsel %vm13084_vm0, %v2281_v17, %v1839_v40  ;;  %v2211_v16 = vsel %vm13086_vm8, %v6249_v63, %v9780_v24  ;;  %vm13087_vm13 = vcmask 121856   ;;  %v4326_v15 = vadd.f32 %v4325_v31, %v4324_v20 }
 0x280   :  { %v1917_v56 = vpop.permute.xlu1 %1916  ;;  %v2353_v6 = vsel %vm13087_vm13, %v2317_v13, %v1915_v45  ;;  %v2247_v29 = vsel %vm13088_vm1, %v2211_v16, %v9788_v39  ;;  %v4327_v40 = vsel %vm13089_vm2, %v4220_v41, 0.0  ;;  %vm13090_vm4 = vcmask 146432  }
 0x281   :  { %v2283_v17 = vsel %vm13083_vm7, %v2247_v29, %v9793_v26  ;;  %vm13091_vm0 = vcmask 171008   ;;  %v9904_v47 = vadd.f32 %v4327_v40, %v4326_v15  ;;  %vm13092_vm15 = vcmask 97280   ;;  %vm13095_vm2 = vmmov %vm13090_vm4 }
 0x282   :  { %v1968_v61 = vpop.permute.xlu0 %1967  ;;  %v2319_v24 = vsel %vm13092_vm15, %v2283_v17, %v9796_v35  ;;  %vm13093_vm8 = vcmask 195584   ;;  %vm13094_vm1 = vcmask 220160   ;;  %v3363_v13 = vshrl.u32 %v9859_v2, 4 }
 0x283   :  { %v2389_v1 = vsel %vm13090_vm4, %v2353_v6, %v1968_v61  ;;  %v2355_v39 = vsel %vm13087_vm13, %v2319_v24, %v1917_v56  ;;  %vm13096_vm4 = vmmov %vm13091_vm0  ;;  %v3385_v20 = vshrl.u32 %v9852_v62, 4  ;;  %v3374_v35 = vshrl.u32 %v9887_v38, 4 }
 0x284   :  { %v1970_v7 = vpop.permute.xlu1 %1969  ;;  %vm13097_vm7 = vmmov %vm13093_vm8  ;;  %v3364_v56 = vmul.u32 18, %v3363_v13 }
 0x285   :  { %v2391_v31 = vsel %vm13095_vm2, %v2355_v39, %v1970_v7  ;;  %v3386_v7 = vmul.u32 18, %v3385_v20  ;;  %v3375_v16 = vmul.u32 18, %v3374_v35 }
 0x286   :  { %v2097_v54 = vpop.permute.xlu0 %2096  ;;  %v3365_v6 = vsub.s32 %v9824_v30, %v3364_v56  ;;  %v13107_v56 = vmov 0 }
 0x287   :  { %v2425_v37 = vsel %vm13091_vm0, %v2389_v1, %v2097_v54  ;;  %vm13098_vm0 = vmmov %vm13094_vm1  ;;  %v3387_v29 = vsub.s32 %v9815_v57, %v3386_v7  ;;  %v3376_v40 = vsub.s32 %v2926_v10, %v3375_v16 }
 0x288   :  { %v2099_v18 = vpop.permute.xlu1 %2098  ;;  %vm3789_vm15 = vcmp.ne.s32.totalorder %v3365_v6, 0  ;;  %v4005_v17 = vadd.s32 18, %v3365_v6 }
 0x289   :  { %v2427_v26 = vsel %vm13096_vm4, %v2391_v31, %v2099_v18  ;;  %vm3791_vm13 = vcmp.ne.s32.totalorder %v3387_v29, 0  ;;  %vm3790_vm4 = vcmp.ne.s32.totalorder %v3376_v40, 0  ;;  %v4007_v30 = vadd.s32 18, %v3387_v29 }
 0x28a   :  { %v2173_v8 = vpop.permute.xlu0 %2172  ;;  %v9947_v31 = vadd.s32 336, %v7604_v48 }
 0x28b   :  { %v2461_v45 = vsel %vm13093_vm8, %v2425_v37, %v2173_v8  ;;  %v3396_v8 = vshrl.u32 %v9878_v36, 4  ;;  %vm3861_vm8 = vcmp.lt.s32.totalorder %v3365_v6, 0  ;;  %v13110_v37 = vmov 0 }
 0x28c   :  { %v9899_v42 = vpop.permute.xlu1 %1584  ;;  %5923 = vmatprep.mubr.msk.bf16.mxu1 %vm13094_vm1, %v2461_v45  ;;  %vm3863_vm1 = vcmp.lt.s32.totalorder %v3387_v29, 0  ;;  %vm9930_vm2 = vmand %vm3861_vm8, %vm3789_vm15 }
 0x28d   :  { %v3397_v18 = vmul.u32 18, %v3396_v8  ;;  %vm9936_vm3 = vmand %vm3863_vm1, %vm3791_vm13  ;;  %v4077_v45 = vsel %vm9930_vm2, %v4005_v17, %v3365_v6  ;;  %vm13117_vm2 = vcmask 48128  }
 0x28e   :  { %v2175_v41 = vpop.permute.xlu0 %2174  ;;  %v4079_v20 = vsel %vm9936_vm3, %v4007_v30, %v3387_v29  ;;  %vm9961_vm13 = vcmp.lt.s32.totalorder %v4077_v45, 16  ;;  %v9974_v29 = vadd.s32 344, %v7604_v48  ;;  %v13114_v45 = vmov 0 }
 0x28f   :  { %v2463_v54 = vsel %vm13097_vm7, %v2427_v26, %v2175_v41  ;;  %v3398_v38 = vsub.s32 %v9839_v27, %v3397_v18  ;;  %vm3862_vm7 = vcmp.lt.s32.totalorder %v3376_v40, 0  ;;  %v4006_v27 = vadd.s32 18, %v3376_v40 }
 0x290   :  { %v9913_v61 = vpop.permute.xlu1 %1586  ;;  %5924 = vmatmul.mubr.msk.bf16.gmra.mrb[16].mxu1 %vm13098_vm0, %v2463_v54  ;;  %vm9942_vm15 = vmand %vm3862_vm7, %vm3790_vm4  ;;  %v9954_v41 = vadd.s32 320, %v7604_v48  ;;  %v9959_v54 = vadd.s32 328, %v7604_v48  ;;  %v13108_v56 = vsel %vm9961_vm13, 4294967295, %v13107_v56  ;;  %vm9978_vm3 = vcmp.lt.s32.totalorder %v4079_v20, 16 }
 0x291   :  { %vm3792_vm0 = vcmp.ne.s32.totalorder %v3398_v38, 0  ;;  %vm3864_vm6 = vcmp.lt.s32.totalorder %v3398_v38, 0  ;;  %v4008_v39 = vadd.s32 18, %v3398_v38  ;;  %13109 = vst [vmem:[#allocation56_spill] sm:$0xff] %v13108_v56  ;;  %v4078_v8 = vsel %vm9942_vm15, %v4006_v27, %v3376_v40 }
 0x292   :  { %v1661_v2 = vpop.permute.xlu0 %1660  ;;  %vm9949_vm8 = vmand %vm3864_vm6, %vm3792_vm0  ;;  %v9970_v6 = vmul.u32.u64.low 3817748708, %v9947_v31  ;;  %v9971_v18 = vmul.u32.u64.high 3817748708, %v9947_v31, %v9970_v6  ;;  %v13111_v37 = vsel %vm9978_vm3, 4294967295, %v13110_v37  ;;  %vm13113_vm6 = vcmask 23552  }
 0x293   :  { %v4080_v16 = vsel %vm9949_vm8, %v4008_v39, %v3398_v38  ;;  %13112 = vst [vmem:[#allocation57_spill] sm:$0xff] %v13111_v37  ;;  %v9983_v30 = vmul.u32.u64.low 3817748708, %v9954_v41  ;;  %v9984_v40 = vmul.u32.u64.high 3817748708, %v9954_v41, %v9983_v30  ;;  %v6250_v38 = vld [vmem:[%s12183_s0 + $0x114] sm:$0xff]   ;;  %vm9993_vm1 = vcmp.lt.s32.totalorder %v4078_v8, 16  ;;  %vm13124_vm8 = vmmov %vm13113_vm6 }
 0x294   :  { %v9921_v63 = vpop.permute.xlu1 %1662  ;;  %v2213_v10 = vsel %vm13113_vm6, %v6250_v38, %v9899_v42  ;;  %v13115_v45 = vsel %vm9993_vm1, 4294967295, %v13114_v45  ;;  %v9998_v39 = vmul.u32.u64.low 3817748708, %v9959_v54  ;;  %v9999_v13 = vmul.u32.u64.high 3817748708, %v9959_v54, %v9998_v39 }
 0x295   :  { %13116 = vst [vmem:[#allocation58_spill] sm:$0xff] %v13115_v45  ;;  %v2249_v26 = vsel %vm13117_vm2, %v2213_v10, %v1661_v2  ;;  %vm10007_vm4 = vcmp.lt.s32.totalorder %v4080_v16, 16  ;;  %v13118_v42 = vmov 0  ;;  %vm13121_vm7 = vcmask 72704  }
 0x296   :  { %v1714_v62 = vpop.permute.xlu0 %1713  ;;  %v9976_v17 = vpop.f32.mrb[36].mxu0  ;;  %v13119_v42 = vsel %vm10007_vm4, 4294967295, %v13118_v42  ;;  %vm13122_vm0 = vcmask 523264   ;;  %v10016_v2 = vmul.u32.u64.low 3817748708, %v9974_v29  ;;  %v10017_v10 = vmul.u32.u64.high 3817748708, %v9974_v29, %v10016_v2 }
 0x297   :  { %v9991_v27 = vpop.f32.mrb[37].mxu0  ;;  %13120 = vst [vmem:[#allocation59_spill] sm:$0xff] %v13119_v42  ;;  %v2285_v30 = vsel %vm13121_vm7, %v2249_v26, %v1714_v62  ;;  %vm13123_vm15 = vcmask 97280   ;;  %v4223_v16 = vsel %vm9978_vm3, %v9976_v17, 0.0  ;;  %v6251_v26 = vld [vmem:[%s12183_s0 + $0x11c] sm:$0xff]   ;;  %vm13125_vm6 = vcmask 121856   ;;  %vm13126_vm2 = vmmov %vm13122_vm0 }
 0x298   :  { %v9924_v15 = vpop.permute.xlu1 %1715  ;;  %v4221_v20 = vsel %vm9961_vm13, %v9991_v27, 0.0  ;;  %v10005_v6 = vpop.f32.mrb[38].mxu0  ;;  %vm13127_vm7 = vcmask 48128  }
 0x299   :  { %v4329_v38 = vsel %vm13122_vm0, %v4221_v20, 0.0  ;;  %v10013_v9 = vpop.f32.mrb[39].mxu0  ;;  %v2215_v20 = vsel %vm13124_vm8, %v6251_v26, %v9913_v61  ;;  %vm13128_vm0 = vcmask 146432   ;;  %vm13130_vm8 = vmmov %vm13126_vm2 }
 0x29a   :  { %v1843_v36 = vpop.permute.xlu0 %1842  ;;  %v4330_v28 = vadd.f32 %v4329_v38, %v9904_v47  ;;  %v4222_v62 = vsel %vm9993_vm1, %v10013_v9, 0.0  ;;  %v4224_v38 = vsel %vm10007_vm4, %v10005_v6, 0.0  ;;  %v4333_v61 = vsel %vm13130_vm8, %v4223_v16, 0.0  ;;  %vm13135_vm4 = vmmov %vm13130_vm8 }
 0x29b   :  { %v2321_v56 = vsel %vm13123_vm15, %v2285_v30, %v1843_v36  ;;  %v4331_v36 = vsel %vm13126_vm2, %v4222_v62, 0.0  ;;  %v2251_v30 = vsel %vm13127_vm7, %v2215_v20, %v9921_v63  ;;  %vm13129_vm15 = vcmask 72704  }
 0x29c   :  { %v9928_v1 = vpop.permute.xlu1 %1844  ;;  %v4332_v37 = vadd.f32 %v4331_v36, %v4330_v28  ;;  %v2287_v19 = vsel %vm13129_vm15, %v2251_v30, %v9924_v15  ;;  %v3429_v62 = vshrl.u32 %v9971_v18, 4  ;;  %vm13132_vm2 = vcmask 97280  }
 0x29d   :  { %v2323_v63 = vsel %vm13132_vm2, %v2287_v19, %v9928_v1  ;;  %vm13133_vm7 = vcmask 195584   ;;  %v3407_v28 = vshrl.u32 %v9984_v40, 4  ;;  %v4335_v15 = vsel %vm13135_vm4, %v4224_v38, 0.0 }
 0x29e   :  { %v1919_v24 = vpop.permute.xlu0 %1918  ;;  %vm13136_vm15 = vcmask 220160   ;;  %vm13137_vm8 = vcmask 146432   ;;  %vm13138_vm2 = vmmov %vm13133_vm7 }
 0x29f   :  { %v2357_v2 = vsel %vm13125_vm6, %v2321_v56, %v1919_v24  ;;  %vm13131_vm6 = vcmask 171008   ;;  %v3408_v36 = vmul.u32 18, %v3407_v28  ;;  %v6252_v28 = vld [vmem:[%s12183_s0 + $0x124] sm:$0xff]  }
 0x2a0   :  { %v9934_v57 = vpop.permute.xlu1 %1920 }
 0x2a2   :  { %v1972_v7 = vpop.permute.xlu0 %1971 }
 0x2a3   :  { %v2393_v47 = vsel %vm13128_vm0, %v2357_v2, %v1972_v7  ;;  %v4334_v7 = vadd.f32 %v4333_v61, %v4332_v37  ;;  %vm13134_vm0 = vcmask 121856   ;;  %v3430_v37 = vmul.u32 18, %v3429_v62 }
 0x2a4   :  { %v1974_v35 = vpop.permute.xlu1 %1973  ;;  %v2359_v20 = vsel %vm13134_vm0, %v2323_v63, %v9934_v57  ;;  %v3440_v57 = vshrl.u32 %v10017_v10, 4 }
 0x2a5   :  { %v2395_v16 = vsel %vm13137_vm8, %v2359_v20, %v1974_v35  ;;  %v10057_v2 = vadd.f32 %v4335_v15, %v4334_v7  ;;  %v3409_v35 = vsub.s32 %v9954_v41, %v3408_v36  ;;  %v10096_v36 = vadd.s32 376, %v7604_v48 }
 0x2a6   :  { %v2101_v39 = vpop.permute.xlu0 %2100  ;;  %v3441_v61 = vmul.u32 18, %v3440_v57  ;;  %v10099_v57 = vadd.s32 360, %v7604_v48 }
 0x2a7   :  { %v2429_v24 = vsel %vm13131_vm6, %v2393_v47, %v2101_v39  ;;  %v3418_v39 = vshrl.u32 %v9999_v13, 4  ;;  %v3431_v13 = vsub.s32 %v9947_v31, %v3430_v37  ;;  %vm3865_vm8 = vcmp.lt.s32.totalorder %v3409_v35, 0 }
 0x2a8   :  { %v2103_v8 = vpop.permute.xlu1 %2102  ;;  %v3442_v10 = vsub.s32 %v9974_v29, %v3441_v61  ;;  %v10090_v37 = vadd.s32 368, %v7604_v48 }
 0x2a9   :  { %v2431_v19 = vsel %vm13131_vm6, %v2395_v16, %v2103_v8  ;;  %v3419_v30 = vmul.u32 18, %v3418_v39  ;;  %vm3795_vm4 = vcmp.ne.s32.totalorder %v3431_v13, 0  ;;  %vm3867_vm0 = vcmp.lt.s32.totalorder %v3431_v13, 0 }
 0x2aa   :  { %v2177_v56 = vpop.permute.xlu0 %2176  ;;  %v4011_v31 = vadd.s32 18, %v3431_v13  ;;  %vm3796_vm1 = vcmp.ne.s32.totalorder %v3442_v10, 0  ;;  %vm3868_vm13 = vcmp.lt.s32.totalorder %v3442_v10, 0  ;;  %v4012_v15 = vadd.s32 18, %v3442_v10 }
 0x2ab   :  { %v2465_v26 = vsel %vm13133_vm7, %v2429_v24, %v2177_v56  ;;  %vm13139_vm7 = vmmov %vm13136_vm15  ;;  %v3420_v24 = vsub.s32 %v9959_v54, %v3419_v30  ;;  %v4009_v54 = vadd.s32 18, %v3409_v35 }
 0x2ac   :  { %v10040_v45 = vpop.permute.xlu1 %1588  ;;  %5927 = vmatprep.mubr.msk.bf16.mxu1 %vm13136_vm15, %v2465_v26  ;;  %vm3793_vm15 = vcmp.ne.s32.totalorder %v3409_v35, 0 }
 0x2ad   :  { %vm3794_vm6 = vcmp.ne.s32.totalorder %v3420_v24, 0  ;;  %vm10071_vm3 = vmand %vm3865_vm8, %vm3793_vm15  ;;  %v4010_v26 = vadd.s32 18, %v3420_v24  ;;  %vm13159_vm15 = vcmask 48128  }
 0x2ae   :  { %v2179_v1 = vpop.permute.xlu0 %2178  ;;  %v4081_v16 = vsel %vm10071_vm3, %v4009_v54, %v3409_v35  ;;  %v13151_v35 = vmov 0  ;;  %vm13160_vm8 = vmmov %vm13159_vm15 }
 0x2af   :  { %v2467_v40 = vsel %vm13138_vm2, %v2431_v19, %v2179_v1  ;;  %vm3866_vm2 = vcmp.lt.s32.totalorder %v3420_v24, 0  ;;  %vm10105_vm3 = vcmp.lt.s32.totalorder %v4081_v16, 16 }
 0x2b0   :  { %v1591_v18 = vpop.permute.xlu1 %1590  ;;  %5928 = vmatmul.mubr.msk.bf16.gmra.mrb[20].mxu1 %vm13139_vm7, %v2467_v40  ;;  %vm10067_vm7 = vmand %vm3867_vm0, %vm3795_vm4  ;;  %v10093_v40 = vadd.s32 352, %v7604_v48  ;;  %v13152_v35 = vsel %vm10105_vm3, 4294967295, %v13151_v35 }
 0x2b1   :  { %vm10075_vm14 = vmand %vm3866_vm2, %vm3794_vm6  ;;  %v4083_v20 = vsel %vm10067_vm7, %v4011_v31, %v3431_v13  ;;  %v13148_v13 = vmov 0  ;;  %13153 = vst [vmem:[#allocation61_spill] sm:$0xff] %v13152_v35  ;;  %v10116_v31 = vmul.u32.u64.low 3817748708, %v10090_v37  ;;  %v10117_v7 = vmul.u32.u64.high 3817748708, %v10090_v37, %v10116_v31 }
 0x2b2   :  { %v1665_v38 = vpop.permute.xlu0 %1664  ;;  %vm10083_vm4 = vmand %vm3868_vm13, %vm3796_vm1  ;;  %v4082_v1 = vsel %vm10075_vm14, %v4010_v26, %v3420_v24  ;;  %vm10101_vm13 = vcmp.lt.s32.totalorder %v4083_v20, 16  ;;  %v13154_v24 = vmov 0  ;;  %vm13157_vm1 = vcmask 23552   ;;  %v6253_v20 = vld [vmem:[%s12183_s0 + $0x12c] sm:$0xff]  }
 0x2b3   :  { %v13149_v13 = vsel %vm10101_vm13, 4294967295, %v13148_v13  ;;  %v4084_v61 = vsel %vm10083_vm4, %v4012_v15, %v3442_v10  ;;  %vm10111_vm14 = vcmp.lt.s32.totalorder %v4082_v1, 16  ;;  %v2217_v10 = vsel %vm13157_vm1, %v6252_v28, %v10040_v45  ;;  %vm13158_vm0 = vmmov %vm13157_vm1 }
 0x2b4   :  { %v1667_v47 = vpop.permute.xlu1 %1666  ;;  %13150 = vst [vmem:[#allocation60_spill] sm:$0xff] %v13149_v13  ;;  %v13155_v24 = vsel %vm10111_vm14, 4294967295, %v13154_v24  ;;  %v10120_v54 = vmul.u32.u64.low 3817748708, %v10093_v40  ;;  %v10121_v26 = vmul.u32.u64.high 3817748708, %v10093_v40, %v10120_v54  ;;  %v2219_v15 = vsel %vm13158_vm0, %v6253_v20, %v1591_v18 }
 0x2b5   :  { %13156 = vst [vmem:[#allocation62_spill] sm:$0xff] %v13155_v24  ;;  %v10135_v19 = vmul.u32.u64.low 3817748708, %v10096_v36  ;;  %v10136_v1 = vmul.u32.u64.high 3817748708, %v10096_v36, %v10135_v19  ;;  %v2255_v31 = vsel %vm13159_vm15, %v2219_v15, %v1667_v47  ;;  %v2253_v54 = vsel %vm13160_vm8, %v2217_v10, %v1665_v38 }
 0x2b6   :  { %v1718_v56 = vpop.permute.xlu0 %1717  ;;  %v10143_v45 = vmul.u32.u64.low 3817748708, %v10099_v57  ;;  %v10144_v28 = vmul.u32.u64.high 3817748708, %v10099_v57, %v10143_v45  ;;  %vm13161_vm6 = vcmask 72704   ;;  %vm13163_vm7 = vcmask 97280  }
 0x2b7   :  { %vm13162_vm2 = vmmov %vm13161_vm6  ;;  %vm13165_vm1 = vcmask 523264   ;;  %vm10156_vm0 = vcmp.lt.s32.totalorder %v4084_v61, 16  ;;  %v13166_v15 = vmov 0  ;;  %vm13169_vm15 = vcmask 121856  }
 0x2b8   :  { %v1720_v8 = vpop.permute.xlu1 %1719  ;;  %v2289_v18 = vsel %vm13162_vm2, %v2253_v54, %v1718_v56  ;;  %vm13164_vm4 = vmmov %vm13163_vm7  ;;  %v13167_v15 = vsel %vm10156_vm0, 4294967295, %v13166_v15 }
 0x2b9   :  { %v2291_v50 = vsel %vm13161_vm6, %v2255_v31, %v1720_v8  ;;  %13168 = vst [vmem:[#allocation63_spill] sm:$0xff] %v13167_v15  ;;  %vm13170_vm8 = vmmov %vm13169_vm15  ;;  %vm13171_vm6 = vcmask 146432  }
 0x2ba   :  { %v1847_v41 = vpop.permute.xlu0 %1846  ;;  %v10132_v16 = vpop.f32.mrb[40].mxu0  ;;  %vm13172_vm2 = vmmov %vm13165_vm1 }
 0x2bb   :  { %v10140_v42 = vpop.f32.mrb[41].mxu0  ;;  %v2325_v38 = vsel %vm13164_vm4, %v2289_v18, %v1847_v41  ;;  %v4227_v54 = vsel %vm10101_vm13, %v10132_v16, 0.0  ;;  %vm13174_vm4 = vcmask 171008   ;;  %vm13176_vm13 = vcmask 195584  }
 0x2bc   :  { %v1849_v62 = vpop.permute.xlu1 %1848  ;;  %v4225_v20 = vsel %vm10105_vm3, %v10140_v42, 0.0  ;;  %v10151_v58 = vpop.f32.mrb[42].mxu0 }
 0x2bd   :  { %v2327_v47 = vsel %vm13163_vm7, %v2291_v50, %v1849_v62  ;;  %v4337_v10 = vsel %vm13165_vm1, %v4225_v20, 0.0  ;;  %v10160_v8 = vpop.f32.mrb[43].mxu0  ;;  %vm13173_vm7 = vmmov %vm13171_vm6 }
 0x2be   :  { %v1923_v39 = vpop.permute.xlu0 %1922  ;;  %v4338_v45 = vadd.f32 %v4337_v10, %v10057_v2  ;;  %v4226_v50 = vsel %vm10111_vm14, %v10160_v8, 0.0  ;;  %v4341_v10 = vsel %vm13165_vm1, %v4227_v54, 0.0  ;;  %v3462_v54 = vshrl.u32 %v10144_v28, 4 }
 0x2bf   :  { %v2361_v62 = vsel %vm13170_vm8, %v2325_v38, %v1923_v39  ;;  %v4339_v61 = vsel %vm13172_vm2, %v4226_v50, 0.0  ;;  %vm13177_vm8 = vmmov %vm13176_vm13  ;;  %vm13179_vm2 = vcmask 220160   ;;  %v3473_v50 = vshrl.u32 %v10117_v7, 4 }
 0x2c0   :  { %v1925_v29 = vpop.permute.xlu1 %1924 }
 0x2c1   :  { %v2363_v31 = vsel %vm13169_vm15, %v2327_v47, %v1925_v29  ;;  %v4228_v29 = vsel %vm10156_vm0, %v10151_v58, 0.0  ;;  %v4340_v47 = vadd.f32 %v4339_v61, %v4338_v45  ;;  %vm13175_vm15 = vmmov %vm13174_vm4  ;;  %v3463_v61 = vmul.u32 18, %v3462_v54 }
 0x2c2   :  { %v13192_v54 = vmov 0 }
 0x2c4   :  { %v1978_v30 = vpop.permute.xlu1 %1977 }
 0x2c5   :  { %v2399_v41 = vsel %vm13171_vm6, %v2363_v31, %v1978_v30  ;;  %v4342_v30 = vadd.f32 %v4341_v10, %v4340_v47  ;;  %vm13178_vm6 = vmmov %vm13165_vm1 }
 0x2c6   :  { %v1976_v63 = vpop.permute.xlu0 %1975 }
 0x2c7   :  { %v2397_v18 = vsel %vm13173_vm7, %v2361_v62, %v1976_v63  ;;  %v4343_v63 = vsel %vm13178_vm6, %v4228_v29, 0.0  ;;  %vm13180_vm7 = vmmov %vm13179_vm2  ;;  %v3484_v62 = vshrl.u32 %v10136_v1, 4 }
 0x2c8   :  { %v2107_v19 = vpop.permute.xlu1 %2106  ;;  %v4344_v45 = vadd.f32 %v4343_v63, %v4342_v30  ;;  %v2938_v30 = vadd.s32 392, %v7604_v48 }
 0x2c9   :  { %v2435_v20 = vsel %vm13174_vm4, %v2399_v41, %v2107_v19  ;;  %v3451_v19 = vshrl.u32 %v10121_v26, 4  ;;  %v3474_v41 = vmul.u32 18, %v3473_v50 }
 0x2ca   :  { %v2105_v56 = vpop.permute.xlu0 %2104 }
 0x2cb   :  { %v2433_v13 = vsel %vm13175_vm15, %v2397_v18, %v2105_v56  ;;  %v3452_v56 = vmul.u32 18, %v3451_v19  ;;  %v3485_v18 = vmul.u32 18, %v3484_v62  ;;  %v3475_v29 = vsub.s32 %v10090_v37, %v3474_v41 }
 0x2cc   :  { %v2183_v2 = vpop.permute.xlu1 %2182  ;;  %v13189_v19 = vmov 0 }
 0x2cd   :  { %v2471_v39 = vsel %vm13176_vm13, %v2435_v20, %v2183_v2  ;;  %v3464_v20 = vsub.s32 %v10099_v57, %v3463_v61  ;;  %v3486_v26 = vsub.s32 %v10096_v36, %v3485_v18  ;;  %vm3799_vm1 = vcmp.ne.s32.totalorder %v3475_v29, 0 }
 0x2ce   :  { %v2181_v38 = vpop.permute.xlu0 %2180  ;;  %vm3871_vm15 = vcmp.lt.s32.totalorder %v3475_v29, 0  ;;  %v2939_v36 = vadd.s32 400, %v7604_v48 }
 0x2cf   :  { %v2469_v31 = vsel %vm13177_vm8, %v2433_v13, %v2181_v38  ;;  %v3453_v13 = vsub.s32 %v10093_v40, %v3452_v56  ;;  %vm3798_vm8 = vcmp.ne.s32.totalorder %v3464_v20, 0  ;;  %vm3870_vm6 = vcmp.lt.s32.totalorder %v3464_v20, 0 }
 0x2d0   :  { %5931 = vmatprep.mubr.msk.bf16.mxu1 %vm13179_vm2, %v2469_v31  ;;  %v4015_v40 = vadd.s32 18, %v3475_v29  ;;  %vm3800_vm0 = vcmp.ne.s32.totalorder %v3486_v26, 0  ;;  %vm3872_vm14 = vcmp.lt.s32.totalorder %v3486_v26, 0  ;;  %v4014_v37 = vadd.s32 18, %v3464_v20  ;;  %vm3942_vm3 = vmand %vm3870_vm6, %vm3798_vm8 }
 0x2d1   :  { %5932 = vmatmul.mubr.msk.bf16.gmra.mrb[24].mxu1 %vm13180_vm7, %v2471_v39  ;;  %vm3797_vm13 = vcmp.ne.s32.totalorder %v3453_v13, 0  ;;  %vm3869_vm4 = vcmp.lt.s32.totalorder %v3453_v13, 0  ;;  %v4013_v7 = vadd.s32 18, %v3453_v13  ;;  %vm10193_vm7 = vmand %vm3871_vm15, %vm3799_vm1  ;;  %v4016_v28 = vadd.s32 18, %v3486_v26 }
 0x2d2   :  { %vm3941_vm2 = vmand %vm3869_vm4, %vm3797_vm13  ;;  %v4087_v2 = vsel %vm10193_vm7, %v4015_v40, %v3475_v29  ;;  %v4086_v10 = vsel %vm3942_vm3, %v4014_v37, %v3464_v20  ;;  %v2937_v39 = vadd.s32 384, %v7604_v48  ;;  %v13185_v38 = vmov 0 }
 0x2d3   :  { %v4085_v57 = vsel %vm3941_vm2, %v4013_v7, %v3453_v13  ;;  %vm10197_vm10 = vmand %vm3872_vm14, %vm3800_vm0  ;;  %vm10214_vm14 = vcmp.lt.s32.totalorder %v4087_v2, 16  ;;  %vm10220_vm3 = vcmp.lt.s32.totalorder %v4086_v10, 16  ;;  %v2940_v29 = vadd.s32 408, %v7604_v48 }
 0x2d4   :  { %vm10205_vm13 = vcmp.lt.s32.totalorder %v4085_v57, 16  ;;  %v4088_v63 = vsel %vm10197_vm10, %v4016_v28, %v3486_v26  ;;  %v13190_v19 = vsel %vm10214_vm14, 4294967295, %v13189_v19  ;;  %v13193_v54 = vsel %vm10220_vm3, 4294967295, %v13192_v54 }
 0x2d5   :  { %v13186_v38 = vsel %vm10205_vm13, 4294967295, %v13185_v38  ;;  %13191 = vst [vmem:[#allocation66_spill] sm:$0xff] %v13190_v19  ;;  %13194 = vst [vmem:[#allocation67_spill] sm:$0xff] %v13193_v54  ;;  %v10224_v56 = vmul.u32.u64.low 3817748708, %v2939_v36  ;;  %v10225_v62 = vmul.u32.u64.high 3817748708, %v2939_v36, %v10224_v56  ;;  %vm13196_vm10 = vcmask 523264  }
 0x2d6   :  { %13187 = vst [vmem:[#allocation64_spill] sm:$0xff] %v13186_v38  ;;  %v10232_v13 = vmul.u32.u64.low 3817748708, %v2937_v39  ;;  %v10233_v18 = vmul.u32.u64.high 3817748708, %v2937_v39, %v10232_v13  ;;  %vm10237_vm0 = vcmp.lt.s32.totalorder %v4088_v63, 16  ;;  %v13197_v26 = vmov 0  ;;  %vm13201_vm4 = vmmov %vm13196_vm10 }
 0x2d7   :  { %v13198_v26 = vsel %vm10237_vm0, 4294967295, %v13197_v26  ;;  %v10243_v1 = vmul.u32.u64.low 3817748708, %v2938_v30  ;;  %v10244_v40 = vmul.u32.u64.high 3817748708, %v2938_v30, %v10243_v1  ;;  %vm13202_vm1 = vmmov %vm13201_vm4  ;;  %v3517_v19 = vshrl.u32 %v10225_v62, 4 }
 0x2d8   :  { %13199 = vst [vmem:[#allocation69_spill] sm:$0xff] %v13198_v26  ;;  %v10256_v63 = vmul.u32.u64.low 3817748708, %v2940_v29  ;;  %v10257_v56 = vmul.u32.u64.high 3817748708, %v2940_v29, %v10256_v63  ;;  %vm13203_vm15 = vmmov %vm13202_vm1  ;;  %v13221_v62 = vmov 0 }
 0x2d9   :  { %v3518_v38 = vmul.u32 18, %v3517_v19 }
 0x2da   :  { %v3528_v26 = vshrl.u32 %v10257_v56, 4 }
 0x2db   :  { %v3519_v63 = vsub.s32 %v2939_v36, %v3518_v38 }
 0x2dc   :  { %v3529_v15 = vmul.u32 18, %v3528_v26  ;;  %v13208_v26 = vmov 0 }
 0x2dd   :  { %vm3803_vm2 = vcmp.ne.s32.totalorder %v3519_v63, 0  ;;  %vm3875_vm7 = vcmp.lt.s32.totalorder %v3519_v63, 0 }
 0x2df   :  { %v10210_v31 = vpop.f32.mrb[0].mxu1 }
 0x2e0   :  { %13188 = vst [vmem:[#allocation65_spill] sm:$0xff] %v10210_v31  ;;  %v10218_v50 = vpop.f32.mrb[1].mxu1  ;;  %v4231_v37 = vsel %vm10214_vm14, %v10210_v31, 0.0 }
 0x2e1   :  { %v4229_v41 = vsel %vm10205_vm13, %v10218_v50, 0.0  ;;  %v10230_v61 = vpop.f32.mrb[2].mxu1 }
 0x2e2   :  { %13195 = vst [vmem:[#allocation68_spill] sm:$0xff] %v10230_v61  ;;  %v4345_v20 = vsel %vm13196_vm10, %v4229_v41, 0.0  ;;  %v10241_v7 = vpop.f32.mrb[3].mxu1  ;;  %v4232_v2 = vsel %vm10237_vm0, %v10230_v61, 0.0  ;;  %v4349_v41 = vsel %vm13202_vm1, %v4231_v37, 0.0  ;;  %v3530_v37 = vsub.s32 %v2940_v29, %v3529_v15 }
 0x2e3   :  { %13200 = vst [vmem:[#allocation70_spill] sm:$0xff] %v10241_v7  ;;  %v4346_v57 = vadd.f32 %v4345_v20, %v4344_v45  ;;  %v4230_v28 = vsel %vm10220_vm3, %v10241_v7, 0.0  ;;  %v4351_v1 = vsel %vm13203_vm15, %v4232_v2, 0.0  ;;  %v3495_v45 = vshrl.u32 %v10233_v18, 4  ;;  %vm10265_vm15 = vmand %vm3875_vm7, %vm3803_vm2 }
 0x2e4   :  { %v4347_v47 = vsel %vm13201_vm4, %v4230_v28, 0.0  ;;  %v3506_v28 = vshrl.u32 %v10244_v40, 4  ;;  %v4019_v40 = vadd.s32 18, %v3519_v63  ;;  %vm3804_vm0 = vcmp.ne.s32.totalorder %v3530_v37, 0 }
 0x2e5   :  { %v4348_v10 = vadd.f32 %v4347_v47, %v4346_v57  ;;  %v3496_v54 = vmul.u32 18, %v3495_v45  ;;  %vm3876_vm14 = vcmp.lt.s32.totalorder %v3530_v37, 0  ;;  %v4020_v38 = vadd.s32 18, %v3530_v37 }
 0x2e6   :  { %v3507_v57 = vmul.u32 18, %v3506_v28  ;;  %vm10269_vm13 = vmand %vm3876_vm14, %vm3804_vm0  ;;  %v2943_v15 = vadd.s32 432, %v7604_v48  ;;  %v4091_v19 = vsel %vm10265_vm15, %v4019_v40, %v3519_v63  ;;  %v2941_v29 = vadd.s32 416, %v7604_v48 }
 0x2e7   :  { %v4350_v13 = vadd.f32 %v4349_v41, %v4348_v10  ;;  %v3497_v47 = vsub.s32 %v2937_v39, %v3496_v54  ;;  %v2942_v2 = vadd.s32 424, %v7604_v48  ;;  %v4092_v56 = vsel %vm10269_vm13, %v4020_v38, %v3530_v37 }
 0x2e8   :  { %v3508_v24 = vsub.s32 %v2938_v30, %v3507_v57  ;;  %vm10286_vm14 = vcmp.lt.s32.totalorder %v4091_v19, 16  ;;  %v13212_v41 = vmov 0  ;;  %v2944_v37 = vadd.s32 440, %v7604_v48 }
 0x2e9   :  { %v4352_v20 = vadd.f32 %v4351_v1, %v4350_v13  ;;  %vm3801_vm8 = vcmp.ne.s32.totalorder %v3497_v47, 0  ;;  %vm3873_vm6 = vcmp.lt.s32.totalorder %v3497_v47, 0  ;;  %v4017_v18 = vadd.s32 18, %v3497_v47 }
 0x2ea   :  { %vm3802_vm10 = vcmp.ne.s32.totalorder %v3508_v24, 0  ;;  %vm3874_vm4 = vcmp.lt.s32.totalorder %v3508_v24, 0  ;;  %vm3945_vm1 = vmand %vm3873_vm6, %vm3801_vm8  ;;  %v4018_v39 = vadd.s32 18, %v3508_v24  ;;  %v13213_v41 = vsel %vm10286_vm14, 4294967295, %v13212_v41 }
 0x2eb   :  { %vm3946_vm3 = vmand %vm3874_vm4, %vm3802_vm10  ;;  %v4089_v36 = vsel %vm3945_vm1, %v4017_v18, %v3497_v47  ;;  %13214 = vst [vmem:[#allocation73_spill] sm:$0xff] %v13213_v41  ;;  %v10296_v1 = vmul.u32.u64.low 3817748708, %v2943_v15  ;;  %v10297_v45 = vmul.u32.u64.high 3817748708, %v2943_v15, %v10296_v1  ;;  %vm13220_vm13 = vcmask 523264  }
 0x2ec   :  { %v4090_v54 = vsel %vm3946_vm3, %v4018_v39, %v3508_v24  ;;  %vm10277_vm8 = vcmp.lt.s32.totalorder %v4089_v36, 16  ;;  %v13216_v24 = vmov 0  ;;  %vm10309_vm0 = vcmp.lt.s32.totalorder %v4092_v56, 16  ;;  %vm13225_vm6 = vmmov %vm13220_vm13 }
 0x2ed   :  { %v13209_v26 = vsel %vm10277_vm8, 4294967295, %v13208_v26  ;;  %vm10292_vm3 = vcmp.lt.s32.totalorder %v4090_v54, 16  ;;  %v10304_v47 = vmul.u32.u64.low 3817748708, %v2941_v29  ;;  %v10305_v63 = vmul.u32.u64.high 3817748708, %v2941_v29, %v10304_v47  ;;  %vm13226_vm2 = vmmov %vm13225_vm6 }
 0x2ee   :  { %13210 = vst [vmem:[#allocation71_spill] sm:$0xff] %v13209_v26  ;;  %v13217_v24 = vsel %vm10292_vm3, 4294967295, %v13216_v24  ;;  %v13222_v62 = vsel %vm10309_vm0, 4294967295, %v13221_v62  ;;  %v10315_v39 = vmul.u32.u64.low 3817748708, %v2942_v2  ;;  %v10316_v36 = vmul.u32.u64.high 3817748708, %v2942_v2, %v10315_v39  ;;  %vm13227_vm7 = vmmov %vm13226_vm2 }
 0x2ef   :  { %13218 = vst [vmem:[#allocation75_spill] sm:$0xff] %v13217_v24  ;;  %13223 = vst [vmem:[#allocation77_spill] sm:$0xff] %v13222_v62  ;;  %v3561_v24 = vshrl.u32 %v10297_v45, 4  ;;  %v2945_v45 = vadd.s32 448, %v7604_v48 }
 0x2f1   :  { %v3562_v60 = vmul.u32 18, %v3561_v24 }
 0x303   :  { %v10282_v10 = vpop.f32.mrb[4].mxu1 }
 0x304   :  { %13211 = vst [vmem:[#allocation72_spill] sm:$0xff] %v10282_v10  ;;  %v10290_v13 = vpop.f32.mrb[5].mxu1  ;;  %v4235_v38 = vsel %vm10286_vm14, %v10282_v10, 0.0 }
 0x305   :  { %13215 = vst [vmem:[#allocation74_spill] sm:$0xff] %v10290_v13  ;;  %v4233_v28 = vsel %vm10277_vm8, %v10290_v13, 0.0  ;;  %v10302_v57 = vpop.f32.mrb[6].mxu1  ;;  %v4357_v39 = vsel %vm13226_vm2, %v4235_v38, 0.0 }
 0x306   :  { %13219 = vst [vmem:[#allocation76_spill] sm:$0xff] %v10302_v57  ;;  %v4353_v18 = vsel %vm13220_vm13, %v4233_v28, 0.0  ;;  %v10313_v40 = vpop.f32.mrb[7].mxu1  ;;  %v4236_v56 = vsel %vm10309_vm0, %v10302_v57, 0.0  ;;  %v10328_v28 = vmul.u32.u64.low 3817748708, %v2944_v37  ;;  %v10329_v47 = vmul.u32.u64.high 3817748708, %v2944_v37, %v10328_v28 }
 0x307   :  { %13224 = vst [vmem:[#allocation78_spill] sm:$0xff] %v10313_v40  ;;  %v4354_v30 = vadd.f32 %v4353_v18, %v4352_v20  ;;  %v4234_v19 = vsel %vm10292_vm3, %v10313_v40, 0.0  ;;  %v4359_v41 = vsel %vm13227_vm7, %v4236_v56, 0.0  ;;  %v3539_v20 = vshrl.u32 %v10305_v63, 4  ;;  %v13384_v57 = vld [vmem:[#allocation7_spill] sm:$0xff] }
 0x308   :  { %v4355_v54 = vsel %vm13225_vm6, %v4234_v19, 0.0  ;;  %v3550_v19 = vshrl.u32 %v10316_v36, 4  ;;  %v3572_v62 = vshrl.u32 %v10329_v47, 4  ;;  %v3563_v28 = vsub.s32 %v2943_v15, %v3562_v60 }
 0x309   :  { %v4356_v1 = vadd.f32 %v4355_v54, %v4354_v30  ;;  %v3540_v35 = vmul.u32 18, %v3539_v20 }
 0x30a   :  { %v3551_v30 = vmul.u32 18, %v3550_v19  ;;  %v3573_v49 = vmul.u32 18, %v3572_v62  ;;  %vm3807_vm1 = vcmp.ne.s32.totalorder %v3563_v28, 0  ;;  %vm3879_vm15 = vcmp.lt.s32.totalorder %v3563_v28, 0 }
 0x30b   :  { %v4358_v26 = vadd.f32 %v4357_v39, %v4356_v1  ;;  %v3541_v54 = vsub.s32 %v2941_v29, %v3540_v35  ;;  %vm10337_vm7 = vmand %vm3879_vm15, %vm3807_vm1  ;;  %v2946_v62 = vadd.s32 456, %v7604_v48  ;;  %v13236_v1 = vmov 0 }
 0x30c   :  { %v3552_v33 = vsub.s32 %v2942_v2, %v3551_v30  ;;  %v3574_v38 = vsub.s32 %v2944_v37, %v3573_v49  ;;  %v2947_v49 = vadd.s32 464, %v7604_v48  ;;  %v13232_v37 = vmov 0 }
 0x30d   :  { %v4360_v18 = vadd.f32 %v4359_v41, %v4358_v26  ;;  %vm3805_vm10 = vcmp.ne.s32.totalorder %v3541_v54, 0  ;;  %vm3877_vm4 = vcmp.lt.s32.totalorder %v3541_v54, 0  ;;  %v4021_v63 = vadd.s32 18, %v3541_v54 }
 0x30e   :  { %vm3806_vm13 = vcmp.ne.s32.totalorder %v3552_v33, 0  ;;  %vm3878_vm6 = vcmp.lt.s32.totalorder %v3552_v33, 0  ;;  %vm3949_vm2 = vmand %vm3877_vm4, %vm3805_vm10  ;;  %v4023_v41 = vadd.s32 18, %v3563_v28  ;;  %vm3808_vm0 = vcmp.ne.s32.totalorder %v3574_v38, 0 }
 0x30f   :  { %vm3880_vm14 = vcmp.lt.s32.totalorder %v3574_v38, 0  ;;  %v4022_v35 = vadd.s32 18, %v3552_v33  ;;  %vm3950_vm3 = vmand %vm3878_vm6, %vm3806_vm13  ;;  %v4093_v60 = vsel %vm3949_vm2, %v4021_v63, %v3541_v54  ;;  %v4024_v15 = vadd.s32 18, %v3574_v38 }
 0x310   :  { %vm10341_vm8 = vmand %vm3880_vm14, %vm3808_vm0  ;;  %v4095_v2 = vsel %vm10337_vm7, %v4023_v41, %v3563_v28  ;;  %vm10349_vm10 = vcmp.lt.s32.totalorder %v4093_v60, 16  ;;  %v10368_v39 = vmul.u32.u64.low 3817748708, %v2947_v49  ;;  %v10369_v20 = vmul.u32.u64.high 3817748708, %v2947_v49, %v10368_v39 }
 0x311   :  { %v4094_v24 = vsel %vm3950_vm3, %v4022_v35, %v3552_v33  ;;  %v13233_v37 = vsel %vm10349_vm10, 4294967295, %v13232_v37  ;;  %v4096_v56 = vsel %vm10341_vm8, %v4024_v15, %v3574_v38  ;;  %vm10358_vm14 = vcmp.lt.s32.totalorder %v4095_v2, 16 }
 0x312   :  { %13234 = vst [vmem:[#allocation79_spill] sm:$0xff] %v13233_v37  ;;  %v13237_v1 = vsel %vm10358_vm14, 4294967295, %v13236_v1  ;;  %vm10364_vm3 = vcmp.lt.s32.totalorder %v4094_v24, 16  ;;  %v13240_v33 = vmov 0  ;;  %v2948_v38 = vadd.s32 472, %v7604_v48 }
 0x313   :  { %13238 = vst [vmem:[#allocation81_spill] sm:$0xff] %v13237_v1  ;;  %v13241_v33 = vsel %vm10364_vm3, 4294967295, %v13240_v33  ;;  %v10376_v54 = vmul.u32.u64.low 3817748708, %v2945_v45  ;;  %v10377_v28 = vmul.u32.u64.high 3817748708, %v2945_v45, %v10376_v54  ;;  %vm13244_vm8 = vcmask 523264  }
 0x314   :  { %13242 = vst [vmem:[#allocation83_spill] sm:$0xff] %v13241_v33  ;;  %vm10381_vm0 = vcmp.lt.s32.totalorder %v4096_v56, 16  ;;  %v13245_v26 = vmov 0  ;;  %v10387_v35 = vmul.u32.u64.low 3817748708, %v2946_v62  ;;  %v10388_v60 = vmul.u32.u64.high 3817748708, %v2946_v62, %v10387_v35  ;;  %vm13249_vm4 = vmmov %vm13244_vm8 }
 0x315   :  { %v13246_v26 = vsel %vm10381_vm0, 4294967295, %v13245_v26  ;;  %vm13250_vm1 = vmmov %vm13249_vm4  ;;  %v3605_v33 = vshrl.u32 %v10369_v20, 4 }
 0x316   :  { %13247 = vst [vmem:[#allocation85_spill] sm:$0xff] %v13246_v26  ;;  %vm13251_vm15 = vmmov %vm13250_vm1 }
 0x329   :  { %v10354_v36 = vpop.f32.mrb[8].mxu1 }
 0x32a   :  { %13235 = vst [vmem:[#allocation80_spill] sm:$0xff] %v10354_v36  ;;  %v10362_v47 = vpop.f32.mrb[9].mxu1  ;;  %v4239_v15 = vsel %vm10358_vm14, %v10354_v36, 0.0 }
 0x32b   :  { %13239 = vst [vmem:[#allocation82_spill] sm:$0xff] %v10362_v47  ;;  %v4237_v19 = vsel %vm10349_vm10, %v10362_v47, 0.0  ;;  %v10374_v30 = vpop.f32.mrb[10].mxu1  ;;  %v4365_v35 = vsel %vm13250_vm1, %v4239_v15, 0.0 }
 0x32c   :  { %13243 = vst [vmem:[#allocation84_spill] sm:$0xff] %v10374_v30  ;;  %v4361_v63 = vsel %vm13244_vm8, %v4237_v19, 0.0  ;;  %v10385_v41 = vpop.f32.mrb[11].mxu1  ;;  %v4240_v56 = vsel %vm10381_vm0, %v10374_v30, 0.0  ;;  %v10400_v19 = vmul.u32.u64.low 3817748708, %v2948_v38  ;;  %v10401_v54 = vmul.u32.u64.high 3817748708, %v2948_v38, %v10400_v19 }
 0x32d   :  { %13248 = vst [vmem:[#allocation86_spill] sm:$0xff] %v10385_v41  ;;  %v4362_v29 = vadd.f32 %v4361_v63, %v4360_v18  ;;  %v4238_v2 = vsel %vm10364_vm3, %v10385_v41, 0.0  ;;  %v4367_v1 = vsel %vm13251_vm15, %v4240_v56, 0.0  ;;  %v3583_v18 = vshrl.u32 %v10377_v28, 4 }
 0x32e   :  { %v4363_v24 = vsel %vm13249_vm4, %v4238_v2, 0.0  ;;  %v3594_v2 = vshrl.u32 %v10388_v60, 4  ;;  %v3616_v26 = vshrl.u32 %v10401_v54, 4  ;;  %v3606_v30 = vmul.u32 18, %v3605_v33 }
 0x32f   :  { %v4364_v39 = vadd.f32 %v4363_v24, %v4362_v29  ;;  %v3584_v36 = vmul.u32 18, %v3583_v18  ;;  %v2951_v33 = vadd.s32 496, %v7604_v48 }
 0x330   :  { %v3595_v29 = vmul.u32 18, %v3594_v2  ;;  %v3617_v41 = vmul.u32 18, %v3616_v26  ;;  %v3607_v19 = vsub.s32 %v2947_v49, %v3606_v30  ;;  %v13256_v26 = vmov 0 }
 0x331   :  { %v4366_v37 = vadd.f32 %v4365_v35, %v4364_v39  ;;  %v3585_v24 = vsub.s32 %v2945_v45, %v3584_v36  ;;  %v13260_v39 = vmov 0 }
 0x332   :  { %v3596_v47 = vsub.s32 %v2946_v62, %v3595_v29  ;;  %v3618_v15 = vsub.s32 %v2948_v38, %v3617_v41  ;;  %vm3811_vm2 = vcmp.ne.s32.totalorder %v3607_v19, 0  ;;  %vm3883_vm7 = vcmp.lt.s32.totalorder %v3607_v19, 0 }
 0x333   :  { %v4368_v63 = vadd.f32 %v4367_v1, %v4366_v37  ;;  %vm3809_vm13 = vcmp.ne.s32.totalorder %v3585_v24, 0  ;;  %vm3881_vm6 = vcmp.lt.s32.totalorder %v3585_v24, 0  ;;  %v4025_v28 = vadd.s32 18, %v3585_v24  ;;  %vm10409_vm15 = vmand %vm3883_vm7, %vm3811_vm2 }
 0x334   :  { %vm3810_vm8 = vcmp.ne.s32.totalorder %v3596_v47, 0  ;;  %vm3882_vm4 = vcmp.lt.s32.totalorder %v3596_v47, 0  ;;  %vm3953_vm1 = vmand %vm3881_vm6, %vm3809_vm13  ;;  %v4027_v1 = vadd.s32 18, %v3607_v19  ;;  %vm3812_vm0 = vcmp.ne.s32.totalorder %v3618_v15, 0 }
 0x335   :  { %vm3884_vm14 = vcmp.lt.s32.totalorder %v3618_v15, 0  ;;  %v4026_v45 = vadd.s32 18, %v3596_v47  ;;  %vm3954_vm3 = vmand %vm3882_vm4, %vm3810_vm8  ;;  %v4097_v49 = vsel %vm3953_vm1, %v4025_v28, %v3585_v24  ;;  %v4028_v62 = vadd.s32 18, %v3618_v15 }
 0x336   :  { %vm10413_vm10 = vmand %vm3884_vm14, %vm3812_vm0  ;;  %v4099_v20 = vsel %vm10409_vm15, %v4027_v1, %v3607_v19  ;;  %v2949_v38 = vadd.s32 480, %v7604_v48  ;;  %vm10421_vm13 = vcmp.lt.s32.totalorder %v4097_v49, 16  ;;  %v2950_v41 = vadd.s32 488, %v7604_v48 }
 0x337   :  { %v4098_v30 = vsel %vm3954_vm3, %v4026_v45, %v3596_v47  ;;  %v13257_v26 = vsel %vm10421_vm13, 4294967295, %v13256_v26  ;;  %v4100_v56 = vsel %vm10413_vm10, %v4028_v62, %v3618_v15  ;;  %vm10430_vm14 = vcmp.lt.s32.totalorder %v4099_v20, 16 }
 0x338   :  { %13258 = vst [vmem:[#allocation87_spill] sm:$0xff] %v13257_v26  ;;  %v13261_v39 = vsel %vm10430_vm14, 4294967295, %v13260_v39  ;;  %vm10436_vm3 = vcmp.lt.s32.totalorder %v4098_v30, 16  ;;  %v13264_v47 = vmov 0  ;;  %v2952_v15 = vadd.s32 504, %v7604_v48 }
 0x339   :  { %13262 = vst [vmem:[#allocation89_spill] sm:$0xff] %v13261_v39  ;;  %v13265_v47 = vsel %vm10436_vm3, 4294967295, %v13264_v47  ;;  %v10440_v35 = vmul.u32.u64.low 3817748708, %v2951_v33  ;;  %v10441_v18 = vmul.u32.u64.high 3817748708, %v2951_v33, %v10440_v35  ;;  %vm13268_vm10 = vcmask 523264  }
 0x33a   :  { %13266 = vst [vmem:[#allocation91_spill] sm:$0xff] %v13265_v47  ;;  %v10448_v24 = vmul.u32.u64.low 3817748708, %v2949_v38  ;;  %v10449_v19 = vmul.u32.u64.high 3817748708, %v2949_v38, %v10448_v24  ;;  %vm10453_vm0 = vcmp.lt.s32.totalorder %v4100_v56, 16  ;;  %v13269_v37 = vmov 0  ;;  %vm13273_vm6 = vmmov %vm13268_vm10 }
 0x33b   :  { %v13270_v37 = vsel %vm10453_vm0, 4294967295, %v13269_v37  ;;  %v10459_v45 = vmul.u32.u64.low 3817748708, %v2950_v41  ;;  %v10460_v49 = vmul.u32.u64.high 3817748708, %v2950_v41, %v10459_v45  ;;  %vm13274_vm2 = vmmov %vm13273_vm6  ;;  %v3649_v47 = vshrl.u32 %v10441_v18, 4 }
 0x33c   :  { %13271 = vst [vmem:[#allocation93_spill] sm:$0xff] %v13270_v37  ;;  %vm13275_vm7 = vmmov %vm13274_vm2 }
 0x344   :  { %v10426_v60 = vpop.f32.mrb[12].mxu1 }
 0x345   :  { %13259 = vst [vmem:[#allocation88_spill] sm:$0xff] %v10426_v60  ;;  %v10434_v54 = vpop.f32.mrb[13].mxu1  ;;  %v4243_v62 = vsel %vm10430_vm14, %v10426_v60, 0.0 }
 0x346   :  { %13263 = vst [vmem:[#allocation90_spill] sm:$0xff] %v10434_v54  ;;  %v4241_v2 = vsel %vm10421_vm13, %v10434_v54, 0.0  ;;  %v10446_v29 = vpop.f32.mrb[14].mxu1  ;;  %v4373_v45 = vsel %vm13274_vm2, %v4243_v62, 0.0 }
 0x347   :  { %13267 = vst [vmem:[#allocation92_spill] sm:$0xff] %v10446_v29  ;;  %v4369_v28 = vsel %vm13268_vm10, %v4241_v2, 0.0  ;;  %v10457_v1 = vpop.f32.mrb[15].mxu1  ;;  %v4244_v56 = vsel %vm10453_vm0, %v10446_v29, 0.0  ;;  %v10472_v2 = vmul.u32.u64.low 3817748708, %v2952_v15  ;;  %v10473_v24 = vmul.u32.u64.high 3817748708, %v2952_v15, %v10472_v2 }
 0x348   :  { %13272 = vst [vmem:[#allocation94_spill] sm:$0xff] %v10457_v1  ;;  %v4370_v36 = vadd.f32 %v4369_v28, %v4368_v63  ;;  %v4242_v20 = vsel %vm10436_vm3, %v10457_v1, 0.0  ;;  %v4375_v39 = vsel %vm13275_vm7, %v4244_v56, 0.0  ;;  %v3627_v63 = vshrl.u32 %v10449_v19, 4 }
 0x349   :  { %v4371_v30 = vsel %vm13273_vm6, %v4242_v20, 0.0  ;;  %v3638_v20 = vshrl.u32 %v10460_v49, 4  ;;  %v3660_v37 = vshrl.u32 %v10473_v24, 4  ;;  %v3650_v29 = vmul.u32 18, %v3649_v47 }
 0x34a   :  { %v4372_v35 = vadd.f32 %v4371_v30, %v4370_v36  ;;  %v3628_v60 = vmul.u32 18, %v3627_v63  ;;  %v2955_v47 = vadd.s32 528, %v7604_v48 }
 0x34b   :  { %v3639_v36 = vmul.u32 18, %v3638_v20  ;;  %v3661_v1 = vmul.u32 18, %v3660_v37  ;;  %v3651_v2 = vsub.s32 %v2951_v33, %v3650_v29  ;;  %v13280_v37 = vmov 0 }
 0x34c   :  { %v4374_v26 = vadd.f32 %v4373_v45, %v4372_v35  ;;  %v3629_v30 = vsub.s32 %v2949_v38, %v3628_v60  ;;  %v13284_v35 = vmov 0 }
 0x34d   :  { %v3640_v54 = vsub.s32 %v2950_v41, %v3639_v36  ;;  %v3662_v62 = vsub.s32 %v2952_v15, %v3661_v1  ;;  %vm3815_vm1 = vcmp.ne.s32.totalorder %v3651_v2, 0  ;;  %vm3887_vm15 = vcmp.lt.s32.totalorder %v3651_v2, 0 }
 0x34e   :  { %v4376_v28 = vadd.f32 %v4375_v39, %v4374_v26  ;;  %vm3813_vm8 = vcmp.ne.s32.totalorder %v3629_v30, 0  ;;  %vm3885_vm4 = vcmp.lt.s32.totalorder %v3629_v30, 0  ;;  %v4029_v19 = vadd.s32 18, %v3629_v30  ;;  %vm10481_vm7 = vmand %vm3887_vm15, %vm3815_vm1 }
 0x34f   :  { %vm3814_vm10 = vcmp.ne.s32.totalorder %v3640_v54, 0  ;;  %vm3886_vm6 = vcmp.lt.s32.totalorder %v3640_v54, 0  ;;  %vm3957_vm2 = vmand %vm3885_vm4, %vm3813_vm8  ;;  %v4031_v39 = vadd.s32 18, %v3651_v2  ;;  %vm3816_vm0 = vcmp.ne.s32.totalorder %v3662_v62, 0 }
 0x350   :  { %vm3888_vm14 = vcmp.lt.s32.totalorder %v3662_v62, 0  ;;  %v4030_v38 = vadd.s32 18, %v3640_v54  ;;  %vm3958_vm3 = vmand %vm3886_vm6, %vm3814_vm10  ;;  %v4101_v33 = vsel %vm3957_vm2, %v4029_v19, %v3629_v30  ;;  %v4032_v41 = vadd.s32 18, %v3662_v62 }
 0x351   :  { %vm10485_vm13 = vmand %vm3888_vm14, %vm3816_vm0  ;;  %v4103_v18 = vsel %vm10481_vm7, %v4031_v39, %v3651_v2  ;;  %v2953_v15 = vadd.s32 512, %v7604_v48  ;;  %vm10493_vm8 = vcmp.lt.s32.totalorder %v4101_v33, 16  ;;  %v2954_v1 = vadd.s32 520, %v7604_v48 }
 0x352   :  { %v4102_v29 = vsel %vm3958_vm3, %v4030_v38, %v3640_v54  ;;  %v13281_v37 = vsel %vm10493_vm8, 4294967295, %v13280_v37  ;;  %v4104_v56 = vsel %vm10485_vm13, %v4032_v41, %v3662_v62  ;;  %vm10502_vm14 = vcmp.lt.s32.totalorder %v4103_v18, 16 }
 0x353   :  { %13282 = vst [vmem:[#allocation95_spill] sm:$0xff] %v13281_v37  ;;  %v13285_v35 = vsel %vm10502_vm14, 4294967295, %v13284_v35  ;;  %vm10508_vm3 = vcmp.lt.s32.totalorder %v4102_v29, 16  ;;  %v13288_v54 = vmov 0  ;;  %v2956_v62 = vadd.s32 536, %v7604_v48 }
 0x354   :  { %13286 = vst [vmem:[#allocation97_spill] sm:$0xff] %v13285_v35  ;;  %v13289_v54 = vsel %vm10508_vm3, 4294967295, %v13288_v54  ;;  %v10512_v45 = vmul.u32.u64.low 3817748708, %v2955_v47  ;;  %v10513_v63 = vmul.u32.u64.high 3817748708, %v2955_v47, %v10512_v45  ;;  %vm13292_vm13 = vcmask 523264  }
 0x355   :  { %13290 = vst [vmem:[#allocation99_spill] sm:$0xff] %v13289_v54  ;;  %v10520_v30 = vmul.u32.u64.low 3817748708, %v2953_v15  ;;  %v10521_v2 = vmul.u32.u64.high 3817748708, %v2953_v15, %v10520_v30  ;;  %vm10525_vm0 = vcmp.lt.s32.totalorder %v4104_v56, 16  ;;  %v13293_v26 = vmov 0  ;;  %vm13297_vm4 = vmmov %vm13292_vm13 }
 0x356   :  { %v13294_v26 = vsel %vm10525_vm0, 4294967295, %v13293_v26  ;;  %v10531_v38 = vmul.u32.u64.low 3817748708, %v2954_v1  ;;  %v10532_v33 = vmul.u32.u64.high 3817748708, %v2954_v1, %v10531_v38  ;;  %vm13298_vm1 = vmmov %vm13297_vm4  ;;  %v3693_v54 = vshrl.u32 %v10513_v63, 4 }
 0x357   :  { %13295 = vst [vmem:[#allocation101_spill] sm:$0xff] %v13294_v26  ;;  %vm13299_vm15 = vmmov %vm13298_vm1  ;;  %v2959_v63 = vadd.s32 560, %v7604_v48 }
 0x363   :  { %v10498_v49 = vpop.f32.mrb[16].mxu1 }
 0x364   :  { %13283 = vst [vmem:[#allocation96_spill] sm:$0xff] %v10498_v49  ;;  %v10506_v24 = vpop.f32.mrb[17].mxu1  ;;  %v4247_v41 = vsel %vm10502_vm14, %v10498_v49, 0.0 }
 0x365   :  { %13287 = vst [vmem:[#allocation98_spill] sm:$0xff] %v10506_v24  ;;  %v4245_v20 = vsel %vm10493_vm8, %v10506_v24, 0.0  ;;  %v10518_v36 = vpop.f32.mrb[18].mxu1  ;;  %v4381_v38 = vsel %vm13298_vm1, %v4247_v41, 0.0 }
 0x366   :  { %13291 = vst [vmem:[#allocation100_spill] sm:$0xff] %v10518_v36  ;;  %v4377_v19 = vsel %vm13292_vm13, %v4245_v20, 0.0  ;;  %v10529_v39 = vpop.f32.mrb[19].mxu1  ;;  %v4248_v56 = vsel %vm10525_vm0, %v10518_v36, 0.0  ;;  %v10544_v20 = vmul.u32.u64.low 3817748708, %v2956_v62  ;;  %v10545_v30 = vmul.u32.u64.high 3817748708, %v2956_v62, %v10544_v20 }
 0x367   :  { %13296 = vst [vmem:[#allocation102_spill] sm:$0xff] %v10529_v39  ;;  %v4378_v60 = vadd.f32 %v4377_v19, %v4376_v28  ;;  %v4246_v18 = vsel %vm10508_vm3, %v10529_v39, 0.0  ;;  %v4383_v35 = vsel %vm13299_vm15, %v4248_v56, 0.0  ;;  %v3671_v28 = vshrl.u32 %v10521_v2, 4 }
 0x368   :  { %v4379_v29 = vsel %vm13297_vm4, %v4246_v18, 0.0  ;;  %v3682_v18 = vshrl.u32 %v10532_v33, 4  ;;  %v3704_v26 = vshrl.u32 %v10545_v30, 4  ;;  %v3694_v36 = vmul.u32 18, %v3693_v54 }
 0x369   :  { %v4380_v45 = vadd.f32 %v4379_v29, %v4378_v60  ;;  %v3672_v49 = vmul.u32 18, %v3671_v28  ;;  %v13306_v33 = vmov 0  ;;  %v2960_v30 = vadd.s32 568, %v7604_v48 }
 0x36a   :  { %v3683_v60 = vmul.u32 18, %v3682_v18  ;;  %v3705_v39 = vmul.u32 18, %v3704_v26  ;;  %v3695_v20 = vsub.s32 %v2955_v47, %v3694_v36 }
 0x36b   :  { %v4382_v37 = vadd.f32 %v4381_v38, %v4380_v45  ;;  %v3673_v29 = vsub.s32 %v2953_v15, %v3672_v49  ;;  %v13368_v13 = vld [vmem:[#allocation96_spill] sm:$0xff] }
 0x36c   :  { %v3684_v24 = vsub.s32 %v2954_v1, %v3683_v60  ;;  %v3706_v41 = vsub.s32 %v2956_v62, %v3705_v39  ;;  %vm3819_vm2 = vcmp.ne.s32.totalorder %v3695_v20, 0  ;;  %vm3891_vm7 = vcmp.lt.s32.totalorder %v3695_v20, 0 }
 0x36d   :  { %v4384_v19 = vadd.f32 %v4383_v35, %v4382_v37  ;;  %vm3817_vm10 = vcmp.ne.s32.totalorder %v3673_v29, 0  ;;  %vm3889_vm6 = vcmp.lt.s32.totalorder %v3673_v29, 0  ;;  %v4033_v2 = vadd.s32 18, %v3673_v29  ;;  %vm10553_vm15 = vmand %vm3891_vm7, %vm3819_vm2  ;;  %v13369_v40 = vld [vmem:[#allocation100_spill] sm:$0xff] }
 0x36e   :  { %vm3818_vm13 = vcmp.ne.s32.totalorder %v3684_v24, 0  ;;  %vm3890_vm4 = vcmp.lt.s32.totalorder %v3684_v24, 0  ;;  %vm3961_vm1 = vmand %vm3889_vm6, %vm3817_vm10  ;;  %v4035_v35 = vadd.s32 18, %v3695_v20  ;;  %vm3820_vm0 = vcmp.ne.s32.totalorder %v3706_v41, 0  ;;  %v13367_v61 = vld [vmem:[#allocation102_spill] sm:$0xff] }
 0x36f   :  { %vm3892_vm14 = vcmp.lt.s32.totalorder %v3706_v41, 0  ;;  %v4034_v15 = vadd.s32 18, %v3684_v24  ;;  %vm10557_vm3 = vmand %vm3890_vm4, %vm3818_vm13  ;;  %v2957_v1 = vadd.s32 544, %v7604_v48  ;;  %v4105_v49 = vsel %vm3961_vm1, %v4033_v2, %v3673_v29 }
 0x370   :  { %v4036_v54 = vadd.s32 18, %v3706_v41  ;;  %vm10563_vm8 = vmand %vm3892_vm14, %vm3820_vm0  ;;  %v2958_v62 = vadd.s32 552, %v7604_v48  ;;  %v4107_v26 = vsel %vm10553_vm15, %v4035_v35, %v3695_v20  ;;  %vm10572_vm10 = vcmp.lt.s32.totalorder %v4105_v49, 16 }
 0x371   :  { %v4106_v39 = vsel %vm10557_vm3, %v4034_v15, %v3684_v24  ;;  %v13307_v33 = vsel %vm10572_vm10, 4294967295, %v13306_v33  ;;  %v10576_v56 = vmul.u32.u64.low 3817748708, %v2957_v1  ;;  %v10577_v45 = vmul.u32.u64.high 3817748708, %v2957_v1, %v10576_v56 }
 0x372   :  { %13308 = vst [vmem:[#allocation103_spill] sm:$0xff] %v13307_v33  ;;  %v4108_v28 = vsel %vm10563_vm8, %v4036_v54, %v3706_v41  ;;  %v10584_v18 = vmul.u32.u64.low 3817748708, %v2959_v63  ;;  %v10585_v60 = vmul.u32.u64.high 3817748708, %v2959_v63, %v10584_v18  ;;  %vm10587_vm14 = vcmp.lt.s32.totalorder %v4107_v26, 16 }
 0x373   :  { %v13310_v29 = vmov 0  ;;  %vm10593_vm3 = vcmp.lt.s32.totalorder %v4106_v39, 16  ;;  %v13313_v20 = vmov 0  ;;  %vm13317_vm8 = vcmask 523264  }
 0x374   :  { %v13311_v29 = vsel %vm10587_vm14, 4294967295, %v13310_v29  ;;  %v13314_v20 = vsel %vm10593_vm3, 4294967295, %v13313_v20  ;;  %v10597_v2 = vmul.u32.u64.low 3817748708, %v2958_v62  ;;  %v10598_v48 = vmul.u32.u64.high 3817748708, %v2958_v62, %v10597_v2  ;;  %vm13322_vm6 = vmmov %vm13317_vm8 }
 0x375   :  { %13312 = vst [vmem:[#allocation105_spill] sm:$0xff] %v13311_v29  ;;  %13315 = vst [vmem:[#allocation106_spill] sm:$0xff] %v13314_v20  ;;  %vm10606_vm0 = vcmp.lt.s32.totalorder %v4108_v28, 16  ;;  %v13318_v15 = vmov 0  ;;  %v10612_v49 = vmul.u32.u64.low 3817748708, %v2960_v30  ;;  %v10613_v54 = vmul.u32.u64.high 3817748708, %v2960_v30, %v10612_v49 }
 0x376   :  { %v13319_v15 = vsel %vm10606_vm0, 4294967295, %v13318_v15  ;;  %vm13323_vm2 = vmmov %vm13322_vm6  ;;  %v3737_v29 = vshrl.u32 %v10585_v60, 4 }
 0x377   :  { %13320 = vst [vmem:[#allocation108_spill] sm:$0xff] %v13319_v15  ;;  %vm13324_vm7 = vmmov %vm13323_vm2 }
 0x383   :  { %v10580_v38 = vpop.f32.mrb[20].mxu1 }
 0x384   :  { %13309 = vst [vmem:[#allocation104_spill] sm:$0xff] %v10580_v38  ;;  %v10591_v24 = vpop.f32.mrb[21].mxu1  ;;  %v4251_v36 = vsel %vm10587_vm14, %v10580_v38, 0.0  ;;  %v3738_v38 = vmul.u32 18, %v3737_v29 }
 0x385   :  { %v4249_v41 = vsel %vm10572_vm10, %v10591_v24, 0.0  ;;  %v10603_v37 = vpop.f32.mrb[22].mxu1  ;;  %v4389_v2 = vsel %vm13323_vm2, %v4251_v36, 0.0  ;;  %v13332_v36 = vmov 0 }
 0x386   :  { %13316 = vst [vmem:[#allocation107_spill] sm:$0xff] %v10603_v37  ;;  %v4385_v35 = vsel %vm13317_vm8, %v4249_v41, 0.0  ;;  %v10610_v47 = vpop.f32.mrb[23].mxu1  ;;  %v4252_v28 = vsel %vm10606_vm0, %v10603_v37, 0.0  ;;  %v3715_v41 = vshrl.u32 %v10577_v45, 4 }
 0x387   :  { %13321 = vst [vmem:[#allocation109_spill] sm:$0xff] %v10610_v47  ;;  %v4386_v26 = vadd.f32 %v4385_v35, %v4384_v19  ;;  %v4250_v39 = vsel %vm10593_vm3, %v10610_v47, 0.0  ;;  %v4391_v19 = vsel %vm13324_vm7, %v4252_v28, 0.0  ;;  %v3726_v35 = vshrl.u32 %v10598_v48, 4 }
 0x388   :  { %v4387_v56 = vsel %vm13322_vm6, %v4250_v39, 0.0  ;;  %v3716_v33 = vmul.u32 18, %v3715_v41  ;;  %v3748_v39 = vshrl.u32 %v10613_v54, 4 }
 0x389   :  { %v4388_v18 = vadd.f32 %v4387_v56, %v4386_v26  ;;  %v3727_v47 = vmul.u32 18, %v3726_v35  ;;  %v3739_v26 = vsub.s32 %v2959_v63, %v3738_v38 }
 0x38a   :  { %v3717_v15 = vsub.s32 %v2957_v1, %v3716_v33  ;;  %v3749_v37 = vmul.u32 18, %v3748_v39  ;;  %v13325_v33 = vmov 0 }
 0x38b   :  { %v4390_v49 = vadd.f32 %v4389_v2, %v4388_v18  ;;  %v3728_v56 = vsub.s32 %v2958_v62, %v3727_v47  ;;  %vm3823_vm1 = vcmp.ne.s32.totalorder %v3739_v26, 0  ;;  %vm3895_vm15 = vcmp.lt.s32.totalorder %v3739_v26, 0 }
 0x38c   :  { %vm3821_vm13 = vcmp.ne.s32.totalorder %v3717_v15, 0  ;;  %vm3893_vm4 = vcmp.lt.s32.totalorder %v3717_v15, 0  ;;  %v3750_v45 = vsub.s32 %v2960_v30, %v3749_v37  ;;  %v4037_v60 = vadd.s32 18, %v3717_v15  ;;  %vm3967_vm7 = vmand %vm3895_vm15, %vm3823_vm1 }
 0x38d   :  { %v4392_v20 = vadd.f32 %v4391_v19, %v4390_v49  ;;  %vm3822_vm8 = vcmp.ne.s32.totalorder %v3728_v56, 0  ;;  %vm3894_vm6 = vcmp.lt.s32.totalorder %v3728_v56, 0  ;;  %vm3965_vm2 = vmand %vm3893_vm4, %vm3821_vm13  ;;  %v4039_v48 = vadd.s32 18, %v3739_v26 }
 0x38e   :  { %vm3824_vm0 = vcmp.ne.s32.totalorder %v3750_v45, 0  ;;  %vm3896_vm14 = vcmp.lt.s32.totalorder %v3750_v45, 0  ;;  %v4038_v54 = vadd.s32 18, %v3728_v56  ;;  %vm3966_vm3 = vmand %vm3894_vm6, %vm3822_vm8  ;;  %v4109_v29 = vsel %vm3965_vm2, %v4037_v60, %v3717_v15 }
 0x38f   :  { %v4040_v1 = vadd.s32 18, %v3750_v45  ;;  %vm3968_vm10 = vmand %vm3896_vm14, %vm3824_vm0  ;;  %v4111_v63 = vsel %vm3967_vm7, %v4039_v48, %v3739_v26  ;;  %vm10631_vm11 = vcmp.lt.s32.totalorder %v4109_v29, 16  ;;  %v13328_v37 = vmov 0 }
 0x390   :  { %v4110_v62 = vsel %vm3966_vm3, %v4038_v54, %v3728_v56  ;;  %v13326_v33 = vsel %vm10631_vm11, 4294967295, %v13325_v33  ;;  %vm10637_vm5 = vcmp.lt.s32.totalorder %v4111_v63, 16  ;;  %vm13336_vm14 = vcmask 523264  }
 0x391   :  { %13327 = vst [vmem:[#allocation110_spill] sm:$0xff] %v13326_v33  ;;  %v4112_v38 = vsel %vm3968_vm10, %v4040_v1, %v3750_v45  ;;  %v13329_v37 = vsel %vm10637_vm5, 4294967295, %v13328_v37  ;;  %vm10643_vm13 = vcmp.lt.s32.totalorder %v4110_v62, 16  ;;  %v13337_v2 = vmov 0  ;;  %vm13340_vm10 = vmmov %vm13336_vm14 }
 0x392   :  { %13330 = vst [vmem:[#allocation111_spill] sm:$0xff] %v13329_v37  ;;  %v13333_v36 = vsel %vm10643_vm13, 4294967295, %v13332_v36  ;;  %vm10653_vm3 = vcmp.lt.s32.totalorder %v4112_v38, 16  ;;  %vm13341_vm0 = vmmov %vm13340_vm10  ;;  %vm13385_vm15 = vnez %v13384_v57  ;;  %v13394_v57 = vld [vmem:[#allocation13_spill] sm:$0xff] }
 0x393   :  { %13334 = vst [vmem:[#allocation113_spill] sm:$0xff] %v13333_v36  ;;  %v13338_v2 = vsel %vm10653_vm3, 4294967295, %v13337_v2  ;;  %vm13342_vm4 = vmmov %vm13341_vm0  ;;  %v13372_v36 = vld [vmem:[#allocation107_spill] sm:$0xff]  ;;  %vm13395_vm7 = vnez %v13394_v57 }
 0x394   :  { %13339 = vst [vmem:[#allocation115_spill] sm:$0xff] %v13338_v2  ;;  %v13363_v2 = vld [vmem:[#allocation94_spill] sm:$0xff]  ;;  %vm13391_vm6 = vmmov %vm13341_vm0 }
 0x395   :  { %vm13392_vm2 = vmmov %vm13341_vm0 }
 0x3a4   :  { %v10635_v30 = vpop.f32.mrb[24].mxu1 }
 0x3a5   :  { %v10641_v47 = vpop.f32.mrb[25].mxu1  ;;  %v4255_v49 = vsel %vm10637_vm5, %v10635_v30, 0.0 }
 0x3a6   :  { %13331 = vst [vmem:[#allocation112_spill] sm:$0xff] %v10641_v47  ;;  %v4253_v15 = vsel %vm10631_vm11, %v10641_v47, 0.0  ;;  %v10650_v28 = vpop.f32.mrb[26].mxu1  ;;  %v4397_v45 = vsel %vm13341_vm0, %v4255_v49, 0.0  ;;  %v13356_v49 = vld [vmem:[#allocation38_spill] sm:$0xff] }
 0x3a7   :  { %13335 = vst [vmem:[#allocation114_spill] sm:$0xff] %v10650_v28  ;;  %v4393_v18 = vsel %vm13336_vm14, %v4253_v15, 0.0  ;;  %v10657_v41 = vpop.f32.mrb[27].mxu1  ;;  %v4256_v26 = vsel %vm10653_vm3, %v10650_v28, 0.0  ;;  %vm13397_vm14 = vmmov %vm13341_vm0 }
 0x3a8   :  { %v4394_v19 = vadd.f32 %v4393_v18, %v4392_v20  ;;  %v4254_v35 = vsel %vm10643_vm13, %v10657_v41, 0.0  ;;  %v4399_v48 = vsel %vm13342_vm4, %v4256_v26, 0.0  ;;  %v13344_v26 = vld [vmem:[#allocation15_spill] sm:$0xff] }
 0x3a9   :  { %v4395_v39 = vsel %vm13340_vm10, %v4254_v35, 0.0  ;;  %v13343_v35 = vld [vmem:[#allocation9_spill] sm:$0xff] }
 0x3aa   :  { %v4396_v56 = vadd.f32 %v4395_v39, %v4394_v19  ;;  %v13355_v39 = vld [vmem:[#allocation36_spill] sm:$0xff]  ;;  %v13357_v19 = vld [vmem:[#allocation43_spill] sm:$0xff] }
 0x3ac   :  { %v4398_v60 = vadd.f32 %v4397_v45, %v4396_v56  ;;  %v13345_v45 = vld [vmem:[#allocation17_spill] sm:$0xff]  ;;  %v13349_v56 = vld [vmem:[#allocation23_spill] sm:$0xff] }
 0x3ae   :  { %v4400_v54 = vadd.f32 %v4399_v48, %v4398_v60  ;;  %v13346_v48 = vld [vmem:[#allocation14_spill] sm:$0xff]  ;;  %v13350_v60 = vld [vmem:[#allocation29_spill] sm:$0xff] }
 0x3b0   :  { %v4401_v29 = vrot.slane %v4400_v54, 4 }
 0x3b2   :  { %v4402_v1 = vadd.f32 %v4401_v29, %v4400_v54  ;;  %v13347_v29 = vld [vmem:[#allocation16_spill] sm:$0xff]  ;;  %v13380_v54 = vld [vmem:[#allocation5_spill] sm:$0xff] }
 0x3b3   :  { %vm13381_vm1 = vnez %v13380_v54  ;;  %v13388_v54 = vld [vmem:[#allocation11_spill] sm:$0xff] }
 0x3b4   :  { %v4403_v20 = vrot.slane %v4402_v1, 2  ;;  %vm13389_vm8 = vnez %v13388_v54 }
 0x3b6   :  { %v4404_v63 = vadd.f32 %v4403_v20, %v4402_v1  ;;  %v13348_v20 = vld [vmem:[#allocation22_spill] sm:$0xff]  ;;  %v13352_v1 = vld [vmem:[#allocation28_spill] sm:$0xff] }
 0x3b8   :  { %v4405_v62 = vrot.slane %v4404_v63, 1 }
 0x3ba   :  { %v4406_v38 = vadd.f32 %v4405_v62, %v4404_v63  ;;  %v13353_v63 = vld [vmem:[#allocation30_spill] sm:$0xff]  ;;  %v13354_v62 = vld [vmem:[#allocation37_spill] sm:$0xff] }
 0x3bc   :  { %v10671_v15 = vmul.f32 0.001953125, %v4406_v38  ;;  %v13371_v38 = vld [vmem:[#allocation104_spill] sm:$0xff] }
 0x3be   :  { %v13373_v37 = vsub.f32 %v7925_v52, %v10671_v15  ;;  %v13376_v31 = vsub.f32 %v7949_v53, %v10671_v15  ;;  %v13379_v18 = vsub.f32 %v7906_v34, %v10671_v15  ;;  %v13383_v53 = vsub.f32 %v13343_v35, %v10671_v15 }
 0x3bf   :  { %v13398_v54 = vsub.f32 %v13346_v48, %v10671_v15 }
 0x3c0   :  { %v10822_v7 = vsel %vm7890_vm9, %v13373_v37, 0.0  ;;  %v10829_v47 = vsel %vm7914_vm12, %v13376_v31, 0.0  ;;  %v10836_v10 = vsel %vm13381_vm1, %v13379_v18, 0.0  ;;  %v10847_v31 = vsel %vm13385_vm15, %v13383_v53, 0.0 }
 0x3c1   :  { %13375 = vst [vmem:[#allocation9_spill] sm:$0xff] %v10822_v7  ;;  %13378 = vst [vmem:[#allocation15_spill] sm:$0xff] %v10829_v47  ;;  %v4552_v52 = vmul.f32 %v10822_v7, %v10822_v7  ;;  %v4553_v37 = vmul.f32 %v10829_v47, %v10829_v47  ;;  %v4554_v34 = vmul.f32 %v10836_v10, %v10836_v10 }
 0x3c2   :  { %13382 = vst [vmem:[#allocation17_spill] sm:$0xff] %v10836_v10  ;;  %13386 = vst [vmem:[#allocation14_spill] sm:$0xff] %v10847_v31  ;;  %v13387_v18 = vsub.f32 %v13344_v26, %v10671_v15  ;;  %v4555_v47 = vmul.f32 %v10847_v31, %v10847_v31  ;;  %v13393_v53 = vsub.f32 %v13345_v45, %v10671_v15  ;;  %v13399_v31 = vld [vmem:[#allocation10_spill] sm:$0xff] }
 0x3c3   :  { %v4624_v7 = vsel %vm13391_vm6, %v4552_v52, 0.0  ;;  %v4625_v35 = vsel %vm13392_vm2, %v4553_v37, 0.0  ;;  %vm13400_vm10 = vnez %v13399_v31  ;;  %vm13406_vm6 = vmmov %vm13341_vm0 }
 0x3c4   :  { %v10856_v33 = vsel %vm13389_vm8, %v13387_v18, 0.0  ;;  %v10867_v10 = vsel %vm13395_vm7, %v13393_v53, 0.0  ;;  %v4626_v28 = vadd.f32 %v4625_v35, %v4624_v7  ;;  %v4627_v18 = vsel %vm13397_vm14, %v4554_v34, 0.0  ;;  %v13403_v35 = vld [vmem:[#allocation12_spill] sm:$0xff]  ;;  %vm13411_vm14 = vmmov %vm13341_vm0 }
 0x3c5   :  { %13390 = vst [vmem:[#allocation16_spill] sm:$0xff] %v10856_v33  ;;  %13396 = vst [vmem:[#allocation22_spill] sm:$0xff] %v10867_v10  ;;  %v4556_v26 = vmul.f32 %v10856_v33, %v10856_v33  ;;  %v10877_v52 = vsel %vm13400_vm10, %v13398_v54, 0.0  ;;  %v4557_v45 = vmul.f32 %v10867_v10, %v10867_v10  ;;  %v4629_v53 = vsel %vm13341_vm0, %v4555_v47, 0.0  ;;  %v13615_v10 = vld [vmem:[#allocation90_spill] sm:$0xff] }
 0x3c6   :  { %13401 = vst [vmem:[#allocation23_spill] sm:$0xff] %v10877_v52  ;;  %v4628_v37 = vadd.f32 %v4627_v18, %v4626_v28  ;;  %v13402_v7 = vsub.f32 %v13347_v29, %v10671_v15  ;;  %vm13404_vm4 = vnez %v13403_v35  ;;  %v4558_v48 = vmul.f32 %v10877_v52, %v10877_v52  ;;  %v13408_v18 = vld [vmem:[#allocation19_spill] sm:$0xff] }
 0x3c7   :  { %v4631_v54 = vsel %vm13406_vm6, %v4556_v26, 0.0  ;;  %v13407_v28 = vsub.f32 %v13348_v20, %v10671_v15  ;;  %vm13409_vm2 = vnez %v13408_v18 }
 0x3c8   :  { %v10887_v57 = vsel %vm13404_vm4, %v13402_v7, 0.0  ;;  %v4630_v34 = vadd.f32 %v4629_v53, %v4628_v37  ;;  %v4633_v7 = vsel %vm13411_vm14, %v4557_v45, 0.0  ;;  %v13412_v37 = vsub.f32 %v8491_v46, %v10671_v15  ;;  %v13413_v53 = vld [vmem:[#allocation21_spill] sm:$0xff]  ;;  %vm13420_vm14 = vmmov %vm13406_vm6 }
 0x3c9   :  { %13405 = vst [vmem:[#allocation29_spill] sm:$0xff] %v10887_v57  ;;  %v10897_v31 = vsel %vm13409_vm2, %v13407_v28, 0.0  ;;  %v4559_v29 = vmul.f32 %v10887_v57, %v10887_v57  ;;  %vm13414_vm0 = vnez %v13413_v53  ;;  %v4635_v28 = vsel %vm13406_vm6, %v4558_v48, 0.0  ;;  %v13611_v57 = vld [vmem:[#allocation84_spill] sm:$0xff] }
 0x3ca   :  { %13410 = vst [vmem:[#allocation28_spill] sm:$0xff] %v10897_v31  ;;  %v4632_v47 = vadd.f32 %v4631_v54, %v4630_v34  ;;  %v10907_v35 = vsel %vm13414_vm0, %v13412_v37, 0.0  ;;  %v4560_v20 = vmul.f32 %v10897_v31, %v10897_v31  ;;  %v13416_v34 = vsub.f32 %v8449_v23, %v10671_v15  ;;  %v13417_v54 = vld [vmem:[#allocation18_spill] sm:$0xff] }
 0x3cb   :  { %13415 = vst [vmem:[#allocation30_spill] sm:$0xff] %v10907_v35  ;;  %vm13418_vm2 = vnez %v13417_v54  ;;  %v4561_v46 = vmul.f32 %v10907_v35, %v10907_v35  ;;  %v4637_v37 = vsel %vm13420_vm14, %v4559_v29, 0.0  ;;  %vm13429_vm14 = vmmov %vm13406_vm6  ;;  %v13606_v35 = vld [vmem:[#allocation80_spill] sm:$0xff] }
 0x3cc   :  { %v4634_v26 = vadd.f32 %v4633_v7, %v4632_v47  ;;  %v10917_v18 = vsel %vm13418_vm2, %v13416_v34, 0.0  ;;  %v13421_v47 = vsub.f32 %v13349_v56, %v10671_v15  ;;  %v13422_v7 = vld [vmem:[#allocation20_spill] sm:$0xff]  ;;  %v4639_v34 = vsel %vm13406_vm6, %v4560_v20, 0.0 }
 0x3cd   :  { %13419 = vst [vmem:[#allocation37_spill] sm:$0xff] %v10917_v18  ;;  %vm13423_vm0 = vnez %v13422_v7  ;;  %v4562_v23 = vmul.f32 %v10917_v18, %v10917_v18  ;;  %v13430_v7 = vld [vmem:[#allocation31_spill] sm:$0xff] }
 0x3ce   :  { %v4636_v45 = vadd.f32 %v4635_v28, %v4634_v26  ;;  %v10927_v53 = vsel %vm13423_vm0, %v13421_v47, 0.0  ;;  %v13425_v26 = vsub.f32 %v13350_v60, %v10671_v15  ;;  %v13426_v28 = vld [vmem:[#allocation25_spill] sm:$0xff]  ;;  %v4641_v47 = vsel %vm13429_vm14, %v4561_v46, 0.0  ;;  %vm13439_vm14 = vmmov %vm13406_vm6 }
 0x3cf   :  { %13424 = vst [vmem:[#allocation36_spill] sm:$0xff] %v10927_v53  ;;  %vm13427_vm2 = vnez %v13426_v28  ;;  %v4563_v56 = vmul.f32 %v10927_v53, %v10927_v53 }
 0x3d0   :  { %v4638_v48 = vadd.f32 %v4637_v37, %v4636_v45  ;;  %v10937_v54 = vsel %vm13427_vm2, %v13425_v26, 0.0  ;;  %v13431_v45 = vsub.f32 %v13430_v7, %v10671_v15  ;;  %v13432_v37 = vld [vmem:[#allocation27_spill] sm:$0xff]  ;;  %v4643_v26 = vsel %vm13406_vm6, %v4562_v23, 0.0 }
 0x3d1   :  { %13428 = vst [vmem:[#allocation38_spill] sm:$0xff] %v10937_v54  ;;  %vm13433_vm0 = vnez %v13432_v37  ;;  %v4564_v60 = vmul.f32 %v10937_v54, %v10937_v54  ;;  %v13602_v54 = vld [vmem:[#allocation86_spill] sm:$0xff] }
 0x3d2   :  { %v4640_v29 = vadd.f32 %v4639_v34, %v4638_v48  ;;  %v10947_v18 = vsel %vm13433_vm0, %v13431_v45, 0.0  ;;  %v13435_v48 = vsub.f32 %v13352_v1, %v10671_v15  ;;  %v13436_v34 = vld [vmem:[#allocation24_spill] sm:$0xff]  ;;  %v4645_v45 = vsel %vm13439_vm14, %v4563_v56, 0.0  ;;  %vm13448_vm14 = vmmov %vm13406_vm6 }
 0x3d3   :  { %13434 = vst [vmem:[#allocation43_spill] sm:$0xff] %v10947_v18  ;;  %vm13437_vm2 = vnez %v13436_v34  ;;  %v4565_v7 = vmul.f32 %v10947_v18, %v10947_v18 }
 0x3d4   :  { %v4642_v20 = vadd.f32 %v4641_v47, %v4640_v29  ;;  %v10957_v28 = vsel %vm13437_vm2, %v13435_v48, 0.0  ;;  %v13440_v29 = vsub.f32 %v13353_v63, %v10671_v15  ;;  %v13441_v47 = vld [vmem:[#allocation26_spill] sm:$0xff]  ;;  %v4647_v48 = vsel %vm13406_vm6, %v4564_v60, 0.0 }
 0x3d5   :  { %13438 = vst [vmem:[#allocation94_spill] sm:$0xff] %v10957_v28  ;;  %vm13442_vm0 = vnez %v13441_v47  ;;  %v4566_v1 = vmul.f32 %v10957_v28, %v10957_v28  ;;  %v13597_v28 = vld [vmem:[#allocation82_spill] sm:$0xff] }
 0x3d6   :  { %v4644_v46 = vadd.f32 %v4643_v26, %v4642_v20  ;;  %v10967_v37 = vsel %vm13442_vm0, %v13440_v29, 0.0  ;;  %v13444_v20 = vsub.f32 %v13354_v62, %v10671_v15  ;;  %v13445_v26 = vld [vmem:[#allocation33_spill] sm:$0xff]  ;;  %v4649_v29 = vsel %vm13448_vm14, %v4565_v7, 0.0  ;;  %vm13457_vm14 = vmmov %vm13406_vm6 }
 0x3d7   :  { %13443 = vst [vmem:[#allocation102_spill] sm:$0xff] %v10967_v37  ;;  %vm13446_vm2 = vnez %v13445_v26  ;;  %v4567_v63 = vmul.f32 %v10967_v37, %v10967_v37 }
 0x3d8   :  { %v4646_v23 = vadd.f32 %v4645_v45, %v4644_v46  ;;  %v10977_v34 = vsel %vm13446_vm2, %v13444_v20, 0.0  ;;  %v13449_v46 = vsub.f32 %v9024_v44, %v10671_v15  ;;  %v13450_v45 = vld [vmem:[#allocation35_spill] sm:$0xff]  ;;  %v4651_v20 = vsel %vm13406_vm6, %v4566_v1, 0.0 }
 0x3d9   :  { %13447 = vst [vmem:[#allocation96_spill] sm:$0xff] %v10977_v34  ;;  %vm13451_vm0 = vnez %v13450_v45  ;;  %v4568_v62 = vmul.f32 %v10977_v34, %v10977_v34  ;;  %v13593_v34 = vld [vmem:[#allocation76_spill] sm:$0xff] }
 0x3da   :  { %v4648_v56 = vadd.f32 %v4647_v48, %v4646_v23  ;;  %v10987_v47 = vsel %vm13451_vm0, %v13449_v46, 0.0  ;;  %v13453_v23 = vsub.f32 %v13355_v39, %v10671_v15  ;;  %v13454_v48 = vld [vmem:[#allocation32_spill] sm:$0xff]  ;;  %v4653_v46 = vsel %vm13457_vm14, %v4567_v63, 0.0  ;;  %vm13466_vm14 = vmmov %vm13406_vm6 }
 0x3db   :  { %13452 = vst [vmem:[#allocation100_spill] sm:$0xff] %v10987_v47  ;;  %vm13455_vm2 = vnez %v13454_v48  ;;  %v4569_v44 = vmul.f32 %v10987_v47, %v10987_v47 }
 0x3dc   :  { %v4650_v60 = vadd.f32 %v4649_v29, %v4648_v56  ;;  %v10997_v26 = vsel %vm13455_vm2, %v13453_v23, 0.0  ;;  %v13458_v56 = vsub.f32 %v13356_v49, %v10671_v15  ;;  %v13459_v29 = vld [vmem:[#allocation34_spill] sm:$0xff]  ;;  %v4655_v23 = vsel %vm13406_vm6, %v4568_v62, 0.0 }
 0x3dd   :  { %13456 = vst [vmem:[#allocation104_spill] sm:$0xff] %v10997_v26  ;;  %vm13460_vm0 = vnez %v13459_v29  ;;  %v4570_v39 = vmul.f32 %v10997_v26, %v10997_v26  ;;  %v13588_v26 = vld [vmem:[#allocation72_spill] sm:$0xff] }
 0x3de   :  { %v4652_v7 = vadd.f32 %v4651_v20, %v4650_v60  ;;  %v11007_v45 = vsel %vm13460_vm0, %v13458_v56, 0.0  ;;  %v13462_v60 = vsub.f32 %v13357_v19, %v10671_v15  ;;  %v13463_v20 = vld [vmem:[#allocation40_spill] sm:$0xff]  ;;  %v4657_v56 = vsel %vm13466_vm14, %v4569_v44, 0.0  ;;  %vm13475_vm14 = vmmov %vm13406_vm6 }
 0x3df   :  { %13461 = vst [vmem:[#allocation107_spill] sm:$0xff] %v11007_v45  ;;  %vm13464_vm2 = vnez %v13463_v20  ;;  %v4571_v49 = vmul.f32 %v11007_v45, %v11007_v45 }
 0x3e0   :  { %v4654_v1 = vadd.f32 %v4653_v46, %v4652_v7  ;;  %v11017_v48 = vsel %vm13464_vm2, %v13462_v60, 0.0  ;;  %v13467_v7 = vsub.f32 %v9284_v43, %v10671_v15  ;;  %v13468_v46 = vld [vmem:[#allocation42_spill] sm:$0xff]  ;;  %v4659_v60 = vsel %vm13406_vm6, %v4570_v39, 0.0 }
 0x3e1   :  { %13465 = vst [vmem:[#allocation31_spill] sm:$0xff] %v11017_v48  ;;  %vm13469_vm0 = vnez %v13468_v46  ;;  %v4572_v19 = vmul.f32 %v11017_v48, %v11017_v48  ;;  %v13584_v48 = vld [vmem:[#allocation78_spill] sm:$0xff] }
 0x3e2   :  { %v4656_v63 = vadd.f32 %v4655_v23, %v4654_v1  ;;  %v11027_v29 = vsel %vm13469_vm0, %v13467_v7, 0.0  ;;  %v13471_v1 = vsub.f32 %v9239_v0, %v10671_v15  ;;  %v13472_v23 = vld [vmem:[#allocation39_spill] sm:$0xff]  ;;  %v4661_v7 = vsel %vm13475_vm14, %v4571_v49, 0.0  ;;  %vm13484_vm14 = vmmov %vm13406_vm6 }
 0x3e3   :  { %13470 = vst [vmem:[#allocation116_spill] sm:$0xff] %v11027_v29  ;;  %vm13473_vm2 = vnez %v13472_v23  ;;  %v4573_v43 = vmul.f32 %v11027_v29, %v11027_v29 }
 0x3e4   :  { %v4658_v62 = vadd.f32 %v4657_v56, %v4656_v63  ;;  %v11037_v20 = vsel %vm13473_vm2, %v13471_v1, 0.0  ;;  %v13476_v63 = vsub.f32 %v9275_v21, %v10671_v15  ;;  %v13477_v56 = vld [vmem:[#allocation41_spill] sm:$0xff]  ;;  %v4663_v1 = vsel %vm13406_vm6, %v4572_v19, 0.0 }
 0x3e5   :  { %13474 = vst [vmem:[#allocation117_spill] sm:$0xff] %v11037_v20  ;;  %vm13478_vm0 = vnez %v13477_v56  ;;  %v4574_v0 = vmul.f32 %v11037_v20, %v11037_v20  ;;  %v13579_v20 = vld [vmem:[#allocation74_spill] sm:$0xff] }
 0x3e6   :  { %v4660_v44 = vadd.f32 %v4659_v60, %v4658_v62  ;;  %v11047_v46 = vsel %vm13478_vm0, %v13476_v63, 0.0  ;;  %v13480_v62 = vsub.f32 %v9541_v51, %v10671_v15  ;;  %v13481_v60 = vld [vmem:[#allocation45_spill] sm:$0xff]  ;;  %v4665_v63 = vsel %vm13484_vm14, %v4573_v43, 0.0  ;;  %vm13493_vm14 = vmmov %vm13406_vm6 }
 0x3e7   :  { %13479 = vst [vmem:[#allocation118_spill] sm:$0xff] %v11047_v46  ;;  %vm13482_vm2 = vnez %v13481_v60  ;;  %v4575_v21 = vmul.f32 %v11047_v46, %v11047_v46 }
 0x3e8   :  { %v4662_v39 = vadd.f32 %v4661_v7, %v4660_v44  ;;  %v11057_v23 = vsel %vm13482_vm2, %v13480_v62, 0.0  ;;  %v13485_v44 = vsub.f32 %v9562_v5, %v10671_v15  ;;  %v13486_v7 = vld [vmem:[#allocation47_spill] sm:$0xff]  ;;  %v4667_v62 = vsel %vm13406_vm6, %v4574_v0, 0.0 }
 0x3e9   :  { %13483 = vst [vmem:[#allocation119_spill] sm:$0xff] %v11057_v23  ;;  %vm13487_vm0 = vnez %v13486_v7  ;;  %v4576_v51 = vmul.f32 %v11057_v23, %v11057_v23  ;;  %v13575_v23 = vld [vmem:[#allocation68_spill] sm:$0xff] }
 0x3ea   :  { %v4664_v49 = vadd.f32 %v4663_v1, %v4662_v39  ;;  %v11067_v56 = vsel %vm13487_vm0, %v13485_v44, 0.0  ;;  %v13489_v39 = vsub.f32 %v9528_v55, %v10671_v15  ;;  %v13490_v1 = vld [vmem:[#allocation44_spill] sm:$0xff]  ;;  %v4669_v44 = vsel %vm13493_vm14, %v4575_v21, 0.0  ;;  %vm13502_vm14 = vmmov %vm13406_vm6 }
 0x3eb   :  { %13488 = vst [vmem:[#allocation120_spill] sm:$0xff] %v11067_v56  ;;  %vm13491_vm2 = vnez %v13490_v1  ;;  %v4577_v5 = vmul.f32 %v11067_v56, %v11067_v56 }
 0x3ec   :  { %v4666_v19 = vadd.f32 %v4665_v63, %v4664_v49  ;;  %v11077_v60 = vsel %vm13491_vm2, %v13489_v39, 0.0  ;;  %v13494_v49 = vsub.f32 %v9553_v59, %v10671_v15  ;;  %v13495_v63 = vld [vmem:[#allocation46_spill] sm:$0xff]  ;;  %v4671_v39 = vsel %vm13406_vm6, %v4576_v51, 0.0 }
 0x3ed   :  { %13492 = vst [vmem:[#allocation121_spill] sm:$0xff] %v11077_v60  ;;  %vm13496_vm0 = vnez %v13495_v63  ;;  %v4578_v55 = vmul.f32 %v11077_v60, %v11077_v60  ;;  %v13570_v60 = vld [vmem:[#allocation65_spill] sm:$0xff] }
 0x3ee   :  { %v4668_v43 = vadd.f32 %v4667_v62, %v4666_v19  ;;  %v11087_v7 = vsel %vm13496_vm0, %v13494_v49, 0.0  ;;  %v13498_v19 = vsub.f32 %v9714_v14, %v10671_v15  ;;  %v13499_v62 = vld [vmem:[#allocation48_spill] sm:$0xff]  ;;  %v4673_v49 = vsel %vm13502_vm14, %v4577_v5, 0.0  ;;  %vm13511_vm14 = vmmov %vm13406_vm6 }
 0x3ef   :  { %13497 = vst [vmem:[#allocation122_spill] sm:$0xff] %v11087_v7  ;;  %vm13500_vm2 = vnez %v13499_v62  ;;  %v4579_v59 = vmul.f32 %v11087_v7, %v11087_v7 }
 0x3f0   :  { %v4670_v0 = vadd.f32 %v4669_v44, %v4668_v43  ;;  %v11097_v1 = vsel %vm13500_vm2, %v13498_v19, 0.0  ;;  %v13503_v43 = vsub.f32 %v9740_v25, %v10671_v15  ;;  %v13504_v44 = vld [vmem:[#allocation50_spill] sm:$0xff]  ;;  %v4675_v19 = vsel %vm13406_vm6, %v4578_v55, 0.0 }
 0x3f1   :  { %13501 = vst [vmem:[#allocation123_spill] sm:$0xff] %v11097_v1  ;;  %vm13505_vm0 = vnez %v13504_v44  ;;  %v4580_v14 = vmul.f32 %v11097_v1, %v11097_v1  ;;  %v13566_v1 = vld [vmem:[#allocation70_spill] sm:$0xff] }
 0x3f2   :  { %v4672_v21 = vadd.f32 %v4671_v39, %v4670_v0  ;;  %v11107_v63 = vsel %vm13505_vm0, %v13503_v43, 0.0  ;;  %v13507_v0 = vsub.f32 %v9697_v11, %v10671_v15  ;;  %v13508_v39 = vld [vmem:[#allocation49_spill] sm:$0xff]  ;;  %v4677_v43 = vsel %vm13511_vm14, %v4579_v59, 0.0  ;;  %vm13520_vm14 = vmmov %vm13406_vm6 }
 0x3f3   :  { %13506 = vst [vmem:[#allocation124_spill] sm:$0xff] %v11107_v63  ;;  %vm13509_vm2 = vnez %v13508_v39  ;;  %v4581_v25 = vmul.f32 %v11107_v63, %v11107_v63 }
 0x3f4   :  { %v4674_v51 = vadd.f32 %v4673_v49, %v4672_v21  ;;  %v11117_v62 = vsel %vm13509_vm2, %v13507_v0, 0.0  ;;  %v13512_v21 = vsub.f32 %v9728_v22, %v10671_v15  ;;  %v13513_v49 = vld [vmem:[#allocation51_spill] sm:$0xff]  ;;  %v4679_v0 = vsel %vm13406_vm6, %v4580_v14, 0.0 }
 0x3f5   :  { %13510 = vst [vmem:[#allocation125_spill] sm:$0xff] %v11117_v62  ;;  %vm13514_vm0 = vnez %v13513_v49  ;;  %v4582_v11 = vmul.f32 %v11117_v62, %v11117_v62 }
 0x3f6   :  { %v4676_v5 = vadd.f32 %v4675_v19, %v4674_v51  ;;  %v11127_v44 = vsel %vm13514_vm0, %v13512_v21, 0.0  ;;  %v13516_v51 = vsub.f32 %v9832_v3, %v10671_v15  ;;  %v13517_v19 = vld [vmem:[#allocation52_spill] sm:$0xff]  ;;  %v4681_v21 = vsel %vm13520_vm14, %v4581_v25, 0.0  ;;  %vm13529_vm14 = vmmov %vm13406_vm6 }
 0x3f7   :  { %13515 = vst [vmem:[#allocation126_spill] sm:$0xff] %v11127_v44  ;;  %vm13518_vm2 = vnez %v13517_v19  ;;  %v4583_v22 = vmul.f32 %v11127_v44, %v11127_v44 }
 0x3f8   :  { %v4678_v55 = vadd.f32 %v4677_v43, %v4676_v5  ;;  %v11137_v39 = vsel %vm13518_vm2, %v13516_v51, 0.0  ;;  %v13521_v5 = vsub.f32 %v9855_v12, %v10671_v15  ;;  %v13522_v43 = vld [vmem:[#allocation54_spill] sm:$0xff]  ;;  %v4683_v51 = vsel %vm13406_vm6, %v4582_v11, 0.0 }
 0x3f9   :  { %13519 = vst [vmem:[#allocation127_spill] sm:$0xff] %v11137_v39  ;;  %vm13523_vm0 = vnez %v13522_v43  ;;  %v4584_v3 = vmul.f32 %v11137_v39, %v11137_v39 }
 0x3fa   :  { %v4680_v59 = vadd.f32 %v4679_v0, %v4678_v55  ;;  %v11147_v49 = vsel %vm13523_vm0, %v13521_v5, 0.0  ;;  %v13525_v55 = vsub.f32 %v9826_v4, %v10671_v15  ;;  %v13526_v0 = vld [vmem:[#allocation53_spill] sm:$0xff]  ;;  %v4685_v5 = vsel %vm13529_vm14, %v4583_v22, 0.0  ;;  %vm13537_vm14 = vmmov %vm13406_vm6 }
 0x3fb   :  { %13524 = vst [vmem:[#allocation128_spill] sm:$0xff] %v11147_v49  ;;  %vm13527_vm2 = vnez %v13526_v0  ;;  %v4585_v12 = vmul.f32 %v11147_v49, %v11147_v49 }
 0x3fc   :  { %v4682_v14 = vadd.f32 %v4681_v21, %v4680_v59  ;;  %v11157_v19 = vsel %vm13527_vm2, %v13525_v55, 0.0  ;;  %v13530_v59 = vsub.f32 %v9844_v32, %v10671_v15  ;;  %v13531_v21 = vld [vmem:[#allocation55_spill] sm:$0xff]  ;;  %v4687_v55 = vsel %vm13406_vm6, %v4584_v3, 0.0 }
 0x3fd   :  { %13528 = vst [vmem:[#allocation129_spill] sm:$0xff] %v11157_v19  ;;  %vm13532_vm0 = vnez %v13531_v21  ;;  %v4586_v4 = vmul.f32 %v11157_v19, %v11157_v19 }
 0x3fe   :  { %v4684_v25 = vadd.f32 %v4683_v51, %v4682_v14  ;;  %v11167_v43 = vsel %vm13532_vm0, %v13530_v59, 0.0  ;;  %v13534_v14 = vsub.f32 %v9991_v27, %v10671_v15  ;;  %v13535_v51 = vld [vmem:[#allocation56_spill] sm:$0xff]  ;;  %v4689_v59 = vsel %vm13537_vm14, %v4585_v12, 0.0  ;;  %vm13544_vm14 = vmmov %vm13406_vm6 }
 0x3ff   :  { %13533 = vst [vmem:[#allocation130_spill] sm:$0xff] %v11167_v43  ;;  %vm13536_vm2 = vnez %v13535_v51  ;;  %v4587_v32 = vmul.f32 %v11167_v43, %v11167_v43 }
 0x400   :  { %v4686_v11 = vadd.f32 %v4685_v5, %v4684_v25  ;;  %v11177_v0 = vsel %vm13536_vm2, %v13534_v14, 0.0  ;;  %v13538_v25 = vsub.f32 %v10013_v9, %v10671_v15  ;;  %v13539_v5 = vld [vmem:[#allocation58_spill] sm:$0xff]  ;;  %v4691_v14 = vsel %vm13406_vm6, %v4586_v4, 0.0 }
 0x401   :  { %vm13540_vm0 = vnez %v13539_v5  ;;  %v4588_v27 = vmul.f32 %v11177_v0, %v11177_v0 }
 0x402   :  { %v4688_v22 = vadd.f32 %v4687_v55, %v4686_v11  ;;  %v11187_v21 = vsel %vm13540_vm0, %v13538_v25, 0.0  ;;  %v13541_v11 = vsub.f32 %v9976_v17, %v10671_v15  ;;  %v13542_v55 = vld [vmem:[#allocation57_spill] sm:$0xff]  ;;  %v4693_v25 = vsel %vm13544_vm14, %v4587_v32, 0.0  ;;  %vm13551_vm14 = vmmov %vm13406_vm6 }
 0x403   :  { %vm13543_vm4 = vnez %v13542_v55  ;;  %v4589_v9 = vmul.f32 %v11187_v21, %v11187_v21 }
 0x404   :  { %v4690_v3 = vadd.f32 %v4689_v59, %v4688_v22  ;;  %v11197_v43 = vsel %vm13543_vm4, %v13541_v11, 0.0  ;;  %v13545_v22 = vsub.f32 %v10005_v6, %v10671_v15  ;;  %v13546_v59 = vld [vmem:[#allocation59_spill] sm:$0xff]  ;;  %v4695_v11 = vsel %vm13406_vm6, %v4588_v27, 0.0 }
 0x405   :  { %vm13547_vm10 = vnez %v13546_v59  ;;  %v4590_v17 = vmul.f32 %v11197_v43, %v11197_v43 }
 0x406   :  { %v4692_v12 = vadd.f32 %v4691_v14, %v4690_v3  ;;  %v11207_v19 = vsel %vm13547_vm10, %v13545_v22, 0.0  ;;  %v13548_v3 = vsub.f32 %v10140_v42, %v10671_v15  ;;  %v13549_v14 = vld [vmem:[#allocation61_spill] sm:$0xff]  ;;  %v4697_v22 = vsel %vm13551_vm14, %v4589_v9, 0.0  ;;  %vm13558_vm14 = vmmov %vm13406_vm6 }
 0x407   :  { %vm13550_vm7 = vnez %v13549_v14  ;;  %v4591_v6 = vmul.f32 %v11207_v19, %v11207_v19 }
 0x408   :  { %v4694_v4 = vadd.f32 %v4693_v25, %v4692_v12  ;;  %v11217_v49 = vsel %vm13550_vm7, %v13548_v3, 0.0  ;;  %v13552_v12 = vsub.f32 %v10160_v8, %v10671_v15  ;;  %v13553_v25 = vld [vmem:[#allocation62_spill] sm:$0xff]  ;;  %v4699_v3 = vsel %vm13406_vm6, %v4590_v17, 0.0 }
 0x409   :  { %vm13554_vm8 = vnez %v13553_v25  ;;  %v4592_v42 = vmul.f32 %v11217_v49, %v11217_v49 }
 0x40a   :  { %v4696_v32 = vadd.f32 %v4695_v11, %v4694_v4  ;;  %v11227_v39 = vsel %vm13554_vm8, %v13552_v12, 0.0  ;;  %v13555_v4 = vsub.f32 %v10132_v16, %v10671_v15  ;;  %v13556_v11 = vld [vmem:[#allocation60_spill] sm:$0xff]  ;;  %v4701_v12 = vsel %vm13558_vm14, %v4591_v6, 0.0  ;;  %vm13565_vm14 = vmmov %vm13406_vm6 }
 0x40b   :  { %vm13557_vm15 = vnez %v13556_v11  ;;  %v4593_v8 = vmul.f32 %v11227_v39, %v11227_v39 }
 0x40c   :  { %v4698_v27 = vadd.f32 %v4697_v22, %v4696_v32  ;;  %v11237_v44 = vsel %vm13557_vm15, %v13555_v4, 0.0  ;;  %v13559_v32 = vsub.f32 %v10151_v58, %v10671_v15  ;;  %v13560_v22 = vld [vmem:[#allocation63_spill] sm:$0xff]  ;;  %v4703_v4 = vsel %vm13406_vm6, %v4592_v42, 0.0 }
 0x40d   :  { %vm13561_vm1 = vnez %v13560_v22  ;;  %v4594_v16 = vmul.f32 %v11237_v44, %v11237_v44 }
 0x40e   :  { %v4700_v9 = vadd.f32 %v4699_v3, %v4698_v27  ;;  %v11247_v62 = vsel %vm13561_vm1, %v13559_v32, 0.0  ;;  %v13562_v27 = vsub.f32 %v10218_v50, %v10671_v15  ;;  %v13563_v3 = vld [vmem:[#allocation64_spill] sm:$0xff]  ;;  %v4705_v32 = vsel %vm13565_vm14, %v4593_v8, 0.0  ;;  %vm13574_vm14 = vmmov %vm13406_vm6 }
 0x40f   :  { %vm13564_vm12 = vnez %v13563_v3  ;;  %v4595_v58 = vmul.f32 %v11247_v62, %v11247_v62 }
 0x410   :  { %v4702_v17 = vadd.f32 %v4701_v12, %v4700_v9  ;;  %v11257_v63 = vsel %vm13564_vm12, %v13562_v27, 0.0  ;;  %v13567_v9 = vsub.f32 %v13566_v1, %v10671_v15  ;;  %v13568_v12 = vld [vmem:[#allocation67_spill] sm:$0xff]  ;;  %v4707_v27 = vsel %vm13406_vm6, %v4594_v16, 0.0 }
 0x411   :  { %vm13569_vm9 = vnez %v13568_v12  ;;  %v4596_v50 = vmul.f32 %v11257_v63, %v11257_v63 }
 0x412   :  { %v4704_v6 = vadd.f32 %v4703_v4, %v4702_v17  ;;  %v11267_v7 = vsel %vm13569_vm9, %v13567_v9, 0.0  ;;  %v13571_v17 = vsub.f32 %v13570_v60, %v10671_v15  ;;  %v13572_v4 = vld [vmem:[#allocation66_spill] sm:$0xff]  ;;  %v4709_v9 = vsel %vm13574_vm14, %v4595_v58, 0.0  ;;  %vm13583_vm14 = vmmov %vm13406_vm6 }
 0x413   :  { %vm13573_vm12 = vnez %v13572_v4  ;;  %v4597_v1 = vmul.f32 %v11267_v7, %v11267_v7 }
 0x414   :  { %v4706_v42 = vadd.f32 %v4705_v32, %v4704_v6  ;;  %v11277_v56 = vsel %vm13573_vm12, %v13571_v17, 0.0  ;;  %v13576_v6 = vsub.f32 %v13575_v23, %v10671_v15  ;;  %v13577_v32 = vld [vmem:[#allocation69_spill] sm:$0xff]  ;;  %v4711_v17 = vsel %vm13406_vm6, %v4596_v50, 0.0 }
 0x415   :  { %vm13578_vm9 = vnez %v13577_v32  ;;  %v4598_v60 = vmul.f32 %v11277_v56, %v11277_v56 }
 0x416   :  { %v4708_v8 = vadd.f32 %v4707_v27, %v4706_v42  ;;  %v11287_v46 = vsel %vm13578_vm9, %v13576_v6, 0.0  ;;  %v13580_v42 = vsub.f32 %v13579_v20, %v10671_v15  ;;  %v13581_v27 = vld [vmem:[#allocation71_spill] sm:$0xff]  ;;  %v4713_v6 = vsel %vm13583_vm14, %v4597_v1, 0.0  ;;  %vm13592_vm14 = vmmov %vm13406_vm6 }
 0x417   :  { %vm13582_vm12 = vnez %v13581_v27  ;;  %v4599_v23 = vmul.f32 %v11287_v46, %v11287_v46 }
 0x418   :  { %v4710_v16 = vadd.f32 %v4709_v9, %v4708_v8  ;;  %v11297_v29 = vsel %vm13582_vm12, %v13580_v42, 0.0  ;;  %v13585_v8 = vsub.f32 %v13584_v48, %v10671_v15  ;;  %v13586_v9 = vld [vmem:[#allocation75_spill] sm:$0xff]  ;;  %v4715_v42 = vsel %vm13406_vm6, %v4598_v60, 0.0 }
 0x419   :  { %vm13587_vm9 = vnez %v13586_v9  ;;  %v4600_v20 = vmul.f32 %v11297_v29, %v11297_v29 }
 0x41a   :  { %v4712_v58 = vadd.f32 %v4711_v17, %v4710_v16  ;;  %v11307_v45 = vsel %vm13587_vm9, %v13585_v8, 0.0  ;;  %v13589_v16 = vsub.f32 %v13588_v26, %v10671_v15  ;;  %v13590_v17 = vld [vmem:[#allocation73_spill] sm:$0xff]  ;;  %v4717_v8 = vsel %vm13592_vm14, %v4599_v23, 0.0  ;;  %vm13601_vm14 = vmmov %vm13406_vm6 }
 0x41b   :  { %vm13591_vm12 = vnez %v13590_v17  ;;  %v4601_v48 = vmul.f32 %v11307_v45, %v11307_v45 }
 0x41c   :  { %v4714_v50 = vadd.f32 %v4713_v6, %v4712_v58  ;;  %v11317_v47 = vsel %vm13591_vm12, %v13589_v16, 0.0  ;;  %v13594_v58 = vsub.f32 %v13593_v34, %v10671_v15  ;;  %v13595_v6 = vld [vmem:[#allocation77_spill] sm:$0xff]  ;;  %v4719_v16 = vsel %vm13406_vm6, %v4600_v20, 0.0 }
 0x41d   :  { %vm13596_vm9 = vnez %v13595_v6  ;;  %v4602_v26 = vmul.f32 %v11317_v47, %v11317_v47 }
 0x41e   :  { %v4716_v1 = vadd.f32 %v4715_v42, %v4714_v50  ;;  %v11327_v37 = vsel %vm13596_vm9, %v13594_v58, 0.0  ;;  %v13598_v50 = vsub.f32 %v13597_v28, %v10671_v15  ;;  %v13599_v42 = vld [vmem:[#allocation79_spill] sm:$0xff]  ;;  %v4721_v58 = vsel %vm13601_vm14, %v4601_v48, 0.0  ;;  %vm13610_vm14 = vmmov %vm13406_vm6 }
 0x41f   :  { %vm13600_vm12 = vnez %v13599_v42  ;;  %v4603_v34 = vmul.f32 %v11327_v37, %v11327_v37 }
 0x420   :  { %v4718_v60 = vadd.f32 %v4717_v8, %v4716_v1  ;;  %v11337_v18 = vsel %vm13600_vm12, %v13598_v50, 0.0  ;;  %v13603_v1 = vsub.f32 %v13602_v54, %v10671_v15  ;;  %v13604_v8 = vld [vmem:[#allocation83_spill] sm:$0xff]  ;;  %v4723_v50 = vsel %vm13406_vm6, %v4602_v26, 0.0 }
 0x421   :  { %vm13605_vm9 = vnez %v13604_v8  ;;  %v4604_v28 = vmul.f32 %v11337_v18, %v11337_v18 }
 0x422   :  { %v4720_v23 = vadd.f32 %v4719_v16, %v4718_v60  ;;  %v11347_v53 = vsel %vm13605_vm9, %v13603_v1, 0.0  ;;  %v13607_v60 = vsub.f32 %v13606_v35, %v10671_v15  ;;  %v13608_v16 = vld [vmem:[#allocation81_spill] sm:$0xff]  ;;  %v4725_v1 = vsel %vm13610_vm14, %v4603_v34, 0.0  ;;  %vm13619_vm14 = vmmov %vm13406_vm6 }
 0x423   :  { %vm13609_vm12 = vnez %v13608_v16  ;;  %v4605_v54 = vmul.f32 %v11347_v53, %v11347_v53 }
 0x424   :  { %v4722_v20 = vadd.f32 %v4721_v58, %v4720_v23  ;;  %v11357_v31 = vsel %vm13609_vm12, %v13607_v60, 0.0  ;;  %v13612_v23 = vsub.f32 %v13611_v57, %v10671_v15  ;;  %v13613_v58 = vld [vmem:[#allocation85_spill] sm:$0xff]  ;;  %v4727_v60 = vsel %vm13406_vm6, %v4604_v28, 0.0 }
 0x425   :  { %vm13614_vm9 = vnez %v13613_v58  ;;  %v4606_v35 = vmul.f32 %v11357_v31, %v11357_v31 }
 0x426   :  { %v4724_v48 = vadd.f32 %v4723_v50, %v4722_v20  ;;  %v11367_v52 = vsel %vm13614_vm9, %v13612_v23, 0.0  ;;  %v13616_v20 = vsub.f32 %v13615_v10, %v10671_v15  ;;  %v13617_v50 = vld [vmem:[#allocation87_spill] sm:$0xff]  ;;  %v4729_v23 = vsel %vm13619_vm14, %v4605_v54, 0.0  ;;  %vm13627_vm14 = vmmov %vm13406_vm6 }
 0x427   :  { %vm13618_vm12 = vnez %v13617_v50  ;;  %v4607_v57 = vmul.f32 %v11367_v52, %v11367_v52  ;;  %v13623_v50 = vld [vmem:[#allocation88_spill] sm:$0xff] }
 0x428   :  { %v4726_v26 = vadd.f32 %v4725_v1, %v4724_v48  ;;  %v11377_v33 = vsel %vm13618_vm12, %v13616_v20, 0.0  ;;  %v13620_v48 = vsub.f32 %v13363_v2, %v10671_v15  ;;  %v13621_v1 = vld [vmem:[#allocation91_spill] sm:$0xff]  ;;  %v4731_v20 = vsel %vm13406_vm6, %v4606_v35, 0.0 }
 0x429   :  { %vm13622_vm9 = vnez %v13621_v1  ;;  %v4608_v10 = vmul.f32 %v11377_v33, %v11377_v33  ;;  %v13628_v1 = vld [vmem:[#allocation92_spill] sm:$0xff] }
 0x42a   :  { %v4728_v34 = vadd.f32 %v4727_v60, %v4726_v26  ;;  %v11387_v58 = vsel %vm13622_vm9, %v13620_v48, 0.0  ;;  %v13624_v26 = vsub.f32 %v13623_v50, %v10671_v15  ;;  %v13625_v60 = vld [vmem:[#allocation89_spill] sm:$0xff]  ;;  %v4733_v48 = vsel %vm13627_vm14, %v4607_v57, 0.0  ;;  %vm13636_vm14 = vmmov %vm13406_vm6 }
 0x42b   :  { %vm13626_vm12 = vnez %v13625_v60  ;;  %v4609_v2 = vmul.f32 %v11387_v58, %v11387_v58  ;;  %v13632_v60 = vld [vmem:[#allocation98_spill] sm:$0xff] }
 0x42c   :  { %v4730_v28 = vadd.f32 %v4729_v23, %v4728_v34  ;;  %v11397_v16 = vsel %vm13626_vm12, %v13624_v26, 0.0  ;;  %v13629_v34 = vsub.f32 %v13628_v1, %v10671_v15  ;;  %v13630_v23 = vld [vmem:[#allocation93_spill] sm:$0xff]  ;;  %v4735_v26 = vsel %vm13406_vm6, %v4608_v10, 0.0 }
 0x42d   :  { %vm13631_vm9 = vnez %v13630_v23  ;;  %v4610_v50 = vmul.f32 %v11397_v16, %v11397_v16 }
 0x42e   :  { %v4732_v54 = vadd.f32 %v4731_v20, %v4730_v28  ;;  %v11407_v8 = vsel %vm13631_vm9, %v13629_v34, 0.0  ;;  %v13633_v28 = vsub.f32 %v13632_v60, %v10671_v15  ;;  %v13634_v20 = vld [vmem:[#allocation95_spill] sm:$0xff]  ;;  %v4737_v34 = vsel %vm13636_vm14, %v4609_v2, 0.0  ;;  %vm13643_vm14 = vmmov %vm13406_vm6 }
 0x42f   :  { %vm13635_vm12 = vnez %v13634_v20  ;;  %v4611_v1 = vmul.f32 %v11407_v8, %v11407_v8 }
 0x430   :  { %v4734_v35 = vadd.f32 %v4733_v48, %v4732_v54  ;;  %v11417_v42 = vsel %vm13635_vm12, %v13633_v28, 0.0  ;;  %v13637_v54 = vsub.f32 %v13367_v61, %v10671_v15  ;;  %v13638_v48 = vld [vmem:[#allocation99_spill] sm:$0xff]  ;;  %v4739_v28 = vsel %vm13406_vm6, %v4610_v50, 0.0 }
 0x431   :  { %vm13639_vm9 = vnez %v13638_v48  ;;  %v4612_v60 = vmul.f32 %v11417_v42, %v11417_v42 }
 0x432   :  { %v4736_v57 = vadd.f32 %v4735_v26, %v4734_v35  ;;  %v11427_v23 = vsel %vm13639_vm9, %v13637_v54, 0.0  ;;  %v13640_v35 = vsub.f32 %v13368_v13, %v10671_v15  ;;  %v13641_v26 = vld [vmem:[#allocation97_spill] sm:$0xff]  ;;  %v4741_v54 = vsel %vm13643_vm14, %v4611_v1, 0.0  ;;  %vm13650_vm14 = vmmov %vm13406_vm6 }
 0x433   :  { %vm13642_vm12 = vnez %v13641_v26  ;;  %v4613_v61 = vmul.f32 %v11427_v23, %v11427_v23 }
 0x434   :  { %v4738_v10 = vadd.f32 %v4737_v34, %v4736_v57  ;;  %v11437_v20 = vsel %vm13642_vm12, %v13640_v35, 0.0  ;;  %v13644_v57 = vsub.f32 %v13369_v40, %v10671_v15  ;;  %v13645_v34 = vld [vmem:[#allocation101_spill] sm:$0xff]  ;;  %v4743_v35 = vsel %vm13406_vm6, %v4612_v60, 0.0 }
 0x435   :  { %vm13646_vm9 = vnez %v13645_v34  ;;  %v4614_v13 = vmul.f32 %v11437_v20, %v11437_v20  ;;  %v13651_v34 = vld [vmem:[#allocation109_spill] sm:$0xff] }
 0x436   :  { %v4740_v2 = vadd.f32 %v4739_v28, %v4738_v10  ;;  %v11447_v48 = vsel %vm13646_vm9, %v13644_v57, 0.0  ;;  %v13647_v10 = vsub.f32 %v10591_v24, %v10671_v15  ;;  %v13648_v28 = vld [vmem:[#allocation103_spill] sm:$0xff]  ;;  %v4745_v57 = vsel %vm13650_vm14, %v4613_v61, 0.0  ;;  %vm13658_vm14 = vmmov %vm13406_vm6 }
 0x437   :  { %vm13649_vm12 = vnez %v13648_v28  ;;  %v4615_v40 = vmul.f32 %v11447_v48, %v11447_v48 }
 0x438   :  { %v4742_v50 = vadd.f32 %v4741_v54, %v4740_v2  ;;  %v11457_v26 = vsel %vm13649_vm12, %v13647_v10, 0.0  ;;  %v13652_v2 = vsub.f32 %v13651_v34, %v10671_v15  ;;  %v13653_v54 = vld [vmem:[#allocation106_spill] sm:$0xff]  ;;  %v4747_v10 = vsel %vm13406_vm6, %v4614_v13, 0.0 }
 0x439   :  { %vm13654_vm9 = vnez %v13653_v54  ;;  %v4616_v24 = vmul.f32 %v11457_v26, %v11457_v26 }
 0x43a   :  { %v4744_v1 = vadd.f32 %v4743_v35, %v4742_v50  ;;  %v11467_v6 = vsel %vm13654_vm9, %v13652_v2, 0.0  ;;  %v13655_v50 = vsub.f32 %v13371_v38, %v10671_v15  ;;  %v13656_v35 = vld [vmem:[#allocation105_spill] sm:$0xff]  ;;  %v4749_v2 = vsel %vm13658_vm14, %v4615_v40, 0.0  ;;  %vm13667_vm14 = vmmov %vm13406_vm6 }
 0x43b   :  { %vm13657_vm12 = vnez %v13656_v35  ;;  %v4617_v34 = vmul.f32 %v11467_v6, %v11467_v6  ;;  %v13663_v35 = vld [vmem:[#allocation112_spill] sm:$0xff] }
 0x43c   :  { %v4746_v60 = vadd.f32 %v4745_v57, %v4744_v1  ;;  %v11477_v28 = vsel %vm13657_vm12, %v13655_v50, 0.0  ;;  %v13659_v1 = vsub.f32 %v13372_v36, %v10671_v15  ;;  %v13660_v57 = vld [vmem:[#allocation108_spill] sm:$0xff]  ;;  %v4751_v50 = vsel %vm13406_vm6, %v4616_v24, 0.0 }
 0x43d   :  { %vm13661_vm9 = vnez %v13660_v57  ;;  %v4618_v38 = vmul.f32 %v11477_v28, %v11477_v28  ;;  %v13669_v24 = vsub.f32 %v10657_v41, %v10671_v15 }
 0x43e   :  { %v4748_v61 = vadd.f32 %v4747_v10, %v4746_v60  ;;  %v11487_v54 = vsel %vm13661_vm9, %v13659_v1, 0.0  ;;  %v13664_v60 = vsub.f32 %v13663_v35, %v10671_v15  ;;  %v4753_v1 = vsel %vm13667_vm14, %v4617_v34, 0.0  ;;  %vm13668_vm9 = vmmov %vm13406_vm6 }
 0x43f   :  { %13662 = vst [vmem:[#allocation56_spill] sm:$0xff] %v11487_v54  ;;  %v4619_v36 = vmul.f32 %v11487_v54, %v11487_v54  ;;  %v11510_v10 = vsel %vm10643_vm13, %v13669_v24, 0.0  ;;  %vm13672_vm14 = vmmov %vm13406_vm6 }
 0x440   :  { %v4750_v13 = vadd.f32 %v4749_v2, %v4748_v61  ;;  %v11497_v17 = vsel %vm10631_vm11, %v13664_v60, 0.0  ;;  %v4755_v2 = vsel %vm13668_vm9, %v4618_v38, 0.0  ;;  %13671 = vst [vmem:[#allocation57_spill] sm:$0xff] %v11510_v10  ;;  %v4621_v34 = vmul.f32 %v11510_v10, %v11510_v10  ;;  %vm13676_vm9 = vmmov %vm13406_vm6 }
 0x441   :  { %13666 = vst [vmem:[#allocation58_spill] sm:$0xff] %v11497_v17  ;;  %v4620_v61 = vmul.f32 %v11497_v17, %v11497_v17 }
 0x442   :  { %v4752_v40 = vadd.f32 %v4751_v50, %v4750_v13  ;;  %v4757_v13 = vsel %vm13406_vm6, %v4619_v36, 0.0  ;;  %v13677_v36 = vld [vmem:[#allocation114_spill] sm:$0xff] }
 0x444   :  { %v4754_v57 = vadd.f32 %v4753_v1, %v4752_v40  ;;  %v4759_v40 = vsel %vm13672_vm14, %v4620_v61, 0.0  ;;  %v13673_v1 = vsub.f32 %v10635_v30, %v10671_v15  ;;  %vm13680_vm14 = vmmov %vm13406_vm6 }
 0x446   :  { %v4756_v60 = vadd.f32 %v4755_v2, %v4754_v57  ;;  %v11521_v17 = vsel %vm10637_vm5, %v13673_v1, 0.0  ;;  %v4761_v57 = vsel %vm13676_vm9, %v4621_v34, 0.0  ;;  %v13678_v2 = vsub.f32 %v13677_v36, %v10671_v15 }
 0x447   :  { %13675 = vst [vmem:[#allocation59_spill] sm:$0xff] %v11521_v17  ;;  %v4622_v24 = vmul.f32 %v11521_v17, %v11521_v17 }
 0x448   :  { %v4758_v50 = vadd.f32 %v4757_v13, %v4756_v60  ;;  %v11531_v13 = vsel %vm10653_vm3, %v13678_v2, 0.0 }
 0x449   :  { %v4623_v30 = vmul.f32 %v11531_v13, %v11531_v13  ;;  %v4763_v1 = vsel %vm13406_vm6, %v4622_v24, 0.0 }
 0x44a   :  { %v4760_v41 = vadd.f32 %v4759_v40, %v4758_v50 }
 0x44b   :  { %v4765_v50 = vsel %vm13680_vm14, %v4623_v30, 0.0 }
 0x44c   :  { %v4762_v61 = vadd.f32 %v4761_v57, %v4760_v41 }
 0x44e   :  { %v4764_v38 = vadd.f32 %v4763_v1, %v4762_v61 }
 0x450   :  { %v4766_v40 = vadd.f32 %v4765_v50, %v4764_v38  ;;  %v11546_v38 = vld [vmem:[%s12185_s2] ss:$0 sm:$0xff] }
 0x452   :  { %v4767_v35 = vrot.slane %v4766_v40, 4 }
 0x454   :  { %v4768_v17 = vadd.f32 %v4767_v35, %v4766_v40 }
 0x456   :  { %v4769_v34 = vrot.slane %v4768_v17, 2 }
 0x458   :  { %v4770_v10 = vadd.f32 %v4769_v34, %v4768_v17 }
 0x45a   :  { %v4771_v54 = vrot.slane %v4770_v10, 1 }
 0x45c   :  { %v4772_v15 = vadd.f32 %v4771_v54, %v4770_v10 }
 0x45e   :  { %v4773_v36 = vmul.f32 0.001953125, %v4772_v15 }
 0x460   :  { %v4774_v60 = vadd.f32 1e-05, %v4773_v36 }
 0x462   :  { %6223 = vrsqrt.f32 %v4774_v60 }
 0x46c   :  { %v11537_v2 = vpop.eup %6223 }
 0x46d   :  { %v4812_v41 = vmul.f32 %v11537_v2, %v11177_v0  ;;  %v4813_v24 = vmul.f32 %v11537_v2, %v11187_v21  ;;  %v4814_v17 = vmul.f32 %v11537_v2, %v11197_v43  ;;  %v4815_v54 = vmul.f32 %v11537_v2, %v11207_v19  ;;  %v11557_v0 = vld [vmem:[%s12186_s3] ss:$0 sm:$0xff] }
 0x46e   :  { %v4816_v21 = vmul.f32 %v11537_v2, %v11217_v49  ;;  %v4817_v43 = vmul.f32 %v11537_v2, %v11227_v39  ;;  %v4818_v30 = vmul.f32 %v11537_v2, %v11237_v44  ;;  %v4819_v49 = vmul.f32 %v11537_v2, %v11247_v62 }
 0x46f   :  { %v4891_v10 = vmul.f32 %v11546_v38, %v4812_v41  ;;  %v4892_v35 = vmul.f32 %v11546_v38, %v4813_v24  ;;  %v4893_v57 = vmul.f32 %v11546_v38, %v4814_v17  ;;  %v4894_v60 = vmul.f32 %v11546_v38, %v4815_v54 }
 0x470   :  { %v4895_v1 = vmul.f32 %v11546_v38, %v4816_v21  ;;  %v4896_v40 = vmul.f32 %v11546_v38, %v4817_v43  ;;  %v4820_v36 = vmul.f32 %v11537_v2, %v11257_v63  ;;  %v4897_v41 = vmul.f32 %v11546_v38, %v4818_v30 }
 0x471   :  { %v4970_v19 = vadd.f32 %v11557_v0, %v4891_v10  ;;  %v4971_v61 = vadd.f32 %v11557_v0, %v4892_v35  ;;  %v4972_v50 = vadd.f32 %v11557_v0, %v4893_v57  ;;  %v4973_v39 = vadd.f32 %v11557_v0, %v4894_v60 }
 0x472   :  { %v4974_v44 = vadd.f32 %v11557_v0, %v4895_v1  ;;  %v4821_v17 = vmul.f32 %v11537_v2, %v11267_v7  ;;  %v4898_v54 = vmul.f32 %v11546_v38, %v4819_v49  ;;  %v4975_v62 = vadd.f32 %v11557_v0, %v4896_v40 }
 0x473   :  { %v5042_v34 = vmax.f32 %v4970_v19, 0.0  ;;  %v5043_v15 = vmax.f32 %v4971_v61, 0.0  ;;  %v5044_v24 = vmax.f32 %v4972_v50, 0.0  ;;  %v5045_v10 = vmax.f32 %v4973_v39, 0.0 }
 0x474   :  { %v4822_v63 = vmul.f32 %v11537_v2, %v11277_v56  ;;  %v4899_v57 = vmul.f32 %v11546_v38, %v4820_v36  ;;  %v4976_v43 = vadd.f32 %v11557_v0, %v4897_v41  ;;  %v5046_v60 = vmax.f32 %v4974_v44, 0.0 }
 0x475   :  { %v5114_v35 = vsel %vm13536_vm2, %v5042_v34, 0.0  ;;  %v5115_v21 = vsel %vm13540_vm0, %v5043_v15, 0.0  ;;  %v5116_v7 = vsel %vm13543_vm4, %v5044_v24, 0.0  ;;  %v4823_v19 = vmul.f32 %v11537_v2, %v11287_v46  ;;  %vm13681_vm2 = vmmov %vm13406_vm6 }
 0x476   :  { %v4900_v51 = vmul.f32 %v11546_v38, %v4821_v17  ;;  %v5228_v61 = vsel %vm13681_vm2, %v5114_v35, 0.0  ;;  %vm13682_vm9 = vmmov %vm13681_vm2  ;;  %v4977_v30 = vadd.f32 %v11557_v0, %v4898_v54  ;;  %v5047_v56 = vmax.f32 %v4975_v62, 0.0 }
 0x477   :  { %v5229_v5 = vsel %vm13682_vm9, %v5115_v21, 0.0  ;;  %v5117_v1 = vsel %vm13547_vm10, %v5045_v10, 0.0  ;;  %v4824_v55 = vmul.f32 %v11537_v2, %v11297_v29  ;;  %v4901_v49 = vmul.f32 %v11546_v38, %v4822_v63  ;;  %vm13683_vm4 = vmmov %vm13681_vm2 }
 0x478   :  { %v5230_v50 = vadd.f32 %v5229_v5, %v5228_v61  ;;  %v5231_v46 = vsel %vm13683_vm4, %v5116_v7, 0.0  ;;  %v4978_v40 = vadd.f32 %v11557_v0, %v4899_v57  ;;  %v5048_v39 = vmax.f32 %v4976_v43, 0.0  ;;  %vm13684_vm0 = vmmov %vm13681_vm2 }
 0x479   :  { %v5118_v34 = vsel %vm13550_vm7, %v5046_v60, 0.0  ;;  %v4902_v36 = vmul.f32 %v11546_v38, %v4823_v19  ;;  %v5233_v59 = vsel %vm13684_vm0, %v5117_v1, 0.0  ;;  %v4979_v41 = vadd.f32 %v11557_v0, %v4900_v51  ;;  %vm13685_vm10 = vmmov %vm13684_vm0 }
 0x47a   :  { %v5232_v15 = vadd.f32 %v5231_v46, %v5230_v50  ;;  %v5049_v44 = vmax.f32 %v4977_v30, 0.0  ;;  %v5119_v29 = vsel %vm13554_vm8, %v5047_v56, 0.0  ;;  %v4825_v17 = vmul.f32 %v11537_v2, %v11307_v45  ;;  %vm13686_vm7 = vmmov %vm13684_vm0 }
 0x47b   :  { %v4903_v54 = vmul.f32 %v11546_v38, %v4824_v55  ;;  %v5235_v14 = vsel %vm13685_vm10, %v5118_v34, 0.0  ;;  %v4980_v62 = vadd.f32 %v11557_v0, %v4901_v49  ;;  %v5050_v10 = vmax.f32 %v4978_v40, 0.0  ;;  %vm13687_vm8 = vmmov %vm13684_vm0 }
 0x47c   :  { %v5234_v24 = vadd.f32 %v5233_v59, %v5232_v15  ;;  %v5120_v35 = vsel %vm13557_vm15, %v5048_v39, 0.0  ;;  %v5237_v63 = vsel %vm13686_vm7, %v5119_v29, 0.0  ;;  %v4981_v25 = vadd.f32 %v11557_v0, %v4902_v36  ;;  %vm13689_vm6 = vmmov %vm13684_vm0 }
 0x47d   :  { %v5051_v57 = vmax.f32 %v4979_v41, 0.0  ;;  %v5121_v43 = vsel %vm13561_vm1, %v5049_v44, 0.0  ;;  %v4826_v60 = vmul.f32 %v11537_v2, %v11317_v47  ;;  %v4904_v7 = vmul.f32 %v11546_v38, %v4825_v17  ;;  %vm13691_vm14 = vmmov %vm13684_vm0 }
 0x47e   :  { %v5236_v21 = vadd.f32 %v5235_v14, %v5234_v24  ;;  %v5239_v19 = vsel %vm13687_vm8, %v5120_v35, 0.0  ;;  %v4982_v11 = vadd.f32 %v11557_v0, %v4903_v54  ;;  %v5052_v51 = vmax.f32 %v4980_v62, 0.0  ;;  %vm13693_vm9 = vmmov %vm13684_vm0 }
 0x47f   :  { %vm13688_vm15 = vnez %v13563_v3  ;;  %v5241_v30 = vsel %vm13689_vm6, %v5121_v43, 0.0  ;;  %v5053_v56 = vmax.f32 %v4981_v25, 0.0  ;;  %vm13690_vm1 = vnez %v13568_v12  ;;  %vm13696_vm7 = vmmov %vm13684_vm0  ;;  %v13699_v25 = vld [vmem:[#allocation56_spill] sm:$0xff] }
 0x480   :  { %v5238_v45 = vadd.f32 %v5237_v63, %v5236_v21  ;;  %v5122_v61 = vsel %vm13688_vm15, %v5050_v10, 0.0  ;;  %v5123_v22 = vsel %vm13690_vm1, %v5051_v57, 0.0  ;;  %v4827_v47 = vmul.f32 %v11537_v2, %v11327_v37  ;;  %vm13698_vm15 = vmmov %vm13684_vm0 }
 0x481   :  { %v4905_v50 = vmul.f32 %v11546_v38, %v4826_v60  ;;  %v4983_v55 = vadd.f32 %v11557_v0, %v4904_v7  ;;  %v5243_v49 = vsel %vm13691_vm14, %v5122_v61, 0.0  ;;  %v5054_v46 = vmax.f32 %v4982_v11, 0.0  ;;  %vm13702_vm6 = vmmov %vm13684_vm0  ;;  %v13705_v11 = vld [vmem:[#allocation59_spill] sm:$0xff] }
 0x482   :  { %v5240_v5 = vadd.f32 %v5239_v19, %v5238_v45  ;;  %vm13692_vm2 = vnez %v13572_v4  ;;  %v5245_v39 = vsel %vm13693_vm9, %v5123_v22, 0.0  ;;  %v4828_v12 = vmul.f32 %v11537_v2, %v11337_v18  ;;  %vm13706_vm14 = vmmov %vm13684_vm0 }
 0x483   :  { %v5124_v3 = vsel %vm13692_vm2, %v5052_v51, 0.0  ;;  %v4829_v34 = vmul.f32 %v11537_v2, %v11347_v53  ;;  %vm13694_vm4 = vnez %v13577_v32  ;;  %v4906_v36 = vmul.f32 %v11546_v38, %v4827_v47  ;;  %vm13709_vm9 = vmmov %vm13684_vm0 }
 0x484   :  { %v5242_v1 = vadd.f32 %v5241_v30, %v5240_v5  ;;  %v5125_v37 = vsel %vm13694_vm4, %v5053_v56, 0.0  ;;  %v4984_v59 = vadd.f32 %v11557_v0, %v4905_v50  ;;  %v5055_v41 = vmax.f32 %v4983_v55, 0.0 }
 0x485   :  { %v5247_v4 = vsel %vm13684_vm0, %v5124_v3, 0.0  ;;  %v4830_v44 = vmul.f32 %v11537_v2, %v11357_v31  ;;  %v4831_v18 = vmul.f32 %v11537_v2, %v11367_v52  ;;  %vm13695_vm10 = vnez %v13581_v27 }
 0x486   :  { %v5244_v40 = vadd.f32 %v5243_v49, %v5242_v1  ;;  %v5126_v53 = vsel %vm13695_vm10, %v5054_v46, 0.0  ;;  %v4832_v32 = vmul.f32 %v11537_v2, %v11377_v33  ;;  %v4833_v24 = vmul.f32 %v11537_v2, %v11387_v58 }
 0x487   :  { %v4834_v17 = vmul.f32 %v11537_v2, %v11397_v16  ;;  %v5249_v54 = vsel %vm13696_vm7, %v5125_v37, 0.0  ;;  %v4835_v31 = vmul.f32 %v11537_v2, %v11407_v8  ;;  %v4836_v52 = vmul.f32 %v11537_v2, %v11417_v42  ;;  %vm13714_vm7 = vmmov %vm13684_vm0 }
 0x488   :  { %v5246_v15 = vadd.f32 %v5245_v39, %v5244_v40  ;;  %v4907_v27 = vmul.f32 %v11546_v38, %v4828_v12  ;;  %v4985_v62 = vadd.f32 %v11557_v0, %v4906_v36  ;;  %v5056_v33 = vmax.f32 %v4984_v59, 0.0  ;;  %v13707_v40 = vld [vmem:[#allocation77_spill] sm:$0xff] }
 0x489   :  { %vm13697_vm8 = vnez %v13586_v9  ;;  %v5251_v10 = vsel %vm13698_vm15, %v5126_v53, 0.0  ;;  %v4837_v16 = vmul.f32 %v11537_v2, %v11427_v23  ;;  %v4838_v8 = vmul.f32 %v11537_v2, %v11437_v20  ;;  %v13700_v23 = vld [vmem:[#allocation58_spill] sm:$0xff]  ;;  %v13701_v20 = vld [vmem:[#allocation57_spill] sm:$0xff] }
 0x48a   :  { %v5248_v29 = vadd.f32 %v5247_v4, %v5246_v15  ;;  %v5127_v58 = vsel %vm13697_vm8, %v5055_v41, 0.0  ;;  %v4839_v42 = vmul.f32 %v11537_v2, %v11447_v48  ;;  %v4840_v21 = vmul.f32 %v11537_v2, %v11457_v26 }
 0x48b   :  { %v4841_v63 = vmul.f32 %v11537_v2, %v11467_v6  ;;  %v4842_v9 = vmul.f32 %v11537_v2, %v11477_v28  ;;  %v4843_v57 = vmul.f32 %v11537_v2, %v13699_v25  ;;  %v4844_v43 = vmul.f32 %v11537_v2, %v13700_v23  ;;  %v13703_v6 = vld [vmem:[#allocation73_spill] sm:$0xff] }
 0x48c   :  { %v5250_v14 = vadd.f32 %v5249_v54, %v5248_v29  ;;  %v4845_v45 = vmul.f32 %v11537_v2, %v13701_v20  ;;  %v4908_v48 = vmul.f32 %v11546_v38, %v4829_v34  ;;  %v5253_v60 = vsel %vm13702_vm6, %v5127_v58, 0.0  ;;  %v13710_v54 = vld [vmem:[#allocation79_spill] sm:$0xff]  ;;  %vm13721_vm6 = vmmov %vm13684_vm0 }
 0x48d   :  { %v4986_v26 = vadd.f32 %v11557_v0, %v4907_v27  ;;  %v5057_v7 = vmax.f32 %v4985_v62, 0.0  ;;  %vm13704_vm1 = vnez %v13703_v6  ;;  %v4846_v51 = vmul.f32 %v11537_v2, %v13705_v11 }
 0x48e   :  { %v5252_v35 = vadd.f32 %v5251_v10, %v5250_v14  ;;  %v5128_v19 = vsel %vm13704_vm1, %v5056_v33, 0.0  ;;  %v4847_v61 = vmul.f32 %v11537_v2, %v11531_v13  ;;  %v4909_v5 = vmul.f32 %v11546_v38, %v4830_v44 }
 0x48f   :  { %v4910_v30 = vmul.f32 %v11546_v38, %v4831_v18  ;;  %v4911_v56 = vmul.f32 %v11546_v38, %v4832_v32  ;;  %v4912_v22 = vmul.f32 %v11546_v38, %v4833_v24  ;;  %v4913_v1 = vmul.f32 %v11546_v38, %v4834_v17 }
 0x490   :  { %v5254_v28 = vadd.f32 %v5253_v60, %v5252_v35  ;;  %v4914_v47 = vmul.f32 %v11546_v38, %v4835_v31  ;;  %v4915_v50 = vmul.f32 %v11546_v38, %v4836_v52  ;;  %v4916_v55 = vmul.f32 %v11546_v38, %v4837_v16 }
 0x491   :  { %v4917_v49 = vmul.f32 %v11546_v38, %v4838_v8  ;;  %v5255_v13 = vsel %vm13706_vm14, %v5128_v19, 0.0  ;;  %v4987_v46 = vadd.f32 %v11557_v0, %v4908_v48  ;;  %v5058_v3 = vmax.f32 %v4986_v26, 0.0 }
 0x492   :  { %vm13708_vm2 = vnez %v13707_v40  ;;  %v5256_v12 = vadd.f32 %v5255_v13, %v5254_v28  ;;  %v4918_v34 = vmul.f32 %v11546_v38, %v4839_v42  ;;  %v4919_v37 = vmul.f32 %v11546_v38, %v4840_v21  ;;  %v13718_v13 = vld [vmem:[#allocation15_spill] sm:$0xff] }
 0x493   :  { %v5129_v39 = vsel %vm13708_vm2, %v5057_v7, 0.0  ;;  %v4920_v15 = vmul.f32 %v11546_v38, %v4841_v63  ;;  %v4921_v36 = vmul.f32 %v11546_v38, %v4842_v9  ;;  %v4922_v59 = vmul.f32 %v11546_v38, %v4843_v57  ;;  %v13712_v57 = vld [vmem:[#allocation83_spill] sm:$0xff] }
 0x494   :  { %v4923_v41 = vmul.f32 %v11546_v38, %v4844_v43  ;;  %v4924_v4 = vmul.f32 %v11546_v38, %v4845_v45  ;;  %v4925_v44 = vmul.f32 %v11546_v38, %v4846_v51  ;;  %v4926_v18 = vmul.f32 %v11546_v38, %v4847_v61 }
 0x495   :  { %v4988_v53 = vadd.f32 %v11557_v0, %v4909_v5  ;;  %v4989_v29 = vadd.f32 %v11557_v0, %v4910_v30  ;;  %v5257_v32 = vsel %vm13709_vm9, %v5129_v39, 0.0  ;;  %v4990_v24 = vadd.f32 %v11557_v0, %v4911_v56  ;;  %v13715_v30 = vld [vmem:[#allocation81_spill] sm:$0xff] }
 0x496   :  { %v5059_v17 = vmax.f32 %v4987_v46, 0.0  ;;  %vm13711_vm4 = vnez %v13710_v54  ;;  %v5258_v52 = vadd.f32 %v5257_v32, %v5256_v12  ;;  %v4991_v27 = vadd.f32 %v11557_v0, %v4912_v22  ;;  %v13729_v54 = vld [vmem:[#allocation93_spill] sm:$0xff] }
 0x497   :  { %v5130_v31 = vsel %vm13711_vm4, %v5058_v3, 0.0  ;;  %v4992_v14 = vadd.f32 %v11557_v0, %v4913_v1  ;;  %v4993_v62 = vadd.f32 %v11557_v0, %v4914_v47  ;;  %v4994_v33 = vadd.f32 %v11557_v0, %v4915_v50  ;;  %v13717_v1 = vld [vmem:[#allocation9_spill] sm:$0xff] }
 0x498   :  { %v4995_v58 = vadd.f32 %v11557_v0, %v4916_v55  ;;  %v4996_v10 = vadd.f32 %v11557_v0, %v4917_v49  ;;  %v4997_v16 = vadd.f32 %v11557_v0, %v4918_v34  ;;  %v4998_v8 = vadd.f32 %v11557_v0, %v4919_v37  ;;  %v13719_v37 = vld [vmem:[#allocation85_spill] sm:$0xff] }
 0x499   :  { %v4999_v42 = vadd.f32 %v11557_v0, %v4920_v15  ;;  %v5000_v35 = vadd.f32 %v11557_v0, %v4921_v36  ;;  %v5001_v21 = vadd.f32 %v11557_v0, %v4922_v59  ;;  %v5259_v63 = vsel %vm13684_vm0, %v5130_v31, 0.0  ;;  %v13722_v59 = vld [vmem:[#allocation17_spill] sm:$0xff] }
 0x49a   :  { %v5002_v9 = vadd.f32 %v11557_v0, %v4923_v41  ;;  %v5060_v25 = vmax.f32 %v4988_v53, 0.0  ;;  %vm13713_vm10 = vnez %v13712_v57  ;;  %v5260_v43 = vadd.f32 %v5259_v63, %v5258_v52  ;;  %v13731_v52 = vld [vmem:[#allocation14_spill] sm:$0xff] }
 0x49b   :  { %v5131_v23 = vsel %vm13713_vm10, %v5059_v17, 0.0  ;;  %v5003_v20 = vadd.f32 %v11557_v0, %v4924_v4  ;;  %v5004_v45 = vadd.f32 %v11557_v0, %v4925_v44  ;;  %v5005_v48 = vadd.f32 %v11557_v0, %v4926_v18  ;;  %v13723_v4 = vld [vmem:[#allocation87_spill] sm:$0xff] }
 0x49c   :  { %v5061_v60 = vmax.f32 %v4989_v29, 0.0  ;;  %v5062_v26 = vmax.f32 %v4990_v24, 0.0  ;;  %v5063_v7 = vmax.f32 %v4991_v27, 0.0  ;;  %v5064_v6 = vmax.f32 %v4992_v14, 0.0  ;;  %v13725_v18 = vld [vmem:[#allocation91_spill] sm:$0xff]  ;;  %v13727_v24 = vld [vmem:[#allocation89_spill] sm:$0xff] }
 0x49d   :  { %v5065_v19 = vmax.f32 %v4993_v62, 0.0  ;;  %v5066_v28 = vmax.f32 %v4994_v33, 0.0  ;;  %v5067_v11 = vmax.f32 %v4995_v58, 0.0  ;;  %v5068_v51 = vmax.f32 %v4996_v10, 0.0  ;;  %v13732_v62 = vld [vmem:[#allocation95_spill] sm:$0xff] }
 0x49e   :  { %v5261_v61 = vsel %vm13714_vm7, %v5131_v23, 0.0  ;;  %v5069_v5 = vmax.f32 %v4997_v16, 0.0  ;;  %vm13716_vm8 = vnez %v13715_v30  ;;  %v4776_v47 = vmul.f32 %v11537_v2, %v13717_v1  ;;  %v13734_v58 = vld [vmem:[#allocation99_spill] sm:$0xff]  ;;  %v13736_v16 = vld [vmem:[#allocation97_spill] sm:$0xff] }
 0x49f   :  { %v5132_v56 = vsel %vm13716_vm8, %v5060_v25, 0.0  ;;  %v5262_v22 = vadd.f32 %v5261_v61, %v5260_v43  ;;  %v5070_v50 = vmax.f32 %v4998_v8, 0.0  ;;  %v5071_v55 = vmax.f32 %v4999_v42, 0.0  ;;  %v13738_v42 = vld [vmem:[#allocation101_spill] sm:$0xff]  ;;  %v13743_v25 = vld [vmem:[#allocation16_spill] sm:$0xff]  ;;  %v13744_v43 = vld [vmem:[#allocation106_spill] sm:$0xff] }
 0x4a0   :  { %v5072_v49 = vmax.f32 %v5000_v35, 0.0  ;;  %v4777_v46 = vmul.f32 %v11537_v2, %v13718_v13  ;;  %v5073_v3 = vmax.f32 %v5001_v21, 0.0  ;;  %v5074_v40 = vmax.f32 %v5002_v9, 0.0  ;;  %v13740_v21 = vld [vmem:[#allocation103_spill] sm:$0xff] }
 0x4a1   :  { %v5075_v39 = vmax.f32 %v5003_v20, 0.0  ;;  %v5076_v12 = vmax.f32 %v5004_v45, 0.0  ;;  %v5077_v34 = vmax.f32 %v5005_v48, 0.0  ;;  %vm13720_vm15 = vnez %v13719_v37 }
 0x4a2   :  { %v5133_v15 = vsel %vm13720_vm15, %v5061_v60, 0.0  ;;  %v5263_v36 = vsel %vm13721_vm6, %v5132_v56, 0.0  ;;  %v4778_v41 = vmul.f32 %v11537_v2, %v13722_v59  ;;  %vm13724_vm1 = vnez %v13723_v4  ;;  %vm13742_vm15 = vmmov %vm13721_vm6 }
 0x4a3   :  { %v5134_v44 = vsel %vm13724_vm1, %v5062_v26, 0.0  ;;  %vm13726_vm14 = vnez %v13725_v18  ;;  %v5264_v29 = vadd.f32 %v5263_v36, %v5262_v22  ;;  %v4855_v32 = vmul.f32 %v11546_v38, %v4776_v47  ;;  %v13778_v22 = vld [vmem:[#allocation7_spill] sm:$0xff] }
 0x4a4   :  { %v5135_v53 = vsel %vm13726_vm14, %v5063_v7, 0.0  ;;  %vm13728_vm2 = vnez %v13727_v24  ;;  %vm13730_vm9 = vnez %v13729_v54  ;;  %v4779_v27 = vmul.f32 %v11537_v2, %v13731_v52  ;;  %v13747_v7 = vld [vmem:[#allocation108_spill] sm:$0xff] }
 0x4a5   :  { %v5136_v17 = vsel %vm13728_vm2, %v5064_v6, 0.0  ;;  %v5137_v31 = vsel %vm13730_vm9, %v5065_v19, 0.0  ;;  %v4856_v14 = vmul.f32 %v11546_v38, %v4777_v46  ;;  %vm13733_vm4 = vnez %v13732_v62  ;;  %v13749_v19 = vld [vmem:[#allocation22_spill] sm:$0xff] }
 0x4a6   :  { %v5138_v33 = vsel %vm13733_vm4, %v5066_v28, 0.0  ;;  %vm13735_vm0 = vnez %v13734_v58  ;;  %vm13737_vm10 = vnez %v13736_v16  ;;  %vm13739_vm7 = vnez %v13738_v42  ;;  %v13766_v62 = vld [vmem:[#allocation6_spill] sm:$0xff] }
 0x4a7   :  { %v5139_v10 = vsel %vm13735_vm0, %v5067_v11, 0.0  ;;  %v5140_v8 = vsel %vm13737_vm10, %v5068_v51, 0.0  ;;  %v5141_v35 = vsel %vm13739_vm7, %v5069_v5, 0.0  ;;  %vm13741_vm8 = vnez %v13740_v21 }
 0x4a8   :  { %v5142_v63 = vsel %vm13741_vm8, %v5070_v50, 0.0  ;;  %v5265_v9 = vsel %vm13742_vm15, %v5133_v15, 0.0  ;;  %v4780_v57 = vmul.f32 %v11537_v2, %v13743_v25  ;;  %v4857_v23 = vmul.f32 %v11546_v38, %v4778_v41  ;;  %v13758_v15 = vld [vmem:[#allocation29_spill] sm:$0xff]  ;;  %v13772_v25 = vld [vmem:[#allocation36_spill] sm:$0xff] }
 0x4a9   :  { %vm13745_vm6 = vnez %v13744_v43  ;;  %v11790_v48 = vsel %vm13657_vm12, %v5072_v49, 0.0  ;;  %v5266_v60 = vadd.f32 %v5265_v9, %v5264_v29  ;;  %v4934_v26 = vadd.f32 %v11557_v0, %v4855_v32  ;;  %vm13754_vm12 = vmmov %vm13742_vm15  ;;  %v13755_v49 = vld [vmem:[#allocation23_spill] sm:$0xff]  ;;  %v13762_v29 = vld [vmem:[#allocation28_spill] sm:$0xff] }
 0x4aa   :  { %v11786_v20 = vsel %vm13745_vm6, %v5071_v55, 0.0  ;;  %vm13748_vm1 = vnez %v13747_v7  ;;  %v4781_v28 = vmul.f32 %v11537_v2, %v13749_v19  ;;  %v4858_v11 = vmul.f32 %v11546_v38, %v4779_v27  ;;  %v13771_v9 = vld [vmem:[#allocation37_spill] sm:$0xff] }
 0x4ab   :  { %v11795_v6 = vsel %vm13748_vm1, %v5073_v3, 0.0  ;;  %v4935_v51 = vadd.f32 %v11557_v0, %v4856_v14  ;;  %v11803_v5 = vsel %vm10631_vm11, %v5074_v40, 0.0  ;;  %v11807_v56 = vsel %vm10643_vm13, %v5075_v39, 0.0  ;;  %vm13756_vm11 = vmmov %vm13754_vm12 }
 0x4ac   :  { %v11811_v1 = vsel %vm10637_vm5, %v5076_v12, 0.0  ;;  %v11815_v50 = vsel %vm10653_vm3, %v5077_v34, 0.0  ;;  %v5267_v55 = vsel %vm13754_vm12, %v5134_v44, 0.0  ;;  %v4782_v13 = vmul.f32 %v11537_v2, %v13755_v49  ;;  %vm13757_vm13 = vmmov %vm13756_vm11  ;;  %v13780_v49 = vld [vmem:[#allocation43_spill] sm:$0xff] }
 0x4ad   :  { %v4859_v46 = vmul.f32 %v11546_v38, %v4780_v57  ;;  %v4936_v3 = vadd.f32 %v11557_v0, %v4857_v23  ;;  %v5268_v40 = vadd.f32 %v5267_v55, %v5266_v60  ;;  %v5269_v39 = vsel %vm13756_vm11, %v5135_v53, 0.0  ;;  %vm13759_vm5 = vmmov %vm13756_vm11  ;;  %v13773_v60 = vld [vmem:[#allocation5_spill] sm:$0xff] }
 0x4ae   :  { %v5271_v37 = vsel %vm13757_vm13, %v5136_v17, 0.0  ;;  %v5006_v12 = vmax.f32 %v4934_v26, 0.0  ;;  %v4783_v36 = vmul.f32 %v11537_v2, %v13758_v15  ;;  %v4860_v34 = vmul.f32 %v11546_v38, %v4781_v28  ;;  %vm13760_vm3 = vmmov %vm13759_vm5  ;;  %v13776_v28 = vld [vmem:[#allocation38_spill] sm:$0xff]  ;;  %v13783_v15 = vld [vmem:[#allocation11_spill] sm:$0xff] }
 0x4af   :  { %v4937_v59 = vadd.f32 %v11557_v0, %v4858_v11  ;;  %v5007_v41 = vmax.f32 %v4935_v51, 0.0  ;;  %v5273_v4 = vsel %vm13759_vm5, %v5137_v31, 0.0  ;;  %v5275_v44 = vsel %vm13760_vm3, %v5138_v33, 0.0  ;;  %vm13761_vm14 = vmmov %vm13760_vm3  ;;  %v13765_v31 = vld [vmem:[#allocation30_spill] sm:$0xff] }
 0x4b0   :  { %v11831_v18 = vsel %vm13761_vm14, %v5139_v10, 0.0  ;;  %v4784_v53 = vmul.f32 %v11537_v2, %v13762_v29  ;;  %vm13763_vm2 = vmmov %vm13760_vm3  ;;  %v4861_v24 = vmul.f32 %v11546_v38, %v4782_v13  ;;  %v4938_v17 = vadd.f32 %v11557_v0, %v4859_v46  ;;  %v13781_v46 = vld [vmem:[#allocation94_spill] sm:$0xff] }
 0x4b1   :  { %v11836_v32 = vsel %vm13763_vm2, %v5140_v8, 0.0  ;;  %v5008_v54 = vmax.f32 %v4936_v3, 0.0  ;;  %v5270_v52 = vadd.f32 %v5269_v39, %v5268_v40  ;;  %vm13764_vm9 = vmmov %vm13763_vm2  ;;  %v4785_v14 = vmul.f32 %v11537_v2, %v13765_v31  ;;  %v13768_v8 = vld [vmem:[#allocation8_spill] sm:$0xff] }
 0x4b2   :  { %v11841_v27 = vsel %vm13764_vm9, %v5141_v35, 0.0  ;;  %vm13767_vm4 = vnez %v13766_v62  ;;  %v4862_v58 = vmul.f32 %v11546_v38, %v4783_v36  ;;  %v4939_v10 = vadd.f32 %v11557_v0, %v4860_v34  ;;  %vm13770_vm10 = vmmov %vm13763_vm2  ;;  %v13789_v62 = vld [vmem:[#allocation96_spill] sm:$0xff] }
 0x4b3   :  { %v5078_v33 = vsel %vm13767_vm4, %v5006_v12, 0.0  ;;  %v5009_v16 = vmax.f32 %v4937_v59, 0.0  ;;  %vm13769_vm0 = vnez %v13768_v8  ;;  %v11852_v21 = vsel %vm13770_vm10, %v5142_v63, 0.0  ;;  %vm13775_vm8 = vmmov %vm13763_vm2 }
 0x4b4   :  { %v5079_v42 = vsel %vm13769_vm0, %v5007_v41, 0.0  ;;  %v4786_v35 = vmul.f32 %v11537_v2, %v13771_v9  ;;  %v4787_v57 = vmul.f32 %v11537_v2, %v13772_v25  ;;  %v4863_v23 = vmul.f32 %v11546_v38, %v4784_v53  ;;  %vm13777_vm15 = vmmov %vm13763_vm2  ;;  %v13785_v41 = vld [vmem:[#allocation102_spill] sm:$0xff] }
 0x4b5   :  { %v4940_v43 = vadd.f32 %v11557_v0, %v4861_v24  ;;  %v5010_v45 = vmax.f32 %v4938_v17, 0.0  ;;  %vm13774_vm7 = vnez %v13773_v60  ;;  %v5150_v7 = vsel %vm13775_vm8, %v5078_v33, 0.0  ;;  %vm13782_vm1 = vmmov %vm13763_vm2 }
 0x4b6   :  { %v5080_v26 = vsel %vm13774_vm7, %v5008_v54, 0.0  ;;  %v5272_v19 = vadd.f32 %v5271_v37, %v5270_v52  ;;  %v4788_v63 = vmul.f32 %v11537_v2, %v13776_v28  ;;  %v4864_v11 = vmul.f32 %v11546_v38, %v4785_v14  ;;  %vm13786_vm11 = vmmov %vm13782_vm1  ;;  %v13787_v52 = vld [vmem:[#allocation13_spill] sm:$0xff] }
 0x4b7   :  { %v5151_v51 = vsel %vm13777_vm15, %v5079_v42, 0.0  ;;  %v4941_v61 = vadd.f32 %v11557_v0, %v4862_v58  ;;  %v5011_v30 = vmax.f32 %v4939_v10, 0.0  ;;  %vm13779_vm6 = vnez %v13778_v22  ;;  %vm13790_vm5 = vmmov %vm13782_vm1  ;;  %v13791_v42 = vld [vmem:[#allocation10_spill] sm:$0xff] }
 0x4b8   :  { %v5081_v47 = vsel %vm13779_vm6, %v5009_v16, 0.0  ;;  %v5152_v55 = vadd.f32 %v5151_v51, %v5150_v7  ;;  %v4789_v13 = vmul.f32 %v11537_v2, %v13780_v49  ;;  %v4790_v3 = vmul.f32 %v11537_v2, %v13781_v46  ;;  %vm13794_vm14 = vmmov %vm13782_vm1  ;;  %v13795_v7 = vld [vmem:[#allocation12_spill] sm:$0xff] }
 0x4b9   :  { %v4865_v40 = vmul.f32 %v11546_v38, %v4786_v35  ;;  %v5153_v39 = vsel %vm13782_vm1, %v5080_v26, 0.0  ;;  %v4942_v37 = vadd.f32 %v11557_v0, %v4863_v23  ;;  %v5012_v12 = vmax.f32 %v4940_v43, 0.0  ;;  %vm13797_vm9 = vmmov %vm13782_vm1  ;;  %v5311_v46 = vld [vmem:[%s12187_s4 + $0x18] sm:$0xff] }
 0x4ba   :  { %vm13784_vm12 = vnez %v13783_v15  ;;  %v5154_v34 = vadd.f32 %v5153_v39, %v5152_v55  ;;  %v5274_v59 = vadd.f32 %v5273_v4, %v5272_v19  ;;  %v4791_v29 = vmul.f32 %v11537_v2, %v13785_v41  ;;  %vm13800_vm0 = vmmov %vm13782_vm1  ;;  %v13801_v15 = vld [vmem:[#allocation21_spill] sm:$0xff] }
 0x4bb   :  { %v5082_v36 = vsel %vm13784_vm12, %v5010_v45, 0.0  ;;  %v4866_v53 = vmul.f32 %v11546_v38, %v4787_v57  ;;  %v5155_v24 = vsel %vm13786_vm11, %v5081_v47, 0.0  ;;  %v4943_v17 = vadd.f32 %v11557_v0, %v4864_v11  ;;  %v13793_v57 = vld [vmem:[#allocation100_spill] sm:$0xff]  ;;  %v13798_v47 = vld [vmem:[#allocation19_spill] sm:$0xff]  ;;  %vm13804_vm7 = vmmov %vm13800_vm0 }
 0x4bc   :  { %v5013_v54 = vmax.f32 %v4941_v61, 0.0  ;;  %vm13788_vm13 = vnez %v13787_v52  ;;  %v5156_v14 = vadd.f32 %v5155_v24, %v5154_v34  ;;  %v4792_v33 = vmul.f32 %v11537_v2, %v13789_v62  ;;  %v13805_v52 = vld [vmem:[#allocation18_spill] sm:$0xff]  ;;  %v5312_v62 = vld [vmem:[%s12187_s4 + $0x20] sm:$0xff]  ;;  %vm13808_vm6 = vmmov %vm13800_vm0 }
 0x4bd   :  { %v5083_v31 = vsel %vm13788_vm13, %v5011_v30, 0.0  ;;  %v4867_v58 = vmul.f32 %v11546_v38, %v4788_v63  ;;  %v4868_v4 = vmul.f32 %v11546_v38, %v4789_v13  ;;  %v5157_v10 = vsel %vm13790_vm5, %v5082_v36, 0.0  ;;  %v5308_v63 = vld [vmem:[%s12187_s4] sm:$0xff]  ;;  %v5310_v13 = vld [vmem:[%s12187_s4 + $0x10] sm:$0xff]  ;;  %vm13812_vm12 = vmmov %vm13800_vm0 }
 0x4be   :  { %v4944_v16 = vadd.f32 %v11557_v0, %v4865_v40  ;;  %v5014_v8 = vmax.f32 %v4942_v37, 0.0  ;;  %vm13792_vm3 = vnez %v13791_v42  ;;  %v5158_v35 = vadd.f32 %v5157_v10, %v5156_v14  ;;  %vm13816_vm13 = vmmov %vm13800_vm0 }
 0x4bf   :  { %v5084_v9 = vsel %vm13792_vm3, %v5012_v12, 0.0  ;;  %v5276_v25 = vadd.f32 %v5275_v44, %v5274_v59  ;;  %v4793_v23 = vmul.f32 %v11537_v2, %v13793_v57  ;;  %v4945_v43 = vadd.f32 %v11557_v0, %v4866_v53  ;;  %v5309_v44 = vld [vmem:[%s12187_s4 + $0x8] sm:$0xff]  ;;  %v13803_v59 = vld [vmem:[#allocation104_spill] sm:$0xff]  ;;  %vm13820_vm3 = vmmov %vm13800_vm0 }
 0x4c0   :  { %v5159_v45 = vsel %vm13794_vm14, %v5083_v31, 0.0  ;;  %v4869_v60 = vmul.f32 %v11546_v38, %v4790_v3  ;;  %v5015_v26 = vmax.f32 %v4943_v17, 0.0  ;;  %vm13796_vm2 = vnez %v13795_v7 }
 0x4c1   :  { %v5085_v19 = vsel %vm13796_vm2, %v5013_v54, 0.0  ;;  %v5160_v28 = vadd.f32 %v5159_v45, %v5158_v35  ;;  %v4870_v11 = vmul.f32 %v11546_v38, %v4791_v29  ;;  %v4946_v51 = vadd.f32 %v11557_v0, %v4867_v58  ;;  %v13807_v58 = vld [vmem:[#allocation107_spill] sm:$0xff]  ;;  %v13809_v35 = vld [vmem:[#allocation20_spill] sm:$0xff]  ;;  %vm13824_vm2 = vmmov %vm13800_vm0 }
 0x4c2   :  { %v4947_v61 = vadd.f32 %v11557_v0, %v4868_v4  ;;  %v5161_v30 = vsel %vm13797_vm9, %v5084_v9, 0.0  ;;  %v5016_v22 = vmax.f32 %v4944_v16, 0.0  ;;  %vm13799_vm4 = vnez %v13798_v47 }
 0x4c3   :  { %v5086_v55 = vsel %vm13799_vm4, %v5014_v8, 0.0  ;;  %v5162_v49 = vadd.f32 %v5161_v30, %v5160_v28  ;;  %v5278_v3 = vadd.f32 %v11831_v18, %v5276_v25  ;;  %v5017_v40 = vmax.f32 %v4945_v43, 0.0  ;;  %v13811_v43 = vld [vmem:[#allocation31_spill] sm:$0xff]  ;;  %v13813_v28 = vld [vmem:[#allocation25_spill] sm:$0xff]  ;;  %vm13827_vm4 = vmmov %vm13800_vm0 }
 0x4c4   :  { %v5163_v39 = vsel %vm13800_vm0, %v5085_v19, 0.0  ;;  %v6287_v37 = vmov 0.0|0.0   ;;  %v5977_v12 = vpack.c.bf16 %v5309_v44, %v5308_v63  ;;  %vm13802_vm10 = vnez %v13801_v15  ;;  %v5314_v44 = vld [vmem:[%s12187_s4 + $0x30] sm:$0xff] }
 0x4c5   :  { %5976 = vmatprep.subr.bf16.mxu1 %v6287_v37  ;;  %v5087_v36 = vsel %vm13802_vm10, %v5015_v26, 0.0  ;;  %v5164_v34 = vadd.f32 %v5163_v39, %v5162_v49  ;;  %v4794_v41 = vmul.f32 %v11537_v2, %v13803_v59  ;;  %v4871_v29 = vmul.f32 %v11546_v38, %v4792_v33  ;;  %v5313_v33 = vld [vmem:[%s12187_s4 + $0x28] sm:$0xff] }
 0x4c6   :  { %v5165_v53 = vsel %vm13804_vm7, %v5086_v55, 0.0  ;;  %5978 = vmatpush3.bf16.msra.mxu1 %v5977_v12  ;;  %v5980_v18 = vpack.c.bf16 %v5311_v46, %v5310_v13  ;;  %vm6288_vm8 = vmmov 0   ;;  %v6289_v24 = vmov 0.0   ;;  %v13817_v13 = vld [vmem:[#allocation27_spill] sm:$0xff]  ;;  %vm13832_vm7 = vmmov %vm13800_vm0 }
 0x4c7   :  { %5951 = vmatprep.mubr.msk.f32.mxu1 %vm6288_vm8, %v6289_v24  ;;  %v4948_v17 = vadd.f32 %v11557_v0, %v4869_v60  ;;  %v5018_v54 = vmax.f32 %v4946_v51, 0.0  ;;  %vm13806_vm15 = vnez %v13805_v52  ;;  %v5166_v14 = vadd.f32 %v5165_v53, %v5164_v34  ;;  %5979 = vmatprep.subr.bf16.mxu1 %v6287_v37  ;;  %v13815_v51 = vld [vmem:[#allocation116_spill] sm:$0xff]  ;;  %v13823_v53 = vld [vmem:[#allocation118_spill] sm:$0xff] }
 0x4c8   :  { %v5088_v31 = vsel %vm13806_vm15, %v5016_v22, 0.0  ;;  %v4795_v4 = vmul.f32 %v11537_v2, %v13807_v58  ;;  %v4872_v10 = vmul.f32 %v11546_v38, %v4793_v23  ;;  %v4949_v16 = vadd.f32 %v11557_v0, %v4870_v11  ;;  %v5315_v11 = vld [vmem:[%s12187_s4 + $0x38] sm:$0xff]  ;;  %s5636_s4 = sshll.u32 %s6290_s27, 4  ;;  %s5637_s4 = int_to_ptr.vmem [resolvable:$true] %s5636_s4 }
 0x4c9   :  { %v5167_v8 = vsel %vm13808_vm6, %v5087_v36, 0.0  ;;  %v5280_v42 = vadd.f32 %v11836_v32, %v5278_v3  ;;  %v5019_v9 = vmax.f32 %v4947_v61, 0.0  ;;  %vm13810_vm1 = vnez %v13809_v35  ;;  %vm13835_vm6 = vmmov %vm13800_vm0  ;;  %p6259_p1 = scmp.lt.s32.totalorder %s5637_s4, %s5637_s4 }
 0x4ca   :  { %v5089_v25 = vsel %vm13810_vm1, %v5017_v40, 0.0  ;;  %v5168_v57 = vadd.f32 %v5167_v8, %v5166_v14  ;;  %v4796_v45 = vmul.f32 %v11537_v2, %v13811_v43  ;;  %v4873_v60 = vmul.f32 %v11546_v38, %v4794_v41  ;;  %5981 = vmatpush3.bf16.msra.mxu1 %v5980_v18  ;;  %v13819_v40 = vld [vmem:[#allocation117_spill] sm:$0xff]  ;;  %v13821_v41 = vld [vmem:[#allocation24_spill] sm:$0xff]  ;;  %vm13837_vm1 = vmmov %vm13800_vm0 }
 0x4cb   :  { %v5169_v26 = vsel %vm13812_vm12, %v5088_v31, 0.0  ;;  %v5983_v23 = vpack.c.bf16 %v5313_v33, %v5312_v62  ;;  %v4950_v7 = vadd.f32 %v11557_v0, %v4871_v29  ;;  %v5020_v19 = vmax.f32 %v4948_v17, 0.0  ;;  %5982 = vmatprep.subr.bf16.mxu1 %v6287_v37  ;;  %v13825_v62 = vld [vmem:[#allocation26_spill] sm:$0xff]  ;;  %v13831_v43 = vld [vmem:[#allocation120_spill] sm:$0xff] }
 0x4cc   :  { %vm13814_vm11 = vnez %v13813_v28  ;;  %v5170_v63 = vadd.f32 %v5169_v26, %v5168_v57  ;;  %v4797_v61 = vmul.f32 %v11537_v2, %v13815_v51  ;;  %v4874_v30 = vmul.f32 %v11546_v38, %v4795_v4 }
 0x4cd   :  { %v5090_v32 = vsel %vm13814_vm11, %v5018_v54, 0.0  ;;  %v4951_v22 = vadd.f32 %v11557_v0, %v4872_v10  ;;  %v5171_v47 = vsel %vm13816_vm13, %v5089_v25, 0.0  ;;  %v5282_v55 = vadd.f32 %v11841_v27, %v5280_v42  ;;  %v13828_v10 = vld [vmem:[#allocation119_spill] sm:$0xff]  ;;  %vm13841_vm11 = vmmov %vm13800_vm0 }
 0x4ce   :  { %v5021_v49 = vmax.f32 %v4949_v16, 0.0  ;;  %vm13818_vm5 = vnez %v13817_v13  ;;  %v5172_v3 = vadd.f32 %v5171_v47, %v5170_v63  ;;  %v4798_v39 = vmul.f32 %v11537_v2, %v13819_v40  ;;  %5984 = vmatpush3.bf16.msra.mxu1 %v5983_v23  ;;  %v13838_v47 = vld [vmem:[#allocation32_spill] sm:$0xff]  ;;  %v13840_v13 = vld [vmem:[#allocation122_spill] sm:$0xff] }
 0x4cf   :  { %v5091_v46 = vsel %vm13818_vm5, %v5019_v9, 0.0  ;;  %v4875_v12 = vmul.f32 %v11546_v38, %v4796_v45  ;;  %v5173_v15 = vsel %vm13820_vm3, %v5090_v32, 0.0  ;;  %v5986_v36 = vpack.c.bf16 %v5315_v11, %v5314_v44  ;;  %5985 = vmatprep.subr.bf16.mxu1 %v6287_v37  ;;  %v13836_v44 = vld [vmem:[#allocation121_spill] sm:$0xff]  ;;  %vm13844_vm5 = vmmov %vm13800_vm0 }
 0x4d0   :  { %v4952_v34 = vadd.f32 %v11557_v0, %v4873_v60  ;;  %v5022_v59 = vmax.f32 %v4950_v7, 0.0  ;;  %vm13822_vm14 = vnez %v13821_v41  ;;  %v5174_v29 = vadd.f32 %v5173_v15, %v5172_v3  ;;  %v13842_v15 = vld [vmem:[#allocation34_spill] sm:$0xff]  ;;  %v13845_v41 = vld [vmem:[#allocation123_spill] sm:$0xff]  ;;  %vm13846_vm3 = vmmov %vm13800_vm0 }
 0x4d1   :  { %v5092_v27 = vsel %vm13822_vm14, %v5020_v19, 0.0  ;;  %v4799_v18 = vmul.f32 %v11537_v2, %v13823_v53  ;;  %v4876_v17 = vmul.f32 %v11546_v38, %v4797_v61  ;;  %v4953_v54 = vadd.f32 %v11557_v0, %v4874_v30  ;;  %v13833_v19 = vld [vmem:[#allocation35_spill] sm:$0xff] }
 0x4d2   :  { %v5175_v52 = vsel %vm13824_vm2, %v5091_v46, 0.0  ;;  %v5284_v31 = vadd.f32 %v11852_v21, %v5282_v55  ;;  %v5023_v14 = vmax.f32 %v4951_v22, 0.0  ;;  %vm13826_vm9 = vnez %v13825_v62  ;;  %5987 = vmatpush3.bf16.msra.mxu1 %v5986_v36  ;;  %v13829_v21 = vld [vmem:[#allocation33_spill] sm:$0xff]  ;;  %vm13850_vm2 = vmmov %vm13800_vm0 }
 0x4d3   :  { %v5093_v33 = vsel %vm13826_vm9, %v5021_v49, 0.0  ;;  %v5176_v58 = vadd.f32 %v5175_v52, %v5174_v29  ;;  %v5285_v4 = vsel %vm13827_vm4, %v11786_v20, 0.0  ;;  %v4800_v16 = vmul.f32 %v11537_v2, %v13828_v10  ;;  %5988 = vmatprep.subr.bf16.mxu1 %v6287_v37  ;;  %vm13853_vm4 = vmmov %vm13800_vm0 }
 0x4d4   :  { %v4877_v8 = vmul.f32 %v11546_v38, %v4798_v39  ;;  %v5177_v42 = vsel %vm13800_vm0, %v5092_v27, 0.0  ;;  %v4954_v9 = vadd.f32 %v11557_v0, %v4875_v12  ;;  %v5024_v35 = vmax.f32 %v4952_v34, 0.0 }
 0x4d5   :  { %vm13830_vm10 = vnez %v13829_v21  ;;  %v5178_v57 = vadd.f32 %v5177_v42, %v5176_v58  ;;  %v4801_v20 = vmul.f32 %v11537_v2, %v13831_v43  ;;  %v4878_v45 = vmul.f32 %v11546_v38, %v4799_v18 }
 0x4d6   :  { %v5094_v25 = vsel %vm13830_vm10, %v5022_v59, 0.0  ;;  %v4955_v60 = vadd.f32 %v11557_v0, %v4876_v17  ;;  %v5179_v26 = vsel %vm13832_vm7, %v5093_v33, 0.0  ;;  %v5286_v23 = vadd.f32 %v5285_v4, %v5284_v31  ;;  %vm13858_vm7 = vmmov %vm13800_vm0 }
 0x4d7   :  { %v5025_v7 = vmax.f32 %v4953_v54, 0.0  ;;  %vm13834_vm15 = vnez %v13833_v19  ;;  %v5180_v32 = vadd.f32 %v5179_v26, %v5178_v57  ;;  %v5287_v63 = vsel %vm13835_vm6, %v11790_v48, 0.0  ;;  %v13847_v54 = vld [vmem:[#allocation40_spill] sm:$0xff]  ;;  %vm13861_vm6 = vmmov %vm13800_vm0 }
 0x4d8   :  { %v5095_v28 = vsel %vm13834_vm15, %v5023_v14, 0.0  ;;  %v4802_v11 = vmul.f32 %v11537_v2, %v13836_v44  ;;  %v4879_v51 = vmul.f32 %v11546_v38, %v4800_v16  ;;  %v5181_v61 = vsel %vm13837_vm1, %v5094_v25, 0.0  ;;  %v13849_v14 = vld [vmem:[#allocation124_spill] sm:$0xff]  ;;  %v13851_v16 = vld [vmem:[#allocation42_spill] sm:$0xff]  ;;  %v13859_v44 = vld [vmem:[#allocation41_spill] sm:$0xff] }
 0x4d9   :  { %v4956_v30 = vadd.f32 %v11557_v0, %v4877_v8  ;;  %v5026_v22 = vmax.f32 %v4954_v9, 0.0  ;;  %vm13839_vm12 = vnez %v13838_v47  ;;  %v5182_v49 = vadd.f32 %v5181_v61, %v5180_v32  ;;  %vm13863_vm1 = vmmov %vm13800_vm0 }
 0x4da   :  { %v5096_v55 = vsel %vm13839_vm12, %v5024_v35, 0.0  ;;  %v4803_v46 = vmul.f32 %v11537_v2, %v13840_v13  ;;  %v4880_v3 = vmul.f32 %v11546_v38, %v4801_v20  ;;  %v4957_v48 = vadd.f32 %v11557_v0, %v4878_v45  ;;  %v13854_v35 = vld [vmem:[#allocation125_spill] sm:$0xff]  ;;  %v13855_v45 = vld [vmem:[#allocation39_spill] sm:$0xff] }
 0x4db   :  { %v5183_v40 = vsel %vm13841_vm11, %v5095_v28, 0.0  ;;  %v5288_v39 = vadd.f32 %v5287_v63, %v5286_v23  ;;  %v5027_v12 = vmax.f32 %v4955_v60, 0.0  ;;  %vm13843_vm13 = vnez %v13842_v15  ;;  %v13857_v23 = vld [vmem:[#allocation126_spill] sm:$0xff]  ;;  %vm13867_vm11 = vmmov %vm13800_vm0 }
 0x4dc   :  { %v5097_v36 = vsel %vm13843_vm13, %v5025_v7, 0.0  ;;  %v5184_v34 = vadd.f32 %v5183_v40, %v5182_v49  ;;  %v5289_v59 = vsel %vm13844_vm5, %v11795_v6, 0.0  ;;  %v4804_v27 = vmul.f32 %v11537_v2, %v13845_v41  ;;  %v13866_v40 = vld [vmem:[#allocation128_spill] sm:$0xff]  ;;  %vm13870_vm5 = vmmov %vm13800_vm0 }
 0x4dd   :  { %v4881_v29 = vmul.f32 %v11546_v38, %v4802_v11  ;;  %v5185_v53 = vsel %vm13846_vm3, %v5096_v55, 0.0  ;;  %v4958_v18 = vadd.f32 %v11557_v0, %v4879_v51  ;;  %v5028_v17 = vmax.f32 %v4956_v30, 0.0  ;;  %v13862_v30 = vld [vmem:[#allocation127_spill] sm:$0xff]  ;;  %vm13872_vm3 = vmmov %vm13800_vm0 }
 0x4de   :  { %vm13848_vm14 = vnez %v13847_v54  ;;  %v5186_v31 = vadd.f32 %v5185_v53, %v5184_v34  ;;  %v4805_v62 = vmul.f32 %v11537_v2, %v13849_v14  ;;  %v4882_v33 = vmul.f32 %v11546_v38, %v4803_v46  ;;  %v13864_v46 = vld [vmem:[#allocation45_spill] sm:$0xff]  ;;  %v13873_v14 = vld [vmem:[#allocation44_spill] sm:$0xff] }
 0x4df   :  { %v5098_v52 = vsel %vm13848_vm14, %v5026_v22, 0.0  ;;  %v4959_v6 = vadd.f32 %v11557_v0, %v4880_v3  ;;  %v5187_v58 = vsel %vm13850_vm2, %v5097_v36, 0.0  ;;  %v5290_v4 = vadd.f32 %v5289_v59, %v5288_v39  ;;  %v13868_v59 = vld [vmem:[#allocation47_spill] sm:$0xff]  ;;  %v13871_v53 = vld [vmem:[#allocation129_spill] sm:$0xff]  ;;  %vm13876_vm2 = vmmov %vm13800_vm0 }
 0x4e0   :  { %v5029_v10 = vmax.f32 %v4957_v48, 0.0  ;;  %vm13852_vm9 = vnez %v13851_v16  ;;  %v5188_v42 = vadd.f32 %v5187_v58, %v5186_v31  ;;  %v5291_v9 = vsel %vm13853_vm4, %v11803_v5, 0.0  ;;  %vm13879_vm4 = vmmov %vm13800_vm0 }
 0x4e1   :  { %v5099_v8 = vsel %vm13852_vm9, %v5027_v12, 0.0  ;;  %v4806_v21 = vmul.f32 %v11537_v2, %v13854_v35  ;;  %v4883_v25 = vmul.f32 %v11546_v38, %v4804_v27  ;;  %v5189_v57 = vsel %vm13800_vm0, %v5098_v52, 0.0 }
 0x4e2   :  { %v4960_v43 = vadd.f32 %v11557_v0, %v4881_v29  ;;  %v5030_v20 = vmax.f32 %v4958_v18, 0.0  ;;  %vm13856_vm10 = vnez %v13855_v45  ;;  %v5190_v26 = vadd.f32 %v5189_v57, %v5188_v42  ;;  %v13877_v42 = vld [vmem:[#allocation46_spill] sm:$0xff] }
 0x4e3   :  { %v5100_v60 = vsel %vm13856_vm10, %v5028_v17, 0.0  ;;  %v4807_v7 = vmul.f32 %v11537_v2, %v13857_v23  ;;  %v4884_v19 = vmul.f32 %v11546_v38, %v4805_v62  ;;  %v4961_v5 = vadd.f32 %v11557_v0, %v4882_v33  ;;  %vm13882_vm10 = vmmov %vm13863_vm1 }
 0x4e4   :  { %v5191_v28 = vsel %vm13858_vm7, %v5099_v8, 0.0  ;;  %v5292_v32 = vadd.f32 %v5291_v9, %v5290_v4  ;;  %v5031_v63 = vmax.f32 %v4959_v6, 0.0  ;;  %vm13860_vm15 = vnez %v13859_v44  ;;  %v13875_v6 = vld [vmem:[#allocation130_spill] sm:$0xff]  ;;  %vm13883_vm7 = vmmov %vm13863_vm1 }
 0x4e5   :  { %v5101_v11 = vsel %vm13860_vm15, %v5029_v10, 0.0  ;;  %v5192_v51 = vadd.f32 %v5191_v28, %v5190_v26  ;;  %v5293_v61 = vsel %vm13861_vm6, %v11807_v56, 0.0  ;;  %v4808_v22 = vmul.f32 %v11537_v2, %v13862_v30  ;;  %v13884_v28 = vld [vmem:[#allocation50_spill] sm:$0xff]  ;;  %vm13886_vm6 = vmmov %vm13863_vm1 }
 0x4e6   :  { %v4885_v47 = vmul.f32 %v11546_v38, %v4806_v21  ;;  %v5193_v55 = vsel %vm13863_vm1, %v5100_v60, 0.0  ;;  %v4962_v49 = vadd.f32 %v11557_v0, %v4883_v25  ;;  %v5032_v13 = vmax.f32 %v4960_v43, 0.0 }
 0x4e7   :  { %vm13865_vm12 = vnez %v13864_v46  ;;  %v5194_v48 = vadd.f32 %v5193_v55, %v5192_v51  ;;  %v4809_v39 = vmul.f32 %v11537_v2, %v13866_v40  ;;  %v4886_v12 = vmul.f32 %v11546_v38, %v4807_v7  ;;  %v13893_v40 = vld [vmem:[#allocation52_spill] sm:$0xff] }
 0x4e8   :  { %v5102_v3 = vsel %vm13865_vm12, %v5030_v20, 0.0  ;;  %v4963_v56 = vadd.f32 %v11557_v0, %v4884_v19  ;;  %v5195_v15 = vsel %vm13867_vm11, %v5101_v11, 0.0  ;;  %v5294_v36 = vadd.f32 %v5293_v61, %v5292_v32  ;;  %v13887_v61 = vld [vmem:[#allocation49_spill] sm:$0xff]  ;;  %vm13889_vm12 = vmmov %vm13876_vm2 }
 0x4e9   :  { %v5033_v34 = vmax.f32 %v4961_v5, 0.0  ;;  %vm13869_vm13 = vnez %v13868_v59  ;;  %v5196_v27 = vadd.f32 %v5195_v15, %v5194_v48  ;;  %v5295_v29 = vsel %vm13870_vm5, %v11811_v1, 0.0 }
 0x4ea   :  { %v5103_v41 = vsel %vm13869_vm13, %v5031_v63, 0.0  ;;  %v4810_v18 = vmul.f32 %v11537_v2, %v13871_v53  ;;  %v4887_v17 = vmul.f32 %v11546_v38, %v4808_v22  ;;  %v5197_v54 = vsel %vm13872_vm3, %v5102_v3, 0.0  ;;  %vm13892_vm13 = vmmov %vm13876_vm2 }
 0x4eb   :  { %v4964_v52 = vadd.f32 %v11557_v0, %v4885_v47  ;;  %v5034_v31 = vmax.f32 %v4962_v49, 0.0  ;;  %vm13874_vm14 = vnez %v13873_v14  ;;  %v5198_v33 = vadd.f32 %v5197_v54, %v5196_v27  ;;  %v13890_v49 = vld [vmem:[#allocation51_spill] sm:$0xff]  ;;  %vm13895_vm3 = vmmov %vm13876_vm2  ;;  %v13898_v27 = vld [vmem:[#allocation53_spill] sm:$0xff] }
 0x4ec   :  { %v5104_v62 = vsel %vm13874_vm14, %v5032_v13, 0.0  ;;  %v4811_v58 = vmul.f32 %v11537_v2, %v13875_v6  ;;  %v4888_v4 = vmul.f32 %v11546_v38, %v4809_v39  ;;  %v4965_v1 = vadd.f32 %v11557_v0, %v4886_v12  ;;  %v13880_v2 = vld [vmem:[#allocation48_spill] sm:$0xff]  ;;  %v13901_v54 = vld [vmem:[#allocation55_spill] sm:$0xff] }
 0x4ed   :  { %v5199_v10 = vsel %vm13876_vm2, %v5103_v41, 0.0  ;;  %v5296_v16 = vadd.f32 %v5295_v29, %v5294_v36  ;;  %v5035_v8 = vmax.f32 %v4963_v56, 0.0  ;;  %vm13878_vm9 = vnez %v13877_v42 }
 0x4ee   :  { %v5105_v9 = vsel %vm13878_vm9, %v5033_v34, 0.0  ;;  %v5200_v35 = vadd.f32 %v5199_v10, %v5198_v33  ;;  %v4889_v21 = vmul.f32 %v11546_v38, %v4810_v18  ;;  %v5201_v25 = vsel %vm13879_vm4, %v5104_v62, 0.0  ;;  %vm13900_vm4 = vmmov %vm13876_vm2 }
 0x4ef   :  { %v4966_v57 = vadd.f32 %v11557_v0, %v4887_v17  ;;  %v5036_v43 = vmax.f32 %v4964_v52, 0.0  ;;  %vm13881_vm0 = vnez %v13880_v2  ;;  %v5297_v60 = vsel %vm13882_vm10, %v11815_v50, 0.0  ;;  %vm13903_vm10 = vmmov %vm13876_vm2  ;;  %v5430_v2 = vld [vmem:[%s12190_s7 + $0x8] sm:$0xff] }
 0x4f0   :  { %v5106_v20 = vsel %vm13881_vm0, %v5034_v31, 0.0  ;;  %v5202_v45 = vadd.f32 %v5201_v25, %v5200_v35  ;;  %v4890_v26 = vmul.f32 %v11546_v38, %v4811_v58  ;;  %v4967_v23 = vadd.f32 %v11557_v0, %v4888_v4 }
 0x4f1   :  { %v5203_v7 = vsel %vm13883_vm7, %v5105_v9, 0.0  ;;  %v5298_v19 = vadd.f32 %v5297_v60, %v5296_v16  ;;  %v5037_v5 = vmax.f32 %v4965_v1, 0.0  ;;  %vm13885_vm15 = vnez %v13884_v28  ;;  %vm13904_vm7 = vmmov %vm13876_vm2  ;;  %v5432_v60 = vld [vmem:[%s12190_s7 + $0x18] sm:$0xff] }
 0x4f2   :  { %v5107_v32 = vsel %vm13885_vm15, %v5035_v8, 0.0  ;;  %v5204_v63 = vadd.f32 %v5203_v7, %v5202_v45  ;;  %v5205_v44 = vsel %vm13886_vm6, %v5106_v20, 0.0  ;;  %v4968_v11 = vadd.f32 %v11557_v0, %v4889_v21  ;;  %vm13905_vm6 = vmmov %vm13876_vm2  ;;  %v5431_v20 = vld [vmem:[%s12190_s7 + $0x10] sm:$0xff] }
 0x4f3   :  { %v5038_v51 = vmax.f32 %v4966_v57, 0.0  ;;  %vm13888_vm1 = vnez %v13887_v61  ;;  %v4969_v38 = vadd.f32 %v11557_v0, %v4890_v26  ;;  %v5207_v22 = vsel %vm13889_vm12, %v5107_v32, 0.0  ;;  %v13896_v0 = vld [vmem:[#allocation54_spill] sm:$0xff] }
 0x4f4   :  { %v5108_v50 = vsel %vm13888_vm1, %v5036_v43, 0.0  ;;  %v5206_v30 = vadd.f32 %v5205_v44, %v5204_v63  ;;  %v5299_v47 = vrot.slane %v5298_v19, 4  ;;  %v5039_v55 = vmax.f32 %v4967_v23, 0.0  ;;  %v5429_v43 = vld [vmem:[%s12190_s7] sm:$0xff] }
 0x4f5   :  { %vm13891_vm11 = vnez %v13890_v49  ;;  %v5209_v3 = vsel %vm13892_vm13, %v5108_v50, 0.0  ;;  %v5040_v48 = vmax.f32 %v4968_v11, 0.0  ;;  %vm13894_vm5 = vnez %v13893_v40  ;;  %v5795_v40 = vld [vmem:[%s12188_s5] ss:$0 sm:$0xff] }
 0x4f6   :  { %v5109_v13 = vsel %vm13891_vm11, %v5037_v5, 0.0  ;;  %v5208_v46 = vadd.f32 %v5207_v22, %v5206_v30  ;;  %v5110_v39 = vsel %vm13894_vm5, %v5038_v51, 0.0  ;;  %v5300_v15 = vadd.f32 %v5299_v47, %v5298_v19 }
 0x4f7   :  { %v5211_v56 = vsel %vm13895_vm3, %v5109_v13, 0.0  ;;  %v5041_v36 = vmax.f32 %v4969_v38, 0.0  ;;  %vm13897_vm14 = vnez %v13896_v0  ;;  %v5213_v41 = vsel %vm13876_vm2, %v5110_v39, 0.0  ;;  %v5545_v0 = vld [vmem:[%s12193_s10] sm:$0xff] }
 0x4f8   :  { %v5210_v12 = vadd.f32 %v5209_v3, %v5208_v46  ;;  %v5111_v34 = vsel %vm13897_vm14, %v5039_v55, 0.0  ;;  %vm13899_vm9 = vnez %v13898_v27  ;;  %v5301_v17 = vrot.slane %v5300_v15, 2  ;;  %v5548_v27 = vld [vmem:[%s12193_s10 + $0x18] sm:$0xff] }
 0x4f9   :  { %v5112_v29 = vsel %vm13899_vm9, %v5040_v48, 0.0  ;;  %v5215_v18 = vsel %vm13900_vm4, %v5111_v34, 0.0  ;;  %vm13902_vm0 = vnez %v13901_v54  ;;  %vm5306_vm15 = vcmask 1040384   ;;  %v5546_v34 = vld [vmem:[%s12193_s10 + $0x8] sm:$0xff] }
 0x4fa   :  { %v5212_v59 = vadd.f32 %v5211_v56, %v5210_v12  ;;  %v5113_v52 = vsel %vm13902_vm0, %v5041_v36, 0.0  ;;  %v5217_v14 = vsel %vm13903_vm10, %v5112_v29, 0.0  ;;  %v5302_v58 = vadd.f32 %v5301_v17, %v5300_v15  ;;  %v5796_v12 = vld [vmem:[%s12189_s6] ss:$0 sm:$0xff] }
 0x4fb   :  { %v5219_v33 = vsel %vm13904_vm7, %v5113_v52, 0.0  ;;  %v5989_v45 = vpack.c.bf16 %v5430_v2, %v5429_v43  ;;  %v5992_v26 = vpack.c.bf16 %v5432_v60, %v5431_v20  ;;  %vm5391_vm1 = vcmask 254976   ;;  %v5799_v43 = vld [vmem:[%s12192_s9] ss:$0 sm:$0xff] }
 0x4fc   :  { %v5214_v53 = vadd.f32 %v5213_v41, %v5212_v59  ;;  %v5303_v10 = vrot.slane %v5302_v58, 1  ;;  %vm5435_vm12 = vcmask 261120   ;;  %v5547_v59 = vld [vmem:[%s12193_s10 + $0x10] sm:$0xff]  ;;  %v5995_v41 = vpack.c.bf16 %v5546_v34, %v5545_v0  ;;  %v5800_v60 = vld [vmem:[%s12194_s11] ss:$0 sm:$0xff] }
 0x4fd   :  { %v5998_v29 = vpack.c.bf16 %v5548_v27, %v5547_v59 }
 0x4fe   :  { %v5216_v31 = vadd.f32 %v5215_v18, %v5214_v53  ;;  %v5304_v42 = vadd.f32 %v5303_v10, %v5302_v58 }
 0x500   :  { %v5218_v62 = vadd.f32 %v5217_v14, %v5216_v31  ;;  %v5305_v21 = vmul.f32 0.00390625, %v5304_v42 }
 0x502   :  { %v5220_v6 = vadd.f32 %v5219_v33, %v5218_v62 }
 0x504   :  { %v5221_v4 = vrot.slane %v5220_v6, 4 }
 0x506   :  { %v5222_v1 = vadd.f32 %v5221_v4, %v5220_v6 }
 0x508   :  { %v5223_v16 = vrot.slane %v5222_v1, 2 }
 0x50a   :  { %v5224_v8 = vadd.f32 %v5223_v16, %v5222_v1 }
 0x50c   :  { %v5225_v9 = vrot.slane %v5224_v8, 1 }
 0x50e   :  { %v5226_v35 = vadd.f32 %v5225_v9, %v5224_v8 }
 0x510   :  { %v5227_v25 = vmul.f32 0.00390625, %v5226_v35 }
 0x512   :  { %v5307_v57 = vsel %vm5306_vm15, %v5227_v25, %v5305_v21  ;;  %v5798_v25 = vld [vmem:[%s12191_s8] ss:$0 sm:$0xff]  ;;  %s6254_s8 = scalar_lea.vmem %s5637_s4, 32 }
 0x513   :  { %5952 = vmatmul.mubr.msk.f32.vlgmr.msra.gmra.mrb[28].mxu1 %vm13905_vm6, %v5307_v57  ;;  %p6255_p0 = scmp.ne.s32.totalorder %s5637_s4, %s6254_s8  ;;  %p6260_p2 = scmp.lt.s32.totalorder %s6254_s8, %s6254_s8 }
 0x514   :  { %5962 = vmatprep.mubr.msk.f32.mxu1 %vm6288_vm8, %v6289_v24  ;;  %5990 = vmatpush3.bf16.msra.mxu1 %v5989_v45 }
 0x515   :  { %5991 = vmatprep.subr.bf16.mxu1 %v6287_v37  ;;  %p6261_p3 = por %p6260_p2, %p6259_p1 }
 0x517   :  { %p6262_p4 = pnand %p6261_p3, %p6255_p0 }
 0x518   :  { %5993 = vmatpush3.bf16.msra.mxu1 %v5992_v26 }
 0x519   :  { %5994 = vmatprep.subr.bf16.mxu1 %v6287_v37 }
 0x5e6   :  { %v5387_v23 = vpop.f32.mrb[28].mxu1 }
 0x5e7   :  { %v5392_v7 = vsel %vm5391_vm1, %v5387_v23, 0.0  ;;  %v5953_v19 = vpop.f32.mrb[29].mxu1 }
 0x5e8   :  { %v5393_v5 = vrot.slane %v5392_v7, 4 }
 0x5ea   :  { %v5394_v28 = vadd.f32 %v5393_v5, %v5392_v7 }
 0x5ec   :  { %v5395_v32 = vrot.slane %v5394_v28, 2 }
 0x5ee   :  { %v5396_v63 = vadd.f32 %v5395_v32, %v5394_v28 }
 0x5f0   :  { %v5397_v44 = vrot.slane %v5396_v63, 1 }
 0x5f2   :  { %v5398_v11 = vadd.f32 %v5397_v44, %v5396_v63 }
 0x5f4   :  { %v5400_v51 = vmul.f32 0.5, %v5398_v11 }
 0x5f6   :  { %v5401_v61 = vsub.f32 %v5387_v23, %v5400_v51 }
 0x5f8   :  { %v5402_v50 = vmul.f32 %v5401_v61, %v5401_v61 }
 0x5fa   :  { %v5403_v30 = vsel %vm5391_vm1, %v5402_v50, 0.0 }
 0x5fb   :  { %v5404_v38 = vrot.slane %v5403_v30, 4 }
 0x5fd   :  { %v5405_v22 = vadd.f32 %v5404_v38, %v5403_v30 }
 0x5ff   :  { %v5406_v47 = vrot.slane %v5405_v22, 2 }
 0x601   :  { %v5407_v55 = vadd.f32 %v5406_v47, %v5405_v22 }
 0x603   :  { %v5408_v49 = vrot.slane %v5407_v55, 1 }
 0x605   :  { %v5409_v13 = vadd.f32 %v5408_v49, %v5407_v55 }
 0x607   :  { %v5410_v46 = vmul.f32 0.5, %v5409_v13 }
 0x609   :  { %v5411_v3 = vadd.f32 1e-05, %v5410_v46 }
 0x60b   :  { %6225 = vrsqrt.f32 %v5411_v3 }
 0x615   :  { %v6226_v48 = vpop.eup %6225 }
 0x616   :  { %v5413_v39 = vmul.f32 %v6226_v48, %v5401_v61 }
 0x618   :  { %v5420_v56 = vmul.f32 %v5795_v40, %v5413_v39 }
 0x61a   :  { %v5427_v15 = vadd.f32 %v5796_v12, %v5420_v56 }
 0x61c   :  { %v5428_v36 = vmax.f32 %v5427_v15, 0.0 }
 0x61e   :  { %5963 = vmatmul.mubr.msk.f32.vlgmr.msra.gmra.mrb[30].mxu1 %vm5435_vm12, %v5428_v36 }
 0x61f   :  { %5973 = vmatprep.mubr.msk.f32.mxu1 %vm6288_vm8, %v6289_v24  ;;  %5996 = vmatpush3.bf16.msra.mxu1 %v5995_v41 }
 0x620   :  { %5997 = vmatprep.subr.bf16.mxu1 %v6287_v37 }
 0x623   :  { %5999 = vmatpush3.bf16.msra.mxu1 %v5998_v29 }
 0x6f1   :  { %v5505_v24 = vpop.f32.mrb[30].mxu1 }
 0x6f2   :  { %v5509_v53 = vsel %vm5391_vm1, %v5505_v24, 0.0  ;;  %v5964_v18 = vpop.f32.mrb[31].mxu1 }
 0x6f3   :  { %v5510_v17 = vrot.slane %v5509_v53, 4 }
 0x6f5   :  { %v5511_v54 = vadd.f32 %v5510_v17, %v5509_v53 }
 0x6f7   :  { %v5512_v52 = vrot.slane %v5511_v54, 2 }
 0x6f9   :  { %v5513_v31 = vadd.f32 %v5512_v52, %v5511_v54 }
 0x6fb   :  { %v5514_v14 = vrot.slane %v5513_v31, 1 }
 0x6fd   :  { %v5515_v62 = vadd.f32 %v5514_v14, %v5513_v31 }
 0x6ff   :  { %v5516_v33 = vmul.f32 0.5, %v5515_v62 }
 0x701   :  { %v5517_v6 = vsub.f32 %v5505_v24, %v5516_v33 }
 0x703   :  { %v5518_v58 = vmul.f32 %v5517_v6, %v5517_v6 }
 0x705   :  { %v5519_v4 = vsel %vm5391_vm1, %v5518_v58, 0.0 }
 0x706   :  { %v5520_v1 = vrot.slane %v5519_v4, 4 }
 0x708   :  { %v5521_v10 = vadd.f32 %v5520_v1, %v5519_v4 }
 0x70a   :  { %v5522_v16 = vrot.slane %v5521_v10, 2 }
 0x70c   :  { %v5523_v37 = vadd.f32 %v5522_v16, %v5521_v10 }
 0x70e   :  { %v5524_v8 = vrot.slane %v5523_v37, 1 }
 0x710   :  { %v5525_v42 = vadd.f32 %v5524_v8, %v5523_v37 }
 0x712   :  { %v5526_v9 = vmul.f32 0.5, %v5525_v42 }
 0x714   :  { %v5527_v35 = vadd.f32 1e-05, %v5526_v9 }
 0x716   :  { %6227 = vrsqrt.f32 %v5527_v35 }
 0x720   :  { %v6228_v21 = vpop.eup %6227 }
 0x721   :  { %v5529_v57 = vmul.f32 %v6228_v21, %v5517_v6 }
 0x723   :  { %v5536_v2 = vmul.f32 %v5798_v25, %v5529_v57 }
 0x725   :  { %v5543_v20 = vadd.f32 %v5799_v43, %v5536_v2 }
 0x727   :  { %v5544_v45 = vmax.f32 %v5543_v20, 0.0 }
 0x729   :  { %5974 = vmatmul.mubr.msk.f32.vlgmr.msra.gmra.mrb[32].mxu1 %vm5435_vm12, %v5544_v45 }
 0x7fc   :  { %v5625_v26 = vpop.f32.mrb[32].mxu1 }
 0x7fd   :  { %v5626_v23 = vadd.f32 %v5800_v60, %v5625_v26  ;;  %v5975_v7 = vpop.f32.mrb[33].mxu1 }
 0x7ff   :  { %5629 = vst.msk [vmem:[#allocation2] sm:$0x3] %vm5391_vm1, %v5626_v23 }
 0x800   :  { %6265 = shalt.err (!%p6262_p4)
}
 0x801   :  { %s6266_s22 = scalar_lea.hbm %s12195_s12, 32 }
 0x802   :  { %p6267_p5 = scmp.ne.s32.totalorder %s12195_s12, %s6266_s22  ;;  %p6270_p6 = scmp.lt.u32.totalorder %s6266_s22, %s12195_s12 }
 0x804   :  { %p6272_p7 = pnand %p6270_p6, %p6267_p5 }
 0x806   :  { %6275 = shalt.err (!%p6272_p7)
}
 0x807   :  { %5639 = dma.vmem_to_hbm [thread:$0]  %s5637_s4, 32, %s12195_s12, [#allocation3]  }
 0x808   :  { %6276 = dma.done.wait [#allocation3], 32  }
 0x809   :  { %6277 = vsyncadd [#allocation3], 4294967264 }
 0x80a   :  { %5643 = vsyncpa [#allocation3], 1 }

</bundles_post_ra>
